<compile_context>
chip_gen: v6e
topology: v6e:2x2x1
jax: 0.10.0
libtpu: 0.0.40
codegen_flags: <defaults>
</compile_context>

<pallas_src>
import jax
import jax.numpy as jnp
from jax.experimental import pallas as pl
from jax.experimental.pallas import tpu as pltpu

LEAK = 0.2
BN_EPS = 1e-5
VMEM_CAP_BYTES = 64 * 1024 * 1024  # v7x per-TensorCore physical VMEM


def _leaky(x):
    return jnp.where(x > 0, x, LEAK * x)


# ----------------------------- Pallas kernels ------------------------------

def _stage_kernel_nobn(p_ref, w_ref, wf_ref, y_ref, f_ref):
    """One M-tile: y = LeakyReLU(patches @ Wconv); f = LeakyReLU(y @ Wf).

    The bf16 activation is produced exactly once and reused for both the
    store and the feature-branch matmul (no redundant casts).
    """
    y = jnp.dot(p_ref[...], w_ref[...], preferred_element_type=jnp.float32)
    y_bf = _leaky(y).astype(jnp.bfloat16)
    y_ref[...] = y_bf
    f = jnp.dot(y_bf, wf_ref[...], preferred_element_type=jnp.float32)
    f_ref[...] = _leaky(f).astype(jnp.bfloat16)


def _stage_kernel_bn(p_ref, w_ref, g_ref, b_ref, wf_ref, y_ref, f_ref):
    """y = LeakyReLU(BN_train(patches @ Wconv)); f = LeakyReLU(y @ Wf).

    Whole-M block (grid=(1,)): training-mode BatchNorm2d needs statistics over
    the full N*H*W axis.  Stats taken in a single sweep: var = E[y^2]-mean^2.
    """
    y = jnp.dot(p_ref[...], w_ref[...], preferred_element_type=jnp.float32)
    mean = jnp.mean(y, axis=0, keepdims=True)
    mean_sq = jnp.mean(y * y, axis=0, keepdims=True)
    var = jnp.maximum(mean_sq - mean * mean, 0.0)          # biased var, clamped
    y = (y - mean) * jax.lax.rsqrt(var + BN_EPS)
    y = y * g_ref[...] + b_ref[...]
    y_bf = _leaky(y).astype(jnp.bfloat16)
    y_ref[...] = y_bf
    f = jnp.dot(y_bf, wf_ref[...], preferred_element_type=jnp.float32)
    f_ref[...] = _leaky(f).astype(jnp.bfloat16)


# ------------------------------- glue (JAX) --------------------------------

def extract_patches_nhwc(x, k, stride, pad):
    """im2col for NHWC input -> (B*Ho*Wo, k*k*C), patch layout [(kh,kw), C].

    TODO(synk): replace with in-kernel patch extraction (index_map over
    (row-tile, kh) + shifted sub-matmuls) to avoid the k-fold HBM duplication.
    """
    if pad:
        x = jnp.pad(x, ((0, 0), (pad, pad), (pad, pad), (0, 0)))
    B, H, W, C = x.shape
    Ho = (H - k) // stride + 1
    Wo = (W - k) // stride + 1
    cols = []
    for i in range(k):
        for j in range(k):
            cols.append(x[:, i:i + stride * (Ho - 1) + 1:stride,
                          j:j + stride * (Wo - 1) + 1:stride, :])
    p = jnp.stack(cols, axis=3)  # (B, Ho, Wo, k*k, C)
    return p.reshape(B * Ho * Wo, k * k * C), (B, Ho, Wo)


def _full_spec(shape):
    # grid=(1,): whole array as one block.
    return pl.BlockSpec(shape, lambda i: (0,) * len(shape))


def _vmem_limit(operand_bytes):
    # Default BlockSpec pipelining double-buffers every operand; add headroom,
    # cap at v7x's 64 MiB physical per-core VMEM.
    need = 2 * operand_bytes + (2 << 20)
    return int(min(max(need, 4 << 20), VMEM_CAP_BYTES))


def _stage_cost(M, K, C, bn):
    flops = 2 * M * K * C + 2 * M * C * C + (8 * M * C if bn else 2 * M * C)
    bytes_accessed = ((M * K + K * C + C * C) * 2      # bf16 inputs
                      + 2 * M * C * 2                  # bf16 outputs (y, f)
                      + (2 * C * 4 if bn else 0))      # gamma, beta (f32)
    return pl.CostEstimate(flops=flops, transcendentals=(C if bn else 0),
                           bytes_accessed=bytes_accessed)


def fused_stage_nobn(x_nhwc, w, wf):
    """Stage l1 + f1: conv(4,2,1) + LeakyReLU + 1x1 + LeakyReLU, M-tiled."""
    patches, (B, Ho, Wo) = extract_patches_nhwc(x_nhwc, 4, 2, 1)
    M, K = patches.shape
    Cout = w.shape[1]

    tm = M
    for cand in (512, 256, 128, 64, 32, 16, 8):
        if M % cand == 0:
            tm = cand
            break
    grid = (M // tm,)

    operand_bytes = (tm * K * 2 + K * Cout * 2 + Cout * Cout * 2
                     + 2 * tm * Cout * 2)

    y, f = pl.pallas_call(
        _stage_kernel_nobn,
        out_shape=(jax.ShapeDtypeStruct((M, Cout), jnp.bfloat16),
                   jax.ShapeDtypeStruct((M, Cout), jnp.bfloat16)),
        grid=grid,
        in_specs=[pl.BlockSpec((tm, K), lambda i: (i, 0)),
                  pl.BlockSpec((K, Cout), lambda i: (0, 0)),
                  pl.BlockSpec((Cout, Cout), lambda i: (0, 0))],
        out_specs=(pl.BlockSpec((tm, Cout), lambda i: (i, 0)),
                   pl.BlockSpec((tm, Cout), lambda i: (i, 0))),
        compiler_params=pltpu.CompilerParams(
            dimension_semantics=("parallel",),
            vmem_limit_bytes=_vmem_limit(operand_bytes)),
        cost_estimate=_stage_cost(M, K, Cout, False),
    )(patches, w, wf)

    return y.reshape(B, Ho, Wo, Cout), f.reshape(B, Ho, Wo, Cout)


def fused_stage_bn(x_nhwc, w, gamma, beta, wf):
    """Stages l2..l5 + f2..f5: conv(4,2,1) + BN(train) + LeakyReLU + 1x1 + LeakyReLU."""
    patches, (B, Ho, Wo) = extract_patches_nhwc(x_nhwc, 4, 2, 1)
    M, K = patches.shape
    Cout = w.shape[1]

    operand_bytes = (M * K * 2 + K * Cout * 2 + Cout * Cout * 2
                     + 2 * Cout * 4 + 2 * M * Cout * 2)

    y, f = pl.pallas_call(
        _stage_kernel_bn,
        out_shape=(jax.ShapeDtypeStruct((M, Cout), jnp.bfloat16),
                   jax.ShapeDtypeStruct((M, Cout), jnp.bfloat16)),
        grid=(1,),
        in_specs=[_full_spec(patches.shape), _full_spec(w.shape),
                  _full_spec(gamma.shape), _full_spec(beta.shape),
                  _full_spec(wf.shape)],
        out_specs=(_full_spec((M, Cout)), _full_spec((M, Cout))),
        compiler_params=pltpu.CompilerParams(
            dimension_semantics=("arbitrary",),
            vmem_limit_bytes=_vmem_limit(operand_bytes)),
        cost_estimate=_stage_cost(M, K, Cout, True),
    )(patches, w, gamma, beta, wf)

    return y.reshape(B, Ho, Wo, Cout), f.reshape(B, Ho, Wo, Cout)


def spectral_normalize(w, key, n_power=1, eps=1e-12):
    """Spectral norm for conv1x1 weight (Cout, Cin, 1, 1): one power iteration
    (PyTorch training-mode behaviour), applied once at parameter construction."""
    W = w.reshape(w.shape[0], -1)
    u = jax.random.normal(key, (W.shape[0],), dtype=jnp.float32)
    u = u / (jnp.linalg.norm(u) + eps)
    v = None
    for _ in range(n_power):
        v = W.T @ u
        v = v / (jnp.linalg.norm(v) + eps)
        u = W @ v
        u = u / (jnp.linalg.norm(u) + eps)
    sigma = u @ (W @ v)
    return w / sigma


# --------------------------- parameter construction -------------------------

def init_params(key, channels=1, conv_dim=8):
    keys = jax.random.split(key, 32)
    ki = iter(range(32))

    def nrm(shape):
        return 0.02 * jax.random.normal(keys[next(ki)], shape, dtype=jnp.float32)

    p = {}
    c = conv_dim
    p["l1_w"] = nrm((c, channels, 4, 4))                                  # bias=False in ref
    p["f1_w_sn"] = spectral_normalize(nrm((c, c, 1, 1)), keys[next(ki)])

    p["l2_w"] = nrm((2 * c, c, 4, 4))                                     # bias=False in ref
    p["l2_gamma"] = jnp.ones((2 * c,), jnp.float32)
    p["l2_beta"] = jnp.zeros((2 * c,), jnp.float32)
    c *= 2
    p["f2_w_sn"] = spectral_normalize(nrm((c, c, 1, 1)), keys[next(ki)])

    # l3/l4/l5 conv biases omitted: a per-channel bias immediately before
    # train-mode BatchNorm is exactly cancelled by the mean subtraction.
    for n in (3, 4, 5):
        p[f"l{n}_w"] = nrm((2 * c, c, 4, 4))
        p[f"l{n}_gamma"] = jnp.ones((2 * c,), jnp.float32)
        p[f"l{n}_beta"] = jnp.zeros((2 * c,), jnp.float32)
        c *= 2
        p[f"f{n}_w_sn"] = spectral_normalize(nrm((c, c, 1, 1)), keys[next(ki)])

    p["last_w"] = nrm((1, c, 2, 2))                                       # bias=False in ref
    return p


def prepare_params(raw):
    """One-time conversion to kernel-ready layouts (hoisted out of forward)."""
    def conv_mat(w_oihw):
        # (Cout, Cin, kh, kw) -> (kh*kw*Cin, Cout), matching patch layout [(kh,kw), Cin]
        cout = w_oihw.shape[0]
        return jnp.transpose(w_oihw, (2, 3, 1, 0)).reshape(-1, cout).astype(jnp.bfloat16)

    def f_mat(w_sn):
        return w_sn[:, :, 0, 0].T.astype(jnp.bfloat16)                    # (Cin, Cout)

    prep = {
        "stage1": {"w": conv_mat(raw["l1_w"]), "wf": f_mat(raw["f1_w_sn"])},
        "bn_stages": [],
        "last_w": jnp.transpose(raw["last_w"], (2, 3, 1, 0)).reshape(-1, 1)
                     .astype(jnp.float32),
    }
    for n in (2, 3, 4, 5):
        prep["bn_stages"].append({
            "w": conv_mat(raw[f"l{n}_w"]),
            "wf": f_mat(raw[f"f{n}_w_sn"]),
            "gamma": raw[f"l{n}_gamma"].reshape(1, -1).astype(jnp.float32),
            "beta": raw[f"l{n}_beta"].reshape(1, -1).astype(jnp.float32),
        })
    return prep


# ------------------------------ forward pass -------------------------------

def discriminator_forward(prep, x_nchw):
    # Activations flow between stages in bf16 NHWC, so each stage's im2col
    # patches are already bf16 (no per-stage cast, half the HBM bytes).
    x = jnp.transpose(x_nchw, (0, 2, 3, 1)).astype(jnp.bfloat16)
    feat = []

    out, f1 = fused_stage_nobn(x, prep["stage1"]["w"], prep["stage1"]["wf"])   # l1 + f1
    feat.append(f1)

    for st in prep["bn_stages"]:                                               # l2..l5 + f2..f5
        out, f = fused_stage_bn(out, st["w"], st["gamma"], st["beta"], st["wf"])
        feat.append(f)

    # last_adv: 2x2 conv, stride 1, no pad, 1 output channel on (B,2,2,C)
    # == one (B, 4*C) @ (4*C, 1) matmul; a Pallas launch costs far more than
    # this compute, so plain jnp.dot.
    B = out.shape[0]
    validity = jnp.dot(out.reshape(B, -1).astype(jnp.float32), prep["last_w"],
                       preferred_element_type=jnp.float32).reshape(B, 1, 1, 1)
    feat.append(validity)

    feat_nchw = [jnp.transpose(fm, (0, 3, 1, 2)) for fm in feat]               # back to NCHW
    validity_sq = jnp.squeeze(feat_nchw[-1])                                   # torch .squeeze()
    return validity_sq, feat_nchw


discriminator_forward_jit = jax.jit(discriminator_forward)


# ---------------------------------- main ------------------------------------

if __name__ == "__main__":
    # Small but architecture-consistent config: spatial must survive 5 stride-2
    # convs followed by the final 2x2 conv -> image_size = 64; conv_dim = 8.
    BATCH, CHANNELS, IMSIZE, CONV_DIM = 2, 1, 64, 8

    key = jax.random.PRNGKey(0)
    k_params, k_x = jax.random.split(key)
    raw_params = init_params(k_params, channels=CHANNELS, conv_dim=CONV_DIM)
    prep = prepare_params(raw_params)          # one-time weight layout prep
    x = jax.random.normal(k_x, (BATCH, CHANNELS, IMSIZE, IMSIZE), dtype=jnp.float32)

    validity, feats = discriminator_forward_jit(prep, x)
    jax.block_until_ready(validity)
    for fm in feats:
        jax.block_until_ready(fm)

    expected_feat_shapes = [
        (BATCH, CONV_DIM, 32, 32),
        (BATCH, 2 * CONV_DIM, 16, 16),
        (BATCH, 4 * CONV_DIM, 8, 8),
        (BATCH, 8 * CONV_DIM, 4, 4),
        (BATCH, 16 * CONV_DIM, 2, 2),
        (BATCH, 1, 1, 1),
    ]
    assert validity.shape == (BATCH,), validity.shape
    assert [tuple(fm.shape) for fm in feats] == expected_feat_shapes
    assert all(bool(jnp.all(jnp.isfinite(fm.astype(jnp.float32)))) for fm in feats)
    assert bool(jnp.all(jnp.isfinite(validity)))
    print("KERNEL_OK")
</pallas_src>

<mosaic_0001>
module attributes {stable_mosaic.version = 11 : i64} {
  func.func @_stage_kernel_nobn(%arg0: i32, %arg1: memref<512x16xbf16, #tpu.memory_space<vmem>>, %arg2: memref<16x8xbf16, #tpu.memory_space<vmem>>, %arg3: memref<8x8xbf16, #tpu.memory_space<vmem>>, %arg4: memref<512x8xbf16, #tpu.memory_space<vmem>>, %arg5: memref<512x8xbf16, #tpu.memory_space<vmem>>) attributes {dimension_semantics = [#tpu.dimension_semantics<parallel>], iteration_bounds = array<i64: 4>, scalar_prefetch = 0 : i64, scratch_operands = 0 : i64, tpu.core_type = #tpu.core_type<tc>, window_params = [{transform_indices = @transform_0, window_bounds = array<i64: 512, 16>}, {pipeline_mode = #tpu.pipeline_mode<synchronous>, transform_indices = @transform_1, window_bounds = array<i64: 16, 8>}, {pipeline_mode = #tpu.pipeline_mode<synchronous>, transform_indices = @transform_2, window_bounds = array<i64: 8, 8>}, {transform_indices = @transform_3, window_bounds = array<i64: 512, 8>}, {transform_indices = @transform_4, window_bounds = array<i64: 512, 8>}]} {
    %c0 = arith.constant 0 : index
    %c0_0 = arith.constant 0 : index
    %0 = vector.load %arg1[%c0, %c0_0] : memref<512x16xbf16, #tpu.memory_space<vmem>>, vector<512x16xbf16>
    %c0_1 = arith.constant 0 : index
    %c0_2 = arith.constant 0 : index
    %1 = vector.load %arg2[%c0_1, %c0_2] : memref<16x8xbf16, #tpu.memory_space<vmem>>, vector<16x8xbf16>
    %cst = arith.constant dense<0.000000e+00> : vector<512x8xf32>
    %2 = tpu.matmul %0, %1, %cst {dimension_numbers = #tpu.dot_dimension_numbers<[1], [0], [0], [1], [0, 0, 1, 1], [], []>} : vector<512x16xbf16>, vector<16x8xbf16>, vector<512x8xf32> -> vector<512x8xf32>
    %cst_3 = arith.constant 0.000000e+00 : f32
    %3 = vector.broadcast %cst_3 : f32 to vector<512x8xf32>
    %4 = arith.cmpf ogt, %2, %3 : vector<512x8xf32>
    %cst_4 = arith.constant 2.000000e-01 : f32
    %5 = vector.broadcast %cst_4 : f32 to vector<512x8xf32>
    %6 = arith.mulf %5, %2 : vector<512x8xf32>
    %7 = arith.select %4, %2, %6 : vector<512x8xi1>, vector<512x8xf32>
    %8 = arith.truncf %7 : vector<512x8xf32> to vector<512x8xbf16>
    %c0_5 = arith.constant 0 : index
    %c0_6 = arith.constant 0 : index
    %9 = vector.load %arg4[%c0_5, %c0_6] : memref<512x8xbf16, #tpu.memory_space<vmem>>, vector<512x8xbf16>
    tpu.vector_store %arg4[%c0_5, %c0_6], %8 {strides = array<i32>} : memref<512x8xbf16, #tpu.memory_space<vmem>>, vector<512x8xbf16>,
    %c0_7 = arith.constant 0 : index
    %c0_8 = arith.constant 0 : index
    %10 = vector.load %arg3[%c0_7, %c0_8] : memref<8x8xbf16, #tpu.memory_space<vmem>>, vector<8x8xbf16>
    %cst_9 = arith.constant dense<0.000000e+00> : vector<512x8xf32>
    %11 = tpu.matmul %8, %10, %cst_9 {dimension_numbers = #tpu.dot_dimension_numbers<[1], [0], [0], [1], [0, 0, 1, 1], [], []>} : vector<512x8xbf16>, vector<8x8xbf16>, vector<512x8xf32> -> vector<512x8xf32>
    %cst_10 = arith.constant 0.000000e+00 : f32
    %12 = vector.broadcast %cst_10 : f32 to vector<512x8xf32>
    %13 = arith.cmpf ogt, %11, %12 : vector<512x8xf32>
    %cst_11 = arith.constant 2.000000e-01 : f32
    %14 = vector.broadcast %cst_11 : f32 to vector<512x8xf32>
    %15 = arith.mulf %14, %11 : vector<512x8xf32>
    %16 = arith.select %13, %11, %15 : vector<512x8xi1>, vector<512x8xf32>
    %17 = arith.truncf %16 : vector<512x8xf32> to vector<512x8xbf16>
    %c0_12 = arith.constant 0 : index
    %c0_13 = arith.constant 0 : index
    %18 = vector.load %arg5[%c0_12, %c0_13] : memref<512x8xbf16, #tpu.memory_space<vmem>>, vector<512x8xbf16>
    tpu.vector_store %arg5[%c0_12, %c0_13], %17 {strides = array<i32>} : memref<512x8xbf16, #tpu.memory_space<vmem>>, vector<512x8xbf16>,
    return
  }
  func.func @transform_0(%arg0: i32) -> (i32, i32) {
    %c0_i32 = arith.constant 0 : i32
    %c0_i32_0 = arith.constant 0 : i32
    return %arg0, %c0_i32 : i32, i32
  }
  func.func @transform_1(%arg0: i32) -> (i32, i32) {
    %c0_i32 = arith.constant 0 : i32
    %c0_i32_0 = arith.constant 0 : i32
    %c0_i32_1 = arith.constant 0 : i32
    return %c0_i32, %c0_i32_0 : i32, i32
  }
  func.func @transform_2(%arg0: i32) -> (i32, i32) {
    %c0_i32 = arith.constant 0 : i32
    %c0_i32_0 = arith.constant 0 : i32
    %c0_i32_1 = arith.constant 0 : i32
    return %c0_i32, %c0_i32_0 : i32, i32
  }
  func.func @transform_3(%arg0: i32) -> (i32, i32) {
    %c0_i32 = arith.constant 0 : i32
    %c0_i32_0 = arith.constant 0 : i32
    return %arg0, %c0_i32 : i32, i32
  }
  func.func @transform_4(%arg0: i32) -> (i32, i32) {
    %c0_i32 = arith.constant 0 : i32
    %c0_i32_0 = arith.constant 0 : i32
    return %arg0, %c0_i32 : i32, i32
  }
}

module attributes {stable_mosaic.version = 11 : i64} {
  func.func @_stage_kernel_bn(%arg0: i32, %arg1: memref<512x128xbf16, #tpu.memory_space<vmem>>, %arg2: memref<128x16xbf16, #tpu.memory_space<vmem>>, %arg3: memref<1x16xf32, #tpu.memory_space<vmem>>, %arg4: memref<1x16xf32, #tpu.memory_space<vmem>>, %arg5: memref<16x16xbf16, #tpu.memory_space<vmem>>, %arg6: memref<512x16xbf16, #tpu.memory_space<vmem>>, %arg7: memref<512x16xbf16, #tpu.memory_space<vmem>>) attributes {dimension_semantics = [#tpu.dimension_semantics<arbitrary>], iteration_bounds = array<i64: 1>, scalar_prefetch = 0 : i64, scratch_operands = 0 : i64, tpu.core_type = #tpu.core_type<tc>, window_params = [{pipeline_mode = #tpu.pipeline_mode<synchronous>, transform_indices = @transform_0, window_bounds = array<i64: 512, 128>}, {pipeline_mode = #tpu.pipeline_mode<synchronous>, transform_indices = @transform_1, window_bounds = array<i64: 128, 16>}, {pipeline_mode = #tpu.pipeline_mode<synchronous>, transform_indices = @transform_2, window_bounds = array<i64: 1, 16>}, {pipeline_mode = #tpu.pipeline_mode<synchronous>, transform_indices = @transform_3, window_bounds = array<i64: 1, 16>}, {pipeline_mode = #tpu.pipeline_mode<synchronous>, transform_indices = @transform_4, window_bounds = array<i64: 16, 16>}, {pipeline_mode = #tpu.pipeline_mode<synchronous>, transform_indices = @transform_5, window_bounds = array<i64: 512, 16>}, {pipeline_mode = #tpu.pipeline_mode<synchronous>, transform_indices = @transform_6, window_bounds = array<i64: 512, 16>}]} {
    %c0 = arith.constant 0 : index
    %c0_0 = arith.constant 0 : index
    %0 = vector.load %arg1[%c0, %c0_0] : memref<512x128xbf16, #tpu.memory_space<vmem>>, vector<512x128xbf16>
    %c0_1 = arith.constant 0 : index
    %c0_2 = arith.constant 0 : index
    %1 = vector.load %arg2[%c0_1, %c0_2] : memref<128x16xbf16, #tpu.memory_space<vmem>>, vector<128x16xbf16>
    %cst = arith.constant dense<0.000000e+00> : vector<512x16xf32>
    %2 = tpu.matmul %0, %1, %cst {dimension_numbers = #tpu.dot_dimension_numbers<[1], [0], [0], [1], [0, 0, 1, 1], [], []>} : vector<512x128xbf16>, vector<128x16xbf16>, vector<512x16xf32> -> vector<512x16xf32>
    %cst_3 = arith.constant dense<0.000000e+00> : vector<16xf32>
    %3 = vector.multi_reduction <add>, %2, %cst_3 [0] : vector<512x16xf32> to vector<16xf32>
    %4 = vector.shape_cast %3 : vector<16xf32> to vector<1x16xf32>
    %cst_4 = arith.constant 5.120000e+02 : f32
    %5 = vector.broadcast %cst_4 : f32 to vector<1x16xf32>
    %6 = arith.divf %4, %5 : vector<1x16xf32>
    %7 = arith.mulf %2, %2 : vector<512x16xf32>
    %cst_5 = arith.constant dense<0.000000e+00> : vector<16xf32>
    %8 = vector.multi_reduction <add>, %7, %cst_5 [0] : vector<512x16xf32> to vector<16xf32>
    %9 = vector.shape_cast %8 : vector<16xf32> to vector<1x16xf32>
    %cst_6 = arith.constant 5.120000e+02 : f32
    %10 = vector.broadcast %cst_6 : f32 to vector<1x16xf32>
    %11 = arith.divf %9, %10 : vector<1x16xf32>
    %12 = arith.mulf %6, %6 : vector<1x16xf32>
    %13 = arith.subf %11, %12 : vector<1x16xf32>
    %cst_7 = arith.constant 0.000000e+00 : f32
    %14 = vector.broadcast %cst_7 : f32 to vector<1x16xf32>
    %15 = arith.maximumf %13, %14 : vector<1x16xf32>
    %16 = vector.broadcast %6 : vector<1x16xf32> to vector<512x16xf32>
    %17 = arith.subf %2, %16 : vector<512x16xf32>
    %cst_8 = arith.constant 9.99999974E-6 : f32
    %18 = vector.broadcast %cst_8 : f32 to vector<1x16xf32>
    %19 = arith.addf %15, %18 : vector<1x16xf32>
    %20 = math.rsqrt %19 : vector<1x16xf32>
    %21 = vector.broadcast %20 : vector<1x16xf32> to vector<512x16xf32>
    %22 = arith.mulf %17, %21 : vector<512x16xf32>
    %c0_9 = arith.constant 0 : index
    %c0_10 = arith.constant 0 : index
    %23 = vector.load %arg3[%c0_9, %c0_10] : memref<1x16xf32, #tpu.memory_space<vmem>>, vector<1x16xf32>
    %24 = vector.broadcast %23 : vector<1x16xf32> to vector<512x16xf32>
    %25 = arith.mulf %22, %24 : vector<512x16xf32>
    %c0_11 = arith.constant 0 : index
    %c0_12 = arith.constant 0 : index
    %26 = vector.load %arg4[%c0_11, %c0_12] : memref<1x16xf32, #tpu.memory_space<vmem>>, vector<1x16xf32>
    %27 = vector.broadcast %26 : vector<1x16xf32> to vector<512x16xf32>
    %28 = arith.addf %25, %27 : vector<512x16xf32>
    %cst_13 = arith.constant 0.000000e+00 : f32
    %29 = vector.broadcast %cst_13 : f32 to vector<512x16xf32>
    %30 = arith.cmpf ogt, %28, %29 : vector<512x16xf32>
    %cst_14 = arith.constant 2.000000e-01 : f32
    %31 = vector.broadcast %cst_14 : f32 to vector<512x16xf32>
    %32 = arith.mulf %31, %28 : vector<512x16xf32>
    %33 = arith.select %30, %28, %32 : vector<512x16xi1>, vector<512x16xf32>
    %34 = arith.truncf %33 : vector<512x16xf32> to vector<512x16xbf16>
    %c0_15 = arith.constant 0 : index
    %c0_16 = arith.constant 0 : index
    %35 = vector.load %arg6[%c0_15, %c0_16] : memref<512x16xbf16, #tpu.memory_space<vmem>>, vector<512x16xbf16>
    tpu.vector_store %arg6[%c0_15, %c0_16], %34 {strides = array<i32>} : memref<512x16xbf16, #tpu.memory_space<vmem>>, vector<512x16xbf16>,
    %c0_17 = arith.constant 0 : index
    %c0_18 = arith.constant 0 : index
    %36 = vector.load %arg5[%c0_17, %c0_18] : memref<16x16xbf16, #tpu.memory_space<vmem>>, vector<16x16xbf16>
    %cst_19 = arith.constant dense<0.000000e+00> : vector<512x16xf32>
    %37 = tpu.matmul %34, %36, %cst_19 {dimension_numbers = #tpu.dot_dimension_numbers<[1], [0], [0], [1], [0, 0, 1, 1], [], []>} : vector<512x16xbf16>, vector<16x16xbf16>, vector<512x16xf32> -> vector<512x16xf32>
    %cst_20 = arith.constant 0.000000e+00 : f32
    %38 = vector.broadcast %cst_20 : f32 to vector<512x16xf32>
    %39 = arith.cmpf ogt, %37, %38 : vector<512x16xf32>
    %cst_21 = arith.constant 2.000000e-01 : f32
    %40 = vector.broadcast %cst_21 : f32 to vector<512x16xf32>
    %41 = arith.mulf %40, %37 : vector<512x16xf32>
    %42 = arith.select %39, %37, %41 : vector<512x16xi1>, vector<512x16xf32>
    %43 = arith.truncf %42 : vector<512x16xf32> to vector<512x16xbf16>
    %c0_22 = arith.constant 0 : index
    %c0_23 = arith.constant 0 : index
    %44 = vector.load %arg7[%c0_22, %c0_23] : memref<512x16xbf16, #tpu.memory_space<vmem>>, vector<512x16xbf16>
    tpu.vector_store %arg7[%c0_22, %c0_23], %43 {strides = array<i32>} : memref<512x16xbf16, #tpu.memory_space<vmem>>, vector<512x16xbf16>,
    return
  }
  func.func @transform_0(%arg0: i32) -> (i32, i32) {
    %c0_i32 = arith.constant 0 : i32
    %c0_i32_0 = arith.constant 0 : i32
    %c0_i32_1 = arith.constant 0 : i32
    return %c0_i32, %c0_i32_0 : i32, i32
  }
  func.func @transform_1(%arg0: i32) -> (i32, i32) {
    %c0_i32 = arith.constant 0 : i32
    %c0_i32_0 = arith.constant 0 : i32
    %c0_i32_1 = arith.constant 0 : i32
    return %c0_i32, %c0_i32_0 : i32, i32
  }
  func.func @transform_2(%arg0: i32) -> (i32, i32) {
    %c0_i32 = arith.constant 0 : i32
    %c0_i32_0 = arith.constant 0 : i32
    %c0_i32_1 = arith.constant 0 : i32
    return %c0_i32, %c0_i32_0 : i32, i32
  }
  func.func @transform_3(%arg0: i32) -> (i32, i32) {
    %c0_i32 = arith.constant 0 : i32
    %c0_i32_0 = arith.constant 0 : i32
    %c0_i32_1 = arith.constant 0 : i32
    return %c0_i32, %c0_i32_0 : i32, i32
  }
  func.func @transform_4(%arg0: i32) -> (i32, i32) {
    %c0_i32 = arith.constant 0 : i32
    %c0_i32_0 = arith.constant 0 : i32
    %c0_i32_1 = arith.constant 0 : i32
    return %c0_i32, %c0_i32_0 : i32, i32
  }
  func.func @transform_5(%arg0: i32) -> (i32, i32) {
    %c0_i32 = arith.constant 0 : i32
    %c0_i32_0 = arith.constant 0 : i32
    %c0_i32_1 = arith.constant 0 : i32
    return %c0_i32, %c0_i32_0 : i32, i32
  }
  func.func @transform_6(%arg0: i32) -> (i32, i32) {
    %c0_i32 = arith.constant 0 : i32
    %c0_i32_0 = arith.constant 0 : i32
    %c0_i32_1 = arith.constant 0 : i32
    return %c0_i32, %c0_i32_0 : i32, i32
  }
}

module attributes {stable_mosaic.version = 11 : i64} {
  func.func @_stage_kernel_bn(%arg0: i32, %arg1: memref<128x256xbf16, #tpu.memory_space<vmem>>, %arg2: memref<256x32xbf16, #tpu.memory_space<vmem>>, %arg3: memref<1x32xf32, #tpu.memory_space<vmem>>, %arg4: memref<1x32xf32, #tpu.memory_space<vmem>>, %arg5: memref<32x32xbf16, #tpu.memory_space<vmem>>, %arg6: memref<128x32xbf16, #tpu.memory_space<vmem>>, %arg7: memref<128x32xbf16, #tpu.memory_space<vmem>>) attributes {dimension_semantics = [#tpu.dimension_semantics<arbitrary>], iteration_bounds = array<i64: 1>, scalar_prefetch = 0 : i64, scratch_operands = 0 : i64, tpu.core_type = #tpu.core_type<tc>, window_params = [{pipeline_mode = #tpu.pipeline_mode<synchronous>, transform_indices = @transform_0, window_bounds = array<i64: 128, 256>}, {pipeline_mode = #tpu.pipeline_mode<synchronous>, transform_indices = @transform_1, window_bounds = array<i64: 256, 32>}, {pipeline_mode = #tpu.pipeline_mode<synchronous>, transform_indices = @transform_2, window_bounds = array<i64: 1, 32>}, {pipeline_mode = #tpu.pipeline_mode<synchronous>, transform_indices = @transform_3, window_bounds = array<i64: 1, 32>}, {pipeline_mode = #tpu.pipeline_mode<synchronous>, transform_indices = @transform_4, window_bounds = array<i64: 32, 32>}, {pipeline_mode = #tpu.pipeline_mode<synchronous>, transform_indices = @transform_5, window_bounds = array<i64: 128, 32>}, {pipeline_mode = #tpu.pipeline_mode<synchronous>, transform_indices = @transform_6, window_bounds = array<i64: 128, 32>}]} {
    %c0 = arith.constant 0 : index
    %c0_0 = arith.constant 0 : index
    %0 = vector.load %arg1[%c0, %c0_0] : memref<128x256xbf16, #tpu.memory_space<vmem>>, vector<128x256xbf16>
    %c0_1 = arith.constant 0 : index
    %c0_2 = arith.constant 0 : index
    %1 = vector.load %arg2[%c0_1, %c0_2] : memref<256x32xbf16, #tpu.memory_space<vmem>>, vector<256x32xbf16>
    %cst = arith.constant dense<0.000000e+00> : vector<128x32xf32>
    %2 = tpu.matmul %0, %1, %cst {dimension_numbers = #tpu.dot_dimension_numbers<[1], [0], [0], [1], [0, 0, 1, 1], [], []>} : vector<128x256xbf16>, vector<256x32xbf16>, vector<128x32xf32> -> vector<128x32xf32>
    %cst_3 = arith.constant dense<0.000000e+00> : vector<32xf32>
    %3 = vector.multi_reduction <add>, %2, %cst_3 [0] : vector<128x32xf32> to vector<32xf32>
    %4 = vector.shape_cast %3 : vector<32xf32> to vector<1x32xf32>
    %cst_4 = arith.constant 1.280000e+02 : f32
    %5 = vector.broadcast %cst_4 : f32 to vector<1x32xf32>
    %6 = arith.divf %4, %5 : vector<1x32xf32>
    %7 = arith.mulf %2, %2 : vector<128x32xf32>
    %cst_5 = arith.constant dense<0.000000e+00> : vector<32xf32>
    %8 = vector.multi_reduction <add>, %7, %cst_5 [0] : vector<128x32xf32> to vector<32xf32>
    %9 = vector.shape_cast %8 : vector<32xf32> to vector<1x32xf32>
    %cst_6 = arith.constant 1.280000e+02 : f32
    %10 = vector.broadcast %cst_6 : f32 to vector<1x32xf32>
    %11 = arith.divf %9, %10 : vector<1x32xf32>
    %12 = arith.mulf %6, %6 : vector<1x32xf32>
    %13 = arith.subf %11, %12 : vector<1x32xf32>
    %cst_7 = arith.constant 0.000000e+00 : f32
    %14 = vector.broadcast %cst_7 : f32 to vector<1x32xf32>
    %15 = arith.maximumf %13, %14 : vector<1x32xf32>
    %16 = vector.broadcast %6 : vector<1x32xf32> to vector<128x32xf32>
    %17 = arith.subf %2, %16 : vector<128x32xf32>
    %cst_8 = arith.constant 9.99999974E-6 : f32
    %18 = vector.broadcast %cst_8 : f32 to vector<1x32xf32>
    %19 = arith.addf %15, %18 : vector<1x32xf32>
    %20 = math.rsqrt %19 : vector<1x32xf32>
    %21 = vector.broadcast %20 : vector<1x32xf32> to vector<128x32xf32>
    %22 = arith.mulf %17, %21 : vector<128x32xf32>
    %c0_9 = arith.constant 0 : index
    %c0_10 = arith.constant 0 : index
    %23 = vector.load %arg3[%c0_9, %c0_10] : memref<1x32xf32, #tpu.memory_space<vmem>>, vector<1x32xf32>
    %24 = vector.broadcast %23 : vector<1x32xf32> to vector<128x32xf32>
    %25 = arith.mulf %22, %24 : vector<128x32xf32>
    %c0_11 = arith.constant 0 : index
    %c0_12 = arith.constant 0 : index
    %26 = vector.load %arg4[%c0_11, %c0_12] : memref<1x32xf32, #tpu.memory_space<vmem>>, vector<1x32xf32>
    %27 = vector.broadcast %26 : vector<1x32xf32> to vector<128x32xf32>
    %28 = arith.addf %25, %27 : vector<128x32xf32>
    %cst_13 = arith.constant 0.000000e+00 : f32
    %29 = vector.broadcast %cst_13 : f32 to vector<128x32xf32>
    %30 = arith.cmpf ogt, %28, %29 : vector<128x32xf32>
    %cst_14 = arith.constant 2.000000e-01 : f32
    %31 = vector.broadcast %cst_14 : f32 to vector<128x32xf32>
    %32 = arith.mulf %31, %28 : vector<128x32xf32>
    %33 = arith.select %30, %28, %32 : vector<128x32xi1>, vector<128x32xf32>
    %34 = arith.truncf %33 : vector<128x32xf32> to vector<128x32xbf16>
    %c0_15 = arith.constant 0 : index
    %c0_16 = arith.constant 0 : index
    %35 = vector.load %arg6[%c0_15, %c0_16] : memref<128x32xbf16, #tpu.memory_space<vmem>>, vector<128x32xbf16>
    tpu.vector_store %arg6[%c0_15, %c0_16], %34 {strides = array<i32>} : memref<128x32xbf16, #tpu.memory_space<vmem>>, vector<128x32xbf16>,
    %c0_17 = arith.constant 0 : index
    %c0_18 = arith.constant 0 : index
    %36 = vector.load %arg5[%c0_17, %c0_18] : memref<32x32xbf16, #tpu.memory_space<vmem>>, vector<32x32xbf16>
    %cst_19 = arith.constant dense<0.000000e+00> : vector<128x32xf32>
    %37 = tpu.matmul %34, %36, %cst_19 {dimension_numbers = #tpu.dot_dimension_numbers<[1], [0], [0], [1], [0, 0, 1, 1], [], []>} : vector<128x32xbf16>, vector<32x32xbf16>, vector<128x32xf32> -> vector<128x32xf32>
    %cst_20 = arith.constant 0.000000e+00 : f32
    %38 = vector.broadcast %cst_20 : f32 to vector<128x32xf32>
    %39 = arith.cmpf ogt, %37, %38 : vector<128x32xf32>
    %cst_21 = arith.constant 2.000000e-01 : f32
    %40 = vector.broadcast %cst_21 : f32 to vector<128x32xf32>
    %41 = arith.mulf %40, %37 : vector<128x32xf32>
    %42 = arith.select %39, %37, %41 : vector<128x32xi1>, vector<128x32xf32>
    %43 = arith.truncf %42 : vector<128x32xf32> to vector<128x32xbf16>
    %c0_22 = arith.constant 0 : index
    %c0_23 = arith.constant 0 : index
    %44 = vector.load %arg7[%c0_22, %c0_23] : memref<128x32xbf16, #tpu.memory_space<vmem>>, vector<128x32xbf16>
    tpu.vector_store %arg7[%c0_22, %c0_23], %43 {strides = array<i32>} : memref<128x32xbf16, #tpu.memory_space<vmem>>, vector<128x32xbf16>,
    return
  }
  func.func @transform_0(%arg0: i32) -> (i32, i32) {
    %c0_i32 = arith.constant 0 : i32
    %c0_i32_0 = arith.constant 0 : i32
    %c0_i32_1 = arith.constant 0 : i32
    return %c0_i32, %c0_i32_0 : i32, i32
  }
  func.func @transform_1(%arg0: i32) -> (i32, i32) {
    %c0_i32 = arith.constant 0 : i32
    %c0_i32_0 = arith.constant 0 : i32
    %c0_i32_1 = arith.constant 0 : i32
    return %c0_i32, %c0_i32_0 : i32, i32
  }
  func.func @transform_2(%arg0: i32) -> (i32, i32) {
    %c0_i32 = arith.constant 0 : i32
    %c0_i32_0 = arith.constant 0 : i32
    %c0_i32_1 = arith.constant 0 : i32
    return %c0_i32, %c0_i32_0 : i32, i32
  }
  func.func @transform_3(%arg0: i32) -> (i32, i32) {
    %c0_i32 = arith.constant 0 : i32
    %c0_i32_0 = arith.constant 0 : i32
    %c0_i32_1 = arith.constant 0 : i32
    return %c0_i32, %c0_i32_0 : i32, i32
  }
  func.func @transform_4(%arg0: i32) -> (i32, i32) {
    %c0_i32 = arith.constant 0 : i32
    %c0_i32_0 = arith.constant 0 : i32
    %c0_i32_1 = arith.constant 0 : i32
    return %c0_i32, %c0_i32_0 : i32, i32
  }
  func.func @transform_5(%arg0: i32) -> (i32, i32) {
    %c0_i32 = arith.constant 0 : i32
    %c0_i32_0 = arith.constant 0 : i32
    %c0_i32_1 = arith.constant 0 : i32
    return %c0_i32, %c0_i32_0 : i32, i32
  }
  func.func @transform_6(%arg0: i32) -> (i32, i32) {
    %c0_i32 = arith.constant 0 : i32
    %c0_i32_0 = arith.constant 0 : i32
    %c0_i32_1 = arith.constant 0 : i32
    return %c0_i32, %c0_i32_0 : i32, i32
  }
}

module attributes {stable_mosaic.version = 11 : i64} {
  func.func @_stage_kernel_bn(%arg0: i32, %arg1: memref<32x512xbf16, #tpu.memory_space<vmem>>, %arg2: memref<512x64xbf16, #tpu.memory_space<vmem>>, %arg3: memref<1x64xf32, #tpu.memory_space<vmem>>, %arg4: memref<1x64xf32, #tpu.memory_space<vmem>>, %arg5: memref<64x64xbf16, #tpu.memory_space<vmem>>, %arg6: memref<32x64xbf16, #tpu.memory_space<vmem>>, %arg7: memref<32x64xbf16, #tpu.memory_space<vmem>>) attributes {dimension_semantics = [#tpu.dimension_semantics<arbitrary>], iteration_bounds = array<i64: 1>, scalar_prefetch = 0 : i64, scratch_operands = 0 : i64, tpu.core_type = #tpu.core_type<tc>, window_params = [{pipeline_mode = #tpu.pipeline_mode<synchronous>, transform_indices = @transform_0, window_bounds = array<i64: 32, 512>}, {pipeline_mode = #tpu.pipeline_mode<synchronous>, transform_indices = @transform_1, window_bounds = array<i64: 512, 64>}, {pipeline_mode = #tpu.pipeline_mode<synchronous>, transform_indices = @transform_2, window_bounds = array<i64: 1, 64>}, {pipeline_mode = #tpu.pipeline_mode<synchronous>, transform_indices = @transform_3, window_bounds = array<i64: 1, 64>}, {pipeline_mode = #tpu.pipeline_mode<synchronous>, transform_indices = @transform_4, window_bounds = array<i64: 64, 64>}, {pipeline_mode = #tpu.pipeline_mode<synchronous>, transform_indices = @transform_5, window_bounds = array<i64: 32, 64>}, {pipeline_mode = #tpu.pipeline_mode<synchronous>, transform_indices = @transform_6, window_bounds = array<i64: 32, 64>}]} {
    %c0 = arith.constant 0 : index
    %c0_0 = arith.constant 0 : index
    %0 = vector.load %arg1[%c0, %c0_0] : memref<32x512xbf16, #tpu.memory_space<vmem>>, vector<32x512xbf16>
    %c0_1 = arith.constant 0 : index
    %c0_2 = arith.constant 0 : index
    %1 = vector.load %arg2[%c0_1, %c0_2] : memref<512x64xbf16, #tpu.memory_space<vmem>>, vector<512x64xbf16>
    %cst = arith.constant dense<0.000000e+00> : vector<32x64xf32>
    %2 = tpu.matmul %0, %1, %cst {dimension_numbers = #tpu.dot_dimension_numbers<[1], [0], [0], [1], [0, 0, 1, 1], [], []>} : vector<32x512xbf16>, vector<512x64xbf16>, vector<32x64xf32> -> vector<32x64xf32>
    %cst_3 = arith.constant dense<0.000000e+00> : vector<64xf32>
    %3 = vector.multi_reduction <add>, %2, %cst_3 [0] : vector<32x64xf32> to vector<64xf32>
    %4 = vector.shape_cast %3 : vector<64xf32> to vector<1x64xf32>
    %cst_4 = arith.constant 3.200000e+01 : f32
    %5 = vector.broadcast %cst_4 : f32 to vector<1x64xf32>
    %6 = arith.divf %4, %5 : vector<1x64xf32>
    %7 = arith.mulf %2, %2 : vector<32x64xf32>
    %cst_5 = arith.constant dense<0.000000e+00> : vector<64xf32>
    %8 = vector.multi_reduction <add>, %7, %cst_5 [0] : vector<32x64xf32> to vector<64xf32>
    %9 = vector.shape_cast %8 : vector<64xf32> to vector<1x64xf32>
    %cst_6 = arith.constant 3.200000e+01 : f32
    %10 = vector.broadcast %cst_6 : f32 to vector<1x64xf32>
    %11 = arith.divf %9, %10 : vector<1x64xf32>
    %12 = arith.mulf %6, %6 : vector<1x64xf32>
    %13 = arith.subf %11, %12 : vector<1x64xf32>
    %cst_7 = arith.constant 0.000000e+00 : f32
    %14 = vector.broadcast %cst_7 : f32 to vector<1x64xf32>
    %15 = arith.maximumf %13, %14 : vector<1x64xf32>
    %16 = vector.broadcast %6 : vector<1x64xf32> to vector<32x64xf32>
    %17 = arith.subf %2, %16 : vector<32x64xf32>
    %cst_8 = arith.constant 9.99999974E-6 : f32
    %18 = vector.broadcast %cst_8 : f32 to vector<1x64xf32>
    %19 = arith.addf %15, %18 : vector<1x64xf32>
    %20 = math.rsqrt %19 : vector<1x64xf32>
    %21 = vector.broadcast %20 : vector<1x64xf32> to vector<32x64xf32>
    %22 = arith.mulf %17, %21 : vector<32x64xf32>
    %c0_9 = arith.constant 0 : index
    %c0_10 = arith.constant 0 : index
    %23 = vector.load %arg3[%c0_9, %c0_10] : memref<1x64xf32, #tpu.memory_space<vmem>>, vector<1x64xf32>
    %24 = vector.broadcast %23 : vector<1x64xf32> to vector<32x64xf32>
    %25 = arith.mulf %22, %24 : vector<32x64xf32>
    %c0_11 = arith.constant 0 : index
    %c0_12 = arith.constant 0 : index
    %26 = vector.load %arg4[%c0_11, %c0_12] : memref<1x64xf32, #tpu.memory_space<vmem>>, vector<1x64xf32>
    %27 = vector.broadcast %26 : vector<1x64xf32> to vector<32x64xf32>
    %28 = arith.addf %25, %27 : vector<32x64xf32>
    %cst_13 = arith.constant 0.000000e+00 : f32
    %29 = vector.broadcast %cst_13 : f32 to vector<32x64xf32>
    %30 = arith.cmpf ogt, %28, %29 : vector<32x64xf32>
    %cst_14 = arith.constant 2.000000e-01 : f32
    %31 = vector.broadcast %cst_14 : f32 to vector<32x64xf32>
    %32 = arith.mulf %31, %28 : vector<32x64xf32>
    %33 = arith.select %30, %28, %32 : vector<32x64xi1>, vector<32x64xf32>
    %34 = arith.truncf %33 : vector<32x64xf32> to vector<32x64xbf16>
    %c0_15 = arith.constant 0 : index
    %c0_16 = arith.constant 0 : index
    %35 = vector.load %arg6[%c0_15, %c0_16] : memref<32x64xbf16, #tpu.memory_space<vmem>>, vector<32x64xbf16>
    tpu.vector_store %arg6[%c0_15, %c0_16], %34 {strides = array<i32>} : memref<32x64xbf16, #tpu.memory_space<vmem>>, vector<32x64xbf16>,
    %c0_17 = arith.constant 0 : index
    %c0_18 = arith.constant 0 : index
    %36 = vector.load %arg5[%c0_17, %c0_18] : memref<64x64xbf16, #tpu.memory_space<vmem>>, vector<64x64xbf16>
    %cst_19 = arith.constant dense<0.000000e+00> : vector<32x64xf32>
    %37 = tpu.matmul %34, %36, %cst_19 {dimension_numbers = #tpu.dot_dimension_numbers<[1], [0], [0], [1], [0, 0, 1, 1], [], []>} : vector<32x64xbf16>, vector<64x64xbf16>, vector<32x64xf32> -> vector<32x64xf32>
    %cst_20 = arith.constant 0.000000e+00 : f32
    %38 = vector.broadcast %cst_20 : f32 to vector<32x64xf32>
    %39 = arith.cmpf ogt, %37, %38 : vector<32x64xf32>
    %cst_21 = arith.constant 2.000000e-01 : f32
    %40 = vector.broadcast %cst_21 : f32 to vector<32x64xf32>
    %41 = arith.mulf %40, %37 : vector<32x64xf32>
    %42 = arith.select %39, %37, %41 : vector<32x64xi1>, vector<32x64xf32>
    %43 = arith.truncf %42 : vector<32x64xf32> to vector<32x64xbf16>
    %c0_22 = arith.constant 0 : index
    %c0_23 = arith.constant 0 : index
    %44 = vector.load %arg7[%c0_22, %c0_23] : memref<32x64xbf16, #tpu.memory_space<vmem>>, vector<32x64xbf16>
    tpu.vector_store %arg7[%c0_22, %c0_23], %43 {strides = array<i32>} : memref<32x64xbf16, #tpu.memory_space<vmem>>, vector<32x64xbf16>,
    return
  }
  func.func @transform_0(%arg0: i32) -> (i32, i32) {
    %c0_i32 = arith.constant 0 : i32
    %c0_i32_0 = arith.constant 0 : i32
    %c0_i32_1 = arith.constant 0 : i32
    return %c0_i32, %c0_i32_0 : i32, i32
  }
  func.func @transform_1(%arg0: i32) -> (i32, i32) {
    %c0_i32 = arith.constant 0 : i32
    %c0_i32_0 = arith.constant 0 : i32
    %c0_i32_1 = arith.constant 0 : i32
    return %c0_i32, %c0_i32_0 : i32, i32
  }
  func.func @transform_2(%arg0: i32) -> (i32, i32) {
    %c0_i32 = arith.constant 0 : i32
    %c0_i32_0 = arith.constant 0 : i32
    %c0_i32_1 = arith.constant 0 : i32
    return %c0_i32, %c0_i32_0 : i32, i32
  }
  func.func @transform_3(%arg0: i32) -> (i32, i32) {
    %c0_i32 = arith.constant 0 : i32
    %c0_i32_0 = arith.constant 0 : i32
    %c0_i32_1 = arith.constant 0 : i32
    return %c0_i32, %c0_i32_0 : i32, i32
  }
  func.func @transform_4(%arg0: i32) -> (i32, i32) {
    %c0_i32 = arith.constant 0 : i32
    %c0_i32_0 = arith.constant 0 : i32
    %c0_i32_1 = arith.constant 0 : i32
    return %c0_i32, %c0_i32_0 : i32, i32
  }
  func.func @transform_5(%arg0: i32) -> (i32, i32) {
    %c0_i32 = arith.constant 0 : i32
    %c0_i32_0 = arith.constant 0 : i32
    %c0_i32_1 = arith.constant 0 : i32
    return %c0_i32, %c0_i32_0 : i32, i32
  }
  func.func @transform_6(%arg0: i32) -> (i32, i32) {
    %c0_i32 = arith.constant 0 : i32
    %c0_i32_0 = arith.constant 0 : i32
    %c0_i32_1 = arith.constant 0 : i32
    return %c0_i32, %c0_i32_0 : i32, i32
  }
}

module attributes {stable_mosaic.version = 11 : i64} {
  func.func @_stage_kernel_bn(%arg0: i32, %arg1: memref<8x1024xbf16, #tpu.memory_space<vmem>>, %arg2: memref<1024x128xbf16, #tpu.memory_space<vmem>>, %arg3: memref<1x128xf32, #tpu.memory_space<vmem>>, %arg4: memref<1x128xf32, #tpu.memory_space<vmem>>, %arg5: memref<128x128xbf16, #tpu.memory_space<vmem>>, %arg6: memref<8x128xbf16, #tpu.memory_space<vmem>>, %arg7: memref<8x128xbf16, #tpu.memory_space<vmem>>) attributes {dimension_semantics = [#tpu.dimension_semantics<arbitrary>], iteration_bounds = array<i64: 1>, scalar_prefetch = 0 : i64, scratch_operands = 0 : i64, tpu.core_type = #tpu.core_type<tc>, window_params = [{pipeline_mode = #tpu.pipeline_mode<synchronous>, transform_indices = @transform_0, window_bounds = array<i64: 8, 1024>}, {pipeline_mode = #tpu.pipeline_mode<synchronous>, transform_indices = @transform_1, window_bounds = array<i64: 1024, 128>}, {pipeline_mode = #tpu.pipeline_mode<synchronous>, transform_indices = @transform_2, window_bounds = array<i64: 1, 128>}, {pipeline_mode = #tpu.pipeline_mode<synchronous>, transform_indices = @transform_3, window_bounds = array<i64: 1, 128>}, {pipeline_mode = #tpu.pipeline_mode<synchronous>, transform_indices = @transform_4, window_bounds = array<i64: 128, 128>}, {pipeline_mode = #tpu.pipeline_mode<synchronous>, transform_indices = @transform_5, window_bounds = array<i64: 8, 128>}, {pipeline_mode = #tpu.pipeline_mode<synchronous>, transform_indices = @transform_6, window_bounds = array<i64: 8, 128>}]} {
    %c0 = arith.constant 0 : index
    %c0_0 = arith.constant 0 : index
    %0 = vector.load %arg1[%c0, %c0_0] : memref<8x1024xbf16, #tpu.memory_space<vmem>>, vector<8x1024xbf16>
    %c0_1 = arith.constant 0 : index
    %c0_2 = arith.constant 0 : index
    %1 = vector.load %arg2[%c0_1, %c0_2] : memref<1024x128xbf16, #tpu.memory_space<vmem>>, vector<1024x128xbf16>
    %cst = arith.constant dense<0.000000e+00> : vector<8x128xf32>
    %2 = tpu.matmul %0, %1, %cst {dimension_numbers = #tpu.dot_dimension_numbers<[1], [0], [0], [1], [0, 0, 1, 1], [], []>} : vector<8x1024xbf16>, vector<1024x128xbf16>, vector<8x128xf32> -> vector<8x128xf32>
    %cst_3 = arith.constant dense<0.000000e+00> : vector<128xf32>
    %3 = vector.multi_reduction <add>, %2, %cst_3 [0] : vector<8x128xf32> to vector<128xf32>
    %4 = vector.shape_cast %3 : vector<128xf32> to vector<1x128xf32>
    %cst_4 = arith.constant 8.000000e+00 : f32
    %5 = vector.broadcast %cst_4 : f32 to vector<1x128xf32>
    %6 = arith.divf %4, %5 : vector<1x128xf32>
    %7 = arith.mulf %2, %2 : vector<8x128xf32>
    %cst_5 = arith.constant dense<0.000000e+00> : vector<128xf32>
    %8 = vector.multi_reduction <add>, %7, %cst_5 [0] : vector<8x128xf32> to vector<128xf32>
    %9 = vector.shape_cast %8 : vector<128xf32> to vector<1x128xf32>
    %cst_6 = arith.constant 8.000000e+00 : f32
    %10 = vector.broadcast %cst_6 : f32 to vector<1x128xf32>
    %11 = arith.divf %9, %10 : vector<1x128xf32>
    %12 = arith.mulf %6, %6 : vector<1x128xf32>
    %13 = arith.subf %11, %12 : vector<1x128xf32>
    %cst_7 = arith.constant 0.000000e+00 : f32
    %14 = vector.broadcast %cst_7 : f32 to vector<1x128xf32>
    %15 = arith.maximumf %13, %14 : vector<1x128xf32>
    %16 = vector.broadcast %6 : vector<1x128xf32> to vector<8x128xf32>
    %17 = arith.subf %2, %16 : vector<8x128xf32>
    %cst_8 = arith.constant 9.99999974E-6 : f32
    %18 = vector.broadcast %cst_8 : f32 to vector<1x128xf32>
    %19 = arith.addf %15, %18 : vector<1x128xf32>
    %20 = math.rsqrt %19 : vector<1x128xf32>
    %21 = vector.broadcast %20 : vector<1x128xf32> to vector<8x128xf32>
    %22 = arith.mulf %17, %21 : vector<8x128xf32>
    %c0_9 = arith.constant 0 : index
    %c0_10 = arith.constant 0 : index
    %23 = vector.load %arg3[%c0_9, %c0_10] : memref<1x128xf32, #tpu.memory_space<vmem>>, vector<1x128xf32>
    %24 = vector.broadcast %23 : vector<1x128xf32> to vector<8x128xf32>
    %25 = arith.mulf %22, %24 : vector<8x128xf32>
    %c0_11 = arith.constant 0 : index
    %c0_12 = arith.constant 0 : index
    %26 = vector.load %arg4[%c0_11, %c0_12] : memref<1x128xf32, #tpu.memory_space<vmem>>, vector<1x128xf32>
    %27 = vector.broadcast %26 : vector<1x128xf32> to vector<8x128xf32>
    %28 = arith.addf %25, %27 : vector<8x128xf32>
    %cst_13 = arith.constant 0.000000e+00 : f32
    %29 = vector.broadcast %cst_13 : f32 to vector<8x128xf32>
    %30 = arith.cmpf ogt, %28, %29 : vector<8x128xf32>
    %cst_14 = arith.constant 2.000000e-01 : f32
    %31 = vector.broadcast %cst_14 : f32 to vector<8x128xf32>
    %32 = arith.mulf %31, %28 : vector<8x128xf32>
    %33 = arith.select %30, %28, %32 : vector<8x128xi1>, vector<8x128xf32>
    %34 = arith.truncf %33 : vector<8x128xf32> to vector<8x128xbf16>
    %c0_15 = arith.constant 0 : index
    %c0_16 = arith.constant 0 : index
    %35 = vector.load %arg6[%c0_15, %c0_16] : memref<8x128xbf16, #tpu.memory_space<vmem>>, vector<8x128xbf16>
    tpu.vector_store %arg6[%c0_15, %c0_16], %34 {strides = array<i32>} : memref<8x128xbf16, #tpu.memory_space<vmem>>, vector<8x128xbf16>,
    %c0_17 = arith.constant 0 : index
    %c0_18 = arith.constant 0 : index
    %36 = vector.load %arg5[%c0_17, %c0_18] : memref<128x128xbf16, #tpu.memory_space<vmem>>, vector<128x128xbf16>
    %cst_19 = arith.constant dense<0.000000e+00> : vector<8x128xf32>
    %37 = tpu.matmul %34, %36, %cst_19 {dimension_numbers = #tpu.dot_dimension_numbers<[1], [0], [0], [1], [0, 0, 1, 1], [], []>} : vector<8x128xbf16>, vector<128x128xbf16>, vector<8x128xf32> -> vector<8x128xf32>
    %cst_20 = arith.constant 0.000000e+00 : f32
    %38 = vector.broadcast %cst_20 : f32 to vector<8x128xf32>
    %39 = arith.cmpf ogt, %37, %38 : vector<8x128xf32>
    %cst_21 = arith.constant 2.000000e-01 : f32
    %40 = vector.broadcast %cst_21 : f32 to vector<8x128xf32>
    %41 = arith.mulf %40, %37 : vector<8x128xf32>
    %42 = arith.select %39, %37, %41 : vector<8x128xi1>, vector<8x128xf32>
    %43 = arith.truncf %42 : vector<8x128xf32> to vector<8x128xbf16>
    %c0_22 = arith.constant 0 : index
    %c0_23 = arith.constant 0 : index
    %44 = vector.load %arg7[%c0_22, %c0_23] : memref<8x128xbf16, #tpu.memory_space<vmem>>, vector<8x128xbf16>
    tpu.vector_store %arg7[%c0_22, %c0_23], %43 {strides = array<i32>} : memref<8x128xbf16, #tpu.memory_space<vmem>>, vector<8x128xbf16>,
    return
  }
  func.func @transform_0(%arg0: i32) -> (i32, i32) {
    %c0_i32 = arith.constant 0 : i32
    %c0_i32_0 = arith.constant 0 : i32
    %c0_i32_1 = arith.constant 0 : i32
    return %c0_i32, %c0_i32_0 : i32, i32
  }
  func.func @transform_1(%arg0: i32) -> (i32, i32) {
    %c0_i32 = arith.constant 0 : i32
    %c0_i32_0 = arith.constant 0 : i32
    %c0_i32_1 = arith.constant 0 : i32
    return %c0_i32, %c0_i32_0 : i32, i32
  }
  func.func @transform_2(%arg0: i32) -> (i32, i32) {
    %c0_i32 = arith.constant 0 : i32
    %c0_i32_0 = arith.constant 0 : i32
    %c0_i32_1 = arith.constant 0 : i32
    return %c0_i32, %c0_i32_0 : i32, i32
  }
  func.func @transform_3(%arg0: i32) -> (i32, i32) {
    %c0_i32 = arith.constant 0 : i32
    %c0_i32_0 = arith.constant 0 : i32
    %c0_i32_1 = arith.constant 0 : i32
    return %c0_i32, %c0_i32_0 : i32, i32
  }
  func.func @transform_4(%arg0: i32) -> (i32, i32) {
    %c0_i32 = arith.constant 0 : i32
    %c0_i32_0 = arith.constant 0 : i32
    %c0_i32_1 = arith.constant 0 : i32
    return %c0_i32, %c0_i32_0 : i32, i32
  }
  func.func @transform_5(%arg0: i32) -> (i32, i32) {
    %c0_i32 = arith.constant 0 : i32
    %c0_i32_0 = arith.constant 0 : i32
    %c0_i32_1 = arith.constant 0 : i32
    return %c0_i32, %c0_i32_0 : i32, i32
  }
  func.func @transform_6(%arg0: i32) -> (i32, i32) {
    %c0_i32 = arith.constant 0 : i32
    %c0_i32_0 = arith.constant 0 : i32
    %c0_i32_1 = arith.constant 0 : i32
    return %c0_i32, %c0_i32_0 : i32, i32
  }
}

</mosaic_0001>

<bundles_post_ra>
// kernel: discriminator_forward.5
= control target key start
LH: loop header
LB: loop body
LE: loop exit
PB: predicated region body
PF: predicated region fallthrough
CT: control target
= control target key end

     0   :  { %s2979_s15 = smov 0   ;;  %s3368_s0 = inlined_call_operand.vmem [shape: bf16[2048,16], index: 0, kind: input, shape index: {}]   ;;  %s3369_s1 = inlined_call_operand.vmem [shape: bf16[16,8], index: 1, kind: input, shape index: {}]   ;;  %s3370_s2 = inlined_call_operand.vmem [shape: bf16[8,8], index: 2, kind: input, shape index: {}]   ;;  %s3371_s3 = inlined_call_operand.vmem [shape: bf16[2048,8], index: 3, kind: output, shape index: {0}]   ;;  %s3372_s4 = inlined_call_operand.vmem [shape: bf16[2048,8], index: 4, kind: output, shape index: {1}]  }
   0x1 LB: > { %s2340_s16 = sadd.s32 4294967295, %s2952_s15   ;;  %p2344_p0 = scmp.ge.s32.totalorder %s2952_s15, 1  ;;  %s2952_s15 = sphi %s2979_s15, %s15_s15  }
   0x2   : > { %p166_p1 = scmp.lt.s32.totalorder %s2952_s15, 5 }
   0x4   : > { %p167_p2 = pnand %p2344_p0, %p166_p1 }
   0x5   : > { %s2345_s19 = sshll.u32 (!%p167_p2), %s2340_s16, 6 }
   0x6   : > { %170 = sbr.rel (%p167_p2) target bundleno = 546 (0x222), region = 32  ;;  %p198_p3 = scmp.lt.s32.totalorder (!%p167_p2), %s2345_s19, 255 }
   0xb   : > { %v2913_v0 = vld [vmem:[%s3369_s1] sm:$0xff]   ;;  %s3374_s19 = smov (!%p198_p3, %s2345_s19), 255  ;;  %vm448_vm0 = vcmask 130048   ;;  %vm1445_vm1 = vcmask 1043456   ;;  %vm1282_vm3 = vcmask 60416   ;;  %vm1348_vm8 = vcmask 64512  }
   0xc   : > { %2772 = vmatprep.subr.bf16.mxu0 %v2913_v0  ;;  %s2990_s20 = sshll.u32 %s3374_s19, 2  ;;  %v1347_v22 = vld [vmem:[%s3370_s2] sm:$0xf] }
   0xd   : > { %2773 = vmatpush3.bf16.msra.mxu0 %v2913_v0  ;;  %s2996_s23 = scalar_lea.vmem %s3368_s0, %s2990_s20  ;;  %2904 = vmatprep.subr.msk.bf16.mxu1 %vm1445_vm1, %v1347_v22  ;;  %v1447_v23 = vsel %vm1445_vm1, %v1347_v22, 0  ;;  %s3069_s28 = scalar_lea.vmem %s3371_s3, %s2990_s20 }
   0xe   : > { %v2914_v1 = vld [vmem:[%s2996_s23] sm:$0xff]   ;;  %v2915_v2 = vld [vmem:[%s2996_s23 + $0x8] sm:$0xff]   ;;  %v2916_v3 = vld [vmem:[%s2996_s23 + $0x10] sm:$0xff]   ;;  %2839 = vmatpush3.bf16.msra.mxu1 %v1447_v23  ;;  %s3235_s5 = scalar_lea.vmem %s3372_s4, %s2990_s20 }
   0xf   : > { %2774 = vmatprep.mubr.msk.bf16.mxu0 %vm448_vm0, %v2914_v1  ;;  %v2917_v4 = vld [vmem:[%s2996_s23 + $0x18] sm:$0xff]   ;;  %v2918_v5 = vld [vmem:[%s2996_s23 + $0x20] sm:$0xff]   ;;  %v2919_v6 = vld [vmem:[%s2996_s23 + $0x28] sm:$0xff]  }
  0x10   : > { %2775 = vmatmul.mubr.msk.bf16.vlgmr.msra.gmra.mxu0 %vm448_vm0, %v2915_v2  ;;  %v2920_v7 = vld [vmem:[%s2996_s23 + $0x30] sm:$0xff]   ;;  %v2921_v8 = vld [vmem:[%s2996_s23 + $0x38] sm:$0xff]   ;;  %v2922_v9 = vld [vmem:[%s2996_s23 + $0x40] sm:$0xff]  }
  0x11   : > { %2778 = vmatprep.mubr.msk.bf16.mxu0 %vm448_vm0, %v2916_v3  ;;  %v2923_v10 = vld [vmem:[%s2996_s23 + $0x48] sm:$0xff]   ;;  %v2924_v11 = vld [vmem:[%s2996_s23 + $0x50] sm:$0xff]   ;;  %v2925_v12 = vld [vmem:[%s2996_s23 + $0x58] sm:$0xff]  }
  0x12   : > { %v2926_v13 = vld [vmem:[%s2996_s23 + $0x60] sm:$0xff]   ;;  %v2927_v14 = vld [vmem:[%s2996_s23 + $0x68] sm:$0xff]   ;;  %v2928_v15 = vld [vmem:[%s2996_s23 + $0x70] sm:$0xff]  }
  0x13   : > { %v2929_v16 = vld [vmem:[%s2996_s23 + $0x78] sm:$0xff]   ;;  %v2930_v17 = vld [vmem:[%s2996_s23 + $0x80] sm:$0xff]   ;;  %v2931_v18 = vld [vmem:[%s2996_s23 + $0x88] sm:$0xff]  }
  0x14   : > { %v2932_v19 = vld [vmem:[%s2996_s23 + $0x90] sm:$0xff]   ;;  %v2933_v20 = vld [vmem:[%s2996_s23 + $0x98] sm:$0xff]   ;;  %v2934_v21 = vld [vmem:[%s2996_s23 + $0xa0] sm:$0xff]  }
  0x15   : > { %v2935_v24 = vld [vmem:[%s2996_s23 + $0xa8] sm:$0xff]   ;;  %v2936_v25 = vld [vmem:[%s2996_s23 + $0xb0] sm:$0xff]   ;;  %v2937_v26 = vld [vmem:[%s2996_s23 + $0xb8] sm:$0xff]  }
  0x16   : > { %v2938_v27 = vld [vmem:[%s2996_s23 + $0xc0] sm:$0xff]   ;;  %v2939_v28 = vld [vmem:[%s2996_s23 + $0xc8] sm:$0xff]   ;;  %v2940_v29 = vld [vmem:[%s2996_s23 + $0xd0] sm:$0xff]  }
  0x17   : > { %v2941_v30 = vld [vmem:[%s2996_s23 + $0xd8] sm:$0xff]   ;;  %v2942_v31 = vld [vmem:[%s2996_s23 + $0xe0] sm:$0xff]   ;;  %v2943_v32 = vld [vmem:[%s2996_s23 + $0xe8] sm:$0xff]  }
  0x18   : > { %2779 = vmatmul.mubr.msk.bf16.gmra.mxu0 %vm448_vm0, %v2917_v4  ;;  %v2944_v33 = vld [vmem:[%s2996_s23 + $0xf0] sm:$0xff]   ;;  %v2945_v34 = vld [vmem:[%s2996_s23 + $0xf8] sm:$0xff]  }
  0x19   : > { %2782 = vmatprep.mubr.msk.bf16.mxu0 %vm448_vm0, %v2918_v5 }
  0x20   : > { %2783 = vmatmul.mubr.msk.bf16.gmra.mxu0 %vm448_vm0, %v2919_v6 }
  0x21   : > { %2786 = vmatprep.mubr.msk.bf16.mxu0 %vm448_vm0, %v2920_v7 }
  0x28   : > { %2787 = vmatmul.mubr.msk.bf16.gmra.mxu0 %vm448_vm0, %v2921_v8 }
  0x29   : > { %2790 = vmatprep.mubr.msk.bf16.mxu0 %vm448_vm0, %v2922_v9 }
  0x30   : > { %2791 = vmatmul.mubr.msk.bf16.gmra.mxu0 %vm448_vm0, %v2923_v10 }
  0x31   : > { %2794 = vmatprep.mubr.msk.bf16.mxu0 %vm448_vm0, %v2924_v11 }
  0x38   : > { %2795 = vmatmul.mubr.msk.bf16.gmra.mxu0 %vm448_vm0, %v2925_v12 }
  0x39   : > { %2798 = vmatprep.mubr.msk.bf16.mxu0 %vm448_vm0, %v2926_v13 }
  0x40   : > { %2799 = vmatmul.mubr.msk.bf16.gmra.mxu0 %vm448_vm0, %v2927_v14 }
  0x41   : > { %2802 = vmatprep.mubr.msk.bf16.mxu0 %vm448_vm0, %v2928_v15 }
  0x48   : > { %2803 = vmatmul.mubr.msk.bf16.gmra.mxu0 %vm448_vm0, %v2929_v16 }
  0x49   : > { %2806 = vmatprep.mubr.msk.bf16.mxu0 %vm448_vm0, %v2930_v17 }
  0x50   : > { %2807 = vmatmul.mubr.msk.bf16.gmra.mxu0 %vm448_vm0, %v2931_v18 }
  0x51   : > { %2810 = vmatprep.mubr.msk.bf16.mxu0 %vm448_vm0, %v2932_v19 }
  0x58   : > { %2811 = vmatmul.mubr.msk.bf16.gmra.mxu0 %vm448_vm0, %v2933_v20 }
  0x59   : > { %2814 = vmatprep.mubr.msk.bf16.mxu0 %vm448_vm0, %v2934_v21 }
  0x60   : > { %2815 = vmatmul.mubr.msk.bf16.gmra.mxu0 %vm448_vm0, %v2935_v24 }
  0x61   : > { %2818 = vmatprep.mubr.msk.bf16.mxu0 %vm448_vm0, %v2936_v25 }
  0x68   : > { %2819 = vmatmul.mubr.msk.bf16.gmra.mxu0 %vm448_vm0, %v2937_v26 }
  0x69   : > { %2822 = vmatprep.mubr.msk.bf16.mxu0 %vm448_vm0, %v2938_v27 }
  0x70   : > { %2823 = vmatmul.mubr.msk.bf16.gmra.mxu0 %vm448_vm0, %v2939_v28 }
  0x71   : > { %2826 = vmatprep.mubr.msk.bf16.mxu0 %vm448_vm0, %v2940_v29 }
  0x78   : > { %2827 = vmatmul.mubr.msk.bf16.gmra.mxu0 %vm448_vm0, %v2941_v30 }
  0x79   : > { %2830 = vmatprep.mubr.msk.bf16.mxu0 %vm448_vm0, %v2942_v31 }
  0x80   : > { %2831 = vmatmul.mubr.msk.bf16.gmra.mxu0 %vm448_vm0, %v2943_v32 }
  0x81   : > { %2834 = vmatprep.mubr.msk.bf16.mxu0 %vm448_vm0, %v2944_v33 }
  0x88   : > { %2835 = vmatmul.mubr.msk.bf16.gmra.mxu0 %vm448_vm0, %v2945_v34 }
  0xd0   : > { %v2776_v35 = vpop.f32.mrf.mxu0 }
  0xd1   : > { %vm836_vm2 = vcmp.gt.f32.partialorder %v2776_v35, 0.0  ;;  %v900_v36 = vmul.f32 0.2, %v2776_v35 }
  0xd2   : > { %v579_v37 = vpop.f32.mrf.mxu0 }
  0xd3   : > { %v964_v38 = vsel %vm836_vm2, %v2776_v35, %v900_v36  ;;  %vm834_vm4 = vcmp.gt.f32.partialorder %v579_v37, 0.0  ;;  %v898_v39 = vmul.f32 0.2, %v579_v37 }
  0xd4   : > { %v2580_v40 = vpack.c.bf16 %v964_v38, %v964_v38  ;;  %v2777_v41 = vpop.f32.mrf.mxu0 }
  0xd5   : > { %vm837_vm5 = vcmp.gt.f32.partialorder %v2777_v41, 0.0  ;;  %v901_v42 = vmul.f32 0.2, %v2777_v41  ;;  %v962_v43 = vsel %vm834_vm4, %v579_v37, %v898_v39 }
  0xd6   : > { %1285 = vst.msk [vmem:[%s3069_s28 + $0x8] sm:$0xf] %vm1282_vm3, %v2580_v40  ;;  %v582_v44 = vpop.f32.mrf.mxu0  ;;  %v2578_v45 = vpack.c.bf16 %v962_v43, %v962_v43 }
  0xd7   : > { %v965_v46 = vsel %vm837_vm5, %v2777_v41, %v901_v42  ;;  %vm835_vm6 = vcmp.gt.f32.partialorder %v582_v44, 0.0  ;;  %v899_v47 = vmul.f32 0.2, %v582_v44 }
  0xd8   : > { %v2581_v48 = vpack.c.bf16 %v965_v46, %v965_v46  ;;  %v2780_v49 = vpop.f32.mrf.mxu0  ;;  %1283 = vst.msk [vmem:[%s3069_s28] sm:$0xf] %vm1282_vm3, %v2578_v45  ;;  %v1027_v55 = vpack.c.bf16 %v965_v46, %v964_v38 }
  0xd9   : > { %vm840_vm7 = vcmp.gt.f32.partialorder %v2780_v49, 0.0  ;;  %v904_v50 = vmul.f32 0.2, %v2780_v49  ;;  %v963_v51 = vsel %vm835_vm6, %v582_v44, %v899_v47 }
  0xda   : > { %1286 = vst.msk [vmem:[%s3069_s28 + $0xc] sm:$0xf] %vm1282_vm3, %v2581_v48  ;;  %v595_v52 = vpop.f32.mrf.mxu0  ;;  %v1026_v53 = vpack.c.bf16 %v963_v51, %v962_v43  ;;  %v2579_v54 = vpack.c.bf16 %v963_v51, %v963_v51 }
  0xdb   : > { %v968_v56 = vsel %vm840_vm7, %v2780_v49, %v904_v50  ;;  %vm838_vm9 = vcmp.gt.f32.partialorder %v595_v52, 0.0  ;;  %v902_v57 = vmul.f32 0.2, %v595_v52 }
  0xdc   : > { %v2584_v58 = vpack.c.bf16 %v968_v56, %v968_v56  ;;  %v2781_v59 = vpop.f32.mrf.mxu0  ;;  %1284 = vst.msk [vmem:[%s3069_s28 + $0x4] sm:$0xf] %vm1282_vm3, %v2579_v54  ;;  %2840 = vmatprep.mubr.msk.bf16.mxu1 %vm1348_vm8, %v1026_v53 }
  0xdd   : > { %v966_v60 = vsel %vm838_vm9, %v595_v52, %v902_v57  ;;  %vm841_vm10 = vcmp.gt.f32.partialorder %v2781_v59, 0.0  ;;  %v905_v61 = vmul.f32 0.2, %v2781_v59  ;;  %2841 = vmatmul.mubr.msk.bf16.vlgmr.msra.gmra.mxu1 %vm1348_vm8, %v1027_v55 }
  0xde   : > { %1289 = vst.msk [vmem:[%s3069_s28 + $0x18] sm:$0xf] %vm1282_vm3, %v2584_v58  ;;  %v2582_v62 = vpack.c.bf16 %v966_v60, %v966_v60  ;;  %v598_v63 = vpop.f32.mrf.mxu0 }
  0xdf   : > { %v969_v0 = vsel %vm841_vm10, %v2781_v59, %v905_v61  ;;  %vm839_vm11 = vcmp.gt.f32.partialorder %v598_v63, 0.0  ;;  %v903_v1 = vmul.f32 0.2, %v598_v63 }
  0xe0   : > { %1287 = vst.msk [vmem:[%s3069_s28 + $0x10] sm:$0xf] %vm1282_vm3, %v2582_v62  ;;  %v2585_v2 = vpack.c.bf16 %v969_v0, %v969_v0  ;;  %v2784_v3 = vpop.f32.mrf.mxu0  ;;  %v1029_v9 = vpack.c.bf16 %v969_v0, %v968_v56 }
  0xe1   : > { %v967_v4 = vsel %vm839_vm11, %v598_v63, %v903_v1  ;;  %vm844_vm12 = vcmp.gt.f32.partialorder %v2784_v3, 0.0  ;;  %v908_v5 = vmul.f32 0.2, %v2784_v3 }
  0xe2   : > { %1290 = vst.msk [vmem:[%s3069_s28 + $0x1c] sm:$0xf] %vm1282_vm3, %v2585_v2  ;;  %v1028_v6 = vpack.c.bf16 %v967_v4, %v966_v60  ;;  %v2583_v7 = vpack.c.bf16 %v967_v4, %v967_v4  ;;  %v611_v8 = vpop.f32.mrf.mxu0 }
  0xe3   : > { %v972_v10 = vsel %vm844_vm12, %v2784_v3, %v908_v5  ;;  %vm842_vm13 = vcmp.gt.f32.partialorder %v611_v8, 0.0  ;;  %v906_v11 = vmul.f32 0.2, %v611_v8 }
  0xe4   : > { %1288 = vst.msk [vmem:[%s3069_s28 + $0x14] sm:$0xf] %vm1282_vm3, %v2583_v7  ;;  %v2588_v12 = vpack.c.bf16 %v972_v10, %v972_v10  ;;  %v2785_v13 = vpop.f32.mrf.mxu0  ;;  %2844 = vmatprep.mubr.msk.bf16.mxu1 %vm1348_vm8, %v1028_v6 }
  0xe5   : > { %v970_v14 = vsel %vm842_vm13, %v611_v8, %v906_v11  ;;  %vm845_vm14 = vcmp.gt.f32.partialorder %v2785_v13, 0.0  ;;  %v909_v15 = vmul.f32 0.2, %v2785_v13  ;;  %2845 = vmatmul.mubr.msk.bf16.gmra.mxu1 %vm1348_vm8, %v1029_v9 }
  0xe6   : > { %1293 = vst.msk [vmem:[%s3069_s28 + $0x28] sm:$0xf] %vm1282_vm3, %v2588_v12  ;;  %v2586_v16 = vpack.c.bf16 %v970_v14, %v970_v14  ;;  %v614_v17 = vpop.f32.mrf.mxu0 }
  0xe7   : > { %v973_v18 = vsel %vm845_vm14, %v2785_v13, %v909_v15  ;;  %vm843_vm15 = vcmp.gt.f32.partialorder %v614_v17, 0.0  ;;  %v907_v19 = vmul.f32 0.2, %v614_v17 }
  0xe8   : > { %1291 = vst.msk [vmem:[%s3069_s28 + $0x20] sm:$0xf] %vm1282_vm3, %v2586_v16  ;;  %v2589_v20 = vpack.c.bf16 %v973_v18, %v973_v18  ;;  %v2788_v21 = vpop.f32.mrf.mxu0  ;;  %v1031_v27 = vpack.c.bf16 %v973_v18, %v972_v10 }
  0xe9   : > { %v971_v22 = vsel %vm843_vm15, %v614_v17, %v907_v19  ;;  %vm848_vm0 = vcmp.gt.f32.partialorder %v2788_v21, 0.0  ;;  %v912_v23 = vmul.f32 0.2, %v2788_v21 }
  0xea   : > { %1294 = vst.msk [vmem:[%s3069_s28 + $0x2c] sm:$0xf] %vm1282_vm3, %v2589_v20  ;;  %v1030_v24 = vpack.c.bf16 %v971_v22, %v970_v14  ;;  %v2587_v25 = vpack.c.bf16 %v971_v22, %v971_v22  ;;  %v627_v26 = vpop.f32.mrf.mxu0 }
  0xeb   : > { %v976_v28 = vsel %vm848_vm0, %v2788_v21, %v912_v23  ;;  %vm846_vm1 = vcmp.gt.f32.partialorder %v627_v26, 0.0  ;;  %v910_v29 = vmul.f32 0.2, %v627_v26 }
  0xec   : > { %1292 = vst.msk [vmem:[%s3069_s28 + $0x24] sm:$0xf] %vm1282_vm3, %v2587_v25  ;;  %v2592_v30 = vpack.c.bf16 %v976_v28, %v976_v28  ;;  %v2789_v31 = vpop.f32.mrf.mxu0  ;;  %2848 = vmatprep.mubr.msk.bf16.mxu1 %vm1348_vm8, %v1030_v24 }
  0xed   : > { %v974_v32 = vsel %vm846_vm1, %v627_v26, %v910_v29  ;;  %vm849_vm2 = vcmp.gt.f32.partialorder %v2789_v31, 0.0  ;;  %v913_v33 = vmul.f32 0.2, %v2789_v31  ;;  %2849 = vmatmul.mubr.msk.bf16.gmra.mxu1 %vm1348_vm8, %v1031_v27 }
  0xee   : > { %1297 = vst.msk [vmem:[%s3069_s28 + $0x38] sm:$0xf] %vm1282_vm3, %v2592_v30  ;;  %v2590_v34 = vpack.c.bf16 %v974_v32, %v974_v32  ;;  %v630_v35 = vpop.f32.mrf.mxu0 }
  0xef   : > { %v977_v36 = vsel %vm849_vm2, %v2789_v31, %v913_v33  ;;  %vm847_vm4 = vcmp.gt.f32.partialorder %v630_v35, 0.0  ;;  %v911_v37 = vmul.f32 0.2, %v630_v35 }
  0xf0   : > { %1295 = vst.msk [vmem:[%s3069_s28 + $0x30] sm:$0xf] %vm1282_vm3, %v2590_v34  ;;  %v2593_v38 = vpack.c.bf16 %v977_v36, %v977_v36  ;;  %v2792_v39 = vpop.f32.mrf.mxu0  ;;  %v1033_v45 = vpack.c.bf16 %v977_v36, %v976_v28 }
  0xf1   : > { %v975_v40 = vsel %vm847_vm4, %v630_v35, %v911_v37  ;;  %vm852_vm5 = vcmp.gt.f32.partialorder %v2792_v39, 0.0  ;;  %v916_v41 = vmul.f32 0.2, %v2792_v39 }
  0xf2   : > { %1298 = vst.msk [vmem:[%s3069_s28 + $0x3c] sm:$0xf] %vm1282_vm3, %v2593_v38  ;;  %v1032_v42 = vpack.c.bf16 %v975_v40, %v974_v32  ;;  %v2591_v43 = vpack.c.bf16 %v975_v40, %v975_v40  ;;  %v643_v44 = vpop.f32.mrf.mxu0 }
  0xf3   : > { %v980_v46 = vsel %vm852_vm5, %v2792_v39, %v916_v41  ;;  %vm850_vm6 = vcmp.gt.f32.partialorder %v643_v44, 0.0  ;;  %v914_v47 = vmul.f32 0.2, %v643_v44 }
  0xf4   : > { %1296 = vst.msk [vmem:[%s3069_s28 + $0x34] sm:$0xf] %vm1282_vm3, %v2591_v43  ;;  %v2596_v48 = vpack.c.bf16 %v980_v46, %v980_v46  ;;  %v2793_v49 = vpop.f32.mrf.mxu0  ;;  %2852 = vmatprep.mubr.msk.bf16.mxu1 %vm1348_vm8, %v1032_v42 }
  0xf5   : > { %v978_v50 = vsel %vm850_vm6, %v643_v44, %v914_v47  ;;  %vm853_vm7 = vcmp.gt.f32.partialorder %v2793_v49, 0.0  ;;  %v917_v51 = vmul.f32 0.2, %v2793_v49  ;;  %2853 = vmatmul.mubr.msk.bf16.gmra.mxu1 %vm1348_vm8, %v1033_v45 }
  0xf6   : > { %1301 = vst.msk [vmem:[%s3069_s28 + $0x48] sm:$0xf] %vm1282_vm3, %v2596_v48  ;;  %v2594_v52 = vpack.c.bf16 %v978_v50, %v978_v50  ;;  %v646_v53 = vpop.f32.mrf.mxu0 }
  0xf7   : > { %v981_v54 = vsel %vm853_vm7, %v2793_v49, %v917_v51  ;;  %vm851_vm9 = vcmp.gt.f32.partialorder %v646_v53, 0.0  ;;  %v915_v55 = vmul.f32 0.2, %v646_v53 }
  0xf8   : > { %1299 = vst.msk [vmem:[%s3069_s28 + $0x40] sm:$0xf] %vm1282_vm3, %v2594_v52  ;;  %v2597_v56 = vpack.c.bf16 %v981_v54, %v981_v54  ;;  %v2796_v57 = vpop.f32.mrf.mxu0  ;;  %v1035_v63 = vpack.c.bf16 %v981_v54, %v980_v46 }
  0xf9   : > { %v979_v58 = vsel %vm851_vm9, %v646_v53, %v915_v55  ;;  %vm856_vm10 = vcmp.gt.f32.partialorder %v2796_v57, 0.0  ;;  %v920_v59 = vmul.f32 0.2, %v2796_v57 }
  0xfa   : > { %1302 = vst.msk [vmem:[%s3069_s28 + $0x4c] sm:$0xf] %vm1282_vm3, %v2597_v56  ;;  %v1034_v60 = vpack.c.bf16 %v979_v58, %v978_v50  ;;  %v2595_v61 = vpack.c.bf16 %v979_v58, %v979_v58  ;;  %v659_v62 = vpop.f32.mrf.mxu0 }
  0xfb   : > { %v984_v0 = vsel %vm856_vm10, %v2796_v57, %v920_v59  ;;  %vm854_vm11 = vcmp.gt.f32.partialorder %v659_v62, 0.0  ;;  %v918_v1 = vmul.f32 0.2, %v659_v62 }
  0xfc   : > { %1300 = vst.msk [vmem:[%s3069_s28 + $0x44] sm:$0xf] %vm1282_vm3, %v2595_v61  ;;  %v2600_v2 = vpack.c.bf16 %v984_v0, %v984_v0  ;;  %v2797_v3 = vpop.f32.mrf.mxu0  ;;  %2856 = vmatprep.mubr.msk.bf16.mxu1 %vm1348_vm8, %v1034_v60 }
  0xfd   : > { %v982_v4 = vsel %vm854_vm11, %v659_v62, %v918_v1  ;;  %vm857_vm12 = vcmp.gt.f32.partialorder %v2797_v3, 0.0  ;;  %v921_v5 = vmul.f32 0.2, %v2797_v3  ;;  %2857 = vmatmul.mubr.msk.bf16.gmra.mxu1 %vm1348_vm8, %v1035_v63 }
  0xfe   : > { %1305 = vst.msk [vmem:[%s3069_s28 + $0x58] sm:$0xf] %vm1282_vm3, %v2600_v2  ;;  %v2598_v6 = vpack.c.bf16 %v982_v4, %v982_v4  ;;  %v662_v7 = vpop.f32.mrf.mxu0 }
  0xff   : > { %v985_v8 = vsel %vm857_vm12, %v2797_v3, %v921_v5  ;;  %vm855_vm13 = vcmp.gt.f32.partialorder %v662_v7, 0.0  ;;  %v919_v9 = vmul.f32 0.2, %v662_v7 }
 0x100   : > { %1303 = vst.msk [vmem:[%s3069_s28 + $0x50] sm:$0xf] %vm1282_vm3, %v2598_v6  ;;  %v2601_v10 = vpack.c.bf16 %v985_v8, %v985_v8  ;;  %v2800_v11 = vpop.f32.mrf.mxu0  ;;  %v1037_v17 = vpack.c.bf16 %v985_v8, %v984_v0 }
 0x101   : > { %v983_v12 = vsel %vm855_vm13, %v662_v7, %v919_v9  ;;  %vm860_vm14 = vcmp.gt.f32.partialorder %v2800_v11, 0.0  ;;  %v924_v13 = vmul.f32 0.2, %v2800_v11 }
 0x102   : > { %1306 = vst.msk [vmem:[%s3069_s28 + $0x5c] sm:$0xf] %vm1282_vm3, %v2601_v10  ;;  %v1036_v14 = vpack.c.bf16 %v983_v12, %v982_v4  ;;  %v2599_v15 = vpack.c.bf16 %v983_v12, %v983_v12  ;;  %v675_v16 = vpop.f32.mrf.mxu0 }
 0x103   : > { %v988_v18 = vsel %vm860_vm14, %v2800_v11, %v924_v13  ;;  %vm858_vm15 = vcmp.gt.f32.partialorder %v675_v16, 0.0  ;;  %v922_v19 = vmul.f32 0.2, %v675_v16 }
 0x104   : > { %1304 = vst.msk [vmem:[%s3069_s28 + $0x54] sm:$0xf] %vm1282_vm3, %v2599_v15  ;;  %v2604_v20 = vpack.c.bf16 %v988_v18, %v988_v18  ;;  %v2801_v21 = vpop.f32.mrf.mxu0  ;;  %2860 = vmatprep.mubr.msk.bf16.mxu1 %vm1348_vm8, %v1036_v14 }
 0x105   : > { %v986_v22 = vsel %vm858_vm15, %v675_v16, %v922_v19  ;;  %vm861_vm0 = vcmp.gt.f32.partialorder %v2801_v21, 0.0  ;;  %v925_v23 = vmul.f32 0.2, %v2801_v21  ;;  %2861 = vmatmul.mubr.msk.bf16.gmra.mxu1 %vm1348_vm8, %v1037_v17 }
 0x106   : > { %1309 = vst.msk [vmem:[%s3069_s28 + $0x68] sm:$0xf] %vm1282_vm3, %v2604_v20  ;;  %v2602_v24 = vpack.c.bf16 %v986_v22, %v986_v22  ;;  %v678_v25 = vpop.f32.mrf.mxu0 }
 0x107   : > { %v989_v26 = vsel %vm861_vm0, %v2801_v21, %v925_v23  ;;  %vm859_vm1 = vcmp.gt.f32.partialorder %v678_v25, 0.0  ;;  %v923_v27 = vmul.f32 0.2, %v678_v25 }
 0x108   : > { %1307 = vst.msk [vmem:[%s3069_s28 + $0x60] sm:$0xf] %vm1282_vm3, %v2602_v24  ;;  %v2605_v28 = vpack.c.bf16 %v989_v26, %v989_v26  ;;  %v2804_v29 = vpop.f32.mrf.mxu0  ;;  %v1039_v35 = vpack.c.bf16 %v989_v26, %v988_v18 }
 0x109   : > { %v987_v30 = vsel %vm859_vm1, %v678_v25, %v923_v27  ;;  %vm864_vm2 = vcmp.gt.f32.partialorder %v2804_v29, 0.0  ;;  %v928_v31 = vmul.f32 0.2, %v2804_v29 }
 0x10a   : > { %1310 = vst.msk [vmem:[%s3069_s28 + $0x6c] sm:$0xf] %vm1282_vm3, %v2605_v28  ;;  %v1038_v32 = vpack.c.bf16 %v987_v30, %v986_v22  ;;  %v2603_v33 = vpack.c.bf16 %v987_v30, %v987_v30  ;;  %v691_v34 = vpop.f32.mrf.mxu0 }
 0x10b   : > { %v992_v36 = vsel %vm864_vm2, %v2804_v29, %v928_v31  ;;  %vm862_vm4 = vcmp.gt.f32.partialorder %v691_v34, 0.0  ;;  %v926_v37 = vmul.f32 0.2, %v691_v34 }
 0x10c   : > { %1308 = vst.msk [vmem:[%s3069_s28 + $0x64] sm:$0xf] %vm1282_vm3, %v2603_v33  ;;  %v2608_v38 = vpack.c.bf16 %v992_v36, %v992_v36  ;;  %v2805_v39 = vpop.f32.mrf.mxu0  ;;  %2864 = vmatprep.mubr.msk.bf16.mxu1 %vm1348_vm8, %v1038_v32 }
 0x10d   : > { %v990_v40 = vsel %vm862_vm4, %v691_v34, %v926_v37  ;;  %vm865_vm5 = vcmp.gt.f32.partialorder %v2805_v39, 0.0  ;;  %v929_v41 = vmul.f32 0.2, %v2805_v39  ;;  %2865 = vmatmul.mubr.msk.bf16.gmra.mxu1 %vm1348_vm8, %v1039_v35 }
 0x10e   : > { %1313 = vst.msk [vmem:[%s3069_s28 + $0x78] sm:$0xf] %vm1282_vm3, %v2608_v38  ;;  %v2606_v42 = vpack.c.bf16 %v990_v40, %v990_v40  ;;  %v694_v43 = vpop.f32.mrf.mxu0 }
 0x10f   : > { %v993_v44 = vsel %vm865_vm5, %v2805_v39, %v929_v41  ;;  %vm863_vm6 = vcmp.gt.f32.partialorder %v694_v43, 0.0  ;;  %v927_v45 = vmul.f32 0.2, %v694_v43 }
 0x110   : > { %1311 = vst.msk [vmem:[%s3069_s28 + $0x70] sm:$0xf] %vm1282_vm3, %v2606_v42  ;;  %v2609_v46 = vpack.c.bf16 %v993_v44, %v993_v44  ;;  %v2808_v47 = vpop.f32.mrf.mxu0  ;;  %v1041_v53 = vpack.c.bf16 %v993_v44, %v992_v36 }
 0x111   : > { %v991_v48 = vsel %vm863_vm6, %v694_v43, %v927_v45  ;;  %vm868_vm7 = vcmp.gt.f32.partialorder %v2808_v47, 0.0  ;;  %v932_v49 = vmul.f32 0.2, %v2808_v47 }
 0x112   : > { %1314 = vst.msk [vmem:[%s3069_s28 + $0x7c] sm:$0xf] %vm1282_vm3, %v2609_v46  ;;  %v1040_v50 = vpack.c.bf16 %v991_v48, %v990_v40  ;;  %v2607_v51 = vpack.c.bf16 %v991_v48, %v991_v48  ;;  %v707_v52 = vpop.f32.mrf.mxu0 }
 0x113   : > { %v996_v54 = vsel %vm868_vm7, %v2808_v47, %v932_v49  ;;  %vm866_vm9 = vcmp.gt.f32.partialorder %v707_v52, 0.0  ;;  %v930_v55 = vmul.f32 0.2, %v707_v52 }
 0x114   : > { %1312 = vst.msk [vmem:[%s3069_s28 + $0x74] sm:$0xf] %vm1282_vm3, %v2607_v51  ;;  %v2612_v56 = vpack.c.bf16 %v996_v54, %v996_v54  ;;  %v2809_v57 = vpop.f32.mrf.mxu0  ;;  %2868 = vmatprep.mubr.msk.bf16.mxu1 %vm1348_vm8, %v1040_v50 }
 0x115   : > { %v994_v58 = vsel %vm866_vm9, %v707_v52, %v930_v55  ;;  %vm869_vm10 = vcmp.gt.f32.partialorder %v2809_v57, 0.0  ;;  %v933_v59 = vmul.f32 0.2, %v2809_v57  ;;  %2869 = vmatmul.mubr.msk.bf16.gmra.mxu1 %vm1348_vm8, %v1041_v53 }
 0x116   : > { %1317 = vst.msk [vmem:[%s3069_s28 + $0x88] sm:$0xf] %vm1282_vm3, %v2612_v56  ;;  %v2610_v60 = vpack.c.bf16 %v994_v58, %v994_v58  ;;  %v710_v61 = vpop.f32.mrf.mxu0 }
 0x117   : > { %v997_v62 = vsel %vm869_vm10, %v2809_v57, %v933_v59  ;;  %vm867_vm11 = vcmp.gt.f32.partialorder %v710_v61, 0.0  ;;  %v931_v63 = vmul.f32 0.2, %v710_v61 }
 0x118   : > { %1315 = vst.msk [vmem:[%s3069_s28 + $0x80] sm:$0xf] %vm1282_vm3, %v2610_v60  ;;  %v2613_v0 = vpack.c.bf16 %v997_v62, %v997_v62  ;;  %v2812_v1 = vpop.f32.mrf.mxu0  ;;  %v1043_v7 = vpack.c.bf16 %v997_v62, %v996_v54 }
 0x119   : > { %v995_v2 = vsel %vm867_vm11, %v710_v61, %v931_v63  ;;  %vm872_vm12 = vcmp.gt.f32.partialorder %v2812_v1, 0.0  ;;  %v936_v3 = vmul.f32 0.2, %v2812_v1 }
 0x11a   : > { %1318 = vst.msk [vmem:[%s3069_s28 + $0x8c] sm:$0xf] %vm1282_vm3, %v2613_v0  ;;  %v1042_v4 = vpack.c.bf16 %v995_v2, %v994_v58  ;;  %v2611_v5 = vpack.c.bf16 %v995_v2, %v995_v2  ;;  %v723_v6 = vpop.f32.mrf.mxu0 }
 0x11b   : > { %v1000_v8 = vsel %vm872_vm12, %v2812_v1, %v936_v3  ;;  %vm870_vm13 = vcmp.gt.f32.partialorder %v723_v6, 0.0  ;;  %v934_v9 = vmul.f32 0.2, %v723_v6 }
 0x11c   : > { %1316 = vst.msk [vmem:[%s3069_s28 + $0x84] sm:$0xf] %vm1282_vm3, %v2611_v5  ;;  %v2616_v10 = vpack.c.bf16 %v1000_v8, %v1000_v8  ;;  %v2813_v11 = vpop.f32.mrf.mxu0  ;;  %2872 = vmatprep.mubr.msk.bf16.mxu1 %vm1348_vm8, %v1042_v4 }
 0x11d   : > { %v998_v12 = vsel %vm870_vm13, %v723_v6, %v934_v9  ;;  %vm873_vm14 = vcmp.gt.f32.partialorder %v2813_v11, 0.0  ;;  %v937_v13 = vmul.f32 0.2, %v2813_v11  ;;  %2873 = vmatmul.mubr.msk.bf16.gmra.mxu1 %vm1348_vm8, %v1043_v7 }
 0x11e   : > { %1321 = vst.msk [vmem:[%s3069_s28 + $0x98] sm:$0xf] %vm1282_vm3, %v2616_v10  ;;  %v2614_v14 = vpack.c.bf16 %v998_v12, %v998_v12  ;;  %v726_v15 = vpop.f32.mrf.mxu0 }
 0x11f   : > { %v1001_v16 = vsel %vm873_vm14, %v2813_v11, %v937_v13  ;;  %vm871_vm15 = vcmp.gt.f32.partialorder %v726_v15, 0.0  ;;  %v935_v17 = vmul.f32 0.2, %v726_v15 }
 0x120   : > { %1319 = vst.msk [vmem:[%s3069_s28 + $0x90] sm:$0xf] %vm1282_vm3, %v2614_v14  ;;  %v2617_v18 = vpack.c.bf16 %v1001_v16, %v1001_v16  ;;  %v2816_v19 = vpop.f32.mrf.mxu0  ;;  %v1045_v25 = vpack.c.bf16 %v1001_v16, %v1000_v8 }
 0x121   : > { %v999_v20 = vsel %vm871_vm15, %v726_v15, %v935_v17  ;;  %vm876_vm0 = vcmp.gt.f32.partialorder %v2816_v19, 0.0  ;;  %v940_v21 = vmul.f32 0.2, %v2816_v19 }
 0x122   : > { %1322 = vst.msk [vmem:[%s3069_s28 + $0x9c] sm:$0xf] %vm1282_vm3, %v2617_v18  ;;  %v1044_v22 = vpack.c.bf16 %v999_v20, %v998_v12  ;;  %v2615_v23 = vpack.c.bf16 %v999_v20, %v999_v20  ;;  %v739_v24 = vpop.f32.mrf.mxu0 }
 0x123   : > { %v1004_v26 = vsel %vm876_vm0, %v2816_v19, %v940_v21  ;;  %vm874_vm1 = vcmp.gt.f32.partialorder %v739_v24, 0.0  ;;  %v938_v27 = vmul.f32 0.2, %v739_v24 }
 0x124   : > { %1320 = vst.msk [vmem:[%s3069_s28 + $0x94] sm:$0xf] %vm1282_vm3, %v2615_v23  ;;  %v2620_v28 = vpack.c.bf16 %v1004_v26, %v1004_v26  ;;  %v2817_v29 = vpop.f32.mrf.mxu0  ;;  %2876 = vmatprep.mubr.msk.bf16.mxu1 %vm1348_vm8, %v1044_v22 }
 0x125   : > { %v1002_v30 = vsel %vm874_vm1, %v739_v24, %v938_v27  ;;  %vm877_vm2 = vcmp.gt.f32.partialorder %v2817_v29, 0.0  ;;  %v941_v31 = vmul.f32 0.2, %v2817_v29  ;;  %2877 = vmatmul.mubr.msk.bf16.gmra.mxu1 %vm1348_vm8, %v1045_v25 }
 0x126   : > { %1325 = vst.msk [vmem:[%s3069_s28 + $0xa8] sm:$0xf] %vm1282_vm3, %v2620_v28  ;;  %v2618_v32 = vpack.c.bf16 %v1002_v30, %v1002_v30  ;;  %v742_v33 = vpop.f32.mrf.mxu0 }
 0x127   : > { %v1005_v34 = vsel %vm877_vm2, %v2817_v29, %v941_v31  ;;  %vm875_vm4 = vcmp.gt.f32.partialorder %v742_v33, 0.0  ;;  %v939_v35 = vmul.f32 0.2, %v742_v33 }
 0x128   : > { %1323 = vst.msk [vmem:[%s3069_s28 + $0xa0] sm:$0xf] %vm1282_vm3, %v2618_v32  ;;  %v2621_v36 = vpack.c.bf16 %v1005_v34, %v1005_v34  ;;  %v2820_v37 = vpop.f32.mrf.mxu0  ;;  %v1047_v43 = vpack.c.bf16 %v1005_v34, %v1004_v26 }
 0x129   : > { %v1003_v38 = vsel %vm875_vm4, %v742_v33, %v939_v35  ;;  %vm880_vm5 = vcmp.gt.f32.partialorder %v2820_v37, 0.0  ;;  %v944_v39 = vmul.f32 0.2, %v2820_v37 }
 0x12a   : > { %1326 = vst.msk [vmem:[%s3069_s28 + $0xac] sm:$0xf] %vm1282_vm3, %v2621_v36  ;;  %v1046_v40 = vpack.c.bf16 %v1003_v38, %v1002_v30  ;;  %v2619_v41 = vpack.c.bf16 %v1003_v38, %v1003_v38  ;;  %v755_v42 = vpop.f32.mrf.mxu0 }
 0x12b   : > { %v1008_v44 = vsel %vm880_vm5, %v2820_v37, %v944_v39  ;;  %vm878_vm6 = vcmp.gt.f32.partialorder %v755_v42, 0.0  ;;  %v942_v45 = vmul.f32 0.2, %v755_v42 }
 0x12c   : > { %1324 = vst.msk [vmem:[%s3069_s28 + $0xa4] sm:$0xf] %vm1282_vm3, %v2619_v41  ;;  %v2624_v46 = vpack.c.bf16 %v1008_v44, %v1008_v44  ;;  %v2821_v47 = vpop.f32.mrf.mxu0  ;;  %2880 = vmatprep.mubr.msk.bf16.mxu1 %vm1348_vm8, %v1046_v40 }
 0x12d   : > { %v1006_v48 = vsel %vm878_vm6, %v755_v42, %v942_v45  ;;  %vm881_vm7 = vcmp.gt.f32.partialorder %v2821_v47, 0.0  ;;  %v945_v49 = vmul.f32 0.2, %v2821_v47  ;;  %2881 = vmatmul.mubr.msk.bf16.gmra.mxu1 %vm1348_vm8, %v1047_v43 }
 0x12e   : > { %1329 = vst.msk [vmem:[%s3069_s28 + $0xb8] sm:$0xf] %vm1282_vm3, %v2624_v46  ;;  %v2622_v50 = vpack.c.bf16 %v1006_v48, %v1006_v48  ;;  %v758_v51 = vpop.f32.mrf.mxu0 }
 0x12f   : > { %v1009_v52 = vsel %vm881_vm7, %v2821_v47, %v945_v49  ;;  %vm879_vm9 = vcmp.gt.f32.partialorder %v758_v51, 0.0  ;;  %v943_v53 = vmul.f32 0.2, %v758_v51 }
 0x130   : > { %1327 = vst.msk [vmem:[%s3069_s28 + $0xb0] sm:$0xf] %vm1282_vm3, %v2622_v50  ;;  %v2625_v54 = vpack.c.bf16 %v1009_v52, %v1009_v52  ;;  %v2824_v55 = vpop.f32.mrf.mxu0  ;;  %v1049_v61 = vpack.c.bf16 %v1009_v52, %v1008_v44 }
 0x131   : > { %v1007_v56 = vsel %vm879_vm9, %v758_v51, %v943_v53  ;;  %vm884_vm10 = vcmp.gt.f32.partialorder %v2824_v55, 0.0  ;;  %v948_v57 = vmul.f32 0.2, %v2824_v55 }
 0x132   : > { %1330 = vst.msk [vmem:[%s3069_s28 + $0xbc] sm:$0xf] %vm1282_vm3, %v2625_v54  ;;  %v1048_v58 = vpack.c.bf16 %v1007_v56, %v1006_v48  ;;  %v2623_v59 = vpack.c.bf16 %v1007_v56, %v1007_v56  ;;  %v771_v60 = vpop.f32.mrf.mxu0 }
 0x133   : > { %v1012_v62 = vsel %vm884_vm10, %v2824_v55, %v948_v57  ;;  %vm882_vm11 = vcmp.gt.f32.partialorder %v771_v60, 0.0  ;;  %v946_v63 = vmul.f32 0.2, %v771_v60 }
 0x134   : > { %1328 = vst.msk [vmem:[%s3069_s28 + $0xb4] sm:$0xf] %vm1282_vm3, %v2623_v59  ;;  %v2628_v0 = vpack.c.bf16 %v1012_v62, %v1012_v62  ;;  %v2825_v1 = vpop.f32.mrf.mxu0  ;;  %2884 = vmatprep.mubr.msk.bf16.mxu1 %vm1348_vm8, %v1048_v58 }
 0x135   : > { %v1010_v2 = vsel %vm882_vm11, %v771_v60, %v946_v63  ;;  %vm885_vm12 = vcmp.gt.f32.partialorder %v2825_v1, 0.0  ;;  %v949_v3 = vmul.f32 0.2, %v2825_v1  ;;  %2885 = vmatmul.mubr.msk.bf16.gmra.mxu1 %vm1348_vm8, %v1049_v61 }
 0x136   : > { %1333 = vst.msk [vmem:[%s3069_s28 + $0xc8] sm:$0xf] %vm1282_vm3, %v2628_v0  ;;  %v2626_v4 = vpack.c.bf16 %v1010_v2, %v1010_v2  ;;  %v774_v5 = vpop.f32.mrf.mxu0 }
 0x137   : > { %v1013_v6 = vsel %vm885_vm12, %v2825_v1, %v949_v3  ;;  %vm883_vm13 = vcmp.gt.f32.partialorder %v774_v5, 0.0  ;;  %v947_v7 = vmul.f32 0.2, %v774_v5 }
 0x138   : > { %1331 = vst.msk [vmem:[%s3069_s28 + $0xc0] sm:$0xf] %vm1282_vm3, %v2626_v4  ;;  %v2629_v8 = vpack.c.bf16 %v1013_v6, %v1013_v6  ;;  %v2828_v9 = vpop.f32.mrf.mxu0  ;;  %v1051_v15 = vpack.c.bf16 %v1013_v6, %v1012_v62 }
 0x139   : > { %v1011_v10 = vsel %vm883_vm13, %v774_v5, %v947_v7  ;;  %vm888_vm14 = vcmp.gt.f32.partialorder %v2828_v9, 0.0  ;;  %v952_v11 = vmul.f32 0.2, %v2828_v9 }
 0x13a   : > { %1334 = vst.msk [vmem:[%s3069_s28 + $0xcc] sm:$0xf] %vm1282_vm3, %v2629_v8  ;;  %v1050_v12 = vpack.c.bf16 %v1011_v10, %v1010_v2  ;;  %v2627_v13 = vpack.c.bf16 %v1011_v10, %v1011_v10  ;;  %v787_v14 = vpop.f32.mrf.mxu0 }
 0x13b   : > { %v1016_v16 = vsel %vm888_vm14, %v2828_v9, %v952_v11  ;;  %vm886_vm15 = vcmp.gt.f32.partialorder %v787_v14, 0.0  ;;  %v950_v17 = vmul.f32 0.2, %v787_v14 }
 0x13c   : > { %1332 = vst.msk [vmem:[%s3069_s28 + $0xc4] sm:$0xf] %vm1282_vm3, %v2627_v13  ;;  %v2632_v18 = vpack.c.bf16 %v1016_v16, %v1016_v16  ;;  %v2829_v19 = vpop.f32.mrf.mxu0  ;;  %2888 = vmatprep.mubr.msk.bf16.mxu1 %vm1348_vm8, %v1050_v12 }
 0x13d   : > { %v1014_v20 = vsel %vm886_vm15, %v787_v14, %v950_v17  ;;  %vm889_vm0 = vcmp.gt.f32.partialorder %v2829_v19, 0.0  ;;  %v953_v21 = vmul.f32 0.2, %v2829_v19  ;;  %2889 = vmatmul.mubr.msk.bf16.gmra.mxu1 %vm1348_vm8, %v1051_v15 }
 0x13e   : > { %1337 = vst.msk [vmem:[%s3069_s28 + $0xd8] sm:$0xf] %vm1282_vm3, %v2632_v18  ;;  %v2630_v22 = vpack.c.bf16 %v1014_v20, %v1014_v20  ;;  %v790_v23 = vpop.f32.mrf.mxu0 }
 0x13f   : > { %v1017_v24 = vsel %vm889_vm0, %v2829_v19, %v953_v21  ;;  %vm887_vm1 = vcmp.gt.f32.partialorder %v790_v23, 0.0  ;;  %v951_v25 = vmul.f32 0.2, %v790_v23 }
 0x140   : > { %1335 = vst.msk [vmem:[%s3069_s28 + $0xd0] sm:$0xf] %vm1282_vm3, %v2630_v22  ;;  %v2633_v26 = vpack.c.bf16 %v1017_v24, %v1017_v24  ;;  %v2832_v27 = vpop.f32.mrf.mxu0  ;;  %v1053_v33 = vpack.c.bf16 %v1017_v24, %v1016_v16 }
 0x141   : > { %v1015_v28 = vsel %vm887_vm1, %v790_v23, %v951_v25  ;;  %vm892_vm2 = vcmp.gt.f32.partialorder %v2832_v27, 0.0  ;;  %v956_v29 = vmul.f32 0.2, %v2832_v27 }
 0x142   : > { %1338 = vst.msk [vmem:[%s3069_s28 + $0xdc] sm:$0xf] %vm1282_vm3, %v2633_v26  ;;  %v1052_v30 = vpack.c.bf16 %v1015_v28, %v1014_v20  ;;  %v2631_v31 = vpack.c.bf16 %v1015_v28, %v1015_v28  ;;  %v803_v32 = vpop.f32.mrf.mxu0 }
 0x143   : > { %v1020_v34 = vsel %vm892_vm2, %v2832_v27, %v956_v29  ;;  %vm890_vm4 = vcmp.gt.f32.partialorder %v803_v32, 0.0  ;;  %v954_v35 = vmul.f32 0.2, %v803_v32 }
 0x144   : > { %1336 = vst.msk [vmem:[%s3069_s28 + $0xd4] sm:$0xf] %vm1282_vm3, %v2631_v31  ;;  %v2636_v36 = vpack.c.bf16 %v1020_v34, %v1020_v34  ;;  %v2833_v37 = vpop.f32.mrf.mxu0  ;;  %2892 = vmatprep.mubr.msk.bf16.mxu1 %vm1348_vm8, %v1052_v30 }
 0x145   : > { %v1018_v38 = vsel %vm890_vm4, %v803_v32, %v954_v35  ;;  %vm893_vm5 = vcmp.gt.f32.partialorder %v2833_v37, 0.0  ;;  %v957_v39 = vmul.f32 0.2, %v2833_v37  ;;  %2893 = vmatmul.mubr.msk.bf16.gmra.mxu1 %vm1348_vm8, %v1053_v33 }
 0x146   : > { %1341 = vst.msk [vmem:[%s3069_s28 + $0xe8] sm:$0xf] %vm1282_vm3, %v2636_v36  ;;  %v2634_v40 = vpack.c.bf16 %v1018_v38, %v1018_v38  ;;  %v806_v41 = vpop.f32.mrf.mxu0 }
 0x147   : > { %v1021_v42 = vsel %vm893_vm5, %v2833_v37, %v957_v39  ;;  %vm891_vm6 = vcmp.gt.f32.partialorder %v806_v41, 0.0  ;;  %v955_v43 = vmul.f32 0.2, %v806_v41 }
 0x148   : > { %1339 = vst.msk [vmem:[%s3069_s28 + $0xe0] sm:$0xf] %vm1282_vm3, %v2634_v40  ;;  %v2637_v44 = vpack.c.bf16 %v1021_v42, %v1021_v42  ;;  %v2836_v45 = vpop.f32.mrf.mxu0  ;;  %v1055_v51 = vpack.c.bf16 %v1021_v42, %v1020_v34 }
 0x149   : > { %v1019_v46 = vsel %vm891_vm6, %v806_v41, %v955_v43  ;;  %vm896_vm7 = vcmp.gt.f32.partialorder %v2836_v45, 0.0  ;;  %v960_v47 = vmul.f32 0.2, %v2836_v45 }
 0x14a   : > { %1342 = vst.msk [vmem:[%s3069_s28 + $0xec] sm:$0xf] %vm1282_vm3, %v2637_v44  ;;  %v1054_v48 = vpack.c.bf16 %v1019_v46, %v1018_v38  ;;  %v2635_v49 = vpack.c.bf16 %v1019_v46, %v1019_v46  ;;  %v819_v50 = vpop.f32.mrf.mxu0 }
 0x14b   : > { %v1024_v52 = vsel %vm896_vm7, %v2836_v45, %v960_v47  ;;  %vm894_vm9 = vcmp.gt.f32.partialorder %v819_v50, 0.0  ;;  %v958_v53 = vmul.f32 0.2, %v819_v50 }
 0x14c   : > { %1340 = vst.msk [vmem:[%s3069_s28 + $0xe4] sm:$0xf] %vm1282_vm3, %v2635_v49  ;;  %v2640_v54 = vpack.c.bf16 %v1024_v52, %v1024_v52  ;;  %v2837_v55 = vpop.f32.mrf.mxu0  ;;  %2896 = vmatprep.mubr.msk.bf16.mxu1 %vm1348_vm8, %v1054_v48 }
 0x14d   : > { %v1022_v56 = vsel %vm894_vm9, %v819_v50, %v958_v53  ;;  %vm897_vm10 = vcmp.gt.f32.partialorder %v2837_v55, 0.0  ;;  %v961_v57 = vmul.f32 0.2, %v2837_v55  ;;  %2897 = vmatmul.mubr.msk.bf16.gmra.mxu1 %vm1348_vm8, %v1055_v51 }
 0x14e   : > { %1345 = vst.msk [vmem:[%s3069_s28 + $0xf8] sm:$0xf] %vm1282_vm3, %v2640_v54  ;;  %v2638_v58 = vpack.c.bf16 %v1022_v56, %v1022_v56  ;;  %v822_v59 = vpop.f32.mrf.mxu0 }
 0x14f   : > { %v1025_v60 = vsel %vm897_vm10, %v2837_v55, %v961_v57  ;;  %vm895_vm11 = vcmp.gt.f32.partialorder %v822_v59, 0.0  ;;  %v959_v61 = vmul.f32 0.2, %v822_v59 }
 0x150   : > { %1343 = vst.msk [vmem:[%s3069_s28 + $0xf0] sm:$0xf] %vm1282_vm3, %v2638_v58  ;;  %v2641_v62 = vpack.c.bf16 %v1025_v60, %v1025_v60  ;;  %v1057_v2 = vpack.c.bf16 %v1025_v60, %v1024_v52 }
 0x151   : > { %v1023_v63 = vsel %vm895_vm11, %v822_v59, %v959_v61 }
 0x152   : > { %1346 = vst.msk [vmem:[%s3069_s28 + $0xfc] sm:$0xf] %vm1282_vm3, %v2641_v62  ;;  %v1056_v0 = vpack.c.bf16 %v1023_v63, %v1022_v56  ;;  %v2639_v1 = vpack.c.bf16 %v1023_v63, %v1023_v63 }
 0x154   : > { %1344 = vst.msk [vmem:[%s3069_s28 + $0xf4] sm:$0xf] %vm1282_vm3, %v2639_v1  ;;  %2900 = vmatprep.mubr.msk.bf16.mxu1 %vm1348_vm8, %v1056_v0 }
 0x155   : > { %2901 = vmatmul.mubr.msk.bf16.gmra.mxu1 %vm1348_vm8, %v1057_v2 }
 0x19d   : > { %v2842_v3 = vpop.f32.mrf.mxu1 }
 0x19e   : > { %vm1740_vm12 = vcmp.gt.f32.partialorder %v2842_v3, 0.0  ;;  %v1804_v4 = vmul.f32 0.2, %v2842_v3 }
 0x19f   : > { %v1483_v5 = vpop.f32.mrf.mxu1 }
 0x1a0   : > { %v1868_v6 = vsel %vm1740_vm12, %v2842_v3, %v1804_v4  ;;  %vm1738_vm13 = vcmp.gt.f32.partialorder %v1483_v5, 0.0  ;;  %v1802_v7 = vmul.f32 0.2, %v1483_v5 }
 0x1a1   : > { %v2644_v8 = vpack.c.bf16 %v1868_v6, %v1868_v6  ;;  %v2843_v9 = vpop.f32.mrf.mxu1 }
 0x1a2   : > { %v1866_v10 = vsel %vm1738_vm13, %v1483_v5, %v1802_v7  ;;  %vm1741_vm14 = vcmp.gt.f32.partialorder %v2843_v9, 0.0  ;;  %v1805_v11 = vmul.f32 0.2, %v2843_v9 }
 0x1a3   : > { %2188 = vst.msk [vmem:[%s3235_s5 + $0x8] sm:$0xf] %vm1282_vm3, %v2644_v8  ;;  %v2642_v12 = vpack.c.bf16 %v1866_v10, %v1866_v10  ;;  %v1486_v13 = vpop.f32.mrf.mxu1 }
 0x1a4   : > { %v1869_v14 = vsel %vm1741_vm14, %v2843_v9, %v1805_v11  ;;  %vm1739_vm8 = vcmp.gt.f32.partialorder %v1486_v13, 0.0  ;;  %v1803_v15 = vmul.f32 0.2, %v1486_v13 }
 0x1a5   : > { %2186 = vst.msk [vmem:[%s3235_s5] sm:$0xf] %vm1282_vm3, %v2642_v12  ;;  %v2645_v16 = vpack.c.bf16 %v1869_v14, %v1869_v14  ;;  %v2846_v17 = vpop.f32.mrf.mxu1 }
 0x1a6   : > { %v1867_v18 = vsel %vm1739_vm8, %v1486_v13, %v1803_v15  ;;  %vm1744_vm15 = vcmp.gt.f32.partialorder %v2846_v17, 0.0  ;;  %v1808_v19 = vmul.f32 0.2, %v2846_v17 }
 0x1a7   : > { %2189 = vst.msk [vmem:[%s3235_s5 + $0xc] sm:$0xf] %vm1282_vm3, %v2645_v16  ;;  %v2643_v20 = vpack.c.bf16 %v1867_v18, %v1867_v18  ;;  %v1499_v21 = vpop.f32.mrf.mxu1 }
 0x1a8   : > { %v1872_v22 = vsel %vm1744_vm15, %v2846_v17, %v1808_v19  ;;  %vm1742_vm0 = vcmp.gt.f32.partialorder %v1499_v21, 0.0  ;;  %v1806_v23 = vmul.f32 0.2, %v1499_v21 }
 0x1a9   : > { %2187 = vst.msk [vmem:[%s3235_s5 + $0x4] sm:$0xf] %vm1282_vm3, %v2643_v20  ;;  %v2648_v24 = vpack.c.bf16 %v1872_v22, %v1872_v22  ;;  %v2847_v25 = vpop.f32.mrf.mxu1 }
 0x1aa   : > { %v1870_v26 = vsel %vm1742_vm0, %v1499_v21, %v1806_v23  ;;  %vm1745_vm1 = vcmp.gt.f32.partialorder %v2847_v25, 0.0  ;;  %v1809_v27 = vmul.f32 0.2, %v2847_v25 }
 0x1ab   : > { %2192 = vst.msk [vmem:[%s3235_s5 + $0x18] sm:$0xf] %vm1282_vm3, %v2648_v24  ;;  %v2646_v28 = vpack.c.bf16 %v1870_v26, %v1870_v26  ;;  %v1502_v29 = vpop.f32.mrf.mxu1 }
 0x1ac   : > { %v1873_v30 = vsel %vm1745_vm1, %v2847_v25, %v1809_v27  ;;  %vm1743_vm2 = vcmp.gt.f32.partialorder %v1502_v29, 0.0  ;;  %v1807_v31 = vmul.f32 0.2, %v1502_v29 }
 0x1ad   : > { %2190 = vst.msk [vmem:[%s3235_s5 + $0x10] sm:$0xf] %vm1282_vm3, %v2646_v28  ;;  %v2649_v32 = vpack.c.bf16 %v1873_v30, %v1873_v30  ;;  %v2850_v33 = vpop.f32.mrf.mxu1 }
 0x1ae   : > { %v1871_v34 = vsel %vm1743_vm2, %v1502_v29, %v1807_v31  ;;  %vm1748_vm4 = vcmp.gt.f32.partialorder %v2850_v33, 0.0  ;;  %v1812_v35 = vmul.f32 0.2, %v2850_v33 }
 0x1af   : > { %2193 = vst.msk [vmem:[%s3235_s5 + $0x1c] sm:$0xf] %vm1282_vm3, %v2649_v32  ;;  %v2647_v36 = vpack.c.bf16 %v1871_v34, %v1871_v34  ;;  %v1515_v37 = vpop.f32.mrf.mxu1 }
 0x1b0   : > { %v1876_v38 = vsel %vm1748_vm4, %v2850_v33, %v1812_v35  ;;  %vm1746_vm5 = vcmp.gt.f32.partialorder %v1515_v37, 0.0  ;;  %v1810_v39 = vmul.f32 0.2, %v1515_v37 }
 0x1b1   : > { %2191 = vst.msk [vmem:[%s3235_s5 + $0x14] sm:$0xf] %vm1282_vm3, %v2647_v36  ;;  %v2652_v40 = vpack.c.bf16 %v1876_v38, %v1876_v38  ;;  %v2851_v41 = vpop.f32.mrf.mxu1 }
 0x1b2   : > { %v1874_v42 = vsel %vm1746_vm5, %v1515_v37, %v1810_v39  ;;  %vm1749_vm6 = vcmp.gt.f32.partialorder %v2851_v41, 0.0  ;;  %v1813_v43 = vmul.f32 0.2, %v2851_v41 }
 0x1b3   : > { %2196 = vst.msk [vmem:[%s3235_s5 + $0x28] sm:$0xf] %vm1282_vm3, %v2652_v40  ;;  %v2650_v44 = vpack.c.bf16 %v1874_v42, %v1874_v42  ;;  %v1518_v45 = vpop.f32.mrf.mxu1 }
 0x1b4   : > { %v1877_v46 = vsel %vm1749_vm6, %v2851_v41, %v1813_v43  ;;  %vm1747_vm7 = vcmp.gt.f32.partialorder %v1518_v45, 0.0  ;;  %v1811_v47 = vmul.f32 0.2, %v1518_v45 }
 0x1b5   : > { %2194 = vst.msk [vmem:[%s3235_s5 + $0x20] sm:$0xf] %vm1282_vm3, %v2650_v44  ;;  %v2653_v48 = vpack.c.bf16 %v1877_v46, %v1877_v46  ;;  %v2854_v49 = vpop.f32.mrf.mxu1 }
 0x1b6   : > { %v1875_v50 = vsel %vm1747_vm7, %v1518_v45, %v1811_v47  ;;  %vm1752_vm9 = vcmp.gt.f32.partialorder %v2854_v49, 0.0  ;;  %v1816_v51 = vmul.f32 0.2, %v2854_v49 }
 0x1b7   : > { %2197 = vst.msk [vmem:[%s3235_s5 + $0x2c] sm:$0xf] %vm1282_vm3, %v2653_v48  ;;  %v2651_v52 = vpack.c.bf16 %v1875_v50, %v1875_v50  ;;  %v1531_v53 = vpop.f32.mrf.mxu1 }
 0x1b8   : > { %v1880_v54 = vsel %vm1752_vm9, %v2854_v49, %v1816_v51  ;;  %vm1750_vm10 = vcmp.gt.f32.partialorder %v1531_v53, 0.0  ;;  %v1814_v55 = vmul.f32 0.2, %v1531_v53 }
 0x1b9   : > { %2195 = vst.msk [vmem:[%s3235_s5 + $0x24] sm:$0xf] %vm1282_vm3, %v2651_v52  ;;  %v2656_v56 = vpack.c.bf16 %v1880_v54, %v1880_v54  ;;  %v2855_v57 = vpop.f32.mrf.mxu1 }
 0x1ba   : > { %v1878_v58 = vsel %vm1750_vm10, %v1531_v53, %v1814_v55  ;;  %vm1753_vm11 = vcmp.gt.f32.partialorder %v2855_v57, 0.0  ;;  %v1817_v59 = vmul.f32 0.2, %v2855_v57 }
 0x1bb   : > { %2200 = vst.msk [vmem:[%s3235_s5 + $0x38] sm:$0xf] %vm1282_vm3, %v2656_v56  ;;  %v2654_v60 = vpack.c.bf16 %v1878_v58, %v1878_v58  ;;  %v1534_v61 = vpop.f32.mrf.mxu1 }
 0x1bc   : > { %v1881_v62 = vsel %vm1753_vm11, %v2855_v57, %v1817_v59  ;;  %vm1751_vm12 = vcmp.gt.f32.partialorder %v1534_v61, 0.0  ;;  %v1815_v63 = vmul.f32 0.2, %v1534_v61 }
 0x1bd   : > { %2198 = vst.msk [vmem:[%s3235_s5 + $0x30] sm:$0xf] %vm1282_vm3, %v2654_v60  ;;  %v2657_v0 = vpack.c.bf16 %v1881_v62, %v1881_v62  ;;  %v2858_v1 = vpop.f32.mrf.mxu1 }
 0x1be   : > { %v1879_v2 = vsel %vm1751_vm12, %v1534_v61, %v1815_v63  ;;  %vm1756_vm13 = vcmp.gt.f32.partialorder %v2858_v1, 0.0  ;;  %v1820_v3 = vmul.f32 0.2, %v2858_v1 }
 0x1bf   : > { %2201 = vst.msk [vmem:[%s3235_s5 + $0x3c] sm:$0xf] %vm1282_vm3, %v2657_v0  ;;  %v2655_v4 = vpack.c.bf16 %v1879_v2, %v1879_v2  ;;  %v1547_v5 = vpop.f32.mrf.mxu1 }
 0x1c0   : > { %v1884_v6 = vsel %vm1756_vm13, %v2858_v1, %v1820_v3  ;;  %vm1754_vm14 = vcmp.gt.f32.partialorder %v1547_v5, 0.0  ;;  %v1818_v7 = vmul.f32 0.2, %v1547_v5 }
 0x1c1   : > { %2199 = vst.msk [vmem:[%s3235_s5 + $0x34] sm:$0xf] %vm1282_vm3, %v2655_v4  ;;  %v2660_v8 = vpack.c.bf16 %v1884_v6, %v1884_v6  ;;  %v2859_v9 = vpop.f32.mrf.mxu1 }
 0x1c2   : > { %v1882_v10 = vsel %vm1754_vm14, %v1547_v5, %v1818_v7  ;;  %vm1757_vm8 = vcmp.gt.f32.partialorder %v2859_v9, 0.0  ;;  %v1821_v11 = vmul.f32 0.2, %v2859_v9 }
 0x1c3   : > { %2204 = vst.msk [vmem:[%s3235_s5 + $0x48] sm:$0xf] %vm1282_vm3, %v2660_v8  ;;  %v2658_v12 = vpack.c.bf16 %v1882_v10, %v1882_v10  ;;  %v1550_v13 = vpop.f32.mrf.mxu1 }
 0x1c4   : > { %v1885_v14 = vsel %vm1757_vm8, %v2859_v9, %v1821_v11  ;;  %vm1755_vm15 = vcmp.gt.f32.partialorder %v1550_v13, 0.0  ;;  %v1819_v15 = vmul.f32 0.2, %v1550_v13 }
 0x1c5   : > { %2202 = vst.msk [vmem:[%s3235_s5 + $0x40] sm:$0xf] %vm1282_vm3, %v2658_v12  ;;  %v2661_v16 = vpack.c.bf16 %v1885_v14, %v1885_v14  ;;  %v2862_v17 = vpop.f32.mrf.mxu1 }
 0x1c6   : > { %v1883_v18 = vsel %vm1755_vm15, %v1550_v13, %v1819_v15  ;;  %vm1760_vm0 = vcmp.gt.f32.partialorder %v2862_v17, 0.0  ;;  %v1824_v19 = vmul.f32 0.2, %v2862_v17 }
 0x1c7   : > { %2205 = vst.msk [vmem:[%s3235_s5 + $0x4c] sm:$0xf] %vm1282_vm3, %v2661_v16  ;;  %v2659_v20 = vpack.c.bf16 %v1883_v18, %v1883_v18  ;;  %v1563_v21 = vpop.f32.mrf.mxu1 }
 0x1c8   : > { %v1888_v22 = vsel %vm1760_vm0, %v2862_v17, %v1824_v19  ;;  %vm1758_vm1 = vcmp.gt.f32.partialorder %v1563_v21, 0.0  ;;  %v1822_v23 = vmul.f32 0.2, %v1563_v21 }
 0x1c9   : > { %2203 = vst.msk [vmem:[%s3235_s5 + $0x44] sm:$0xf] %vm1282_vm3, %v2659_v20  ;;  %v2664_v24 = vpack.c.bf16 %v1888_v22, %v1888_v22  ;;  %v2863_v25 = vpop.f32.mrf.mxu1 }
 0x1ca   : > { %v1886_v26 = vsel %vm1758_vm1, %v1563_v21, %v1822_v23  ;;  %vm1761_vm2 = vcmp.gt.f32.partialorder %v2863_v25, 0.0  ;;  %v1825_v27 = vmul.f32 0.2, %v2863_v25 }
 0x1cb   : > { %2208 = vst.msk [vmem:[%s3235_s5 + $0x58] sm:$0xf] %vm1282_vm3, %v2664_v24  ;;  %v2662_v28 = vpack.c.bf16 %v1886_v26, %v1886_v26  ;;  %v1566_v29 = vpop.f32.mrf.mxu1 }
 0x1cc   : > { %v1889_v30 = vsel %vm1761_vm2, %v2863_v25, %v1825_v27  ;;  %vm1759_vm4 = vcmp.gt.f32.partialorder %v1566_v29, 0.0  ;;  %v1823_v31 = vmul.f32 0.2, %v1566_v29 }
 0x1cd   : > { %2206 = vst.msk [vmem:[%s3235_s5 + $0x50] sm:$0xf] %vm1282_vm3, %v2662_v28  ;;  %v2665_v32 = vpack.c.bf16 %v1889_v30, %v1889_v30  ;;  %v2866_v33 = vpop.f32.mrf.mxu1 }
 0x1ce   : > { %v1887_v34 = vsel %vm1759_vm4, %v1566_v29, %v1823_v31  ;;  %vm1764_vm5 = vcmp.gt.f32.partialorder %v2866_v33, 0.0  ;;  %v1828_v35 = vmul.f32 0.2, %v2866_v33 }
 0x1cf   : > { %2209 = vst.msk [vmem:[%s3235_s5 + $0x5c] sm:$0xf] %vm1282_vm3, %v2665_v32  ;;  %v2663_v36 = vpack.c.bf16 %v1887_v34, %v1887_v34  ;;  %v1579_v37 = vpop.f32.mrf.mxu1 }
 0x1d0   : > { %v1892_v38 = vsel %vm1764_vm5, %v2866_v33, %v1828_v35  ;;  %vm1762_vm6 = vcmp.gt.f32.partialorder %v1579_v37, 0.0  ;;  %v1826_v39 = vmul.f32 0.2, %v1579_v37 }
 0x1d1   : > { %2207 = vst.msk [vmem:[%s3235_s5 + $0x54] sm:$0xf] %vm1282_vm3, %v2663_v36  ;;  %v2668_v40 = vpack.c.bf16 %v1892_v38, %v1892_v38  ;;  %v2867_v41 = vpop.f32.mrf.mxu1 }
 0x1d2   : > { %v1890_v42 = vsel %vm1762_vm6, %v1579_v37, %v1826_v39  ;;  %vm1765_vm7 = vcmp.gt.f32.partialorder %v2867_v41, 0.0  ;;  %v1829_v43 = vmul.f32 0.2, %v2867_v41 }
 0x1d3   : > { %2212 = vst.msk [vmem:[%s3235_s5 + $0x68] sm:$0xf] %vm1282_vm3, %v2668_v40  ;;  %v2666_v44 = vpack.c.bf16 %v1890_v42, %v1890_v42  ;;  %v1582_v45 = vpop.f32.mrf.mxu1 }
 0x1d4   : > { %v1893_v46 = vsel %vm1765_vm7, %v2867_v41, %v1829_v43  ;;  %vm1763_vm9 = vcmp.gt.f32.partialorder %v1582_v45, 0.0  ;;  %v1827_v47 = vmul.f32 0.2, %v1582_v45 }
 0x1d5   : > { %2210 = vst.msk [vmem:[%s3235_s5 + $0x60] sm:$0xf] %vm1282_vm3, %v2666_v44  ;;  %v2669_v48 = vpack.c.bf16 %v1893_v46, %v1893_v46  ;;  %v2870_v49 = vpop.f32.mrf.mxu1 }
 0x1d6   : > { %v1891_v50 = vsel %vm1763_vm9, %v1582_v45, %v1827_v47  ;;  %vm1768_vm10 = vcmp.gt.f32.partialorder %v2870_v49, 0.0  ;;  %v1832_v51 = vmul.f32 0.2, %v2870_v49 }
 0x1d7   : > { %2213 = vst.msk [vmem:[%s3235_s5 + $0x6c] sm:$0xf] %vm1282_vm3, %v2669_v48  ;;  %v2667_v52 = vpack.c.bf16 %v1891_v50, %v1891_v50  ;;  %v1595_v53 = vpop.f32.mrf.mxu1 }
 0x1d8   : > { %v1896_v54 = vsel %vm1768_vm10, %v2870_v49, %v1832_v51  ;;  %vm1766_vm11 = vcmp.gt.f32.partialorder %v1595_v53, 0.0  ;;  %v1830_v55 = vmul.f32 0.2, %v1595_v53 }
 0x1d9   : > { %2211 = vst.msk [vmem:[%s3235_s5 + $0x64] sm:$0xf] %vm1282_vm3, %v2667_v52  ;;  %v2672_v56 = vpack.c.bf16 %v1896_v54, %v1896_v54  ;;  %v2871_v57 = vpop.f32.mrf.mxu1 }
 0x1da   : > { %v1894_v58 = vsel %vm1766_vm11, %v1595_v53, %v1830_v55  ;;  %vm1769_vm12 = vcmp.gt.f32.partialorder %v2871_v57, 0.0  ;;  %v1833_v59 = vmul.f32 0.2, %v2871_v57 }
 0x1db   : > { %2216 = vst.msk [vmem:[%s3235_s5 + $0x78] sm:$0xf] %vm1282_vm3, %v2672_v56  ;;  %v2670_v60 = vpack.c.bf16 %v1894_v58, %v1894_v58  ;;  %v1598_v61 = vpop.f32.mrf.mxu1 }
 0x1dc   : > { %v1897_v62 = vsel %vm1769_vm12, %v2871_v57, %v1833_v59  ;;  %vm1767_vm13 = vcmp.gt.f32.partialorder %v1598_v61, 0.0  ;;  %v1831_v63 = vmul.f32 0.2, %v1598_v61 }
 0x1dd   : > { %2214 = vst.msk [vmem:[%s3235_s5 + $0x70] sm:$0xf] %vm1282_vm3, %v2670_v60  ;;  %v2673_v0 = vpack.c.bf16 %v1897_v62, %v1897_v62  ;;  %v2874_v1 = vpop.f32.mrf.mxu1 }
 0x1de   : > { %v1895_v2 = vsel %vm1767_vm13, %v1598_v61, %v1831_v63  ;;  %vm1772_vm14 = vcmp.gt.f32.partialorder %v2874_v1, 0.0  ;;  %v1836_v3 = vmul.f32 0.2, %v2874_v1 }
 0x1df   : > { %2217 = vst.msk [vmem:[%s3235_s5 + $0x7c] sm:$0xf] %vm1282_vm3, %v2673_v0  ;;  %v2671_v4 = vpack.c.bf16 %v1895_v2, %v1895_v2  ;;  %v1611_v5 = vpop.f32.mrf.mxu1 }
 0x1e0   : > { %v1900_v6 = vsel %vm1772_vm14, %v2874_v1, %v1836_v3  ;;  %vm1770_vm8 = vcmp.gt.f32.partialorder %v1611_v5, 0.0  ;;  %v1834_v7 = vmul.f32 0.2, %v1611_v5 }
 0x1e1   : > { %2215 = vst.msk [vmem:[%s3235_s5 + $0x74] sm:$0xf] %vm1282_vm3, %v2671_v4  ;;  %v2676_v8 = vpack.c.bf16 %v1900_v6, %v1900_v6  ;;  %v2875_v9 = vpop.f32.mrf.mxu1 }
 0x1e2   : > { %v1898_v10 = vsel %vm1770_vm8, %v1611_v5, %v1834_v7  ;;  %vm1773_vm15 = vcmp.gt.f32.partialorder %v2875_v9, 0.0  ;;  %v1837_v11 = vmul.f32 0.2, %v2875_v9 }
 0x1e3   : > { %2220 = vst.msk [vmem:[%s3235_s5 + $0x88] sm:$0xf] %vm1282_vm3, %v2676_v8  ;;  %v2674_v12 = vpack.c.bf16 %v1898_v10, %v1898_v10  ;;  %v1614_v13 = vpop.f32.mrf.mxu1 }
 0x1e4   : > { %v1901_v14 = vsel %vm1773_vm15, %v2875_v9, %v1837_v11  ;;  %vm1771_vm0 = vcmp.gt.f32.partialorder %v1614_v13, 0.0  ;;  %v1835_v15 = vmul.f32 0.2, %v1614_v13 }
 0x1e5   : > { %2218 = vst.msk [vmem:[%s3235_s5 + $0x80] sm:$0xf] %vm1282_vm3, %v2674_v12  ;;  %v2677_v16 = vpack.c.bf16 %v1901_v14, %v1901_v14  ;;  %v2878_v17 = vpop.f32.mrf.mxu1 }
 0x1e6   : > { %v1899_v18 = vsel %vm1771_vm0, %v1614_v13, %v1835_v15  ;;  %vm1776_vm1 = vcmp.gt.f32.partialorder %v2878_v17, 0.0  ;;  %v1840_v19 = vmul.f32 0.2, %v2878_v17 }
 0x1e7   : > { %2221 = vst.msk [vmem:[%s3235_s5 + $0x8c] sm:$0xf] %vm1282_vm3, %v2677_v16  ;;  %v2675_v20 = vpack.c.bf16 %v1899_v18, %v1899_v18  ;;  %v1627_v21 = vpop.f32.mrf.mxu1 }
 0x1e8   : > { %v1904_v22 = vsel %vm1776_vm1, %v2878_v17, %v1840_v19  ;;  %vm1774_vm2 = vcmp.gt.f32.partialorder %v1627_v21, 0.0  ;;  %v1838_v23 = vmul.f32 0.2, %v1627_v21 }
 0x1e9   : > { %2219 = vst.msk [vmem:[%s3235_s5 + $0x84] sm:$0xf] %vm1282_vm3, %v2675_v20  ;;  %v2680_v24 = vpack.c.bf16 %v1904_v22, %v1904_v22  ;;  %v2879_v25 = vpop.f32.mrf.mxu1 }
 0x1ea   : > { %v1902_v26 = vsel %vm1774_vm2, %v1627_v21, %v1838_v23  ;;  %vm1777_vm4 = vcmp.gt.f32.partialorder %v2879_v25, 0.0  ;;  %v1841_v27 = vmul.f32 0.2, %v2879_v25 }
 0x1eb   : > { %2224 = vst.msk [vmem:[%s3235_s5 + $0x98] sm:$0xf] %vm1282_vm3, %v2680_v24  ;;  %v2678_v28 = vpack.c.bf16 %v1902_v26, %v1902_v26  ;;  %v1630_v29 = vpop.f32.mrf.mxu1 }
 0x1ec   : > { %v1905_v30 = vsel %vm1777_vm4, %v2879_v25, %v1841_v27  ;;  %vm1775_vm5 = vcmp.gt.f32.partialorder %v1630_v29, 0.0  ;;  %v1839_v31 = vmul.f32 0.2, %v1630_v29 }
 0x1ed   : > { %2222 = vst.msk [vmem:[%s3235_s5 + $0x90] sm:$0xf] %vm1282_vm3, %v2678_v28  ;;  %v2681_v32 = vpack.c.bf16 %v1905_v30, %v1905_v30  ;;  %v2882_v33 = vpop.f32.mrf.mxu1 }
 0x1ee   : > { %v1903_v34 = vsel %vm1775_vm5, %v1630_v29, %v1839_v31  ;;  %vm1780_vm6 = vcmp.gt.f32.partialorder %v2882_v33, 0.0  ;;  %v1844_v35 = vmul.f32 0.2, %v2882_v33 }
 0x1ef   : > { %2225 = vst.msk [vmem:[%s3235_s5 + $0x9c] sm:$0xf] %vm1282_vm3, %v2681_v32  ;;  %v2679_v36 = vpack.c.bf16 %v1903_v34, %v1903_v34  ;;  %v1643_v37 = vpop.f32.mrf.mxu1 }
 0x1f0   : > { %v1908_v38 = vsel %vm1780_vm6, %v2882_v33, %v1844_v35  ;;  %vm1778_vm7 = vcmp.gt.f32.partialorder %v1643_v37, 0.0  ;;  %v1842_v39 = vmul.f32 0.2, %v1643_v37 }
 0x1f1   : > { %2223 = vst.msk [vmem:[%s3235_s5 + $0x94] sm:$0xf] %vm1282_vm3, %v2679_v36  ;;  %v2684_v40 = vpack.c.bf16 %v1908_v38, %v1908_v38  ;;  %v2883_v41 = vpop.f32.mrf.mxu1 }
 0x1f2   : > { %v1906_v42 = vsel %vm1778_vm7, %v1643_v37, %v1842_v39  ;;  %vm1781_vm9 = vcmp.gt.f32.partialorder %v2883_v41, 0.0  ;;  %v1845_v43 = vmul.f32 0.2, %v2883_v41 }
 0x1f3   : > { %2228 = vst.msk [vmem:[%s3235_s5 + $0xa8] sm:$0xf] %vm1282_vm3, %v2684_v40  ;;  %v2682_v44 = vpack.c.bf16 %v1906_v42, %v1906_v42  ;;  %v1646_v45 = vpop.f32.mrf.mxu1 }
 0x1f4   : > { %v1909_v46 = vsel %vm1781_vm9, %v2883_v41, %v1845_v43  ;;  %vm1779_vm10 = vcmp.gt.f32.partialorder %v1646_v45, 0.0  ;;  %v1843_v47 = vmul.f32 0.2, %v1646_v45 }
 0x1f5   : > { %2226 = vst.msk [vmem:[%s3235_s5 + $0xa0] sm:$0xf] %vm1282_vm3, %v2682_v44  ;;  %v2685_v48 = vpack.c.bf16 %v1909_v46, %v1909_v46  ;;  %v2886_v49 = vpop.f32.mrf.mxu1 }
 0x1f6   : > { %v1907_v50 = vsel %vm1779_vm10, %v1646_v45, %v1843_v47  ;;  %vm1784_vm11 = vcmp.gt.f32.partialorder %v2886_v49, 0.0  ;;  %v1848_v51 = vmul.f32 0.2, %v2886_v49 }
 0x1f7   : > { %2229 = vst.msk [vmem:[%s3235_s5 + $0xac] sm:$0xf] %vm1282_vm3, %v2685_v48  ;;  %v2683_v52 = vpack.c.bf16 %v1907_v50, %v1907_v50  ;;  %v1659_v53 = vpop.f32.mrf.mxu1 }
 0x1f8   : > { %v1912_v54 = vsel %vm1784_vm11, %v2886_v49, %v1848_v51  ;;  %vm1782_vm12 = vcmp.gt.f32.partialorder %v1659_v53, 0.0  ;;  %v1846_v55 = vmul.f32 0.2, %v1659_v53 }
 0x1f9   : > { %2227 = vst.msk [vmem:[%s3235_s5 + $0xa4] sm:$0xf] %vm1282_vm3, %v2683_v52  ;;  %v2688_v56 = vpack.c.bf16 %v1912_v54, %v1912_v54  ;;  %v2887_v57 = vpop.f32.mrf.mxu1 }
 0x1fa   : > { %v1910_v58 = vsel %vm1782_vm12, %v1659_v53, %v1846_v55  ;;  %vm1785_vm13 = vcmp.gt.f32.partialorder %v2887_v57, 0.0  ;;  %v1849_v59 = vmul.f32 0.2, %v2887_v57 }
 0x1fb   : > { %2232 = vst.msk [vmem:[%s3235_s5 + $0xb8] sm:$0xf] %vm1282_vm3, %v2688_v56  ;;  %v2686_v60 = vpack.c.bf16 %v1910_v58, %v1910_v58  ;;  %v1662_v61 = vpop.f32.mrf.mxu1 }
 0x1fc   : > { %v1913_v62 = vsel %vm1785_vm13, %v2887_v57, %v1849_v59  ;;  %vm1783_vm14 = vcmp.gt.f32.partialorder %v1662_v61, 0.0  ;;  %v1847_v63 = vmul.f32 0.2, %v1662_v61 }
 0x1fd   : > { %2230 = vst.msk [vmem:[%s3235_s5 + $0xb0] sm:$0xf] %vm1282_vm3, %v2686_v60  ;;  %v2689_v0 = vpack.c.bf16 %v1913_v62, %v1913_v62  ;;  %v2890_v1 = vpop.f32.mrf.mxu1 }
 0x1fe   : > { %v1911_v2 = vsel %vm1783_vm14, %v1662_v61, %v1847_v63  ;;  %vm1788_vm8 = vcmp.gt.f32.partialorder %v2890_v1, 0.0  ;;  %v1852_v3 = vmul.f32 0.2, %v2890_v1 }
 0x1ff   : > { %2233 = vst.msk [vmem:[%s3235_s5 + $0xbc] sm:$0xf] %vm1282_vm3, %v2689_v0  ;;  %v2687_v4 = vpack.c.bf16 %v1911_v2, %v1911_v2  ;;  %v1675_v5 = vpop.f32.mrf.mxu1 }
 0x200   : > { %v1916_v6 = vsel %vm1788_vm8, %v2890_v1, %v1852_v3  ;;  %vm1786_vm15 = vcmp.gt.f32.partialorder %v1675_v5, 0.0  ;;  %v1850_v7 = vmul.f32 0.2, %v1675_v5 }
 0x201   : > { %2231 = vst.msk [vmem:[%s3235_s5 + $0xb4] sm:$0xf] %vm1282_vm3, %v2687_v4  ;;  %v2692_v8 = vpack.c.bf16 %v1916_v6, %v1916_v6  ;;  %v2891_v9 = vpop.f32.mrf.mxu1 }
 0x202   : > { %v1914_v10 = vsel %vm1786_vm15, %v1675_v5, %v1850_v7  ;;  %vm1789_vm0 = vcmp.gt.f32.partialorder %v2891_v9, 0.0  ;;  %v1853_v11 = vmul.f32 0.2, %v2891_v9 }
 0x203   : > { %2236 = vst.msk [vmem:[%s3235_s5 + $0xc8] sm:$0xf] %vm1282_vm3, %v2692_v8  ;;  %v2690_v12 = vpack.c.bf16 %v1914_v10, %v1914_v10  ;;  %v1678_v13 = vpop.f32.mrf.mxu1 }
 0x204   : > { %v1917_v14 = vsel %vm1789_vm0, %v2891_v9, %v1853_v11  ;;  %vm1787_vm1 = vcmp.gt.f32.partialorder %v1678_v13, 0.0  ;;  %v1851_v15 = vmul.f32 0.2, %v1678_v13 }
 0x205   : > { %2234 = vst.msk [vmem:[%s3235_s5 + $0xc0] sm:$0xf] %vm1282_vm3, %v2690_v12  ;;  %v2693_v16 = vpack.c.bf16 %v1917_v14, %v1917_v14  ;;  %v2894_v17 = vpop.f32.mrf.mxu1 }
 0x206   : > { %v1915_v18 = vsel %vm1787_vm1, %v1678_v13, %v1851_v15  ;;  %vm1792_vm2 = vcmp.gt.f32.partialorder %v2894_v17, 0.0  ;;  %v1856_v19 = vmul.f32 0.2, %v2894_v17 }
 0x207   : > { %2237 = vst.msk [vmem:[%s3235_s5 + $0xcc] sm:$0xf] %vm1282_vm3, %v2693_v16  ;;  %v2691_v20 = vpack.c.bf16 %v1915_v18, %v1915_v18  ;;  %v1691_v21 = vpop.f32.mrf.mxu1 }
 0x208   : > { %v1920_v22 = vsel %vm1792_vm2, %v2894_v17, %v1856_v19  ;;  %vm1790_vm4 = vcmp.gt.f32.partialorder %v1691_v21, 0.0  ;;  %v1854_v23 = vmul.f32 0.2, %v1691_v21 }
 0x209   : > { %2235 = vst.msk [vmem:[%s3235_s5 + $0xc4] sm:$0xf] %vm1282_vm3, %v2691_v20  ;;  %v2696_v24 = vpack.c.bf16 %v1920_v22, %v1920_v22  ;;  %v2895_v25 = vpop.f32.mrf.mxu1 }
 0x20a   : > { %v1918_v26 = vsel %vm1790_vm4, %v1691_v21, %v1854_v23  ;;  %vm1793_vm5 = vcmp.gt.f32.partialorder %v2895_v25, 0.0  ;;  %v1857_v27 = vmul.f32 0.2, %v2895_v25 }
 0x20b   : > { %2240 = vst.msk [vmem:[%s3235_s5 + $0xd8] sm:$0xf] %vm1282_vm3, %v2696_v24  ;;  %v2694_v28 = vpack.c.bf16 %v1918_v26, %v1918_v26  ;;  %v1694_v29 = vpop.f32.mrf.mxu1 }
 0x20c   : > { %v1921_v30 = vsel %vm1793_vm5, %v2895_v25, %v1857_v27  ;;  %vm1791_vm6 = vcmp.gt.f32.partialorder %v1694_v29, 0.0  ;;  %v1855_v31 = vmul.f32 0.2, %v1694_v29 }
 0x20d   : > { %2238 = vst.msk [vmem:[%s3235_s5 + $0xd0] sm:$0xf] %vm1282_vm3, %v2694_v28  ;;  %v2697_v32 = vpack.c.bf16 %v1921_v30, %v1921_v30  ;;  %v2898_v33 = vpop.f32.mrf.mxu1 }
 0x20e   : > { %v1919_v34 = vsel %vm1791_vm6, %v1694_v29, %v1855_v31  ;;  %vm1796_vm7 = vcmp.gt.f32.partialorder %v2898_v33, 0.0  ;;  %v1860_v35 = vmul.f32 0.2, %v2898_v33 }
 0x20f   : > { %2241 = vst.msk [vmem:[%s3235_s5 + $0xdc] sm:$0xf] %vm1282_vm3, %v2697_v32  ;;  %v2695_v36 = vpack.c.bf16 %v1919_v34, %v1919_v34  ;;  %v1707_v37 = vpop.f32.mrf.mxu1 }
 0x210   : > { %v1924_v38 = vsel %vm1796_vm7, %v2898_v33, %v1860_v35  ;;  %vm1794_vm9 = vcmp.gt.f32.partialorder %v1707_v37, 0.0  ;;  %v1858_v39 = vmul.f32 0.2, %v1707_v37 }
 0x211   : > { %2239 = vst.msk [vmem:[%s3235_s5 + $0xd4] sm:$0xf] %vm1282_vm3, %v2695_v36  ;;  %v2700_v40 = vpack.c.bf16 %v1924_v38, %v1924_v38  ;;  %v2899_v41 = vpop.f32.mrf.mxu1 }
 0x212   : > { %v1922_v42 = vsel %vm1794_vm9, %v1707_v37, %v1858_v39  ;;  %vm1797_vm10 = vcmp.gt.f32.partialorder %v2899_v41, 0.0  ;;  %v1861_v43 = vmul.f32 0.2, %v2899_v41 }
 0x213   : > { %2244 = vst.msk [vmem:[%s3235_s5 + $0xe8] sm:$0xf] %vm1282_vm3, %v2700_v40  ;;  %v2698_v44 = vpack.c.bf16 %v1922_v42, %v1922_v42  ;;  %v1710_v45 = vpop.f32.mrf.mxu1 }
 0x214   : > { %v1925_v46 = vsel %vm1797_vm10, %v2899_v41, %v1861_v43  ;;  %vm1795_vm11 = vcmp.gt.f32.partialorder %v1710_v45, 0.0  ;;  %v1859_v47 = vmul.f32 0.2, %v1710_v45 }
 0x215   : > { %2242 = vst.msk [vmem:[%s3235_s5 + $0xe0] sm:$0xf] %vm1282_vm3, %v2698_v44  ;;  %v2701_v48 = vpack.c.bf16 %v1925_v46, %v1925_v46  ;;  %v2902_v49 = vpop.f32.mrf.mxu1 }
 0x216   : > { %v1923_v50 = vsel %vm1795_vm11, %v1710_v45, %v1859_v47  ;;  %vm1800_vm12 = vcmp.gt.f32.partialorder %v2902_v49, 0.0  ;;  %v1864_v51 = vmul.f32 0.2, %v2902_v49 }
 0x217   : > { %2245 = vst.msk [vmem:[%s3235_s5 + $0xec] sm:$0xf] %vm1282_vm3, %v2701_v48  ;;  %v2699_v52 = vpack.c.bf16 %v1923_v50, %v1923_v50  ;;  %v1723_v53 = vpop.f32.mrf.mxu1 }
 0x218   : > { %v1928_v54 = vsel %vm1800_vm12, %v2902_v49, %v1864_v51  ;;  %vm1798_vm13 = vcmp.gt.f32.partialorder %v1723_v53, 0.0  ;;  %v1862_v55 = vmul.f32 0.2, %v1723_v53 }
 0x219   : > { %2243 = vst.msk [vmem:[%s3235_s5 + $0xe4] sm:$0xf] %vm1282_vm3, %v2699_v52  ;;  %v2704_v56 = vpack.c.bf16 %v1928_v54, %v1928_v54  ;;  %v2903_v57 = vpop.f32.mrf.mxu1 }
 0x21a   : > { %v1926_v58 = vsel %vm1798_vm13, %v1723_v53, %v1862_v55  ;;  %vm1801_vm14 = vcmp.gt.f32.partialorder %v2903_v57, 0.0  ;;  %v1865_v59 = vmul.f32 0.2, %v2903_v57 }
 0x21b   : > { %2248 = vst.msk [vmem:[%s3235_s5 + $0xf8] sm:$0xf] %vm1282_vm3, %v2704_v56  ;;  %v2702_v60 = vpack.c.bf16 %v1926_v58, %v1926_v58  ;;  %v1726_v61 = vpop.f32.mrf.mxu1 }
 0x21c   : > { %v1929_v62 = vsel %vm1801_vm14, %v2903_v57, %v1865_v59  ;;  %vm1799_vm8 = vcmp.gt.f32.partialorder %v1726_v61, 0.0  ;;  %v1863_v63 = vmul.f32 0.2, %v1726_v61 }
 0x21d   : > { %2246 = vst.msk [vmem:[%s3235_s5 + $0xf0] sm:$0xf] %vm1282_vm3, %v2702_v60  ;;  %v2705_v0 = vpack.c.bf16 %v1929_v62, %v1929_v62 }
 0x21e   : > { %v1927_v1 = vsel %vm1799_vm8, %v1726_v61, %v1863_v63 }
 0x21f   : > { %2249 = vst.msk [vmem:[%s3235_s5 + $0xfc] sm:$0xf] %vm1282_vm3, %v2705_v0  ;;  %v2703_v2 = vpack.c.bf16 %v1927_v1, %v1927_v1 }
 0x221   : > { %2247 = vst.msk [vmem:[%s3235_s5 + $0xf4] sm:$0xf] %vm1282_vm3, %v2703_v2 }
 0x222 PF: > { %s15_s15 = sadd.s32 1, %s2952_s15  }
 0x223   : > { %p12_p4 = scmp.ge.s32.totalorder %s15_s15, 6  }
 0x225   :  { %14 = sbr.rel (!%p12_p4) target bundleno = 1 (0x1), region = 74 }

// kernel: discriminator_forward.6
= control target key start
LH: loop header
LB: loop body
LE: loop exit
PB: predicated region body
PF: predicated region fallthrough
CT: control target
= control target key end

     0   :  { %vm632_vm0 = vcmask 130048   ;;  %vm1689_vm1 = vcmask 125952   ;;  %s5631_s1 = inlined_call_operand.vmem [shape: bf16[128,16], index: 1, kind: input, shape index: {}]   ;;  %s5632_s0 = inlined_call_operand.vmem [shape: bf16[512,128], index: 0, kind: input, shape index: {}]   ;;  %s5633_s4 = inlined_call_operand.vmem [shape: bf16[16,16], index: 4, kind: input, shape index: {}]   ;;  %s5634_s2 = inlined_call_operand.vmem [shape: f32[1,16], index: 2, kind: input, shape index: {}]   ;;  %s5635_s3 = inlined_call_operand.vmem [shape: f32[1,16], index: 3, kind: input, shape index: {}]   ;;  %s5636_s5 = inlined_call_operand.vmem [shape: bf16[512,16], index: 5, kind: output, shape index: {0}]   ;;  %s5637_s6 = inlined_call_operand.vmem [shape: bf16[512,16], index: 6, kind: output, shape index: {1}]  }
   0x1   :  { %v3217_v0 = vld [vmem:[%s5631_s1 + $0x38] sm:$0xff]   ;;  %v3218_v1 = vld [vmem:[%s5631_s1 + $0x30] sm:$0xff]   ;;  %v3219_v2 = vld [vmem:[%s5631_s1 + $0x28] sm:$0xff]  }
   0x2   :  { %3071 = vmatprep.subr.bf16.mxu0 %v3217_v0  ;;  %v3220_v3 = vld [vmem:[%s5631_s1 + $0x20] sm:$0xff]   ;;  %v3221_v5 = vld [vmem:[%s5631_s1 + $0x18] sm:$0xff]   ;;  %v3222_v6 = vld [vmem:[%s5631_s1 + $0x10] sm:$0xff]  }
   0x3   :  { %3072 = vmatpush3.bf16.msra.mxu0 %v3217_v0  ;;  %v3225_v4 = vld [vmem:[%s5632_s0] sm:$0xff]   ;;  %v3223_v7 = vld [vmem:[%s5631_s1 + $0x8] sm:$0xff]   ;;  %v3227_v10 = vld [vmem:[%s5632_s0 + $0x10] sm:$0xff]  }
   0x4   :  { %3073 = vmatprep.subr.bf16.mxu0 %v3218_v1  ;;  %3087 = vmatprep.mubr.bf16.mxu0 %v3225_v4  ;;  %v3224_v8 = vld [vmem:[%s5631_s1] sm:$0xff]   ;;  %v3226_v9 = vld [vmem:[%s5632_s0 + $0x8] sm:$0xff]   ;;  %v3228_v11 = vld [vmem:[%s5632_s0 + $0x18] sm:$0xff]  }
   0x5   :  { %v3229_v12 = vld [vmem:[%s5632_s0 + $0x20] sm:$0xff]   ;;  %v3230_v13 = vld [vmem:[%s5632_s0 + $0x28] sm:$0xff]   ;;  %v3231_v14 = vld [vmem:[%s5632_s0 + $0x30] sm:$0xff]  }
   0x6   :  { %v3232_v15 = vld [vmem:[%s5632_s0 + $0x38] sm:$0xff]   ;;  %v3233_v16 = vld [vmem:[%s5632_s0 + $0x40] sm:$0xff]   ;;  %v3234_v17 = vld [vmem:[%s5632_s0 + $0x48] sm:$0xff]  }
   0x7   :  { %3074 = vmatpush3.bf16.msra.mxu0 %v3218_v1  ;;  %v3235_v18 = vld [vmem:[%s5632_s0 + $0x50] sm:$0xff]   ;;  %v3236_v19 = vld [vmem:[%s5632_s0 + $0x58] sm:$0xff]   ;;  %v3237_v20 = vld [vmem:[%s5632_s0 + $0x60] sm:$0xff]  }
   0x8   :  { %3075 = vmatprep.subr.bf16.mxu0 %v3219_v2  ;;  %v3238_v21 = vld [vmem:[%s5632_s0 + $0x68] sm:$0xff]   ;;  %v3239_v22 = vld [vmem:[%s5632_s0 + $0x70] sm:$0xff]   ;;  %v3240_v23 = vld [vmem:[%s5632_s0 + $0x78] sm:$0xff]  }
   0x9   :  { %v3241_v24 = vld [vmem:[%s5632_s0 + $0x80] sm:$0xff]   ;;  %v3242_v25 = vld [vmem:[%s5632_s0 + $0x88] sm:$0xff]   ;;  %v3243_v26 = vld [vmem:[%s5632_s0 + $0x90] sm:$0xff]  }
   0xa   :  { %v3244_v27 = vld [vmem:[%s5632_s0 + $0x98] sm:$0xff]   ;;  %v3245_v28 = vld [vmem:[%s5632_s0 + $0xa0] sm:$0xff]   ;;  %v3246_v29 = vld [vmem:[%s5632_s0 + $0xa8] sm:$0xff]  }
   0xb   :  { %3076 = vmatpush3.bf16.msra.mxu0 %v3219_v2  ;;  %v3247_v30 = vld [vmem:[%s5632_s0 + $0xb0] sm:$0xff]   ;;  %v3248_v31 = vld [vmem:[%s5632_s0 + $0xb8] sm:$0xff]   ;;  %v3249_v32 = vld [vmem:[%s5632_s0 + $0xc0] sm:$0xff]  }
   0xc   :  { %3077 = vmatprep.subr.bf16.mxu0 %v3220_v3  ;;  %v3250_v33 = vld [vmem:[%s5632_s0 + $0xc8] sm:$0xff]   ;;  %v3251_v34 = vld [vmem:[%s5632_s0 + $0xd0] sm:$0xff]   ;;  %v3252_v35 = vld [vmem:[%s5632_s0 + $0xd8] sm:$0xff]  }
   0xd   :  { %v3253_v36 = vld [vmem:[%s5632_s0 + $0xe0] sm:$0xff]   ;;  %v3254_v37 = vld [vmem:[%s5632_s0 + $0xe8] sm:$0xff]   ;;  %v3255_v38 = vld [vmem:[%s5632_s0 + $0xf0] sm:$0xff]  }
   0xe   :  { %v3256_v39 = vld [vmem:[%s5632_s0 + $0xf8] sm:$0xff]  }
   0xf   :  { %3078 = vmatpush3.bf16.msra.mxu0 %v3220_v3 }
  0x10   :  { %3079 = vmatprep.subr.bf16.mxu0 %v3221_v5 }
  0x13   :  { %3080 = vmatpush3.bf16.msra.mxu0 %v3221_v5 }
  0x14   :  { %3081 = vmatprep.subr.bf16.mxu0 %v3222_v6 }
  0x17   :  { %3082 = vmatpush3.bf16.msra.mxu0 %v3222_v6 }
  0x18   :  { %3083 = vmatprep.subr.bf16.mxu0 %v3223_v7 }
  0x1b   :  { %3084 = vmatpush3.bf16.msra.mxu0 %v3223_v7 }
  0x1c   :  { %3085 = vmatprep.subr.bf16.mxu0 %v3224_v8 }
  0x1f   :  { %3086 = vmatpush3.bf16.msra.mxu0 %v3224_v8 }
  0x22   :  { %3088 = vmatmul.mubr.bf16.vlgmr.msra.gmra.mxu0 %v3226_v9 }
  0x23   :  { %3091 = vmatprep.mubr.bf16.mxu0 %v3227_v10 }
  0x2a   :  { %3092 = vmatmul.mubr.bf16.gmra.mxu0 %v3228_v11 }
  0x2b   :  { %3095 = vmatprep.mubr.bf16.mxu0 %v3229_v12 }
  0x32   :  { %3096 = vmatmul.mubr.bf16.gmra.mxu0 %v3230_v13 }
  0x33   :  { %3099 = vmatprep.mubr.bf16.mxu0 %v3231_v14 }
  0x3a   :  { %3100 = vmatmul.mubr.bf16.gmra.mxu0 %v3232_v15 }
  0x3b   :  { %3103 = vmatprep.mubr.bf16.mxu0 %v3233_v16 }
  0x42   :  { %3104 = vmatmul.mubr.bf16.gmra.mxu0 %v3234_v17 }
  0x43   :  { %3107 = vmatprep.mubr.bf16.mxu0 %v3235_v18 }
  0x4a   :  { %3108 = vmatmul.mubr.bf16.gmra.mxu0 %v3236_v19 }
  0x4b   :  { %3111 = vmatprep.mubr.bf16.mxu0 %v3237_v20 }
  0x52   :  { %3112 = vmatmul.mubr.bf16.gmra.mxu0 %v3238_v21 }
  0x53   :  { %3115 = vmatprep.mubr.bf16.mxu0 %v3239_v22 }
  0x5a   :  { %3116 = vmatmul.mubr.bf16.gmra.mxu0 %v3240_v23 }
  0x5b   :  { %3119 = vmatprep.mubr.bf16.mxu0 %v3241_v24 }
  0x62   :  { %3120 = vmatmul.mubr.bf16.gmra.mxu0 %v3242_v25 }
  0x63   :  { %3123 = vmatprep.mubr.bf16.mxu0 %v3243_v26 }
  0x6a   :  { %3124 = vmatmul.mubr.bf16.gmra.mxu0 %v3244_v27 }
  0x6b   :  { %3127 = vmatprep.mubr.bf16.mxu0 %v3245_v28 }
  0x72   :  { %3128 = vmatmul.mubr.bf16.gmra.mxu0 %v3246_v29 }
  0x73   :  { %3131 = vmatprep.mubr.bf16.mxu0 %v3247_v30 }
  0x7a   :  { %3132 = vmatmul.mubr.bf16.gmra.mxu0 %v3248_v31 }
  0x7b   :  { %3135 = vmatprep.mubr.bf16.mxu0 %v3249_v32 }
  0x82   :  { %3136 = vmatmul.mubr.bf16.gmra.mxu0 %v3250_v33 }
  0x83   :  { %3139 = vmatprep.mubr.bf16.mxu0 %v3251_v34 }
  0x8a   :  { %3140 = vmatmul.mubr.bf16.gmra.mxu0 %v3252_v35 }
  0x8b   :  { %3143 = vmatprep.mubr.bf16.mxu0 %v3253_v36 }
  0x92   :  { %3144 = vmatmul.mubr.bf16.gmra.mxu0 %v3254_v37 }
  0x93   :  { %3147 = vmatprep.mubr.bf16.mxu0 %v3255_v38 }
  0x9a   :  { %3148 = vmatmul.mubr.bf16.gmra.mxu0 %v3256_v39 }
  0xe2   :  { %v3415_v40 = vpop.f32.mrf.mxu0 }
  0xe3   :  { %v770_v45 = vmul.f32 %v3415_v40, %v3415_v40  ;;  %v636_v51 = vsel %vm632_vm0, %v3415_v40, 0.0 }
  0xe4   :  { %v3417_v41 = vpop.f32.mrf.mxu0 }
  0xe5   :  { %v768_v43 = vmul.f32 %v3417_v41, %v3417_v41  ;;  %v633_v46 = vsel %vm632_vm0, %v3417_v41, 0.0  ;;  %v835_v58 = vsel %vm632_vm0, %v770_v45, 0.0 }
  0xe6   :  { %v3419_v42 = vpop.f32.mrf.mxu0 }
  0xe7   :  { %v832_v52 = vsel %vm632_vm0, %v768_v43, 0.0  ;;  %v771_v53 = vmul.f32 %v3419_v42, %v3419_v42  ;;  %v638_v59 = vsel %vm632_vm0, %v3419_v42, 0.0 }
  0xe8   :  { %v3423_v44 = vpop.f32.mrf.mxu0 }
  0xe9   :  { %v634_v47 = vsel %vm632_vm0, %v3423_v44, 0.0  ;;  %v769_v48 = vmul.f32 %v3423_v44, %v3423_v44  ;;  %v837_v0 = vsel %vm632_vm0, %v771_v53, 0.0 }
  0xea   :  { %v635_v49 = vadd.f32 %v634_v47, %v633_v46  ;;  %v3433_v50 = vpop.f32.mrf.mxu0 }
  0xeb   :  { %v833_v54 = vsel %vm632_vm0, %v769_v48, 0.0  ;;  %v774_v5 = vmul.f32 %v3433_v50, %v3433_v50  ;;  %v644_v12 = vsel %vm632_vm0, %v3433_v50, 0.0 }
  0xec   :  { %v637_v55 = vadd.f32 %v636_v51, %v635_v49  ;;  %v834_v56 = vadd.f32 %v833_v54, %v832_v52  ;;  %v3441_v57 = vpop.f32.mrf.mxu0 }
  0xed   :  { %v772_v60 = vmul.f32 %v3441_v57, %v3441_v57  ;;  %v640_v1 = vsel %vm632_vm0, %v3441_v57, 0.0  ;;  %v843_v18 = vsel %vm632_vm0, %v774_v5, 0.0 }
  0xee   :  { %v836_v61 = vadd.f32 %v835_v58, %v834_v56  ;;  %v639_v62 = vadd.f32 %v638_v59, %v637_v55  ;;  %v3448_v63 = vpop.f32.mrf.mxu0 }
  0xef   :  { %v839_v6 = vsel %vm632_vm0, %v772_v60, 0.0  ;;  %v775_v13 = vmul.f32 %v3448_v63, %v3448_v63  ;;  %v646_v19 = vsel %vm632_vm0, %v3448_v63, 0.0 }
  0xf0   :  { %v641_v2 = vadd.f32 %v640_v1, %v639_v62  ;;  %v838_v3 = vadd.f32 %v837_v0, %v836_v61  ;;  %v3453_v4 = vpop.f32.mrf.mxu0 }
  0xf1   :  { %v642_v7 = vsel %vm632_vm0, %v3453_v4, 0.0  ;;  %v773_v8 = vmul.f32 %v3453_v4, %v3453_v4  ;;  %v845_v24 = vsel %vm632_vm0, %v775_v13, 0.0 }
  0xf2   :  { %v840_v9 = vadd.f32 %v839_v6, %v838_v3  ;;  %v643_v10 = vadd.f32 %v642_v7, %v641_v2  ;;  %v3462_v11 = vpop.f32.mrf.mxu0 }
  0xf3   :  { %v841_v14 = vsel %vm632_vm0, %v773_v8, 0.0  ;;  %v778_v29 = vmul.f32 %v3462_v11, %v3462_v11  ;;  %v652_v36 = vsel %vm632_vm0, %v3462_v11, 0.0 }
  0xf4   :  { %v645_v15 = vadd.f32 %v644_v12, %v643_v10  ;;  %v842_v16 = vadd.f32 %v841_v14, %v840_v9  ;;  %v3469_v17 = vpop.f32.mrf.mxu0 }
  0xf5   :  { %v776_v20 = vmul.f32 %v3469_v17, %v3469_v17  ;;  %v648_v25 = vsel %vm632_vm0, %v3469_v17, 0.0  ;;  %v851_v46 = vsel %vm632_vm0, %v778_v29, 0.0 }
  0xf6   :  { %v844_v21 = vadd.f32 %v843_v18, %v842_v16  ;;  %v647_v22 = vadd.f32 %v646_v19, %v645_v15  ;;  %v3476_v23 = vpop.f32.mrf.mxu0 }
  0xf7   :  { %v847_v30 = vsel %vm632_vm0, %v776_v20, 0.0  ;;  %v779_v37 = vmul.f32 %v3476_v23, %v3476_v23  ;;  %v654_v47 = vsel %vm632_vm0, %v3476_v23, 0.0 }
  0xf8   :  { %v649_v26 = vadd.f32 %v648_v25, %v647_v22  ;;  %v846_v27 = vadd.f32 %v845_v24, %v844_v21  ;;  %v3481_v28 = vpop.f32.mrf.mxu0 }
  0xf9   :  { %v650_v31 = vsel %vm632_vm0, %v3481_v28, 0.0  ;;  %v777_v32 = vmul.f32 %v3481_v28, %v3481_v28  ;;  %v853_v53 = vsel %vm632_vm0, %v779_v37, 0.0 }
  0xfa   :  { %v848_v33 = vadd.f32 %v847_v30, %v846_v27  ;;  %v651_v34 = vadd.f32 %v650_v31, %v649_v26  ;;  %v3490_v35 = vpop.f32.mrf.mxu0 }
  0xfb   :  { %v849_v38 = vsel %vm632_vm0, %v777_v32, 0.0  ;;  %v782_v59 = vmul.f32 %v3490_v35, %v3490_v35  ;;  %v660_v3 = vsel %vm632_vm0, %v3490_v35, 0.0 }
  0xfc   :  { %v653_v39 = vadd.f32 %v652_v36, %v651_v34  ;;  %v850_v43 = vadd.f32 %v849_v38, %v848_v33  ;;  %v3497_v45 = vpop.f32.mrf.mxu0 }
  0xfd   :  { %v780_v48 = vmul.f32 %v3497_v45, %v3497_v45  ;;  %v656_v54 = vsel %vm632_vm0, %v3497_v45, 0.0  ;;  %v859_v10 = vsel %vm632_vm0, %v782_v59, 0.0 }
  0xfe   :  { %v852_v49 = vadd.f32 %v851_v46, %v850_v43  ;;  %v655_v51 = vadd.f32 %v654_v47, %v653_v39  ;;  %v3504_v52 = vpop.f32.mrf.mxu0 }
  0xff   :  { %v855_v60 = vsel %vm632_vm0, %v780_v48, 0.0  ;;  %v783_v5 = vmul.f32 %v3504_v52, %v3504_v52  ;;  %v662_v12 = vsel %vm632_vm0, %v3504_v52, 0.0 }
 0x100   :  { %v657_v55 = vadd.f32 %v656_v54, %v655_v51  ;;  %v854_v56 = vadd.f32 %v853_v53, %v852_v49  ;;  %v3509_v58 = vpop.f32.mrf.mxu0 }
 0x101   :  { %v658_v61 = vsel %vm632_vm0, %v3509_v58, 0.0  ;;  %v781_v62 = vmul.f32 %v3509_v58, %v3509_v58  ;;  %v861_v18 = vsel %vm632_vm0, %v783_v5, 0.0 }
 0x102   :  { %v856_v0 = vadd.f32 %v855_v60, %v854_v56  ;;  %v659_v1 = vadd.f32 %v658_v61, %v657_v55  ;;  %v3518_v2 = vpop.f32.mrf.mxu0 }
 0x103   :  { %v857_v6 = vsel %vm632_vm0, %v781_v62, 0.0  ;;  %v786_v24 = vmul.f32 %v3518_v2, %v3518_v2  ;;  %v668_v32 = vsel %vm632_vm0, %v3518_v2, 0.0 }
 0x104   :  { %v661_v7 = vadd.f32 %v660_v3, %v659_v1  ;;  %v858_v8 = vadd.f32 %v857_v6, %v856_v0  ;;  %v3525_v9 = vpop.f32.mrf.mxu0 }
 0x105   :  { %v784_v13 = vmul.f32 %v3525_v9, %v3525_v9  ;;  %v664_v19 = vsel %vm632_vm0, %v3525_v9, 0.0  ;;  %v867_v39 = vsel %vm632_vm0, %v786_v24, 0.0 }
 0x106   :  { %v860_v14 = vadd.f32 %v859_v10, %v858_v8  ;;  %v663_v15 = vadd.f32 %v662_v12, %v661_v7  ;;  %v3532_v16 = vpop.f32.mrf.mxu0 }
 0x107   :  { %v863_v25 = vsel %vm632_vm0, %v784_v13, 0.0  ;;  %v787_v33 = vmul.f32 %v3532_v16, %v3532_v16  ;;  %v670_v43 = vsel %vm632_vm0, %v3532_v16, 0.0 }
 0x108   :  { %v665_v20 = vadd.f32 %v664_v19, %v663_v15  ;;  %v862_v21 = vadd.f32 %v861_v18, %v860_v14  ;;  %v3537_v22 = vpop.f32.mrf.mxu0 }
 0x109   :  { %v666_v26 = vsel %vm632_vm0, %v3537_v22, 0.0  ;;  %v785_v27 = vmul.f32 %v3537_v22, %v3537_v22  ;;  %v869_v51 = vsel %vm632_vm0, %v787_v33, 0.0 }
 0x10a   :  { %v864_v29 = vadd.f32 %v863_v25, %v862_v21  ;;  %v667_v30 = vadd.f32 %v666_v26, %v665_v20  ;;  %v3546_v31 = vpop.f32.mrf.mxu0 }
 0x10b   :  { %v865_v34 = vsel %vm632_vm0, %v785_v27, 0.0  ;;  %v790_v59 = vmul.f32 %v3546_v31, %v3546_v31  ;;  %v676_v5 = vsel %vm632_vm0, %v3546_v31, 0.0 }
 0x10c   :  { %v669_v36 = vadd.f32 %v668_v32, %v667_v30  ;;  %v866_v37 = vadd.f32 %v865_v34, %v864_v29  ;;  %v3553_v38 = vpop.f32.mrf.mxu0 }
 0x10d   :  { %v788_v46 = vmul.f32 %v3553_v38, %v3553_v38  ;;  %v672_v53 = vsel %vm632_vm0, %v3553_v38, 0.0  ;;  %v875_v13 = vsel %vm632_vm0, %v790_v59, 0.0 }
 0x10e   :  { %v868_v47 = vadd.f32 %v867_v39, %v866_v37  ;;  %v671_v48 = vadd.f32 %v670_v43, %v669_v36  ;;  %v3560_v49 = vpop.f32.mrf.mxu0 }
 0x10f   :  { %v871_v60 = vsel %vm632_vm0, %v788_v46, 0.0  ;;  %v791_v6 = vmul.f32 %v3560_v49, %v3560_v49  ;;  %v678_v14 = vsel %vm632_vm0, %v3560_v49, 0.0 }
 0x110   :  { %v673_v54 = vadd.f32 %v672_v53, %v671_v48  ;;  %v870_v55 = vadd.f32 %v869_v51, %v868_v47  ;;  %v3565_v56 = vpop.f32.mrf.mxu0 }
 0x111   :  { %v674_v61 = vsel %vm632_vm0, %v3565_v56, 0.0  ;;  %v789_v62 = vmul.f32 %v3565_v56, %v3565_v56  ;;  %v877_v21 = vsel %vm632_vm0, %v791_v6, 0.0 }
 0x112   :  { %v872_v0 = vadd.f32 %v871_v60, %v870_v55  ;;  %v675_v1 = vadd.f32 %v674_v61, %v673_v54  ;;  %v3574_v3 = vpop.f32.mrf.mxu0 }
 0x113   :  { %v873_v7 = vsel %vm632_vm0, %v789_v62, 0.0  ;;  %v794_v29 = vmul.f32 %v3574_v3, %v3574_v3  ;;  %v684_v39 = vsel %vm632_vm0, %v3574_v3, 0.0 }
 0x114   :  { %v677_v8 = vadd.f32 %v676_v5, %v675_v1  ;;  %v874_v10 = vadd.f32 %v873_v7, %v872_v0  ;;  %v3581_v12 = vpop.f32.mrf.mxu0 }
 0x115   :  { %v792_v15 = vmul.f32 %v3581_v12, %v3581_v12  ;;  %v680_v24 = vsel %vm632_vm0, %v3581_v12, 0.0  ;;  %v883_v53 = vsel %vm632_vm0, %v794_v29, 0.0 }
 0x116   :  { %v876_v18 = vadd.f32 %v875_v13, %v874_v10  ;;  %v679_v19 = vadd.f32 %v678_v14, %v677_v8  ;;  %v3588_v20 = vpop.f32.mrf.mxu0 }
 0x117   :  { %5688 = vst [vmem:[#allocation2_spill] sm:$0xff] %v3588_v20  ;;  %v879_v30 = vsel %vm632_vm0, %v792_v15, 0.0  ;;  %v795_v43 = vmul.f32 %v3588_v20, %v3588_v20  ;;  %v686_v54 = vsel %vm632_vm0, %v3588_v20, 0.0 }
 0x118   :  { %v681_v25 = vadd.f32 %v680_v24, %v679_v19  ;;  %v878_v26 = vadd.f32 %v877_v21, %v876_v18  ;;  %v3593_v27 = vpop.f32.mrf.mxu0 }
 0x119   :  { %v682_v32 = vsel %vm632_vm0, %v3593_v27, 0.0  ;;  %v793_v33 = vmul.f32 %v3593_v27, %v3593_v27  ;;  %v885_v62 = vsel %vm632_vm0, %v795_v43, 0.0 }
 0x11a   :  { %v880_v34 = vadd.f32 %v879_v30, %v878_v26  ;;  %v683_v36 = vadd.f32 %v682_v32, %v681_v25  ;;  %v3602_v37 = vpop.f32.mrf.mxu0 }
 0x11b   :  { %5689 = vst [vmem:[#allocation3_spill] sm:$0xff] %v3602_v37  ;;  %v881_v46 = vsel %vm632_vm0, %v793_v33, 0.0  ;;  %v798_v7 = vmul.f32 %v3602_v37, %v3602_v37  ;;  %v692_v19 = vsel %vm632_vm0, %v3602_v37, 0.0 }
 0x11c   :  { %v685_v47 = vadd.f32 %v684_v39, %v683_v36  ;;  %v882_v48 = vadd.f32 %v881_v46, %v880_v34  ;;  %v3609_v51 = vpop.f32.mrf.mxu0 }
 0x11d   :  { %5690 = vst [vmem:[#allocation4_spill] sm:$0xff] %v3609_v51  ;;  %v796_v55 = vmul.f32 %v3609_v51, %v3609_v51  ;;  %v688_v0 = vsel %vm632_vm0, %v3609_v51, 0.0  ;;  %v891_v30 = vsel %vm632_vm0, %v798_v7, 0.0 }
 0x11e   :  { %v884_v59 = vadd.f32 %v883_v53, %v882_v48  ;;  %v687_v60 = vadd.f32 %v686_v54, %v685_v47  ;;  %v3616_v61 = vpop.f32.mrf.mxu0 }
 0x11f   :  { %5691 = vst [vmem:[#allocation5_spill] sm:$0xff] %v3616_v61  ;;  %v887_v8 = vsel %vm632_vm0, %v796_v55, 0.0  ;;  %v799_v21 = vmul.f32 %v3616_v61, %v3616_v61  ;;  %v694_v32 = vsel %vm632_vm0, %v3616_v61, 0.0 }
 0x120   :  { %v689_v1 = vadd.f32 %v688_v0, %v687_v60  ;;  %v886_v5 = vadd.f32 %v885_v62, %v884_v59  ;;  %v3621_v6 = vpop.f32.mrf.mxu0 }
 0x121   :  { %5692 = vst [vmem:[#allocation6_spill] sm:$0xff] %v3621_v6  ;;  %v690_v10 = vsel %vm632_vm0, %v3621_v6, 0.0  ;;  %v797_v13 = vmul.f32 %v3621_v6, %v3621_v6  ;;  %v893_v43 = vsel %vm632_vm0, %v799_v21, 0.0 }
 0x122   :  { %v888_v14 = vadd.f32 %v887_v8, %v886_v5  ;;  %v691_v15 = vadd.f32 %v690_v10, %v689_v1  ;;  %v3630_v18 = vpop.f32.mrf.mxu0 }
 0x123   :  { %5693 = vst [vmem:[#allocation7_spill] sm:$0xff] %v3630_v18  ;;  %v889_v24 = vsel %vm632_vm0, %v797_v13, 0.0  ;;  %v802_v54 = vmul.f32 %v3630_v18, %v3630_v18  ;;  %v700_v5 = vsel %vm632_vm0, %v3630_v18, 0.0 }
 0x124   :  { %v693_v25 = vadd.f32 %v692_v19, %v691_v15  ;;  %v890_v26 = vadd.f32 %v889_v24, %v888_v14  ;;  %v3637_v29 = vpop.f32.mrf.mxu0 }
 0x125   :  { %5694 = vst [vmem:[#allocation8_spill] sm:$0xff] %v3637_v29  ;;  %v800_v33 = vmul.f32 %v3637_v29, %v3637_v29  ;;  %v696_v46 = vsel %vm632_vm0, %v3637_v29, 0.0  ;;  %v899_v15 = vsel %vm632_vm0, %v802_v54, 0.0 }
 0x126   :  { %v892_v34 = vadd.f32 %v891_v30, %v890_v26  ;;  %v695_v36 = vadd.f32 %v694_v32, %v693_v25  ;;  %v3644_v39 = vpop.f32.mrf.mxu0 }
 0x127   :  { %5695 = vst [vmem:[#allocation9_spill] sm:$0xff] %v3644_v39  ;;  %v895_v55 = vsel %vm632_vm0, %v800_v33, 0.0  ;;  %v803_v7 = vmul.f32 %v3644_v39, %v3644_v39  ;;  %v702_v19 = vsel %vm632_vm0, %v3644_v39, 0.0 }
 0x128   :  { %v697_v47 = vadd.f32 %v696_v46, %v695_v36  ;;  %v894_v48 = vadd.f32 %v893_v43, %v892_v34  ;;  %v3649_v53 = vpop.f32.mrf.mxu0 }
 0x129   :  { %5696 = vst [vmem:[#allocation10_spill] sm:$0xff] %v3649_v53  ;;  %v698_v59 = vsel %vm632_vm0, %v3649_v53, 0.0  ;;  %v801_v60 = vmul.f32 %v3649_v53, %v3649_v53  ;;  %v901_v30 = vsel %vm632_vm0, %v803_v7, 0.0 }
 0x12a   :  { %v896_v62 = vadd.f32 %v895_v55, %v894_v48  ;;  %v699_v0 = vadd.f32 %v698_v59, %v697_v47  ;;  %v3658_v1 = vpop.f32.mrf.mxu0 }
 0x12b   :  { %5697 = vst [vmem:[#allocation11_spill] sm:$0xff] %v3658_v1  ;;  %v897_v8 = vsel %vm632_vm0, %v801_v60, 0.0  ;;  %v806_v43 = vmul.f32 %v3658_v1, %v3658_v1  ;;  %v708_v60 = vsel %vm632_vm0, %v3658_v1, 0.0 }
 0x12c   :  { %v701_v10 = vadd.f32 %v700_v5, %v699_v0  ;;  %v898_v13 = vadd.f32 %v897_v8, %v896_v62  ;;  %v3665_v14 = vpop.f32.mrf.mxu0 }
 0x12d   :  { %5698 = vst [vmem:[#allocation12_spill] sm:$0xff] %v3665_v14  ;;  %v804_v21 = vmul.f32 %v3665_v14, %v3665_v14  ;;  %v704_v32 = vsel %vm632_vm0, %v3665_v14, 0.0 }
 0x12e   :  { %v900_v24 = vadd.f32 %v899_v15, %v898_v13  ;;  %v703_v25 = vadd.f32 %v702_v19, %v701_v10  ;;  %v3672_v26 = vpop.f32.mrf.mxu0  ;;  %v907_v10 = vsel %vm632_vm0, %v806_v43, 0.0 }
 0x12f   :  { %5699 = vst [vmem:[#allocation13_spill] sm:$0xff] %v3672_v26  ;;  %v903_v46 = vsel %vm632_vm0, %v804_v21, 0.0  ;;  %v807_v62 = vmul.f32 %v3672_v26, %v3672_v26  ;;  %v710_v13 = vsel %vm632_vm0, %v3672_v26, 0.0 }
 0x130   :  { %v705_v33 = vadd.f32 %v704_v32, %v703_v25  ;;  %v902_v34 = vadd.f32 %v901_v30, %v900_v24  ;;  %v3677_v36 = vpop.f32.mrf.mxu0 }
 0x131   :  { %5700 = vst [vmem:[#allocation14_spill] sm:$0xff] %v3677_v36  ;;  %v706_v47 = vsel %vm632_vm0, %v3677_v36, 0.0  ;;  %v805_v48 = vmul.f32 %v3677_v36, %v3677_v36  ;;  %v909_v25 = vsel %vm632_vm0, %v807_v62, 0.0 }
 0x132   :  { %v904_v54 = vadd.f32 %v903_v46, %v902_v34  ;;  %v707_v55 = vadd.f32 %v706_v47, %v705_v33  ;;  %v3686_v59 = vpop.f32.mrf.mxu0 }
 0x133   :  { %5701 = vst [vmem:[#allocation15_spill] sm:$0xff] %v3686_v59  ;;  %v905_v0 = vsel %vm632_vm0, %v805_v48, 0.0  ;;  %v810_v43 = vmul.f32 %v3686_v59, %v3686_v59  ;;  %v716_v62 = vsel %vm632_vm0, %v3686_v59, 0.0 }
 0x134   :  { %v709_v5 = vadd.f32 %v708_v60, %v707_v55  ;;  %v906_v7 = vadd.f32 %v905_v0, %v904_v54  ;;  %v3693_v8 = vpop.f32.mrf.mxu0 }
 0x135   :  { %5702 = vst [vmem:[#allocation16_spill] sm:$0xff] %v3693_v8  ;;  %v808_v15 = vmul.f32 %v3693_v8, %v3693_v8  ;;  %v712_v30 = vsel %vm632_vm0, %v3693_v8, 0.0 }
 0x136   :  { %v908_v19 = vadd.f32 %v907_v10, %v906_v7  ;;  %v711_v21 = vadd.f32 %v710_v13, %v709_v5  ;;  %v3700_v24 = vpop.f32.mrf.mxu0  ;;  %v3257_v7 = vld [vmem:[%s5633_s4] sm:$0xff]  }
 0x137   :  { %5703 = vst [vmem:[#allocation17_spill] sm:$0xff] %v3700_v24  ;;  %v911_v46 = vsel %vm632_vm0, %v808_v15, 0.0  ;;  %v811_v0 = vmul.f32 %v3700_v24, %v3700_v24  ;;  %3151 = vmatprep.subr.bf16.mxu1 %v3257_v7 }
 0x138   :  { %v713_v32 = vadd.f32 %v712_v30, %v711_v21  ;;  %v910_v33 = vadd.f32 %v909_v25, %v908_v19  ;;  %v3705_v34 = vpop.f32.mrf.mxu0  ;;  %v915_v19 = vsel %vm632_vm0, %v810_v43, 0.0  ;;  %v718_v21 = vsel %vm632_vm0, %v3700_v24, 0.0  ;;  %3152 = vmatpush3.bf16.msra.mxu1 %v3257_v7 }
 0x139   :  { %5704 = vst [vmem:[#allocation18_spill] sm:$0xff] %v3705_v34  ;;  %v714_v47 = vsel %vm632_vm0, %v3705_v34, 0.0  ;;  %v809_v48 = vmul.f32 %v3705_v34, %v3705_v34 }
 0x13a   :  { %v912_v54 = vadd.f32 %v911_v46, %v910_v33  ;;  %v715_v55 = vadd.f32 %v714_v47, %v713_v32  ;;  %v3714_v60 = vpop.f32.mrf.mxu0  ;;  %v917_v46 = vsel %vm632_vm0, %v811_v0, 0.0 }
 0x13b   :  { %5705 = vst [vmem:[#allocation19_spill] sm:$0xff] %v3714_v60  ;;  %v913_v5 = vsel %vm632_vm0, %v809_v48, 0.0 }
 0x13c   :  { %v717_v10 = vadd.f32 %v716_v62, %v715_v55  ;;  %v914_v13 = vadd.f32 %v913_v5, %v912_v54  ;;  %v3724_v15 = vpop.f32.mrf.mxu0  ;;  %v814_v55 = vmul.f32 %v3714_v60, %v3714_v60 }
 0x13d   :  { %5706 = vst [vmem:[#allocation20_spill] sm:$0xff] %v3724_v15  ;;  %v812_v25 = vmul.f32 %v3724_v15, %v3724_v15  ;;  %v720_v47 = vsel %vm632_vm0, %v3724_v15, 0.0 }
 0x13e   :  { %v916_v30 = vadd.f32 %v915_v19, %v914_v13  ;;  %v719_v32 = vadd.f32 %v718_v21, %v717_v10  ;;  %v3731_v33 = vpop.f32.mrf.mxu0  ;;  %v724_v19 = vsel %vm632_vm0, %v3714_v60, 0.0 }
 0x13f   :  { %5707 = vst [vmem:[#allocation21_spill] sm:$0xff] %v3731_v33  ;;  %v919_v62 = vsel %vm632_vm0, %v812_v25, 0.0  ;;  %v815_v21 = vmul.f32 %v3731_v33, %v3731_v33 }
 0x140   :  { %v721_v48 = vadd.f32 %v720_v47, %v719_v32  ;;  %v918_v54 = vadd.f32 %v917_v46, %v916_v30  ;;  %v3736_v43 = vpop.f32.mrf.mxu0  ;;  %v923_v47 = vsel %vm632_vm0, %v814_v55, 0.0 }
 0x141   :  { %5708 = vst [vmem:[#allocation22_spill] sm:$0xff] %v3736_v43  ;;  %v722_v5 = vsel %vm632_vm0, %v3736_v43, 0.0  ;;  %v813_v7 = vmul.f32 %v3736_v43, %v3736_v43  ;;  %v925_v43 = vsel %vm632_vm0, %v815_v21, 0.0 }
 0x142   :  { %v920_v10 = vadd.f32 %v919_v62, %v918_v54  ;;  %v723_v0 = vadd.f32 %v722_v5, %v721_v48  ;;  %v3745_v13 = vpop.f32.mrf.mxu0  ;;  %v726_v54 = vsel %vm632_vm0, %v3731_v33, 0.0 }
 0x143   :  { %5709 = vst [vmem:[#allocation23_spill] sm:$0xff] %v3745_v13  ;;  %v921_v30 = vsel %vm632_vm0, %v813_v7, 0.0  ;;  %v818_v55 = vmul.f32 %v3745_v13, %v3745_v13 }
 0x144   :  { %v725_v32 = vadd.f32 %v724_v19, %v723_v0  ;;  %v922_v25 = vadd.f32 %v921_v30, %v920_v10  ;;  %v3752_v46 = vpop.f32.mrf.mxu0 }
 0x145   :  { %v816_v48 = vmul.f32 %v3752_v46, %v3752_v46  ;;  %v728_v7 = vsel %vm632_vm0, %v3752_v46, 0.0  ;;  %v931_v15 = vsel %vm632_vm0, %v818_v55, 0.0 }
 0x146   :  { %v924_v62 = vadd.f32 %v923_v47, %v922_v25  ;;  %v727_v5 = vadd.f32 %v726_v54, %v725_v32  ;;  %v3759_v60 = vpop.f32.mrf.mxu0 }
 0x147   :  { %v927_v30 = vsel %vm632_vm0, %v816_v48, 0.0 }
 0x148   :  { %v729_v10 = vadd.f32 %v728_v7, %v727_v5  ;;  %v926_v0 = vadd.f32 %v925_v43, %v924_v62  ;;  %v3764_v19 = vpop.f32.mrf.mxu0  ;;  %v732_v43 = vsel %vm632_vm0, %v3745_v13, 0.0  ;;  %v819_v62 = vmul.f32 %v3759_v60, %v3759_v60 }
 0x149   :  { %v730_v25 = vsel %vm632_vm0, %v3764_v19, 0.0  ;;  %v817_v32 = vmul.f32 %v3764_v19, %v3764_v19 }
 0x14a   :  { %v928_v47 = vadd.f32 %v927_v30, %v926_v0  ;;  %v731_v21 = vadd.f32 %v730_v25, %v729_v10  ;;  %v3773_v54 = vpop.f32.mrf.mxu0  ;;  %v734_v0 = vsel %vm632_vm0, %v3759_v60, 0.0  ;;  %v933_v24 = vsel %vm632_vm0, %v819_v62, 0.0 }
 0x14b   :  { %v929_v5 = vsel %vm632_vm0, %v817_v32, 0.0  ;;  %v822_v55 = vmul.f32 %v3773_v54, %v3773_v54 }
 0x14c   :  { %v733_v7 = vadd.f32 %v732_v43, %v731_v21  ;;  %v930_v48 = vadd.f32 %v929_v5, %v928_v47  ;;  %v3780_v33 = vpop.f32.mrf.mxu0 }
 0x14d   :  { %v820_v10 = vmul.f32 %v3780_v33, %v3780_v33  ;;  %v736_v32 = vsel %vm632_vm0, %v3780_v33, 0.0  ;;  %v939_v34 = vsel %vm632_vm0, %v822_v55, 0.0 }
 0x14e   :  { %v932_v30 = vadd.f32 %v931_v15, %v930_v48  ;;  %v735_v25 = vadd.f32 %v734_v0, %v733_v7  ;;  %v3787_v13 = vpop.f32.mrf.mxu0 }
 0x14f   :  { %v935_v5 = vsel %vm632_vm0, %v820_v10, 0.0 }
 0x150   :  { %v737_v47 = vadd.f32 %v736_v32, %v735_v25  ;;  %v934_v21 = vadd.f32 %v933_v24, %v932_v30  ;;  %v3792_v43 = vpop.f32.mrf.mxu0  ;;  %v740_v24 = vsel %vm632_vm0, %v3773_v54, 0.0  ;;  %v823_v30 = vmul.f32 %v3787_v13, %v3787_v13 }
 0x151   :  { %v738_v15 = vsel %vm632_vm0, %v3792_v43, 0.0  ;;  %v821_v7 = vmul.f32 %v3792_v43, %v3792_v43 }
 0x152   :  { %v936_v48 = vadd.f32 %v935_v5, %v934_v21  ;;  %v739_v62 = vadd.f32 %v738_v15, %v737_v47  ;;  %v3801_v0 = vpop.f32.mrf.mxu0  ;;  %v742_v21 = vsel %vm632_vm0, %v3787_v13, 0.0  ;;  %v941_v26 = vsel %vm632_vm0, %v823_v30, 0.0 }
 0x153   :  { %5710 = vst [vmem:[#allocation24_spill] sm:$0xff] %v3801_v0  ;;  %v937_v25 = vsel %vm632_vm0, %v821_v7, 0.0  ;;  %v826_v55 = vmul.f32 %v3801_v0, %v3801_v0 }
 0x154   :  { %v741_v32 = vadd.f32 %v740_v24, %v739_v62  ;;  %v938_v10 = vadd.f32 %v937_v25, %v936_v48  ;;  %v3808_v59 = vpop.f32.mrf.mxu0 }
 0x155   :  { %5711 = vst [vmem:[#allocation25_spill] sm:$0xff] %v3808_v59  ;;  %v824_v47 = vmul.f32 %v3808_v59, %v3808_v59  ;;  %v744_v7 = vsel %vm632_vm0, %v3808_v59, 0.0  ;;  %v947_v36 = vsel %vm632_vm0, %v826_v55, 0.0 }
 0x156   :  { %v940_v5 = vadd.f32 %v939_v34, %v938_v10  ;;  %v743_v15 = vadd.f32 %v742_v21, %v741_v32  ;;  %v3815_v8 = vpop.f32.mrf.mxu0 }
 0x157   :  { %5712 = vst [vmem:[#allocation26_spill] sm:$0xff] %v3815_v8  ;;  %v943_v25 = vsel %vm632_vm0, %v824_v47, 0.0 }
 0x158   :  { %v745_v48 = vadd.f32 %v744_v7, %v743_v15  ;;  %v942_v62 = vadd.f32 %v941_v26, %v940_v5  ;;  %v3820_v24 = vpop.f32.mrf.mxu0  ;;  %v748_v26 = vsel %vm632_vm0, %v3801_v0, 0.0  ;;  %v827_v5 = vmul.f32 %v3815_v8, %v3815_v8 }
 0x159   :  { %5713 = vst [vmem:[#allocation27_spill] sm:$0xff] %v3820_v24  ;;  %v746_v34 = vsel %vm632_vm0, %v3820_v24, 0.0  ;;  %v825_v32 = vmul.f32 %v3820_v24, %v3820_v24 }
 0x15a   :  { %v944_v10 = vadd.f32 %v943_v25, %v942_v62  ;;  %v747_v30 = vadd.f32 %v746_v34, %v745_v48  ;;  %v3829_v21 = vpop.f32.mrf.mxu0  ;;  %v750_v62 = vsel %vm632_vm0, %v3815_v8, 0.0  ;;  %v949_v39 = vsel %vm632_vm0, %v827_v5, 0.0 }
 0x15b   :  { %5714 = vst [vmem:[#allocation28_spill] sm:$0xff] %v3829_v21  ;;  %v945_v15 = vsel %vm632_vm0, %v825_v32, 0.0  ;;  %v830_v55 = vmul.f32 %v3829_v21, %v3829_v21 }
 0x15c   :  { %v749_v7 = vadd.f32 %v748_v26, %v747_v30  ;;  %v946_v47 = vadd.f32 %v945_v15, %v944_v10  ;;  %v3836_v1 = vpop.f32.mrf.mxu0 }
 0x15d   :  { %5715 = vst [vmem:[#allocation29_spill] sm:$0xff] %v3836_v1  ;;  %v828_v48 = vmul.f32 %v3836_v1, %v3836_v1  ;;  %v752_v32 = vsel %vm632_vm0, %v3836_v1, 0.0 }
 0x15e   :  { %v948_v25 = vadd.f32 %v947_v36, %v946_v47  ;;  %v751_v34 = vadd.f32 %v750_v62, %v749_v7  ;;  %v3843_v14 = vpop.f32.mrf.mxu0  ;;  %v756_v62 = vsel %vm632_vm0, %v3829_v21, 0.0  ;;  %v5739_v21 = vld [vmem:[#allocation19_spill] sm:$0xff] }
 0x15f   :  { %5716 = vst [vmem:[#allocation30_spill] sm:$0xff] %v3843_v14  ;;  %v951_v15 = vsel %vm632_vm0, %v828_v48, 0.0  ;;  %v955_v48 = vsel %vm632_vm0, %v830_v55, 0.0  ;;  %v758_v18 = vsel %vm632_vm0, %v3843_v14, 0.0 }
 0x160   :  { %v753_v10 = vadd.f32 %v752_v32, %v751_v34  ;;  %v950_v30 = vadd.f32 %v949_v39, %v948_v25  ;;  %v3848_v26 = vpop.f32.mrf.mxu0  ;;  %v831_v39 = vmul.f32 %v3843_v14, %v3843_v14 }
 0x161   :  { %v754_v36 = vsel %vm632_vm0, %v3848_v26, 0.0  ;;  %v829_v7 = vmul.f32 %v3848_v26, %v3848_v26 }
 0x162   :  { %v952_v47 = vadd.f32 %v951_v15, %v950_v30  ;;  %v755_v5 = vadd.f32 %v754_v36, %v753_v10  ;;  %v957_v30 = vsel %vm632_vm0, %v831_v39, 0.0 }
 0x163   :  { %v953_v25 = vsel %vm632_vm0, %v829_v7, 0.0 }
 0x164   :  { %v757_v34 = vadd.f32 %v756_v62, %v755_v5  ;;  %v954_v32 = vadd.f32 %v953_v25, %v952_v47 }
 0x166   :  { %v759_v53 = vadd.f32 %v758_v18, %v757_v34  ;;  %v956_v29 = vadd.f32 %v955_v48, %v954_v32 }
 0x168   :  { %v760_v10 = vrot.slane %v759_v53, 4  ;;  %v958_v15 = vadd.f32 %v957_v30, %v956_v29 }
 0x16a   :  { %v761_v36 = vadd.f32 %v760_v10, %v759_v53  ;;  %v959_v61 = vrot.slane %v958_v15, 4 }
 0x16c   :  { %v762_v37 = vrot.slane %v761_v36, 2  ;;  %v960_v6 = vadd.f32 %v959_v61, %v958_v15 }
 0x16e   :  { %v763_v51 = vadd.f32 %v762_v37, %v761_v36  ;;  %v961_v20 = vrot.slane %v960_v6, 2 }
 0x170   :  { %v764_v7 = vrot.slane %v763_v51, 1  ;;  %v962_v5 = vadd.f32 %v961_v20, %v960_v6 }
 0x172   :  { %v765_v47 = vadd.f32 %v764_v7, %v763_v51  ;;  %v963_v62 = vrot.slane %v962_v5, 1 }
 0x174   :  { %v3866_v55 = vmul.f32 0.001953125, %v765_v47  ;;  %v964_v25 = vadd.f32 %v963_v62, %v962_v5  ;;  %v5719_v47 = vld [vmem:[#allocation4_spill] sm:$0xff]  ;;  %v5720_v62 = vld [vmem:[#allocation6_spill] sm:$0xff] }
 0x175   :  { %v5724_v5 = vld [vmem:[#allocation10_spill] sm:$0xff] }
 0x176   :  { %v965_v14 = vmul.f32 0.001953125, %v964_v25  ;;  %v966_v18 = vmul.f32 %v3866_v55, %v3866_v55  ;;  %v994_v25 = vsub.f32 %v3593_v27, %v3866_v55  ;;  %v997_v36 = vsub.f32 %v5719_v47, %v3866_v55  ;;  %v5721_v27 = vld [vmem:[#allocation3_spill] sm:$0xff]  ;;  %v5726_v47 = vld [vmem:[#allocation9_spill] sm:$0xff] }
 0x177   :  { %v998_v15 = vsub.f32 %v5720_v62, %v3866_v55  ;;  %v999_v10 = vsub.f32 %v5721_v27, %v3866_v55  ;;  %v1002_v32 = vsub.f32 %v5724_v5, %v3866_v55  ;;  %v1004_v6 = vsub.f32 %v5726_v47, %v3866_v55  ;;  %v5727_v62 = vld [vmem:[#allocation12_spill] sm:$0xff]  ;;  %v5728_v27 = vld [vmem:[#allocation14_spill] sm:$0xff] }
 0x178   :  { %v967_v53 = vsub.f32 %v965_v14, %v966_v18  ;;  %v995_v18 = vsub.f32 %v3574_v3, %v3866_v55  ;;  %v5722_v3 = vld [vmem:[#allocation5_spill] sm:$0xff]  ;;  %v1005_v61 = vsub.f32 %v5727_v62, %v3866_v55  ;;  %v1006_v51 = vsub.f32 %v5728_v27, %v3866_v55  ;;  %v3983_v5 = vld [vmem:[%s5634_s2] ss:$0 sm:$0xff]  ;;  %v5731_v47 = vld [vmem:[#allocation16_spill] sm:$0xff] }
 0x179   :  { %v1000_v30 = vsub.f32 %v5722_v3, %v3866_v55  ;;  %v5729_v3 = vld [vmem:[#allocation11_spill] sm:$0xff]  ;;  %v1015_v27 = vsub.f32 %v5739_v21, %v3866_v55  ;;  %v5743_v59 = vsub.f32 %v3423_v44, %v3866_v55  ;;  %v5744_v21 = vsub.f32 %v3415_v40, %v3866_v55 }
 0x17a   :  { %v968_v39 = vmax.f32 %v967_v53, 0.0  ;;  %v5723_v53 = vld [vmem:[#allocation8_spill] sm:$0xff]  ;;  %v1007_v20 = vsub.f32 %v5729_v3, %v3866_v55  ;;  %v5734_v3 = vsub.f32 %v3848_v26, %v3866_v55  ;;  %v5740_v26 = vld [vmem:[#allocation21_spill] sm:$0xff]  ;;  %v5741_v62 = vld [vmem:[#allocation23_spill] sm:$0xff] }
 0x17b   :  { %v1001_v48 = vsub.f32 %v5723_v53, %v3866_v55  ;;  %v5730_v53 = vld [vmem:[#allocation13_spill] sm:$0xff]  ;;  %v1019_v0 = vsub.f32 %v5741_v62, %v3866_v55 }
 0x17c   :  { %v1033_v34 = vadd.f32 1e-05, %v968_v39  ;;  %v4006_v39 = vld [vmem:[%s5635_s3] ss:$0 sm:$0xff] }
 0x17e   :  { %3258 = vrsqrt.f32 %v1033_v34  ;;  %v5718_v34 = vld [vmem:[#allocation2_spill] sm:$0xff] }
 0x17f   :  { %v996_v7 = vsub.f32 %v5718_v34, %v3866_v55  ;;  %v5725_v34 = vld [vmem:[#allocation7_spill] sm:$0xff]  ;;  %5738 = vst [vmem:[#allocation2_spill] sm:$0xff] %v4006_v39 }
 0x180   :  { %v1003_v14 = vsub.f32 %v5725_v34, %v3866_v55  ;;  %v1008_v34 = vsub.f32 %v5730_v53, %v3866_v55  ;;  %v5742_v53 = vsub.f32 %v3417_v41, %v3866_v55  ;;  %v5745_v41 = vsub.f32 %v3419_v42, %v3866_v55 }
 0x18b   :  { %v3978_v37 = vpop.eup %3258 }
 0x18c   :  { %v1096_v1 = vmul.f32 %v3978_v37, %v5734_v3  ;;  %v1016_v3 = vsub.f32 %v5740_v26, %v3866_v55  ;;  %v4018_v24 = vmul.f32 %v3978_v37, %v5742_v53  ;;  %v4025_v8 = vmul.f32 %v3978_v37, %v5743_v59 }
 0x18d   :  { %v4031_v26 = vmul.f32 %v3978_v37, %v5744_v21  ;;  %v4037_v62 = vmul.f32 %v3978_v37, %v5745_v41  ;;  %v5747_v59 = vsub.f32 %v3453_v4, %v3866_v55  ;;  %v5748_v53 = vsub.f32 %v3433_v50, %v3866_v55 }
 0x18e   :  { %v1167_v29 = vmul.f32 %v3983_v5, %v1096_v1  ;;  %v5746_v1 = vsub.f32 %v3441_v57, %v3866_v55  ;;  %v5749_v21 = vsub.f32 %v3448_v63, %v3866_v55  ;;  %v5751_v4 = vsub.f32 %v3469_v17, %v3866_v55 }
 0x18f   :  { %v4049_v40 = vmul.f32 %v3978_v37, %v5747_v59  ;;  %v4055_v42 = vmul.f32 %v3978_v37, %v5748_v53  ;;  %v5752_v50 = vsub.f32 %v3481_v28, %v3866_v55  ;;  %v5753_v63 = vsub.f32 %v3462_v11, %v3866_v55 }
 0x190   :  { %v4043_v44 = vmul.f32 %v3978_v37, %v5746_v1  ;;  %v4061_v57 = vmul.f32 %v3978_v37, %v5749_v21  ;;  %v4064_v41 = vadd.f32 %v4006_v39, %v1167_v29  ;;  %v4070_v1 = vmul.f32 %v3978_v37, %v5751_v4 }
 0x191   :  { %v4076_v59 = vmul.f32 %v3978_v37, %v5752_v50  ;;  %v4082_v53 = vmul.f32 %v3978_v37, %v5753_v63  ;;  %v5754_v29 = vsub.f32 %v3476_v23, %v3866_v55  ;;  %v5755_v21 = vsub.f32 %v3497_v45, %v3866_v55 }
 0x192   :  { %5750 = vst [vmem:[#allocation4_spill] sm:$0xff] %v4064_v41  ;;  %v5756_v4 = vsub.f32 %v3509_v58, %v3866_v55  ;;  %v5757_v50 = vsub.f32 %v3490_v35, %v3866_v55  ;;  %v5758_v63 = vsub.f32 %v3504_v52, %v3866_v55 }
 0x193   :  { %v4088_v17 = vmul.f32 %v3978_v37, %v5754_v29  ;;  %v4094_v28 = vmul.f32 %v3978_v37, %v5755_v21  ;;  %v5759_v29 = vsub.f32 %v3525_v9, %v3866_v55  ;;  %v5760_v21 = vsub.f32 %v3537_v22, %v3866_v55 }
 0x194   :  { %v4100_v11 = vmul.f32 %v3978_v37, %v5756_v4  ;;  %v4106_v23 = vmul.f32 %v3978_v37, %v5757_v50  ;;  %v4112_v45 = vmul.f32 %v3978_v37, %v5758_v63  ;;  %v5761_v4 = vsub.f32 %v3518_v2, %v3866_v55 }
 0x195   :  { %v4118_v58 = vmul.f32 %v3978_v37, %v5759_v29  ;;  %v4124_v35 = vmul.f32 %v3978_v37, %v5760_v21  ;;  %v4133_v50 = vmul.f32 0.2, %v4064_v41  ;;  %v5763_v9 = vsub.f32 %v3532_v16, %v3866_v55 }
 0x196   :  { %v4130_v52 = vmul.f32 %v3978_v37, %v5761_v4  ;;  %v5764_v22 = vsub.f32 %v3553_v38, %v3866_v55  ;;  %v5765_v2 = vsub.f32 %v3565_v56, %v3866_v55  ;;  %v5766_v4 = vsub.f32 %v3546_v31, %v3866_v55 }
 0x197   :  { %5762 = vst [vmem:[#allocation6_spill] sm:$0xff] %v4133_v50  ;;  %v4139_v63 = vmul.f32 %v3978_v37, %v5763_v9  ;;  %v5767_v9 = vsub.f32 %v3560_v49, %v3866_v55  ;;  %v4175_v31 = vmul.f32 %v3978_v37, %v995_v18  ;;  %v4181_v49 = vmul.f32 %v3978_v37, %v997_v36 }
 0x198   :  { %v4145_v29 = vmul.f32 %v3978_v37, %v5764_v22  ;;  %v4151_v21 = vmul.f32 %v3978_v37, %v5765_v2  ;;  %v4157_v16 = vmul.f32 %v3978_v37, %v5766_v4  ;;  %v5768_v22 = vsub.f32 %v3581_v12, %v3866_v55 }
 0x199   :  { %v4163_v38 = vmul.f32 %v3978_v37, %v5767_v9  ;;  %v4172_v2 = vmul.f32 %v3978_v37, %v994_v25  ;;  %v4178_v4 = vmul.f32 %v3978_v37, %v996_v7  ;;  %v4184_v9 = vmul.f32 %v3978_v37, %v998_v15 }
 0x19a   :  { %v4169_v56 = vmul.f32 %v3978_v37, %v5768_v22  ;;  %v4187_v12 = vmul.f32 %v3978_v37, %v999_v10  ;;  %v4190_v22 = vmul.f32 %v3978_v37, %v1000_v30  ;;  %v4193_v25 = vmul.f32 %v3978_v37, %v1001_v48 }
 0x19b   :  { %v4196_v18 = vmul.f32 %v3978_v37, %v1002_v32  ;;  %v4199_v7 = vmul.f32 %v3978_v37, %v1003_v14  ;;  %v4202_v36 = vmul.f32 %v3978_v37, %v1004_v6  ;;  %v4205_v15 = vmul.f32 %v3978_v37, %v1005_v61 }
 0x19c   :  { %v4208_v10 = vmul.f32 %v3978_v37, %v1006_v51  ;;  %v4211_v30 = vmul.f32 %v3978_v37, %v1007_v20  ;;  %v4214_v48 = vmul.f32 %v3978_v37, %v1008_v34  ;;  %v4217_v32 = vmul.f32 %v3978_v37, %v1015_v27 }
 0x19d   :  { %v4220_v14 = vmul.f32 %v3978_v37, %v1016_v3  ;;  %v5769_v6 = vsub.f32 %v3752_v46, %v3866_v55  ;;  %v5770_v51 = vsub.f32 %v3764_v19, %v3866_v55  ;;  %v4235_v34 = vmul.f32 %v3978_v37, %v1019_v0 }
 0x19e   :  { %v5771_v27 = vsub.f32 %v3759_v60, %v3866_v55  ;;  %v5772_v46 = vsub.f32 %v3780_v33, %v3866_v55  ;;  %v5774_v19 = vsub.f32 %v3792_v43, %v3866_v55  ;;  %v5776_v0 = vsub.f32 %v3773_v54, %v3866_v55 }
 0x19f   :  { %v4226_v61 = vmul.f32 %v3978_v37, %v5769_v6  ;;  %v4232_v20 = vmul.f32 %v3978_v37, %v5770_v51 }
 0x1a0   :  { %v4241_v3 = vmul.f32 %v3978_v37, %v5771_v27  ;;  %v4247_v6 = vmul.f32 %v3978_v37, %v5772_v46  ;;  %v4253_v51 = vmul.f32 %v3978_v37, %v5774_v19  ;;  %v4259_v60 = vmul.f32 %v3978_v37, %v5776_v0  ;;  %v5780_v46 = vld [vmem:[#allocation25_spill] sm:$0xff]  ;;  %v5783_v19 = vld [vmem:[#allocation27_spill] sm:$0xff]  ;;  %v5786_v0 = vld [vmem:[#allocation24_spill] sm:$0xff] }
 0x1a1   :  { %v5778_v27 = vsub.f32 %v3787_v13, %v3866_v55  ;;  %v5781_v50 = vsub.f32 %v5780_v46, %v3866_v55  ;;  %v5784_v41 = vsub.f32 %v5783_v19, %v3866_v55  ;;  %v5787_v39 = vsub.f32 %v5786_v0, %v3866_v55  ;;  %v5795_v0 = vld [vmem:[#allocation28_spill] sm:$0xff] }
 0x1a2   :  { %5773 = vst [vmem:[#allocation3_spill] sm:$0xff] %v4247_v6  ;;  %5775 = vst [vmem:[#allocation5_spill] sm:$0xff] %v4253_v51 }
 0x1a3   :  { %5777 = vst [vmem:[#allocation8_spill] sm:$0xff] %v4259_v60  ;;  %v4265_v33 = vmul.f32 %v3978_v37, %v5778_v27  ;;  %v4271_v43 = vmul.f32 %v3978_v37, %v5781_v50  ;;  %v4277_v54 = vmul.f32 %v3978_v37, %v5784_v41  ;;  %v4283_v13 = vmul.f32 %v3978_v37, %v5787_v39  ;;  %v5789_v27 = vld [vmem:[#allocation26_spill] sm:$0xff] }
 0x1a4   :  { %v5792_v50 = vsub.f32 %v5731_v47, %v3866_v55  ;;  %v5796_v39 = vsub.f32 %v5795_v0, %v3866_v55  ;;  %v5801_v47 = vld [vmem:[#allocation18_spill] sm:$0xff]  ;;  %v5805_v0 = vld [vmem:[#allocation17_spill] sm:$0xff] }
 0x1a5   :  { %5779 = vst [vmem:[#allocation10_spill] sm:$0xff] %v4265_v33  ;;  %5782 = vst [vmem:[#allocation7_spill] sm:$0xff] %v4271_v43  ;;  %v5790_v33 = vsub.f32 %v5789_v27, %v3866_v55  ;;  %v5793_v43 = vld [vmem:[#allocation29_spill] sm:$0xff]  ;;  %v5798_v27 = vld [vmem:[#allocation30_spill] sm:$0xff] }
 0x1a6   :  { %5785 = vst [vmem:[#allocation9_spill] sm:$0xff] %v4277_v54  ;;  %5788 = vst [vmem:[#allocation12_spill] sm:$0xff] %v4283_v13  ;;  %v1075_v19 = vmul.f32 %v3978_v37, %v5792_v50  ;;  %v5794_v41 = vsub.f32 %v5793_v43, %v3866_v55  ;;  %v4303_v60 = vmul.f32 %v3978_v37, %v5796_v39  ;;  %v5803_v43 = vld [vmem:[#allocation15_spill] sm:$0xff]  ;;  %v5807_v13 = vld [vmem:[#allocation20_spill] sm:$0xff] }
 0x1a7   :  { %v4289_v46 = vmul.f32 %v3978_v37, %v5790_v33  ;;  %v5799_v33 = vsub.f32 %v5798_v27, %v3866_v55  ;;  %v5802_v50 = vsub.f32 %v5801_v47, %v3866_v55  ;;  %v5806_v39 = vsub.f32 %v5805_v0, %v3866_v55 }
 0x1a8   :  { %v1095_v54 = vmul.f32 %v3978_v37, %v5794_v41  ;;  %5797 = vst [vmem:[#allocation11_spill] sm:$0xff] %v4303_v60  ;;  %v5804_v41 = vsub.f32 %v5803_v43, %v3866_v55  ;;  %v5808_v27 = vsub.f32 %v5807_v13, %v3866_v55  ;;  %v4333_v43 = vmul.f32 %v3983_v5, %v4018_v24 }
 0x1a9   :  { %5791 = vst [vmem:[#allocation14_spill] sm:$0xff] %v4289_v46  ;;  %v4309_v51 = vmul.f32 %v3978_v37, %v5799_v33  ;;  %v1076_v6 = vmul.f32 %v3978_v37, %v5802_v50  ;;  %v1078_v60 = vmul.f32 %v3978_v37, %v5806_v39  ;;  %v1108_v0 = vmul.f32 %v3983_v5, %v4031_v26 }
 0x1aa   :  { %v1077_v46 = vmul.f32 %v3978_v37, %v5804_v41  ;;  %v1079_v33 = vmul.f32 %v3978_v37, %v5808_v27  ;;  %5811 = vst [vmem:[#allocation16_spill] sm:$0xff] %v4333_v43  ;;  %v4337_v41 = vmul.f32 %v3983_v5, %v4025_v8  ;;  %v1109_v13 = vmul.f32 %v3983_v5, %v4037_v62 }
 0x1ab   :  { %5800 = vst [vmem:[#allocation13_spill] sm:$0xff] %v4309_v51  ;;  %v5809_v51 = vld [vmem:[#allocation22_spill] sm:$0xff]  ;;  %v1110_v39 = vmul.f32 %v3983_v5, %v4043_v44  ;;  %v1112_v24 = vmul.f32 %v3983_v5, %v4055_v42  ;;  %v1114_v8 = vmul.f32 %v3983_v5, %v4070_v1  ;;  %v1115_v26 = vmul.f32 %v3983_v5, %v4076_v59 }
 0x1ac   :  { %v5810_v47 = vsub.f32 %v5809_v51, %v3866_v55  ;;  %5812 = vst [vmem:[#allocation19_spill] sm:$0xff] %v4337_v41  ;;  %v1111_v55 = vmul.f32 %v3983_v5, %v4049_v40  ;;  %v1116_v62 = vmul.f32 %v3983_v5, %v4082_v53  ;;  %v1117_v44 = vmul.f32 %v3983_v5, %v4088_v17  ;;  %v5817_v41 = vld [vmem:[#allocation5_spill] sm:$0xff] }
 0x1ad   :  { %v1118_v40 = vmul.f32 %v3983_v5, %v4094_v28  ;;  %v1119_v42 = vmul.f32 %v3983_v5, %v4100_v11  ;;  %v1121_v1 = vmul.f32 %v3983_v5, %v4112_v45  ;;  %v1122_v59 = vmul.f32 %v3983_v5, %v4118_v58 }
 0x1ae   :  { %v1080_v50 = vmul.f32 %v3978_v37, %v5810_v47  ;;  %v1113_v37 = vmul.f32 %v3983_v5, %v4061_v57  ;;  %v1120_v57 = vmul.f32 %v3983_v5, %v4106_v23  ;;  %v1123_v53 = vmul.f32 %v3983_v5, %v4124_v35 }
 0x1af   :  { %v1124_v17 = vmul.f32 %v3983_v5, %v4130_v52  ;;  %v1125_v28 = vmul.f32 %v3983_v5, %v4139_v63  ;;  %v1126_v11 = vmul.f32 %v3983_v5, %v4145_v29  ;;  %v1127_v23 = vmul.f32 %v3983_v5, %v4151_v21 }
 0x1b0   :  { %v1128_v45 = vmul.f32 %v3983_v5, %v4157_v16  ;;  %v1129_v58 = vmul.f32 %v3983_v5, %v4163_v38  ;;  %v1130_v35 = vmul.f32 %v3983_v5, %v4169_v56  ;;  %v1131_v52 = vmul.f32 %v3983_v5, %v4172_v2  ;;  %v5814_v47 = vld [vmem:[#allocation14_spill] sm:$0xff] }
 0x1b1   :  { %v1132_v63 = vmul.f32 %v3983_v5, %v4175_v31  ;;  %v1133_v29 = vmul.f32 %v3983_v5, %v4178_v4  ;;  %v1134_v21 = vmul.f32 %v3983_v5, %v4181_v49  ;;  %v1135_v16 = vmul.f32 %v3983_v5, %v4184_v9 }
 0x1b2   :  { %v1136_v38 = vmul.f32 %v3983_v5, %v4187_v12  ;;  %v1137_v56 = vmul.f32 %v3983_v5, %v4190_v22  ;;  %v1138_v2 = vmul.f32 %v3983_v5, %v4193_v25  ;;  %v1139_v31 = vmul.f32 %v3983_v5, %v4196_v18 }
 0x1b3   :  { %v1140_v4 = vmul.f32 %v3983_v5, %v4199_v7  ;;  %v1141_v49 = vmul.f32 %v3983_v5, %v4202_v36  ;;  %v1142_v9 = vmul.f32 %v3983_v5, %v4205_v15  ;;  %v1143_v12 = vmul.f32 %v3983_v5, %v4208_v10 }
 0x1b4   :  { %v1144_v22 = vmul.f32 %v3983_v5, %v4211_v30  ;;  %v1145_v25 = vmul.f32 %v3983_v5, %v4214_v48  ;;  %v1146_v18 = vmul.f32 %v3983_v5, %v1075_v19  ;;  %v1147_v51 = vmul.f32 %v3983_v5, %v1076_v6  ;;  %v5813_v19 = vld [vmem:[#allocation12_spill] sm:$0xff] }
 0x1b5   :  { %v1148_v7 = vmul.f32 %v3983_v5, %v1077_v46  ;;  %v1149_v36 = vmul.f32 %v3983_v5, %v1078_v60  ;;  %v1150_v27 = vmul.f32 %v3983_v5, %v1079_v33  ;;  %v1151_v15 = vmul.f32 %v3983_v5, %v1080_v50  ;;  %v5815_v50 = vld [vmem:[#allocation3_spill] sm:$0xff] }
 0x1b6   :  { %v1152_v10 = vmul.f32 %v3983_v5, %v4217_v32  ;;  %v1153_v30 = vmul.f32 %v3983_v5, %v4220_v14  ;;  %v1154_v48 = vmul.f32 %v3983_v5, %v4226_v61  ;;  %v1155_v6 = vmul.f32 %v3983_v5, %v4232_v20 }
 0x1b7   :  { %v1156_v46 = vmul.f32 %v3983_v5, %v4235_v34  ;;  %v1157_v60 = vmul.f32 %v3983_v5, %v4241_v3  ;;  %v1164_v33 = vmul.f32 %v3983_v5, %v5813_v19  ;;  %v1165_v32 = vmul.f32 %v3983_v5, %v5814_v47  ;;  %v5819_v34 = vld [vmem:[#allocation11_spill] sm:$0xff]  ;;  %v5820_v3 = vld [vmem:[#allocation13_spill] sm:$0xff]  ;;  %v5821_v47 = vld [vmem:[#allocation8_spill] sm:$0xff] }
 0x1b8   :  { %v1166_v14 = vmul.f32 %v3983_v5, %v1095_v54  ;;  %v4440_v61 = vmul.f32 %v3983_v5, %v5815_v50  ;;  %v4444_v20 = vmul.f32 %v3983_v5, %v5817_v41  ;;  %v1168_v43 = vmul.f32 %v3983_v5, %v5819_v34  ;;  %v5823_v50 = vld [vmem:[#allocation10_spill] sm:$0xff]  ;;  %v5825_v41 = vld [vmem:[#allocation7_spill] sm:$0xff]  ;;  %v5827_v34 = vld [vmem:[#allocation9_spill] sm:$0xff] }
 0x1b9   :  { %v1169_v19 = vmul.f32 %v3983_v5, %v5820_v3  ;;  %v4452_v54 = vmul.f32 %v3983_v5, %v5821_v47  ;;  %v4464_v3 = vmul.f32 %v3983_v5, %v5827_v34  ;;  %v5828_v47 = vld [vmem:[#allocation2_spill] sm:$0xff] }
 0x1ba   :  { %5816 = vst [vmem:[#allocation21_spill] sm:$0xff] %v4440_v61  ;;  %5818 = vst [vmem:[#allocation23_spill] sm:$0xff] %v4444_v20  ;;  %v4456_v61 = vmul.f32 %v3983_v5, %v5823_v50  ;;  %v4460_v20 = vmul.f32 %v3983_v5, %v5825_v41  ;;  %v4470_v50 = vadd.f32 %v5828_v47, %v1109_v13 }
 0x1bb   :  { %5822 = vst [vmem:[#allocation25_spill] sm:$0xff] %v4452_v54  ;;  %v4467_v54 = vadd.f32 %v5828_v47, %v1108_v0  ;;  %v4476_v41 = vadd.f32 %v5828_v47, %v1111_v55  ;;  %v4482_v5 = vadd.f32 %v5828_v47, %v1113_v37  ;;  %v4485_v34 = vadd.f32 %v5828_v47, %v1114_v8 }
 0x1bc   :  { %5824 = vst [vmem:[#allocation27_spill] sm:$0xff] %v4456_v61  ;;  %5826 = vst [vmem:[#allocation24_spill] sm:$0xff] %v4460_v20  ;;  %v4473_v61 = vadd.f32 %v5828_v47, %v1110_v39  ;;  %v4479_v20 = vadd.f32 %v5828_v47, %v1112_v24  ;;  %v4488_v0 = vadd.f32 %v5828_v47, %v1115_v26  ;;  %vm1244_vm3 = vcmp.gt.f32.partialorder %v4470_v50, 0.0 }
 0x1bd   :  { %v4491_v13 = vadd.f32 %v5828_v47, %v1116_v62  ;;  %v4494_v39 = vadd.f32 %v5828_v47, %v1117_v44  ;;  %v4497_v55 = vadd.f32 %v5828_v47, %v1118_v40  ;;  %v4500_v24 = vadd.f32 %v5828_v47, %v1119_v42 }
 0x1be   :  { %v4503_v37 = vadd.f32 %v5828_v47, %v1120_v57  ;;  %v4506_v8 = vadd.f32 %v5828_v47, %v1121_v1  ;;  %v4509_v26 = vadd.f32 %v5828_v47, %v1122_v59  ;;  %v4512_v62 = vadd.f32 %v5828_v47, %v1123_v53 }
 0x1bf   :  { %v4515_v44 = vadd.f32 %v5828_v47, %v1124_v17  ;;  %v4518_v40 = vadd.f32 %v5828_v47, %v1125_v28  ;;  %v4521_v42 = vadd.f32 %v5828_v47, %v1126_v11  ;;  %v4524_v57 = vadd.f32 %v5828_v47, %v1127_v23 }
 0x1c0   :  { %v4527_v1 = vadd.f32 %v5828_v47, %v1128_v45  ;;  %v4530_v59 = vadd.f32 %v5828_v47, %v1129_v58  ;;  %v4533_v53 = vadd.f32 %v5828_v47, %v1130_v35  ;;  %v4536_v17 = vadd.f32 %v5828_v47, %v1131_v52 }
 0x1c1   :  { %v4539_v28 = vadd.f32 %v5828_v47, %v1132_v63  ;;  %v4542_v11 = vadd.f32 %v5828_v47, %v1133_v29  ;;  %v4545_v23 = vadd.f32 %v5828_v47, %v1134_v21  ;;  %v4548_v45 = vadd.f32 %v5828_v47, %v1135_v16 }
 0x1c2   :  { %v4551_v58 = vadd.f32 %v5828_v47, %v1136_v38  ;;  %v4554_v35 = vadd.f32 %v5828_v47, %v1137_v56  ;;  %v4557_v52 = vadd.f32 %v5828_v47, %v1138_v2  ;;  %v4560_v63 = vadd.f32 %v5828_v47, %v1139_v31 }
 0x1c3   :  { %v4563_v29 = vadd.f32 %v5828_v47, %v1140_v4  ;;  %v4566_v21 = vadd.f32 %v5828_v47, %v1141_v49  ;;  %v4569_v16 = vadd.f32 %v5828_v47, %v1142_v9  ;;  %v4572_v38 = vadd.f32 %v5828_v47, %v1143_v12 }
 0x1c4   :  { %v4575_v56 = vadd.f32 %v5828_v47, %v1144_v22  ;;  %v4578_v2 = vadd.f32 %v5828_v47, %v1145_v25  ;;  %v4581_v31 = vadd.f32 %v5828_v47, %v1146_v18  ;;  %v4584_v4 = vadd.f32 %v5828_v47, %v1147_v51 }
 0x1c5   :  { %v4587_v49 = vadd.f32 %v5828_v47, %v1148_v7  ;;  %v4590_v9 = vadd.f32 %v5828_v47, %v1149_v36  ;;  %v4593_v12 = vadd.f32 %v5828_v47, %v1150_v27  ;;  %v4596_v22 = vadd.f32 %v5828_v47, %v1151_v15 }
 0x1c6   :  { %v4599_v25 = vadd.f32 %v5828_v47, %v1152_v10  ;;  %v4602_v18 = vadd.f32 %v5828_v47, %v1153_v30  ;;  %v4605_v51 = vadd.f32 %v5828_v47, %v1154_v48  ;;  %v4608_v7 = vadd.f32 %v5828_v47, %v1155_v6 }
 0x1c7   :  { %v4611_v36 = vadd.f32 %v5828_v47, %v1156_v46  ;;  %v4614_v27 = vadd.f32 %v5828_v47, %v1157_v60  ;;  %v4617_v15 = vadd.f32 %v5828_v47, %v1164_v33  ;;  %v4620_v10 = vadd.f32 %v5828_v47, %v1165_v32  ;;  %v5839_v46 = vld [vmem:[#allocation16_spill] sm:$0xff]  ;;  %v5840_v60 = vld [vmem:[#allocation19_spill] sm:$0xff] }
 0x1c8   :  { %5829 = vst [vmem:[#allocation26_spill] sm:$0xff] %v4602_v18  ;;  %5830 = vst [vmem:[#allocation29_spill] sm:$0xff] %v4605_v51  ;;  %v4623_v30 = vadd.f32 %v5828_v47, %v1166_v14  ;;  %v4626_v48 = vadd.f32 %v5828_v47, %v1168_v43  ;;  %v4629_v6 = vadd.f32 %v5828_v47, %v1169_v19  ;;  %vm1243_vm2 = vcmp.gt.f32.partialorder %v4467_v54, 0.0 }
 0x1c9   :  { %5831 = vst [vmem:[#allocation28_spill] sm:$0xff] %v4608_v7  ;;  %5832 = vst [vmem:[#allocation30_spill] sm:$0xff] %v4611_v36  ;;  %v1177_v36 = vadd.f32 %v5828_v47, %v5839_v46  ;;  %v1307_v33 = vmul.f32 0.2, %v4467_v54  ;;  %v1308_v43 = vmul.f32 0.2, %v4470_v50 }
 0x1ca   :  { %5833 = vst [vmem:[#allocation18_spill] sm:$0xff] %v4614_v27  ;;  %5834 = vst [vmem:[#allocation15_spill] sm:$0xff] %v4617_v15  ;;  %v1178_v27 = vadd.f32 %v5828_v47, %v5840_v60  ;;  %vm1245_vm5 = vcmp.gt.f32.partialorder %v4473_v61, 0.0  ;;  %vm1246_vm7 = vcmp.gt.f32.partialorder %v4476_v41, 0.0  ;;  %vm1247_vm8 = vcmp.gt.f32.partialorder %v4479_v20, 0.0 }
 0x1cb   :  { %5835 = vst [vmem:[#allocation17_spill] sm:$0xff] %v4620_v10  ;;  %5836 = vst [vmem:[#allocation20_spill] sm:$0xff] %v4623_v30  ;;  %vm1241_vm4 = vcmp.gt.f32.partialorder %v1177_v36, 0.0  ;;  %v1305_v32 = vmul.f32 0.2, %v1177_v36  ;;  %v1371_v19 = vsel %vm1243_vm2, %v4467_v54, %v1307_v33  ;;  %v1372_v60 = vsel %vm1244_vm3, %v4470_v50, %v1308_v43 }
 0x1cc   :  { %5837 = vst [vmem:[#allocation22_spill] sm:$0xff] %v4626_v48  ;;  %5838 = vst [vmem:[#allocation12_spill] sm:$0xff] %v4629_v6  ;;  %vm1242_vm6 = vcmp.gt.f32.partialorder %v1178_v27, 0.0  ;;  %v1306_v14 = vmul.f32 0.2, %v1178_v27  ;;  %v2872_v6 = vpack.c.bf16 %v1371_v19, %v1371_v19  ;;  %v1434_v15 = vpack.c.bf16 %v1372_v60, %v1371_v19 }
 0x1cd   :  { %v1369_v46 = vsel %vm1241_vm4, %v1177_v36, %v1305_v32  ;;  %v1309_v48 = vmul.f32 0.2, %v4473_v61  ;;  %v2873_v7 = vpack.c.bf16 %v1372_v60, %v1372_v60  ;;  %v1310_v54 = vmul.f32 0.2, %v4476_v41 }
 0x1ce   :  { %v1370_v30 = vsel %vm1242_vm6, %v1178_v27, %v1306_v14  ;;  %v2870_v10 = vpack.c.bf16 %v1369_v46, %v1369_v46  ;;  %1692 = vst.msk [vmem:[%s5636_s5 + $0x8] sm:$0xf] %vm1689_vm1, %v2872_v6  ;;  %vm1248_vm9 = vcmp.gt.f32.partialorder %v4482_v5, 0.0  ;;  %v1311_v27 = vmul.f32 0.2, %v4479_v20 }
 0x1cf   :  { %v1433_v51 = vpack.c.bf16 %v1370_v30, %v1369_v46  ;;  %v2871_v18 = vpack.c.bf16 %v1370_v30, %v1370_v30  ;;  %v1373_v50 = vsel %vm1245_vm5, %v4473_v61, %v1309_v48  ;;  %1693 = vst.msk [vmem:[%s5636_s5 + $0xc] sm:$0xf] %vm1689_vm1, %v2873_v7  ;;  %v1374_v61 = vsel %vm1246_vm7, %v4476_v41, %v1310_v54  ;;  %v5841_v41 = vld [vmem:[#allocation21_spill] sm:$0xff] }
 0x1d0   :  { %1690 = vst.msk [vmem:[%s5636_s5] sm:$0xf] %vm1689_vm1, %v2870_v10  ;;  %v2874_v36 = vpack.c.bf16 %v1373_v50, %v1373_v50  ;;  %v1312_v7 = vmul.f32 0.2, %v4482_v5  ;;  %vm1249_vm10 = vcmp.gt.f32.partialorder %v4485_v34, 0.0  ;;  %vm1250_vm11 = vcmp.gt.f32.partialorder %v4488_v0, 0.0 }
 0x1d1   :  { %1691 = vst.msk [vmem:[%s5636_s5 + $0x4] sm:$0xf] %vm1689_vm1, %v2871_v18  ;;  %3153 = vmatprep.mubr.msk.bf16.mxu1 %vm632_vm0, %v1433_v51  ;;  %v1435_v10 = vpack.c.bf16 %v1374_v61, %v1373_v50  ;;  %v2875_v30 = vpack.c.bf16 %v1374_v61, %v1374_v61  ;;  %v1375_v18 = vsel %vm1247_vm8, %v4479_v20, %v1311_v27  ;;  %v1313_v51 = vmul.f32 0.2, %v4485_v34 }
 0x1d2   :  { %3154 = vmatmul.mubr.msk.bf16.vlgmr.msra.gmra.mxu1 %vm632_vm0, %v1434_v15  ;;  %1694 = vst.msk [vmem:[%s5636_s5 + $0x10] sm:$0xf] %vm1689_vm1, %v2874_v36  ;;  %v4683_v48 = vadd.f32 %v5828_v47, %v5841_v41  ;;  %v1376_v6 = vsel %vm1248_vm9, %v4482_v5, %v1312_v7  ;;  %v2876_v33 = vpack.c.bf16 %v1375_v18, %v1375_v18  ;;  %v1314_v15 = vmul.f32 0.2, %v4488_v0 }
 0x1d3   :  { %1695 = vst.msk [vmem:[%s5636_s5 + $0x14] sm:$0xf] %vm1689_vm1, %v2875_v30  ;;  %3157 = vmatprep.mubr.msk.bf16.mxu1 %vm632_vm0, %v1435_v10  ;;  %v2877_v32 = vpack.c.bf16 %v1376_v6, %v1376_v6  ;;  %v1377_v20 = vsel %vm1249_vm10, %v4485_v34, %v1313_v51  ;;  %vm1251_vm12 = vcmp.gt.f32.partialorder %v4491_v13, 0.0  ;;  %vm1252_vm13 = vcmp.gt.f32.partialorder %v4494_v39, 0.0  ;;  %v5842_v10 = vld [vmem:[#allocation23_spill] sm:$0xff] }
 0x1d4   :  { %1696 = vst.msk [vmem:[%s5636_s5 + $0x18] sm:$0xf] %vm1689_vm1, %v2876_v33  ;;  %v1378_v5 = vsel %vm1250_vm11, %v4488_v0, %v1314_v15  ;;  %v2878_v43 = vpack.c.bf16 %v1377_v20, %v1377_v20  ;;  %v1315_v14 = vmul.f32 0.2, %v4491_v13  ;;  %v1316_v19 = vmul.f32 0.2, %v4494_v39 }
 0x1d5   :  { %v1436_v46 = vpack.c.bf16 %v1376_v6, %v1375_v18  ;;  %1697 = vst.msk [vmem:[%s5636_s5 + $0x1c] sm:$0xf] %vm1689_vm1, %v2877_v32  ;;  %v2879_v34 = vpack.c.bf16 %v1378_v5, %v1378_v5  ;;  %vm1253_vm14 = vcmp.gt.f32.partialorder %v4497_v55, 0.0  ;;  %vm1254_vm15 = vcmp.gt.f32.partialorder %v4500_v24, 0.0  ;;  %v5843_v6 = vld [vmem:[#allocation25_spill] sm:$0xff] }
 0x1d6   :  { %1698 = vst.msk [vmem:[%s5636_s5 + $0x20] sm:$0xf] %vm1689_vm1, %v2878_v43  ;;  %v1379_v0 = vsel %vm1251_vm12, %v4491_v13, %v1315_v14  ;;  %v1380_v60 = vsel %vm1252_vm13, %v4494_v39, %v1316_v19  ;;  %v1317_v54 = vmul.f32 0.2, %v4497_v55  ;;  %v1318_v50 = vmul.f32 0.2, %v4500_v24 }
 0x1d7   :  { %v1437_v36 = vpack.c.bf16 %v1378_v5, %v1377_v20  ;;  %1699 = vst.msk [vmem:[%s5636_s5 + $0x24] sm:$0xf] %vm1689_vm1, %v2879_v34  ;;  %v2880_v27 = vpack.c.bf16 %v1379_v0, %v1379_v0  ;;  %v2881_v61 = vpack.c.bf16 %v1380_v60, %v1380_v60  ;;  %vm1255_vm2 = vcmp.gt.f32.partialorder %v4503_v37, 0.0 }
 0x1d8   :  { %v1381_v7 = vsel %vm1253_vm14, %v4497_v55, %v1317_v54  ;;  %v1382_v13 = vsel %vm1254_vm15, %v4500_v24, %v1318_v50  ;;  %vm1256_vm3 = vcmp.gt.f32.partialorder %v4506_v8, 0.0  ;;  %v1319_v39 = vmul.f32 0.2, %v4503_v37 }
 0x1d9   :  { %v4729_v30 = vadd.f32 %v5828_v47, %v5842_v10  ;;  %1700 = vst.msk [vmem:[%s5636_s5 + $0x28] sm:$0xf] %vm1689_vm1, %v2880_v27  ;;  %1701 = vst.msk [vmem:[%s5636_s5 + $0x2c] sm:$0xf] %vm1689_vm1, %v2881_v61  ;;  %v2882_v55 = vpack.c.bf16 %v1381_v7, %v1381_v7  ;;  %v2883_v24 = vpack.c.bf16 %v1382_v13, %v1382_v13  ;;  %v1320_v18 = vmul.f32 0.2, %v4506_v8 }
 0x1da   :  { %3158 = vmatmul.mubr.msk.bf16.gmra.mxu1 %vm632_vm0, %v1436_v46  ;;  %v4743_v51 = vsel %vm1255_vm2, %v4503_v37, %v1319_v39  ;;  %vm1257_vm4 = vcmp.gt.f32.partialorder %v4509_v26, 0.0  ;;  %vm1258_vm5 = vcmp.gt.f32.partialorder %v4512_v62, 0.0  ;;  %v1321_v41 = vmul.f32 0.2, %v4509_v26  ;;  %v5844_v61 = vld [vmem:[#allocation27_spill] sm:$0xff] }
 0x1db   :  { %3161 = vmatprep.mubr.msk.bf16.mxu1 %vm632_vm0, %v1437_v36  ;;  %v4750_v33 = vadd.f32 %v5828_v47, %v5843_v6  ;;  %1702 = vst.msk [vmem:[%s5636_s5 + $0x30] sm:$0xf] %vm1689_vm1, %v2882_v55  ;;  %1703 = vst.msk [vmem:[%s5636_s5 + $0x34] sm:$0xf] %vm1689_vm1, %v2883_v24  ;;  %v4763_v37 = vsel %vm1256_vm3, %v4506_v8, %v1320_v18  ;;  %v2884_v15 = vpack.c.bf16 %v4743_v51, %v4743_v51 }
 0x1dc   :  { %v1322_v32 = vmul.f32 0.2, %v4512_v62  ;;  %v2885_v20 = vpack.c.bf16 %v4763_v37, %v4763_v37  ;;  %v4771_v5 = vsel %vm1257_vm4, %v4509_v26, %v1321_v41  ;;  %vm1259_vm6 = vcmp.gt.f32.partialorder %v4515_v44, 0.0 }
 0x1dd   :  { %vm1260_vm7 = vcmp.gt.f32.partialorder %v4518_v40, 0.0  ;;  %1704 = vst.msk [vmem:[%s5636_s5 + $0x38] sm:$0xf] %vm1689_vm1, %v2884_v15  ;;  %v2886_v43 = vpack.c.bf16 %v4771_v5, %v4771_v5  ;;  %v1323_v14 = vmul.f32 0.2, %v4515_v44  ;;  %v1438_v19 = vpack.c.bf16 %v1380_v60, %v1379_v0 }
 0x1de   :  { %v4780_v8 = vsel %vm1258_vm5, %v4512_v62, %v1322_v32  ;;  %v1324_v26 = vmul.f32 0.2, %v4518_v40  ;;  %1705 = vst.msk [vmem:[%s5636_s5 + $0x3c] sm:$0xf] %vm1689_vm1, %v2885_v20  ;;  %vm1261_vm8 = vcmp.gt.f32.partialorder %v4521_v42, 0.0  ;;  %vm1262_vm9 = vcmp.gt.f32.partialorder %v4524_v57, 0.0 }
 0x1df   :  { %v2887_v46 = vpack.c.bf16 %v4780_v8, %v4780_v8  ;;  %1706 = vst.msk [vmem:[%s5636_s5 + $0x40] sm:$0xf] %vm1689_vm1, %v2886_v43  ;;  %v4799_v62 = vsel %vm1259_vm6, %v4515_v44, %v1323_v14  ;;  %v1325_v0 = vmul.f32 0.2, %v4521_v42  ;;  %v1326_v60 = vmul.f32 0.2, %v4524_v57 }
 0x1e0   :  { %v4802_v34 = vsel %vm1260_vm7, %v4518_v40, %v1324_v26  ;;  %v1439_v54 = vpack.c.bf16 %v1382_v13, %v1381_v7  ;;  %v2888_v50 = vpack.c.bf16 %v4799_v62, %v4799_v62  ;;  %vm1263_vm10 = vcmp.gt.f32.partialorder %v4527_v1, 0.0  ;;  %v5845_v43 = vld [vmem:[#allocation24_spill] sm:$0xff] }
 0x1e1   :  { %1707 = vst.msk [vmem:[%s5636_s5 + $0x44] sm:$0xf] %vm1689_vm1, %v2887_v46  ;;  %v2889_v44 = vpack.c.bf16 %v4802_v34, %v4802_v34  ;;  %v4817_v40 = vsel %vm1261_vm8, %v4521_v42, %v1325_v0  ;;  %v4820_v36 = vsel %vm1262_vm9, %v4524_v57, %v1326_v60  ;;  %vm1264_vm11 = vcmp.gt.f32.partialorder %v4530_v59, 0.0 }
 0x1e2   :  { %3162 = vmatmul.mubr.msk.bf16.gmra.mxu1 %vm632_vm0, %v1438_v19  ;;  %v1327_v27 = vmul.f32 0.2, %v4527_v1  ;;  %v4826_v7 = vadd.f32 %v5828_v47, %v5844_v61  ;;  %1708 = vst.msk [vmem:[%s5636_s5 + $0x48] sm:$0xf] %vm1689_vm1, %v2888_v50  ;;  %v2890_v42 = vpack.c.bf16 %v4817_v40, %v4817_v40  ;;  %v2891_v57 = vpack.c.bf16 %v4820_v36, %v4820_v36 }
 0x1e3   :  { %3165 = vmatprep.mubr.msk.bf16.mxu1 %vm632_vm0, %v1439_v54  ;;  %1709 = vst.msk [vmem:[%s5636_s5 + $0x4c] sm:$0xf] %vm1689_vm1, %v2889_v44  ;;  %v1328_v13 = vmul.f32 0.2, %v4530_v59  ;;  %vm1265_vm12 = vcmp.gt.f32.partialorder %v4533_v53, 0.0  ;;  %vm1266_vm13 = vcmp.gt.f32.partialorder %v4536_v17, 0.0  ;;  %v1440_v55 = vpack.c.bf16 %v4763_v37, %v4743_v51 }
 0x1e4   :  { %v4843_v39 = vsel %vm1263_vm10, %v4527_v1, %v1327_v27  ;;  %v1329_v10 = vmul.f32 0.2, %v4533_v53  ;;  %1710 = vst.msk [vmem:[%s5636_s5 + $0x50] sm:$0xf] %vm1689_vm1, %v2890_v42  ;;  %1711 = vst.msk [vmem:[%s5636_s5 + $0x54] sm:$0xf] %vm1689_vm1, %v2891_v57  ;;  %v1441_v15 = vpack.c.bf16 %v4780_v8, %v4771_v5  ;;  %v4908_v14 = vadd.f32 %v5828_v47, %v5845_v43 }
 0x1e5   :  { %v4861_v1 = vsel %vm1264_vm11, %v4530_v59, %v1328_v13  ;;  %v2892_v24 = vpack.c.bf16 %v4843_v39, %v4843_v39  ;;  %v1330_v18 = vmul.f32 0.2, %v4536_v17  ;;  %vm1267_vm14 = vcmp.gt.f32.partialorder %v4539_v28, 0.0 }
 0x1e6   :  { %v2893_v51 = vpack.c.bf16 %v4861_v1, %v4861_v1  ;;  %v4869_v41 = vsel %vm1265_vm12, %v4533_v53, %v1329_v10  ;;  %vm1268_vm15 = vcmp.gt.f32.partialorder %v4542_v11, 0.0  ;;  %v1331_v37 = vmul.f32 0.2, %v4539_v28 }
 0x1e7   :  { %1712 = vst.msk [vmem:[%s5636_s5 + $0x58] sm:$0xf] %vm1689_vm1, %v2892_v24  ;;  %v4878_v59 = vsel %vm1266_vm13, %v4536_v17, %v1330_v18  ;;  %v2894_v6 = vpack.c.bf16 %v4869_v41, %v4869_v41  ;;  %v1332_v53 = vmul.f32 0.2, %v4542_v11  ;;  %vm1269_vm2 = vcmp.gt.f32.partialorder %v4545_v23, 0.0 }
 0x1e8   :  { %1713 = vst.msk [vmem:[%s5636_s5 + $0x5c] sm:$0xf] %vm1689_vm1, %v2893_v51  ;;  %v2895_v32 = vpack.c.bf16 %v4878_v59, %v4878_v59  ;;  %vm1270_vm3 = vcmp.gt.f32.partialorder %v4548_v45, 0.0  ;;  %v4899_v17 = vsel %vm1267_vm14, %v4539_v28, %v1331_v37  ;;  %v1333_v5 = vmul.f32 0.2, %v4545_v23 }
 0x1e9   :  { %1714 = vst.msk [vmem:[%s5636_s5 + $0x60] sm:$0xf] %vm1689_vm1, %v2894_v6  ;;  %v4902_v20 = vsel %vm1268_vm15, %v4542_v11, %v1332_v53  ;;  %v1334_v8 = vmul.f32 0.2, %v4548_v45  ;;  %v2896_v28 = vpack.c.bf16 %v4899_v17, %v4899_v17  ;;  %vm1271_vm4 = vcmp.gt.f32.partialorder %v4551_v58, 0.0 }
 0x1ea   :  { %3166 = vmatmul.mubr.msk.bf16.gmra.mxu1 %vm632_vm0, %v1440_v55  ;;  %1715 = vst.msk [vmem:[%s5636_s5 + $0x64] sm:$0xf] %vm1689_vm1, %v2895_v32  ;;  %v2897_v11 = vpack.c.bf16 %v4902_v20, %v4902_v20  ;;  %v4922_v26 = vsel %vm1269_vm2, %v4545_v23, %v1333_v5  ;;  %vm1272_vm5 = vcmp.gt.f32.partialorder %v4554_v35, 0.0  ;;  %v1335_v46 = vmul.f32 0.2, %v4551_v58 }
 0x1eb   :  { %3169 = vmatprep.mubr.msk.bf16.mxu1 %vm632_vm0, %v1441_v15  ;;  %v4925_v19 = vsel %vm1270_vm3, %v4548_v45, %v1334_v8  ;;  %v4931_v0 = vadd.f32 %v5828_v47, %v4464_v3  ;;  %1716 = vst.msk [vmem:[%s5636_s5 + $0x68] sm:$0xf] %vm1689_vm1, %v2896_v28  ;;  %v2898_v23 = vpack.c.bf16 %v4922_v26, %v4922_v26  ;;  %v1336_v60 = vmul.f32 0.2, %v4554_v35 }
 0x1ec   :  { %1717 = vst.msk [vmem:[%s5636_s5 + $0x6c] sm:$0xf] %vm1689_vm1, %v2897_v11  ;;  %v2899_v45 = vpack.c.bf16 %v4925_v19, %v4925_v19  ;;  %v4947_v3 = vsel %vm1271_vm4, %v4551_v58, %v1335_v46  ;;  %vm1273_vm6 = vcmp.gt.f32.partialorder %v4557_v52, 0.0  ;;  %vm1274_vm7 = vcmp.gt.f32.partialorder %v4560_v63, 0.0  ;;  %v5846_v46 = vld [vmem:[#allocation26_spill] sm:$0xff] }
 0x1ed   :  { %v1337_v47 = vmul.f32 0.2, %v4557_v52  ;;  %v1442_v54 = vpack.c.bf16 %v4802_v34, %v4799_v62  ;;  %1718 = vst.msk [vmem:[%s5636_s5 + $0x70] sm:$0xf] %vm1689_vm1, %v2898_v23  ;;  %v4963_v58 = vsel %vm1272_vm5, %v4554_v35, %v1336_v60  ;;  %v2900_v50 = vpack.c.bf16 %v4947_v3, %v4947_v3 }
 0x1ee   :  { %1719 = vst.msk [vmem:[%s5636_s5 + $0x74] sm:$0xf] %vm1689_vm1, %v2899_v45  ;;  %v1338_v44 = vmul.f32 0.2, %v4560_v63  ;;  %v2901_v62 = vpack.c.bf16 %v4963_v58, %v4963_v58  ;;  %vm1275_vm8 = vcmp.gt.f32.partialorder %v4563_v29, 0.0  ;;  %vm1276_vm9 = vcmp.gt.f32.partialorder %v4566_v21, 0.0 }
 0x1ef   :  { %v4971_v34 = vsel %vm1273_vm6, %v4557_v52, %v1337_v47  ;;  %1720 = vst.msk [vmem:[%s5636_s5 + $0x78] sm:$0xf] %vm1689_vm1, %v2900_v50  ;;  %v1339_v61 = vmul.f32 0.2, %v4563_v29  ;;  %v1340_v52 = vmul.f32 0.2, %v4566_v21  ;;  %v1443_v42 = vpack.c.bf16 %v4820_v36, %v4817_v40 }
 0x1f0   :  { %v4980_v35 = vsel %vm1274_vm7, %v4560_v63, %v1338_v44  ;;  %v2902_v27 = vpack.c.bf16 %v4971_v34, %v4971_v34  ;;  %1721 = vst.msk [vmem:[%s5636_s5 + $0x7c] sm:$0xf] %vm1689_vm1, %v2901_v62  ;;  %vm1277_vm10 = vcmp.gt.f32.partialorder %v4569_v16, 0.0  ;;  %vm1278_vm11 = vcmp.gt.f32.partialorder %v4572_v38, 0.0  ;;  %v5848_v50 = vld [vmem:[#allocation28_spill] sm:$0xff] }
 0x1f1   :  { %v2903_v57 = vpack.c.bf16 %v4980_v35, %v4980_v35  ;;  %v5002_v63 = vsel %vm1275_vm8, %v4563_v29, %v1339_v61  ;;  %v5005_v40 = vsel %vm1276_vm9, %v4566_v21, %v1340_v52  ;;  %v1341_v36 = vmul.f32 0.2, %v4569_v16  ;;  %v5849_v61 = vld [vmem:[#allocation30_spill] sm:$0xff] }
 0x1f2   :  { %3170 = vmatmul.mubr.msk.bf16.gmra.mxu1 %vm632_vm0, %v1442_v54  ;;  %1722 = vst.msk [vmem:[%s5636_s5 + $0x80] sm:$0xf] %vm1689_vm1, %v2902_v27  ;;  %v1342_v13 = vmul.f32 0.2, %v4572_v38  ;;  %v1444_v10 = vpack.c.bf16 %v4861_v1, %v4843_v39  ;;  %v2904_v29 = vpack.c.bf16 %v5002_v63, %v5002_v63  ;;  %v2905_v21 = vpack.c.bf16 %v5005_v40, %v5005_v40  ;;  %v5847_v54 = vld [vmem:[#allocation29_spill] sm:$0xff] }
 0x1f3   :  { %3173 = vmatprep.mubr.msk.bf16.mxu1 %vm632_vm0, %v1443_v42  ;;  %1723 = vst.msk [vmem:[%s5636_s5 + $0x84] sm:$0xf] %vm1689_vm1, %v2903_v57  ;;  %vm1279_vm12 = vcmp.gt.f32.partialorder %v4575_v56, 0.0  ;;  %v5022_v55 = vsel %vm1277_vm10, %v4569_v16, %v1341_v36  ;;  %vm1280_vm13 = vcmp.gt.f32.partialorder %v4578_v2, 0.0  ;;  %v1343_v39 = vmul.f32 0.2, %v4575_v56 }
 0x1f4   :  { %v5025_v24 = vsel %vm1278_vm11, %v4572_v38, %v1342_v13  ;;  %v1445_v1 = vpack.c.bf16 %v4878_v59, %v4869_v41  ;;  %1724 = vst.msk [vmem:[%s5636_s5 + $0x88] sm:$0xf] %vm1689_vm1, %v2904_v29  ;;  %1725 = vst.msk [vmem:[%s5636_s5 + $0x8c] sm:$0xf] %vm1689_vm1, %v2905_v21  ;;  %v2906_v16 = vpack.c.bf16 %v5022_v55, %v5022_v55  ;;  %v1344_v18 = vmul.f32 0.2, %v4578_v2 }
 0x1f5   :  { %v2907_v38 = vpack.c.bf16 %v5025_v24, %v5025_v24  ;;  %v5045_v51 = vsel %vm1279_vm12, %v4575_v56, %v1343_v39  ;;  %vm1281_vm14 = vcmp.gt.f32.partialorder %v4581_v31, 0.0  ;;  %vm1282_vm15 = vcmp.gt.f32.partialorder %v4584_v4, 0.0  ;;  %v5850_v36 = vld [vmem:[#allocation18_spill] sm:$0xff] }
 0x1f6   :  { %v1345_v41 = vmul.f32 0.2, %v4581_v31  ;;  %v1446_v59 = vpack.c.bf16 %v4902_v20, %v4899_v17  ;;  %1726 = vst.msk [vmem:[%s5636_s5 + $0x90] sm:$0xf] %vm1689_vm1, %v2906_v16  ;;  %v5061_v56 = vsel %vm1280_vm13, %v4578_v2, %v1344_v18  ;;  %v2908_v6 = vpack.c.bf16 %v5045_v51, %v5045_v51 }
 0x1f7   :  { %1727 = vst.msk [vmem:[%s5636_s5 + $0x94] sm:$0xf] %vm1689_vm1, %v2907_v38  ;;  %v1346_v37 = vmul.f32 0.2, %v4584_v4  ;;  %v2909_v53 = vpack.c.bf16 %v5061_v56, %v5061_v56  ;;  %vm1283_vm2 = vcmp.gt.f32.partialorder %v4587_v49, 0.0  ;;  %vm1284_vm3 = vcmp.gt.f32.partialorder %v4590_v9, 0.0 }
 0x1f8   :  { %v5069_v15 = vsel %vm1281_vm14, %v4581_v31, %v1345_v41  ;;  %1728 = vst.msk [vmem:[%s5636_s5 + $0x98] sm:$0xf] %vm1689_vm1, %v2908_v6  ;;  %v1347_v17 = vmul.f32 0.2, %v4587_v49  ;;  %v1348_v31 = vmul.f32 0.2, %v4590_v9  ;;  %v1447_v20 = vpack.c.bf16 %v4925_v19, %v4922_v26 }
 0x1f9   :  { %v5078_v2 = vsel %vm1282_vm15, %v4584_v4, %v1346_v37  ;;  %v2910_v32 = vpack.c.bf16 %v5069_v15, %v5069_v15  ;;  %1729 = vst.msk [vmem:[%s5636_s5 + $0x9c] sm:$0xf] %vm1689_vm1, %v2909_v53  ;;  %vm1285_vm4 = vcmp.gt.f32.partialorder %v4593_v12, 0.0  ;;  %vm1286_vm5 = vcmp.gt.f32.partialorder %v4596_v22, 0.0 }
 0x1fa   :  { %3174 = vmatmul.mubr.msk.bf16.gmra.mxu1 %vm632_vm0, %v1444_v10  ;;  %v2911_v4 = vpack.c.bf16 %v5078_v2, %v5078_v2  ;;  %v5101_v5 = vsel %vm1283_vm2, %v4587_v49, %v1347_v17  ;;  %v5104_v8 = vsel %vm1284_vm3, %v4590_v9, %v1348_v31  ;;  %v1349_v43 = vmul.f32 0.2, %v4593_v12 }
 0x1fb   :  { %3177 = vmatprep.mubr.msk.bf16.mxu1 %vm632_vm0, %v1445_v1  ;;  %1730 = vst.msk [vmem:[%s5636_s5 + $0xa0] sm:$0xf] %vm1689_vm1, %v2910_v32  ;;  %v1350_v28 = vmul.f32 0.2, %v4596_v22  ;;  %v1448_v11 = vpack.c.bf16 %v4963_v58, %v4947_v3  ;;  %v2912_v26 = vpack.c.bf16 %v5101_v5, %v5101_v5  ;;  %v2913_v49 = vpack.c.bf16 %v5104_v8, %v5104_v8 }
 0x1fc   :  { %1731 = vst.msk [vmem:[%s5636_s5 + $0xa4] sm:$0xf] %vm1689_vm1, %v2911_v4  ;;  %vm1287_vm6 = vcmp.gt.f32.partialorder %v4599_v25, 0.0  ;;  %v5120_v9 = vsel %vm1285_vm4, %v4593_v12, %v1349_v43  ;;  %vm1288_vm7 = vcmp.gt.f32.partialorder %v5846_v46, 0.0  ;;  %v1351_v23 = vmul.f32 0.2, %v4599_v25 }
 0x1fd   :  { %v5123_v19 = vsel %vm1286_vm5, %v4596_v22, %v1350_v28  ;;  %v1449_v45 = vpack.c.bf16 %v4980_v35, %v4971_v34  ;;  %1732 = vst.msk [vmem:[%s5636_s5 + $0xa8] sm:$0xf] %vm1689_vm1, %v2912_v26  ;;  %1733 = vst.msk [vmem:[%s5636_s5 + $0xac] sm:$0xf] %vm1689_vm1, %v2913_v49  ;;  %v2914_v12 = vpack.c.bf16 %v5120_v9, %v5120_v9  ;;  %v1352_v60 = vmul.f32 0.2, %v5846_v46 }
 0x1fe   :  { %v2915_v22 = vpack.c.bf16 %v5123_v19, %v5123_v19  ;;  %v5143_v47 = vsel %vm1287_vm6, %v4599_v25, %v1351_v23  ;;  %vm1289_vm8 = vcmp.gt.f32.partialorder %v5847_v54, 0.0  ;;  %vm1290_vm9 = vcmp.gt.f32.partialorder %v5848_v50, 0.0  ;;  %v5851_v49 = vld [vmem:[#allocation15_spill] sm:$0xff]  ;;  %v5853_v35 = vld [vmem:[#allocation20_spill] sm:$0xff] }
 0x1ff   :  { %v1353_v44 = vmul.f32 0.2, %v5847_v54  ;;  %1734 = vst.msk [vmem:[%s5636_s5 + $0xb0] sm:$0xf] %vm1689_vm1, %v2914_v12  ;;  %v5157_v62 = vsel %vm1288_vm7, %v5846_v46, %v1352_v60  ;;  %v2916_v25 = vpack.c.bf16 %v5143_v47, %v5143_v47  ;;  %v1354_v27 = vmul.f32 0.2, %v5848_v50 }
 0x200   :  { %1735 = vst.msk [vmem:[%s5636_s5 + $0xb4] sm:$0xf] %vm1689_vm1, %v2915_v22  ;;  %vm1291_vm10 = vcmp.gt.f32.partialorder %v5849_v61, 0.0  ;;  %v1456_v52 = vpack.c.bf16 %v5157_v62, %v5143_v47  ;;  %v2917_v42 = vpack.c.bf16 %v5157_v62, %v5157_v62  ;;  %vm1292_vm11 = vcmp.gt.f32.partialorder %v5850_v36, 0.0  ;;  %v5852_v12 = vld [vmem:[#allocation17_spill] sm:$0xff] }
 0x201   :  { %v5168_v57 = vsel %vm1289_vm8, %v5847_v54, %v1353_v44  ;;  %1736 = vst.msk [vmem:[%s5636_s5 + $0xb8] sm:$0xf] %vm1689_vm1, %v2916_v25  ;;  %v5177_v13 = vsel %vm1290_vm9, %v5848_v50, %v1354_v27  ;;  %v1355_v29 = vmul.f32 0.2, %v5849_v61  ;;  %v1356_v21 = vmul.f32 0.2, %v5850_v36 }
 0x202   :  { %3178 = vmatmul.mubr.msk.bf16.gmra.mxu1 %vm632_vm0, %v1446_v59  ;;  %v2918_v10 = vpack.c.bf16 %v5168_v57, %v5168_v57  ;;  %1737 = vst.msk [vmem:[%s5636_s5 + $0xbc] sm:$0xf] %vm1689_vm1, %v2917_v42  ;;  %v1457_v39 = vpack.c.bf16 %v5177_v13, %v5168_v57  ;;  %v2919_v1 = vpack.c.bf16 %v5177_v13, %v5177_v13  ;;  %vm1293_vm12 = vcmp.gt.f32.partialorder %v4683_v48, 0.0  ;;  %v5855_v50 = vld [vmem:[#allocation6_spill] sm:$0xff] }
 0x203   :  { %3181 = vmatprep.mubr.msk.bf16.mxu1 %vm632_vm0, %v1447_v20  ;;  %vm1294_vm13 = vcmp.gt.f32.partialorder %v4729_v30, 0.0  ;;  %v5201_v16 = vsel %vm1291_vm10, %v5849_v61, %v1355_v29  ;;  %v5204_v38 = vsel %vm1292_vm11, %v5850_v36, %v1356_v21  ;;  %v1357_v18 = vmul.f32 0.2, %v4683_v48  ;;  %v5857_v29 = vld [vmem:[#allocation12_spill] sm:$0xff] }
 0x204   :  { %1738 = vst.msk [vmem:[%s5636_s5 + $0xc0] sm:$0xf] %vm1689_vm1, %v2918_v10  ;;  %v1358_v41 = vmul.f32 0.2, %v4729_v30  ;;  %1739 = vst.msk [vmem:[%s5636_s5 + $0xc4] sm:$0xf] %vm1689_vm1, %v2919_v1  ;;  %v1458_v59 = vpack.c.bf16 %v5204_v38, %v5201_v16  ;;  %v2920_v6 = vpack.c.bf16 %v5201_v16, %v5201_v16  ;;  %v2921_v37 = vpack.c.bf16 %v5204_v38, %v5204_v38 }
 0x205   :  { %vm1295_vm14 = vcmp.gt.f32.partialorder %v4750_v33, 0.0  ;;  %v5220_v53 = vsel %vm1293_vm12, %v4683_v48, %v1357_v18  ;;  %vm1296_vm15 = vcmp.gt.f32.partialorder %v4826_v7, 0.0  ;;  %v1359_v17 = vmul.f32 0.2, %v4750_v33  ;;  %v5856_v10 = vld [vmem:[#allocation22_spill] sm:$0xff] }
 0x206   :  { %v5223_v32 = vsel %vm1294_vm13, %v4729_v30, %v1358_v41  ;;  %1740 = vst.msk [vmem:[%s5636_s5 + $0xc8] sm:$0xf] %vm1689_vm1, %v2920_v6  ;;  %1741 = vst.msk [vmem:[%s5636_s5 + $0xcc] sm:$0xf] %vm1689_vm1, %v2921_v37  ;;  %v2922_v30 = vpack.c.bf16 %v5220_v53, %v5220_v53  ;;  %v1360_v20 = vmul.f32 0.2, %v4826_v7  ;;  %v1450_v1 = vpack.c.bf16 %v5005_v40, %v5002_v63 }
 0x207   :  { %v1459_v48 = vpack.c.bf16 %v5223_v32, %v5220_v53  ;;  %v2923_v31 = vpack.c.bf16 %v5223_v32, %v5223_v32  ;;  %v5243_v4 = vsel %vm1295_vm14, %v4750_v33, %v1359_v17  ;;  %vm1297_vm2 = vcmp.gt.f32.partialorder %v4908_v14, 0.0 }
 0x208   :  { %vm1298_vm3 = vcmp.gt.f32.partialorder %v4931_v0, 0.0  ;;  %v1361_v43 = vmul.f32 0.2, %v4908_v14  ;;  %1742 = vst.msk [vmem:[%s5636_s5 + $0xd0] sm:$0xf] %vm1689_vm1, %v2922_v30  ;;  %v5257_v28 = vsel %vm1296_vm15, %v4826_v7, %v1360_v20  ;;  %v2924_v33 = vpack.c.bf16 %v5243_v4, %v5243_v4 }
 0x209   :  { %1743 = vst.msk [vmem:[%s5636_s5 + $0xd4] sm:$0xf] %vm1689_vm1, %v2923_v31  ;;  %v1362_v26 = vmul.f32 0.2, %v4931_v0  ;;  %vm1299_vm4 = vcmp.gt.f32.partialorder %v5851_v49, 0.0  ;;  %v1460_v46 = vpack.c.bf16 %v5257_v28, %v5243_v4  ;;  %v2925_v23 = vpack.c.bf16 %v5257_v28, %v5257_v28 }
 0x20a   :  { %3182 = vmatmul.mubr.msk.bf16.gmra.mxu1 %vm632_vm0, %v1448_v11  ;;  %v1425_v7 = vsel %vm1297_vm2, %v4908_v14, %v1361_v43  ;;  %vm1300_vm5 = vcmp.gt.f32.partialorder %v5852_v12, 0.0  ;;  %1744 = vst.msk [vmem:[%s5636_s5 + $0xd8] sm:$0xf] %vm1689_vm1, %v2924_v33  ;;  %v1363_v11 = vmul.f32 0.2, %v5851_v49  ;;  %vm1301_vm6 = vcmp.gt.f32.partialorder %v5853_v35, 0.0 }
 0x20b   :  { %3185 = vmatprep.mubr.msk.bf16.mxu1 %vm632_vm0, %v1449_v45  ;;  %v1426_v3 = vsel %vm1298_vm3, %v4931_v0, %v1362_v26  ;;  %v2926_v58 = vpack.c.bf16 %v1425_v7, %v1425_v7  ;;  %v1364_v22 = vmul.f32 0.2, %v5852_v12  ;;  %1745 = vst.msk [vmem:[%s5636_s5 + $0xdc] sm:$0xf] %vm1689_vm1, %v2925_v23  ;;  %v5854_v45 = vld [vmem:[#allocation4_spill] sm:$0xff]  ;;  %vm1303_vm8 = vcmp.gt.f32.partialorder %v5856_v10, 0.0 }
 0x20c   :  { %v1461_v14 = vpack.c.bf16 %v1426_v3, %v1425_v7  ;;  %v2927_v34 = vpack.c.bf16 %v1426_v3, %v1426_v3  ;;  %vm1302_vm7 = vcmp.gt.f32.partialorder %v5854_v45, 0.0  ;;  %v1427_v0 = vsel %vm1299_vm4, %v5851_v49, %v1363_v11 }
 0x20d   :  { %1746 = vst.msk [vmem:[%s5636_s5 + $0xe0] sm:$0xf] %vm1689_vm1, %v2926_v58  ;;  %v1428_v60 = vsel %vm1300_vm5, %v5852_v12, %v1364_v22  ;;  %v1365_v54 = vmul.f32 0.2, %v5853_v35  ;;  %v1430_v44 = vsel %vm1302_vm7, %v5854_v45, %v5855_v50  ;;  %v2928_v27 = vpack.c.bf16 %v1427_v0, %v1427_v0 }
 0x20e   :  { %1747 = vst.msk [vmem:[%s5636_s5 + $0xe4] sm:$0xf] %vm1689_vm1, %v2927_v34  ;;  %v1462_v25 = vpack.c.bf16 %v1428_v60, %v1427_v0  ;;  %v2929_v61 = vpack.c.bf16 %v1428_v60, %v1428_v60  ;;  %v2931_v42 = vpack.c.bf16 %v1430_v44, %v1430_v44  ;;  %vm1304_vm9 = vcmp.gt.f32.partialorder %v5857_v29, 0.0 }
 0x20f   :  { %v1429_v36 = vsel %vm1301_vm6, %v5853_v35, %v1365_v54  ;;  %v1367_v21 = vmul.f32 0.2, %v5856_v10  ;;  %1748 = vst.msk [vmem:[%s5636_s5 + $0xe8] sm:$0xf] %vm1689_vm1, %v2928_v27  ;;  %v1368_v6 = vmul.f32 0.2, %v5857_v29  ;;  %v1451_v63 = vpack.c.bf16 %v5025_v24, %v5022_v55 }
 0x210   :  { %1749 = vst.msk [vmem:[%s5636_s5 + $0xec] sm:$0xf] %vm1689_vm1, %v2929_v61  ;;  %v1463_v18 = vpack.c.bf16 %v1430_v44, %v1429_v36  ;;  %v2930_v41 = vpack.c.bf16 %v1429_v36, %v1429_v36  ;;  %1751 = vst.msk [vmem:[%s5636_s5 + $0xf4] sm:$0xf] %vm1689_vm1, %v2931_v42  ;;  %v1452_v55 = vpack.c.bf16 %v5061_v56, %v5045_v51 }
 0x211   :  { %v1431_v40 = vsel %vm1303_vm8, %v5856_v10, %v1367_v21  ;;  %v1432_v37 = vsel %vm1304_vm9, %v5857_v29, %v1368_v6  ;;  %v1453_v24 = vpack.c.bf16 %v5078_v2, %v5069_v15  ;;  %v1454_v20 = vpack.c.bf16 %v5104_v8, %v5101_v5 }
 0x212   :  { %3186 = vmatmul.mubr.msk.bf16.gmra.mxu1 %vm632_vm0, %v1450_v1  ;;  %1750 = vst.msk [vmem:[%s5636_s5 + $0xf0] sm:$0xf] %vm1689_vm1, %v2930_v41  ;;  %v2932_v17 = vpack.c.bf16 %v1431_v40, %v1431_v40  ;;  %v1464_v30 = vpack.c.bf16 %v1432_v37, %v1431_v40  ;;  %v2933_v31 = vpack.c.bf16 %v1432_v37, %v1432_v37 }
 0x213   :  { %3189 = vmatprep.mubr.msk.bf16.mxu1 %vm632_vm0, %v1451_v63  ;;  %v1455_v4 = vpack.c.bf16 %v5123_v19, %v5120_v9 }
 0x214   :  { %1752 = vst.msk [vmem:[%s5636_s5 + $0xf8] sm:$0xf] %vm1689_vm1, %v2932_v17  ;;  %1753 = vst.msk [vmem:[%s5636_s5 + $0xfc] sm:$0xf] %vm1689_vm1, %v2933_v31 }
 0x21a   :  { %3190 = vmatmul.mubr.msk.bf16.gmra.mxu1 %vm632_vm0, %v1452_v55 }
 0x21b   :  { %3193 = vmatprep.mubr.msk.bf16.mxu1 %vm632_vm0, %v1453_v24 }
 0x222   :  { %3194 = vmatmul.mubr.msk.bf16.gmra.mxu1 %vm632_vm0, %v1454_v20 }
 0x223   :  { %3197 = vmatprep.mubr.msk.bf16.mxu1 %vm632_vm0, %v1455_v4 }
 0x22a   :  { %3198 = vmatmul.mubr.msk.bf16.gmra.mxu1 %vm632_vm0, %v1456_v52 }
 0x22b   :  { %3201 = vmatprep.mubr.msk.bf16.mxu1 %vm632_vm0, %v1457_v39 }
 0x232   :  { %3202 = vmatmul.mubr.msk.bf16.gmra.mxu1 %vm632_vm0, %v1458_v59 }
 0x233   :  { %3205 = vmatprep.mubr.msk.bf16.mxu1 %vm632_vm0, %v1459_v48 }
 0x23a   :  { %3206 = vmatmul.mubr.msk.bf16.gmra.mxu1 %vm632_vm0, %v1460_v46 }
 0x23b   :  { %3209 = vmatprep.mubr.msk.bf16.mxu1 %vm632_vm0, %v1461_v14 }
 0x242   :  { %3210 = vmatmul.mubr.msk.bf16.gmra.mxu1 %vm632_vm0, %v1462_v25 }
 0x243   :  { %3213 = vmatprep.mubr.msk.bf16.mxu1 %vm632_vm0, %v1463_v18 }
 0x24a   :  { %3214 = vmatmul.mubr.msk.bf16.gmra.mxu1 %vm632_vm0, %v1464_v30 }
 0x292   :  { %v3155_v51 = vpop.f32.mrf.mxu1 }
 0x293   :  { %vm2149_vm10 = vcmp.gt.f32.partialorder %v3155_v51, 0.0  ;;  %v2213_v56 = vmul.f32 0.2, %v3155_v51 }
 0x294   :  { %v1892_v15 = vpop.f32.mrf.mxu1 }
 0x295   :  { %v2277_v2 = vsel %vm2149_vm10, %v3155_v51, %v2213_v56  ;;  %vm2147_vm11 = vcmp.gt.f32.partialorder %v1892_v15, 0.0  ;;  %v2211_v5 = vmul.f32 0.2, %v1892_v15 }
 0x296   :  { %v2936_v8 = vpack.c.bf16 %v2277_v2, %v2277_v2  ;;  %v3156_v9 = vpop.f32.mrf.mxu1 }
 0x297   :  { %v2275_v19 = vsel %vm2147_vm11, %v1892_v15, %v2211_v5  ;;  %vm2150_vm12 = vcmp.gt.f32.partialorder %v3156_v9, 0.0  ;;  %v2214_v47 = vmul.f32 0.2, %v3156_v9 }
 0x298   :  { %2597 = vst.msk [vmem:[%s5637_s6 + $0x8] sm:$0xf] %vm1689_vm1, %v2936_v8  ;;  %v2934_v62 = vpack.c.bf16 %v2275_v19, %v2275_v19  ;;  %v1895_v52 = vpop.f32.mrf.mxu1 }
 0x299   :  { %v2278_v57 = vsel %vm2150_vm12, %v3156_v9, %v2214_v47  ;;  %vm2148_vm0 = vcmp.gt.f32.partialorder %v1895_v52, 0.0  ;;  %v2212_v13 = vmul.f32 0.2, %v1895_v52 }
 0x29a   :  { %2595 = vst.msk [vmem:[%s5637_s6] sm:$0xf] %vm1689_vm1, %v2934_v62  ;;  %v2937_v39 = vpack.c.bf16 %v2278_v57, %v2278_v57  ;;  %v3159_v16 = vpop.f32.mrf.mxu1 }
 0x29b   :  { %v2276_v38 = vsel %vm2148_vm0, %v1895_v52, %v2212_v13  ;;  %vm2153_vm13 = vcmp.gt.f32.partialorder %v3159_v16, 0.0  ;;  %v2217_v59 = vmul.f32 0.2, %v3159_v16 }
 0x29c   :  { %2598 = vst.msk [vmem:[%s5637_s6 + $0xc] sm:$0xf] %vm1689_vm1, %v2937_v39  ;;  %v2935_v53 = vpack.c.bf16 %v2276_v38, %v2276_v38  ;;  %v1908_v32 = vpop.f32.mrf.mxu1 }
 0x29d   :  { %v2281_v48 = vsel %vm2153_vm13, %v3159_v16, %v2217_v59  ;;  %vm2151_vm14 = vcmp.gt.f32.partialorder %v1908_v32, 0.0  ;;  %v2215_v43 = vmul.f32 0.2, %v1908_v32 }
 0x29e   :  { %2596 = vst.msk [vmem:[%s5637_s6 + $0x4] sm:$0xf] %vm1689_vm1, %v2935_v53  ;;  %v2940_v28 = vpack.c.bf16 %v2281_v48, %v2281_v48  ;;  %v3160_v33 = vpop.f32.mrf.mxu1 }
 0x29f   :  { %v2279_v26 = vsel %vm2151_vm14, %v1908_v32, %v2215_v43  ;;  %vm2154_vm15 = vcmp.gt.f32.partialorder %v3160_v33, 0.0  ;;  %v2218_v49 = vmul.f32 0.2, %v3160_v33 }
 0x2a0   :  { %2601 = vst.msk [vmem:[%s5637_s6 + $0x18] sm:$0xf] %vm1689_vm1, %v2940_v28  ;;  %v2938_v46 = vpack.c.bf16 %v2279_v26, %v2279_v26  ;;  %v1911_v23 = vpop.f32.mrf.mxu1 }
 0x2a1   :  { %v2282_v7 = vsel %vm2154_vm15, %v3160_v33, %v2218_v49  ;;  %vm2152_vm2 = vcmp.gt.f32.partialorder %v1911_v23, 0.0  ;;  %v2216_v12 = vmul.f32 0.2, %v1911_v23 }
 0x2a2   :  { %2599 = vst.msk [vmem:[%s5637_s6 + $0x10] sm:$0xf] %vm1689_vm1, %v2938_v46  ;;  %v2941_v3 = vpack.c.bf16 %v2282_v7, %v2282_v7  ;;  %v3163_v58 = vpop.f32.mrf.mxu1 }
 0x2a3   :  { %v2280_v11 = vsel %vm2152_vm2, %v1911_v23, %v2216_v12  ;;  %vm2157_vm3 = vcmp.gt.f32.partialorder %v3163_v58, 0.0  ;;  %v2221_v22 = vmul.f32 0.2, %v3163_v58 }
 0x2a4   :  { %2602 = vst.msk [vmem:[%s5637_s6 + $0x1c] sm:$0xf] %vm1689_vm1, %v2941_v3  ;;  %v2939_v14 = vpack.c.bf16 %v2280_v11, %v2280_v11  ;;  %v1924_v34 = vpop.f32.mrf.mxu1 }
 0x2a5   :  { %v2285_v35 = vsel %vm2157_vm3, %v3163_v58, %v2221_v22  ;;  %vm2155_vm4 = vcmp.gt.f32.partialorder %v1924_v34, 0.0  ;;  %v2219_v45 = vmul.f32 0.2, %v1924_v34 }
 0x2a6   :  { %2600 = vst.msk [vmem:[%s5637_s6 + $0x14] sm:$0xf] %vm1689_vm1, %v2939_v14  ;;  %v2944_v0 = vpack.c.bf16 %v2285_v35, %v2285_v35  ;;  %v3164_v60 = vpop.f32.mrf.mxu1 }
 0x2a7   :  { %v2283_v54 = vsel %vm2155_vm4, %v1924_v34, %v2219_v45  ;;  %vm2158_vm5 = vcmp.gt.f32.partialorder %v3164_v60, 0.0  ;;  %v2222_v50 = vmul.f32 0.2, %v3164_v60 }
 0x2a8   :  { %2605 = vst.msk [vmem:[%s5637_s6 + $0x28] sm:$0xf] %vm1689_vm1, %v2944_v0  ;;  %v2942_v44 = vpack.c.bf16 %v2283_v54, %v2283_v54  ;;  %v1927_v25 = vpop.f32.mrf.mxu1 }
 0x2a9   :  { %v2286_v27 = vsel %vm2158_vm5, %v3164_v60, %v2222_v50  ;;  %vm2156_vm6 = vcmp.gt.f32.partialorder %v1927_v25, 0.0  ;;  %v2220_v61 = vmul.f32 0.2, %v1927_v25 }
 0x2aa   :  { %2603 = vst.msk [vmem:[%s5637_s6 + $0x20] sm:$0xf] %vm1689_vm1, %v2942_v44  ;;  %v2945_v42 = vpack.c.bf16 %v2286_v27, %v2286_v27  ;;  %v3167_v36 = vpop.f32.mrf.mxu1 }
 0x2ab   :  { %v2284_v10 = vsel %vm2156_vm6, %v1927_v25, %v2220_v61  ;;  %vm2161_vm7 = vcmp.gt.f32.partialorder %v3167_v36, 0.0  ;;  %v2225_v29 = vmul.f32 0.2, %v3167_v36 }
 0x2ac   :  { %2606 = vst.msk [vmem:[%s5637_s6 + $0x2c] sm:$0xf] %vm1689_vm1, %v2945_v42  ;;  %v2943_v21 = vpack.c.bf16 %v2284_v10, %v2284_v10  ;;  %v1940_v1 = vpop.f32.mrf.mxu1 }
 0x2ad   :  { %v2289_v18 = vsel %vm2161_vm7, %v3167_v36, %v2225_v29  ;;  %vm2159_vm8 = vcmp.gt.f32.partialorder %v1940_v1, 0.0  ;;  %v2223_v41 = vmul.f32 0.2, %v1940_v1 }
 0x2ae   :  { %2604 = vst.msk [vmem:[%s5637_s6 + $0x24] sm:$0xf] %vm1689_vm1, %v2943_v21  ;;  %v2948_v6 = vpack.c.bf16 %v2289_v18, %v2289_v18  ;;  %v3168_v63 = vpop.f32.mrf.mxu1 }
 0x2af   :  { %v2287_v40 = vsel %vm2159_vm8, %v1940_v1, %v2223_v41  ;;  %vm2162_vm9 = vcmp.gt.f32.partialorder %v3168_v63, 0.0  ;;  %v2226_v37 = vmul.f32 0.2, %v3168_v63 }
 0x2b0   :  { %2609 = vst.msk [vmem:[%s5637_s6 + $0x38] sm:$0xf] %vm1689_vm1, %v2948_v6  ;;  %v2946_v17 = vpack.c.bf16 %v2287_v40, %v2287_v40  ;;  %v1943_v30 = vpop.f32.mrf.mxu1 }
 0x2b1   :  { %v2290_v31 = vsel %vm2162_vm9, %v3168_v63, %v2226_v37  ;;  %vm2160_vm10 = vcmp.gt.f32.partialorder %v1943_v30, 0.0  ;;  %v2224_v55 = vmul.f32 0.2, %v1943_v30 }
 0x2b2   :  { %2607 = vst.msk [vmem:[%s5637_s6 + $0x30] sm:$0xf] %vm1689_vm1, %v2946_v17  ;;  %v2949_v24 = vpack.c.bf16 %v2290_v31, %v2290_v31  ;;  %v3171_v20 = vpop.f32.mrf.mxu1 }
 0x2b3   :  { %v2288_v4 = vsel %vm2160_vm10, %v1943_v30, %v2224_v55  ;;  %vm2165_vm11 = vcmp.gt.f32.partialorder %v3171_v20, 0.0  ;;  %v2229_v51 = vmul.f32 0.2, %v3171_v20 }
 0x2b4   :  { %2610 = vst.msk [vmem:[%s5637_s6 + $0x3c] sm:$0xf] %vm1689_vm1, %v2949_v24  ;;  %v2947_v56 = vpack.c.bf16 %v2288_v4, %v2288_v4  ;;  %v1956_v15 = vpop.f32.mrf.mxu1 }
 0x2b5   :  { %v2293_v2 = vsel %vm2165_vm11, %v3171_v20, %v2229_v51  ;;  %vm2163_vm12 = vcmp.gt.f32.partialorder %v1956_v15, 0.0  ;;  %v2227_v5 = vmul.f32 0.2, %v1956_v15 }
 0x2b6   :  { %2608 = vst.msk [vmem:[%s5637_s6 + $0x34] sm:$0xf] %vm1689_vm1, %v2947_v56  ;;  %v2952_v8 = vpack.c.bf16 %v2293_v2, %v2293_v2  ;;  %v3172_v9 = vpop.f32.mrf.mxu1 }
 0x2b7   :  { %v2291_v19 = vsel %vm2163_vm12, %v1956_v15, %v2227_v5  ;;  %vm2166_vm0 = vcmp.gt.f32.partialorder %v3172_v9, 0.0  ;;  %v2230_v47 = vmul.f32 0.2, %v3172_v9 }
 0x2b8   :  { %2613 = vst.msk [vmem:[%s5637_s6 + $0x48] sm:$0xf] %vm1689_vm1, %v2952_v8  ;;  %v2950_v62 = vpack.c.bf16 %v2291_v19, %v2291_v19  ;;  %v1959_v52 = vpop.f32.mrf.mxu1 }
 0x2b9   :  { %v2294_v57 = vsel %vm2166_vm0, %v3172_v9, %v2230_v47  ;;  %vm2164_vm13 = vcmp.gt.f32.partialorder %v1959_v52, 0.0  ;;  %v2228_v13 = vmul.f32 0.2, %v1959_v52 }
 0x2ba   :  { %2611 = vst.msk [vmem:[%s5637_s6 + $0x40] sm:$0xf] %vm1689_vm1, %v2950_v62  ;;  %v2953_v39 = vpack.c.bf16 %v2294_v57, %v2294_v57  ;;  %v3175_v16 = vpop.f32.mrf.mxu1 }
 0x2bb   :  { %v2292_v38 = vsel %vm2164_vm13, %v1959_v52, %v2228_v13  ;;  %vm2169_vm14 = vcmp.gt.f32.partialorder %v3175_v16, 0.0  ;;  %v2233_v59 = vmul.f32 0.2, %v3175_v16 }
 0x2bc   :  { %2614 = vst.msk [vmem:[%s5637_s6 + $0x4c] sm:$0xf] %vm1689_vm1, %v2953_v39  ;;  %v2951_v53 = vpack.c.bf16 %v2292_v38, %v2292_v38  ;;  %v1972_v32 = vpop.f32.mrf.mxu1 }
 0x2bd   :  { %v2297_v48 = vsel %vm2169_vm14, %v3175_v16, %v2233_v59  ;;  %vm2167_vm15 = vcmp.gt.f32.partialorder %v1972_v32, 0.0  ;;  %v2231_v43 = vmul.f32 0.2, %v1972_v32 }
 0x2be   :  { %2612 = vst.msk [vmem:[%s5637_s6 + $0x44] sm:$0xf] %vm1689_vm1, %v2951_v53  ;;  %v2956_v28 = vpack.c.bf16 %v2297_v48, %v2297_v48  ;;  %v3176_v33 = vpop.f32.mrf.mxu1 }
 0x2bf   :  { %v2295_v26 = vsel %vm2167_vm15, %v1972_v32, %v2231_v43  ;;  %vm2170_vm2 = vcmp.gt.f32.partialorder %v3176_v33, 0.0  ;;  %v2234_v49 = vmul.f32 0.2, %v3176_v33 }
 0x2c0   :  { %2617 = vst.msk [vmem:[%s5637_s6 + $0x58] sm:$0xf] %vm1689_vm1, %v2956_v28  ;;  %v2954_v46 = vpack.c.bf16 %v2295_v26, %v2295_v26  ;;  %v1975_v23 = vpop.f32.mrf.mxu1 }
 0x2c1   :  { %v2298_v7 = vsel %vm2170_vm2, %v3176_v33, %v2234_v49  ;;  %vm2168_vm3 = vcmp.gt.f32.partialorder %v1975_v23, 0.0  ;;  %v2232_v12 = vmul.f32 0.2, %v1975_v23 }
 0x2c2   :  { %2615 = vst.msk [vmem:[%s5637_s6 + $0x50] sm:$0xf] %vm1689_vm1, %v2954_v46  ;;  %v2957_v3 = vpack.c.bf16 %v2298_v7, %v2298_v7  ;;  %v3179_v58 = vpop.f32.mrf.mxu1 }
 0x2c3   :  { %v2296_v11 = vsel %vm2168_vm3, %v1975_v23, %v2232_v12  ;;  %vm2173_vm4 = vcmp.gt.f32.partialorder %v3179_v58, 0.0  ;;  %v2237_v22 = vmul.f32 0.2, %v3179_v58 }
 0x2c4   :  { %2618 = vst.msk [vmem:[%s5637_s6 + $0x5c] sm:$0xf] %vm1689_vm1, %v2957_v3  ;;  %v2955_v14 = vpack.c.bf16 %v2296_v11, %v2296_v11  ;;  %v1988_v34 = vpop.f32.mrf.mxu1 }
 0x2c5   :  { %v2301_v35 = vsel %vm2173_vm4, %v3179_v58, %v2237_v22  ;;  %vm2171_vm5 = vcmp.gt.f32.partialorder %v1988_v34, 0.0  ;;  %v2235_v45 = vmul.f32 0.2, %v1988_v34 }
 0x2c6   :  { %2616 = vst.msk [vmem:[%s5637_s6 + $0x54] sm:$0xf] %vm1689_vm1, %v2955_v14  ;;  %v2960_v0 = vpack.c.bf16 %v2301_v35, %v2301_v35  ;;  %v3180_v60 = vpop.f32.mrf.mxu1 }
 0x2c7   :  { %v2299_v54 = vsel %vm2171_vm5, %v1988_v34, %v2235_v45  ;;  %vm2174_vm6 = vcmp.gt.f32.partialorder %v3180_v60, 0.0  ;;  %v2238_v50 = vmul.f32 0.2, %v3180_v60 }
 0x2c8   :  { %2621 = vst.msk [vmem:[%s5637_s6 + $0x68] sm:$0xf] %vm1689_vm1, %v2960_v0  ;;  %v2958_v44 = vpack.c.bf16 %v2299_v54, %v2299_v54  ;;  %v1991_v25 = vpop.f32.mrf.mxu1 }
 0x2c9   :  { %v2302_v27 = vsel %vm2174_vm6, %v3180_v60, %v2238_v50  ;;  %vm2172_vm7 = vcmp.gt.f32.partialorder %v1991_v25, 0.0  ;;  %v2236_v61 = vmul.f32 0.2, %v1991_v25 }
 0x2ca   :  { %2619 = vst.msk [vmem:[%s5637_s6 + $0x60] sm:$0xf] %vm1689_vm1, %v2958_v44  ;;  %v2961_v42 = vpack.c.bf16 %v2302_v27, %v2302_v27  ;;  %v3183_v36 = vpop.f32.mrf.mxu1 }
 0x2cb   :  { %v2300_v10 = vsel %vm2172_vm7, %v1991_v25, %v2236_v61  ;;  %vm2177_vm8 = vcmp.gt.f32.partialorder %v3183_v36, 0.0  ;;  %v2241_v29 = vmul.f32 0.2, %v3183_v36 }
 0x2cc   :  { %2622 = vst.msk [vmem:[%s5637_s6 + $0x6c] sm:$0xf] %vm1689_vm1, %v2961_v42  ;;  %v2959_v21 = vpack.c.bf16 %v2300_v10, %v2300_v10  ;;  %v2004_v1 = vpop.f32.mrf.mxu1 }
 0x2cd   :  { %v2305_v18 = vsel %vm2177_vm8, %v3183_v36, %v2241_v29  ;;  %vm2175_vm9 = vcmp.gt.f32.partialorder %v2004_v1, 0.0  ;;  %v2239_v41 = vmul.f32 0.2, %v2004_v1 }
 0x2ce   :  { %2620 = vst.msk [vmem:[%s5637_s6 + $0x64] sm:$0xf] %vm1689_vm1, %v2959_v21  ;;  %v2964_v6 = vpack.c.bf16 %v2305_v18, %v2305_v18  ;;  %v3184_v63 = vpop.f32.mrf.mxu1 }
 0x2cf   :  { %v2303_v40 = vsel %vm2175_vm9, %v2004_v1, %v2239_v41  ;;  %vm2178_vm10 = vcmp.gt.f32.partialorder %v3184_v63, 0.0  ;;  %v2242_v37 = vmul.f32 0.2, %v3184_v63 }
 0x2d0   :  { %2625 = vst.msk [vmem:[%s5637_s6 + $0x78] sm:$0xf] %vm1689_vm1, %v2964_v6  ;;  %v2962_v17 = vpack.c.bf16 %v2303_v40, %v2303_v40  ;;  %v2007_v30 = vpop.f32.mrf.mxu1 }
 0x2d1   :  { %v2306_v31 = vsel %vm2178_vm10, %v3184_v63, %v2242_v37  ;;  %vm2176_vm11 = vcmp.gt.f32.partialorder %v2007_v30, 0.0  ;;  %v2240_v55 = vmul.f32 0.2, %v2007_v30 }
 0x2d2   :  { %2623 = vst.msk [vmem:[%s5637_s6 + $0x70] sm:$0xf] %vm1689_vm1, %v2962_v17  ;;  %v2965_v24 = vpack.c.bf16 %v2306_v31, %v2306_v31  ;;  %v3187_v20 = vpop.f32.mrf.mxu1 }
 0x2d3   :  { %v2304_v4 = vsel %vm2176_vm11, %v2007_v30, %v2240_v55  ;;  %vm2181_vm12 = vcmp.gt.f32.partialorder %v3187_v20, 0.0  ;;  %v2245_v51 = vmul.f32 0.2, %v3187_v20 }
 0x2d4   :  { %2626 = vst.msk [vmem:[%s5637_s6 + $0x7c] sm:$0xf] %vm1689_vm1, %v2965_v24  ;;  %v2963_v56 = vpack.c.bf16 %v2304_v4, %v2304_v4  ;;  %v2020_v15 = vpop.f32.mrf.mxu1 }
 0x2d5   :  { %v2309_v2 = vsel %vm2181_vm12, %v3187_v20, %v2245_v51  ;;  %vm2179_vm0 = vcmp.gt.f32.partialorder %v2020_v15, 0.0  ;;  %v2243_v5 = vmul.f32 0.2, %v2020_v15 }
 0x2d6   :  { %2624 = vst.msk [vmem:[%s5637_s6 + $0x74] sm:$0xf] %vm1689_vm1, %v2963_v56  ;;  %v2968_v8 = vpack.c.bf16 %v2309_v2, %v2309_v2  ;;  %v3188_v9 = vpop.f32.mrf.mxu1 }
 0x2d7   :  { %v2307_v19 = vsel %vm2179_vm0, %v2020_v15, %v2243_v5  ;;  %vm2182_vm13 = vcmp.gt.f32.partialorder %v3188_v9, 0.0  ;;  %v2246_v47 = vmul.f32 0.2, %v3188_v9 }
 0x2d8   :  { %2629 = vst.msk [vmem:[%s5637_s6 + $0x88] sm:$0xf] %vm1689_vm1, %v2968_v8  ;;  %v2966_v62 = vpack.c.bf16 %v2307_v19, %v2307_v19  ;;  %v2023_v52 = vpop.f32.mrf.mxu1 }
 0x2d9   :  { %v2310_v57 = vsel %vm2182_vm13, %v3188_v9, %v2246_v47  ;;  %vm2180_vm14 = vcmp.gt.f32.partialorder %v2023_v52, 0.0  ;;  %v2244_v13 = vmul.f32 0.2, %v2023_v52 }
 0x2da   :  { %2627 = vst.msk [vmem:[%s5637_s6 + $0x80] sm:$0xf] %vm1689_vm1, %v2966_v62  ;;  %v2969_v39 = vpack.c.bf16 %v2310_v57, %v2310_v57  ;;  %v3191_v16 = vpop.f32.mrf.mxu1 }
 0x2db   :  { %v2308_v38 = vsel %vm2180_vm14, %v2023_v52, %v2244_v13  ;;  %vm2185_vm15 = vcmp.gt.f32.partialorder %v3191_v16, 0.0  ;;  %v2249_v59 = vmul.f32 0.2, %v3191_v16 }
 0x2dc   :  { %2630 = vst.msk [vmem:[%s5637_s6 + $0x8c] sm:$0xf] %vm1689_vm1, %v2969_v39  ;;  %v2967_v53 = vpack.c.bf16 %v2308_v38, %v2308_v38  ;;  %v2036_v32 = vpop.f32.mrf.mxu1 }
 0x2dd   :  { %v2313_v48 = vsel %vm2185_vm15, %v3191_v16, %v2249_v59  ;;  %vm2183_vm2 = vcmp.gt.f32.partialorder %v2036_v32, 0.0  ;;  %v2247_v43 = vmul.f32 0.2, %v2036_v32 }
 0x2de   :  { %2628 = vst.msk [vmem:[%s5637_s6 + $0x84] sm:$0xf] %vm1689_vm1, %v2967_v53  ;;  %v2972_v28 = vpack.c.bf16 %v2313_v48, %v2313_v48  ;;  %v3192_v33 = vpop.f32.mrf.mxu1 }
 0x2df   :  { %v2311_v26 = vsel %vm2183_vm2, %v2036_v32, %v2247_v43  ;;  %vm2186_vm3 = vcmp.gt.f32.partialorder %v3192_v33, 0.0  ;;  %v2250_v49 = vmul.f32 0.2, %v3192_v33 }
 0x2e0   :  { %2633 = vst.msk [vmem:[%s5637_s6 + $0x98] sm:$0xf] %vm1689_vm1, %v2972_v28  ;;  %v2970_v46 = vpack.c.bf16 %v2311_v26, %v2311_v26  ;;  %v2039_v23 = vpop.f32.mrf.mxu1 }
 0x2e1   :  { %v2314_v7 = vsel %vm2186_vm3, %v3192_v33, %v2250_v49  ;;  %vm2184_vm4 = vcmp.gt.f32.partialorder %v2039_v23, 0.0  ;;  %v2248_v12 = vmul.f32 0.2, %v2039_v23 }
 0x2e2   :  { %2631 = vst.msk [vmem:[%s5637_s6 + $0x90] sm:$0xf] %vm1689_vm1, %v2970_v46  ;;  %v2973_v3 = vpack.c.bf16 %v2314_v7, %v2314_v7  ;;  %v3195_v58 = vpop.f32.mrf.mxu1 }
 0x2e3   :  { %v2312_v11 = vsel %vm2184_vm4, %v2039_v23, %v2248_v12  ;;  %vm2189_vm5 = vcmp.gt.f32.partialorder %v3195_v58, 0.0  ;;  %v2253_v22 = vmul.f32 0.2, %v3195_v58 }
 0x2e4   :  { %2634 = vst.msk [vmem:[%s5637_s6 + $0x9c] sm:$0xf] %vm1689_vm1, %v2973_v3  ;;  %v2971_v14 = vpack.c.bf16 %v2312_v11, %v2312_v11  ;;  %v2052_v34 = vpop.f32.mrf.mxu1 }
 0x2e5   :  { %v2317_v35 = vsel %vm2189_vm5, %v3195_v58, %v2253_v22  ;;  %vm2187_vm6 = vcmp.gt.f32.partialorder %v2052_v34, 0.0  ;;  %v2251_v45 = vmul.f32 0.2, %v2052_v34 }
 0x2e6   :  { %2632 = vst.msk [vmem:[%s5637_s6 + $0x94] sm:$0xf] %vm1689_vm1, %v2971_v14  ;;  %v2976_v0 = vpack.c.bf16 %v2317_v35, %v2317_v35  ;;  %v3196_v60 = vpop.f32.mrf.mxu1 }
 0x2e7   :  { %v2315_v54 = vsel %vm2187_vm6, %v2052_v34, %v2251_v45  ;;  %vm2190_vm7 = vcmp.gt.f32.partialorder %v3196_v60, 0.0  ;;  %v2254_v50 = vmul.f32 0.2, %v3196_v60 }
 0x2e8   :  { %2637 = vst.msk [vmem:[%s5637_s6 + $0xa8] sm:$0xf] %vm1689_vm1, %v2976_v0  ;;  %v2974_v44 = vpack.c.bf16 %v2315_v54, %v2315_v54  ;;  %v2055_v25 = vpop.f32.mrf.mxu1 }
 0x2e9   :  { %v2318_v27 = vsel %vm2190_vm7, %v3196_v60, %v2254_v50  ;;  %vm2188_vm8 = vcmp.gt.f32.partialorder %v2055_v25, 0.0  ;;  %v2252_v61 = vmul.f32 0.2, %v2055_v25 }
 0x2ea   :  { %2635 = vst.msk [vmem:[%s5637_s6 + $0xa0] sm:$0xf] %vm1689_vm1, %v2974_v44  ;;  %v2977_v42 = vpack.c.bf16 %v2318_v27, %v2318_v27  ;;  %v3199_v36 = vpop.f32.mrf.mxu1 }
 0x2eb   :  { %v2316_v10 = vsel %vm2188_vm8, %v2055_v25, %v2252_v61  ;;  %vm2193_vm9 = vcmp.gt.f32.partialorder %v3199_v36, 0.0  ;;  %v2257_v29 = vmul.f32 0.2, %v3199_v36 }
 0x2ec   :  { %2638 = vst.msk [vmem:[%s5637_s6 + $0xac] sm:$0xf] %vm1689_vm1, %v2977_v42  ;;  %v2975_v21 = vpack.c.bf16 %v2316_v10, %v2316_v10  ;;  %v2068_v1 = vpop.f32.mrf.mxu1 }
 0x2ed   :  { %v2321_v18 = vsel %vm2193_vm9, %v3199_v36, %v2257_v29  ;;  %vm2191_vm10 = vcmp.gt.f32.partialorder %v2068_v1, 0.0  ;;  %v2255_v41 = vmul.f32 0.2, %v2068_v1 }
 0x2ee   :  { %2636 = vst.msk [vmem:[%s5637_s6 + $0xa4] sm:$0xf] %vm1689_vm1, %v2975_v21  ;;  %v2980_v6 = vpack.c.bf16 %v2321_v18, %v2321_v18  ;;  %v3200_v63 = vpop.f32.mrf.mxu1 }
 0x2ef   :  { %v2319_v40 = vsel %vm2191_vm10, %v2068_v1, %v2255_v41  ;;  %vm2194_vm11 = vcmp.gt.f32.partialorder %v3200_v63, 0.0  ;;  %v2258_v37 = vmul.f32 0.2, %v3200_v63 }
 0x2f0   :  { %2641 = vst.msk [vmem:[%s5637_s6 + $0xb8] sm:$0xf] %vm1689_vm1, %v2980_v6  ;;  %v2978_v17 = vpack.c.bf16 %v2319_v40, %v2319_v40  ;;  %v2071_v30 = vpop.f32.mrf.mxu1 }
 0x2f1   :  { %v2322_v31 = vsel %vm2194_vm11, %v3200_v63, %v2258_v37  ;;  %vm2192_vm12 = vcmp.gt.f32.partialorder %v2071_v30, 0.0  ;;  %v2256_v55 = vmul.f32 0.2, %v2071_v30 }
 0x2f2   :  { %2639 = vst.msk [vmem:[%s5637_s6 + $0xb0] sm:$0xf] %vm1689_vm1, %v2978_v17  ;;  %v2981_v24 = vpack.c.bf16 %v2322_v31, %v2322_v31  ;;  %v3203_v20 = vpop.f32.mrf.mxu1 }
 0x2f3   :  { %v2320_v4 = vsel %vm2192_vm12, %v2071_v30, %v2256_v55  ;;  %vm2197_vm0 = vcmp.gt.f32.partialorder %v3203_v20, 0.0  ;;  %v2261_v51 = vmul.f32 0.2, %v3203_v20 }
 0x2f4   :  { %2642 = vst.msk [vmem:[%s5637_s6 + $0xbc] sm:$0xf] %vm1689_vm1, %v2981_v24  ;;  %v2979_v56 = vpack.c.bf16 %v2320_v4, %v2320_v4  ;;  %v2084_v15 = vpop.f32.mrf.mxu1 }
 0x2f5   :  { %v2325_v2 = vsel %vm2197_vm0, %v3203_v20, %v2261_v51  ;;  %vm2195_vm13 = vcmp.gt.f32.partialorder %v2084_v15, 0.0  ;;  %v2259_v5 = vmul.f32 0.2, %v2084_v15 }
 0x2f6   :  { %2640 = vst.msk [vmem:[%s5637_s6 + $0xb4] sm:$0xf] %vm1689_vm1, %v2979_v56  ;;  %v2984_v8 = vpack.c.bf16 %v2325_v2, %v2325_v2  ;;  %v3204_v9 = vpop.f32.mrf.mxu1 }
 0x2f7   :  { %v2323_v19 = vsel %vm2195_vm13, %v2084_v15, %v2259_v5  ;;  %vm2198_vm14 = vcmp.gt.f32.partialorder %v3204_v9, 0.0  ;;  %v2262_v47 = vmul.f32 0.2, %v3204_v9 }
 0x2f8   :  { %2645 = vst.msk [vmem:[%s5637_s6 + $0xc8] sm:$0xf] %vm1689_vm1, %v2984_v8  ;;  %v2982_v62 = vpack.c.bf16 %v2323_v19, %v2323_v19  ;;  %v2087_v52 = vpop.f32.mrf.mxu1 }
 0x2f9   :  { %v2326_v57 = vsel %vm2198_vm14, %v3204_v9, %v2262_v47  ;;  %vm2196_vm15 = vcmp.gt.f32.partialorder %v2087_v52, 0.0  ;;  %v2260_v13 = vmul.f32 0.2, %v2087_v52 }
 0x2fa   :  { %2643 = vst.msk [vmem:[%s5637_s6 + $0xc0] sm:$0xf] %vm1689_vm1, %v2982_v62  ;;  %v2985_v39 = vpack.c.bf16 %v2326_v57, %v2326_v57  ;;  %v3207_v16 = vpop.f32.mrf.mxu1 }
 0x2fb   :  { %v2324_v38 = vsel %vm2196_vm15, %v2087_v52, %v2260_v13  ;;  %vm2201_vm2 = vcmp.gt.f32.partialorder %v3207_v16, 0.0  ;;  %v2265_v59 = vmul.f32 0.2, %v3207_v16 }
 0x2fc   :  { %2646 = vst.msk [vmem:[%s5637_s6 + $0xcc] sm:$0xf] %vm1689_vm1, %v2985_v39  ;;  %v2983_v53 = vpack.c.bf16 %v2324_v38, %v2324_v38  ;;  %v2100_v32 = vpop.f32.mrf.mxu1 }
 0x2fd   :  { %v2329_v48 = vsel %vm2201_vm2, %v3207_v16, %v2265_v59  ;;  %vm2199_vm3 = vcmp.gt.f32.partialorder %v2100_v32, 0.0  ;;  %v2263_v43 = vmul.f32 0.2, %v2100_v32 }
 0x2fe   :  { %2644 = vst.msk [vmem:[%s5637_s6 + $0xc4] sm:$0xf] %vm1689_vm1, %v2983_v53  ;;  %v2988_v28 = vpack.c.bf16 %v2329_v48, %v2329_v48  ;;  %v3208_v33 = vpop.f32.mrf.mxu1 }
 0x2ff   :  { %v2327_v26 = vsel %vm2199_vm3, %v2100_v32, %v2263_v43  ;;  %vm2202_vm4 = vcmp.gt.f32.partialorder %v3208_v33, 0.0  ;;  %v2266_v49 = vmul.f32 0.2, %v3208_v33 }
 0x300   :  { %2649 = vst.msk [vmem:[%s5637_s6 + $0xd8] sm:$0xf] %vm1689_vm1, %v2988_v28  ;;  %v2986_v46 = vpack.c.bf16 %v2327_v26, %v2327_v26  ;;  %v2103_v23 = vpop.f32.mrf.mxu1 }
 0x301   :  { %v2330_v7 = vsel %vm2202_vm4, %v3208_v33, %v2266_v49  ;;  %vm2200_vm5 = vcmp.gt.f32.partialorder %v2103_v23, 0.0  ;;  %v2264_v12 = vmul.f32 0.2, %v2103_v23 }
 0x302   :  { %2647 = vst.msk [vmem:[%s5637_s6 + $0xd0] sm:$0xf] %vm1689_vm1, %v2986_v46  ;;  %v2989_v3 = vpack.c.bf16 %v2330_v7, %v2330_v7  ;;  %v3211_v58 = vpop.f32.mrf.mxu1 }
 0x303   :  { %v2328_v11 = vsel %vm2200_vm5, %v2103_v23, %v2264_v12  ;;  %vm2205_vm6 = vcmp.gt.f32.partialorder %v3211_v58, 0.0  ;;  %v2269_v22 = vmul.f32 0.2, %v3211_v58 }
 0x304   :  { %2650 = vst.msk [vmem:[%s5637_s6 + $0xdc] sm:$0xf] %vm1689_vm1, %v2989_v3  ;;  %v2987_v14 = vpack.c.bf16 %v2328_v11, %v2328_v11  ;;  %v2116_v34 = vpop.f32.mrf.mxu1 }
 0x305   :  { %v2333_v35 = vsel %vm2205_vm6, %v3211_v58, %v2269_v22  ;;  %vm2203_vm7 = vcmp.gt.f32.partialorder %v2116_v34, 0.0  ;;  %v2267_v45 = vmul.f32 0.2, %v2116_v34 }
 0x306   :  { %2648 = vst.msk [vmem:[%s5637_s6 + $0xd4] sm:$0xf] %vm1689_vm1, %v2987_v14  ;;  %v2992_v0 = vpack.c.bf16 %v2333_v35, %v2333_v35  ;;  %v3212_v60 = vpop.f32.mrf.mxu1 }
 0x307   :  { %v2331_v54 = vsel %vm2203_vm7, %v2116_v34, %v2267_v45  ;;  %vm2206_vm8 = vcmp.gt.f32.partialorder %v3212_v60, 0.0  ;;  %v2270_v50 = vmul.f32 0.2, %v3212_v60 }
 0x308   :  { %2653 = vst.msk [vmem:[%s5637_s6 + $0xe8] sm:$0xf] %vm1689_vm1, %v2992_v0  ;;  %v2990_v44 = vpack.c.bf16 %v2331_v54, %v2331_v54  ;;  %v2119_v25 = vpop.f32.mrf.mxu1 }
 0x309   :  { %v2334_v27 = vsel %vm2206_vm8, %v3212_v60, %v2270_v50  ;;  %vm2204_vm9 = vcmp.gt.f32.partialorder %v2119_v25, 0.0  ;;  %v2268_v61 = vmul.f32 0.2, %v2119_v25 }
 0x30a   :  { %2651 = vst.msk [vmem:[%s5637_s6 + $0xe0] sm:$0xf] %vm1689_vm1, %v2990_v44  ;;  %v2993_v42 = vpack.c.bf16 %v2334_v27, %v2334_v27  ;;  %v3215_v36 = vpop.f32.mrf.mxu1 }
 0x30b   :  { %v2332_v10 = vsel %vm2204_vm9, %v2119_v25, %v2268_v61  ;;  %vm2209_vm10 = vcmp.gt.f32.partialorder %v3215_v36, 0.0  ;;  %v2273_v29 = vmul.f32 0.2, %v3215_v36 }
 0x30c   :  { %2654 = vst.msk [vmem:[%s5637_s6 + $0xec] sm:$0xf] %vm1689_vm1, %v2993_v42  ;;  %v2991_v21 = vpack.c.bf16 %v2332_v10, %v2332_v10  ;;  %v2132_v1 = vpop.f32.mrf.mxu1 }
 0x30d   :  { %v2337_v18 = vsel %vm2209_vm10, %v3215_v36, %v2273_v29  ;;  %vm2207_vm11 = vcmp.gt.f32.partialorder %v2132_v1, 0.0  ;;  %v2271_v41 = vmul.f32 0.2, %v2132_v1 }
 0x30e   :  { %2652 = vst.msk [vmem:[%s5637_s6 + $0xe4] sm:$0xf] %vm1689_vm1, %v2991_v21  ;;  %v2996_v6 = vpack.c.bf16 %v2337_v18, %v2337_v18  ;;  %v3216_v63 = vpop.f32.mrf.mxu1 }
 0x30f   :  { %v2335_v40 = vsel %vm2207_vm11, %v2132_v1, %v2271_v41  ;;  %vm2210_vm12 = vcmp.gt.f32.partialorder %v3216_v63, 0.0  ;;  %v2274_v37 = vmul.f32 0.2, %v3216_v63 }
 0x310   :  { %2657 = vst.msk [vmem:[%s5637_s6 + $0xf8] sm:$0xf] %vm1689_vm1, %v2996_v6  ;;  %v2994_v17 = vpack.c.bf16 %v2335_v40, %v2335_v40  ;;  %v2135_v30 = vpop.f32.mrf.mxu1 }
 0x311   :  { %v2338_v31 = vsel %vm2210_vm12, %v3216_v63, %v2274_v37  ;;  %vm2208_vm0 = vcmp.gt.f32.partialorder %v2135_v30, 0.0  ;;  %v2272_v55 = vmul.f32 0.2, %v2135_v30 }
 0x312   :  { %2655 = vst.msk [vmem:[%s5637_s6 + $0xf0] sm:$0xf] %vm1689_vm1, %v2994_v17  ;;  %v2997_v24 = vpack.c.bf16 %v2338_v31, %v2338_v31 }
 0x313   :  { %v2336_v20 = vsel %vm2208_vm0, %v2135_v30, %v2272_v55 }
 0x314   :  { %2658 = vst.msk [vmem:[%s5637_s6 + $0xfc] sm:$0xf] %vm1689_vm1, %v2997_v24  ;;  %v2995_v4 = vpack.c.bf16 %v2336_v20, %v2336_v20 }
 0x316   :  { %2656 = vst.msk [vmem:[%s5637_s6 + $0xf4] sm:$0xf] %vm1689_vm1, %v2995_v4 }

// kernel: discriminator_forward.7
= control target key start
LH: loop header
LB: loop body
LE: loop exit
PB: predicated region body
PF: predicated region fallthrough
CT: control target
= control target key end

     0   :  { %s1691_s0 = inlined_call_operand.vmem [shape: bf16[128,256], index: 0, kind: input, shape index: {}]   ;;  %s1692_s1 = inlined_call_operand.vmem [shape: bf16[256,32], index: 1, kind: input, shape index: {}]   ;;  %s1693_s2 = inlined_call_operand.vmem [shape: f32[1,32], index: 2, kind: input, shape index: {}]   ;;  %s1694_s3 = inlined_call_operand.vmem [shape: f32[1,32], index: 3, kind: input, shape index: {}]   ;;  %s1695_s4 = inlined_call_operand.vmem [shape: bf16[32,32], index: 4, kind: input, shape index: {}]   ;;  %s1696_s5 = inlined_call_operand.vmem [shape: bf16[128,32], index: 5, kind: output, shape index: {0}]   ;;  %s1697_s6 = inlined_call_operand.hbm [shape: bf16[128,32], index: 6, kind: output, shape index: {1}]  }
   0x1   :  { %v1157_v0 = vld [vmem:[%s1692_s1 + $0x78] sm:$0xff]   ;;  %v1159_v2 = vld [vmem:[%s1692_s1 + $0x70] sm:$0xff]   ;;  %v1161_v4 = vld [vmem:[%s1692_s1 + $0x68] sm:$0xff]  }
   0x2   :  { %v1158_v1 = vld [vmem:[%s1692_s1 + $0x38] sm:$0xff]   ;;  %1044 = vmatprep.subr.bf16.mxu0 %v1157_v0  ;;  %1138 = vmatprep.subr.bf16.mxu1 %v1157_v0  ;;  %v1160_v3 = vld [vmem:[%s1692_s1 + $0x30] sm:$0xff]   ;;  %v1162_v5 = vld [vmem:[%s1692_s1 + $0x28] sm:$0xff]  }
   0x3   :  { %1045 = vmatpush3.bf16.msra.mxu0 %v1158_v1  ;;  %1146 = vmatpush3.bf16.msra.mxu1 %v1158_v1  ;;  %v1163_v6 = vld [vmem:[%s1692_s1 + $0x60] sm:$0xff]   ;;  %v1165_v8 = vld [vmem:[%s1692_s1 + $0x58] sm:$0xff]   ;;  %v1167_v10 = vld [vmem:[%s1692_s1 + $0x50] sm:$0xff]  }
   0x4   :  { %1046 = vmatprep.subr.bf16.mxu0 %v1159_v2  ;;  %1139 = vmatprep.subr.bf16.mxu1 %v1159_v2  ;;  %v1164_v7 = vld [vmem:[%s1692_s1 + $0x20] sm:$0xff]   ;;  %v1166_v9 = vld [vmem:[%s1692_s1 + $0x18] sm:$0xff]   ;;  %v1168_v12 = vld [vmem:[%s1692_s1 + $0x10] sm:$0xff]  }
   0x5   :  { %v1175_v11 = vld [vmem:[%s1691_s0 + $0x4] ss:$8 sps:$4 sm:$0xff]  }
   0x6   :  { %280 = vmatprep.mubr.bf16.mxu0 %v1175_v11  ;;  %v1169_v13 = vld [vmem:[%s1692_s1 + $0x48] sm:$0xff]   ;;  %v1171_v16 = vld [vmem:[%s1692_s1 + $0x40] sm:$0xff]  }
   0x7   :  { %1047 = vmatpush3.bf16.msra.mxu0 %v1160_v3  ;;  %1147 = vmatpush3.bf16.msra.mxu1 %v1160_v3  ;;  %v1170_v14 = vld [vmem:[%s1692_s1 + $0x8] sm:$0xff]   ;;  %v1172_v17 = vld [vmem:[%s1692_s1] sm:$0xff]  }
   0x8   :  { %1048 = vmatprep.subr.bf16.mxu0 %v1161_v4  ;;  %1140 = vmatprep.subr.bf16.mxu1 %v1161_v4  ;;  %v1190_v15 = vld [vmem:[%s1691_s0 + $0x64] ss:$8 sps:$4 sm:$0xff]  }
   0x9   :  { %328 = vmatprep.mubr.bf16.mxu1 %v1190_v15 }
   0xb   :  { %1049 = vmatpush3.bf16.msra.mxu0 %v1162_v5  ;;  %1148 = vmatpush3.bf16.msra.mxu1 %v1162_v5 }
   0xc   :  { %1050 = vmatprep.subr.bf16.mxu0 %v1163_v6  ;;  %1141 = vmatprep.subr.bf16.mxu1 %v1163_v6 }
   0xf   :  { %1051 = vmatpush3.bf16.msra.mxu0 %v1164_v7  ;;  %1149 = vmatpush3.bf16.msra.mxu1 %v1164_v7 }
  0x10   :  { %1052 = vmatprep.subr.bf16.mxu0 %v1165_v8  ;;  %1142 = vmatprep.subr.bf16.mxu1 %v1165_v8 }
  0x13   :  { %1053 = vmatpush3.bf16.msra.mxu0 %v1166_v9  ;;  %1150 = vmatpush3.bf16.msra.mxu1 %v1166_v9 }
  0x14   :  { %1054 = vmatprep.subr.bf16.mxu0 %v1167_v10  ;;  %1143 = vmatprep.subr.bf16.mxu1 %v1167_v10 }
  0x17   :  { %1055 = vmatpush3.bf16.msra.mxu0 %v1168_v12  ;;  %1151 = vmatpush3.bf16.msra.mxu1 %v1168_v12 }
  0x18   :  { %1056 = vmatprep.subr.bf16.mxu0 %v1169_v13  ;;  %1144 = vmatprep.subr.bf16.mxu1 %v1169_v13 }
  0x1b   :  { %1057 = vmatpush3.bf16.msra.mxu0 %v1170_v14  ;;  %1152 = vmatpush3.bf16.msra.mxu1 %v1170_v14 }
  0x1c   :  { %1058 = vmatprep.subr.bf16.mxu0 %v1171_v16 }
  0x1d   :  { %12 = vsyncpa [#allocation3], 0  ;;  %1145 = vmatprep.subr.bf16.mxu1 %v1171_v16  ;;  %v1173_v18 = vld [vmem:[%s1691_s0] ss:$8 sps:$4 sm:$0xff]   ;;  %v1176_v19 = vld [vmem:[%s1691_s0 + $0x14] ss:$8 sps:$4 sm:$0xff]  }
  0x1e   :  { %v1188_v20 = vld [vmem:[%s1691_s0 + $0x60] ss:$8 sps:$4 sm:$0xff]   ;;  %v1194_v21 = vld [vmem:[%s1691_s0 + $0x74] ss:$8 sps:$4 sm:$0xff]   ;;  %v1178_v22 = vld [vmem:[%s1691_s0 + $0x10] ss:$8 sps:$4 sm:$0xff]  }
  0x1f   :  { %1059 = vmatpush3.bf16.msra.mxu0 %v1172_v17  ;;  %1153 = vmatpush3.bf16.msra.mxu1 %v1172_v17  ;;  %v1179_v23 = vld [vmem:[%s1691_s0 + $0x24] ss:$8 sps:$4 sm:$0xff]   ;;  %v1196_v24 = vld [vmem:[%s1691_s0 + $0x70] ss:$8 sps:$4 sm:$0xff]   ;;  %v1181_v25 = vld [vmem:[%s1691_s0 + $0x20] ss:$8 sps:$4 sm:$0xff]  }
  0x20   :  { %v1182_v26 = vld [vmem:[%s1691_s0 + $0x34] ss:$8 sps:$4 sm:$0xff]   ;;  %v1184_v27 = vld [vmem:[%s1691_s0 + $0x30] ss:$8 sps:$4 sm:$0xff]   ;;  %v1185_v28 = vld [vmem:[%s1691_s0 + $0x44] ss:$8 sps:$4 sm:$0xff]  }
  0x21   :  { %v1187_v29 = vld [vmem:[%s1691_s0 + $0x40] ss:$8 sps:$4 sm:$0xff]   ;;  %v1191_v30 = vld [vmem:[%s1691_s0 + $0x54] ss:$8 sps:$4 sm:$0xff]   ;;  %v1193_v31 = vld [vmem:[%s1691_s0 + $0x50] ss:$8 sps:$4 sm:$0xff]  }
  0x22   :  { %281 = vmatmul.mubr.bf16.vlgmr.msra.gmra.mxu0 %v1173_v18  ;;  %329 = vmatmul.mubr.bf16.vlgmr.msra.gmra.mxu1 %v1188_v20  ;;  %v1197_v32 = vld [vmem:[%s1695_s4 + $0x8] sm:$0xff]   ;;  %v1198_v33 = vld [vmem:[%s1695_s4] sm:$0xff]   ;;  %vm345_vm0 = vcmask 261120   ;;  %vm634_vm1 = vcmask 257024  }
  0x23   :  { %288 = vmatprep.mubr.bf16.mxu0 %v1176_v19  ;;  %336 = vmatprep.mubr.bf16.mxu1 %v1194_v21 }
  0x24   :  { %1118 = vmatprep.subr.bf16.mxu1 %v1197_v32 }
  0x25   :  { %1119 = vmatpush3.bf16.msra.mxu1 %v1197_v32 }
  0x26   :  { %1120 = vmatprep.subr.bf16.mxu1 %v1198_v33 }
  0x29   :  { %1121 = vmatpush3.bf16.msra.mxu1 %v1198_v33 }
  0x2a   :  { %289 = vmatmul.mubr.bf16.gmra.mxu0 %v1178_v22  ;;  %337 = vmatmul.mubr.bf16.gmra.mxu1 %v1196_v24 }
  0x2b   :  { %296 = vmatprep.mubr.bf16.mxu0 %v1179_v23 }
  0x32   :  { %297 = vmatmul.mubr.bf16.gmra.mxu0 %v1181_v25 }
  0x33   :  { %304 = vmatprep.mubr.bf16.mxu0 %v1182_v26 }
  0x3a   :  { %305 = vmatmul.mubr.bf16.gmra.mxu0 %v1184_v27 }
  0x3b   :  { %312 = vmatprep.mubr.bf16.mxu0 %v1185_v28 }
  0x42   :  { %313 = vmatmul.mubr.bf16.gmra.mxu0 %v1187_v29 }
  0x43   :  { %320 = vmatprep.mubr.bf16.mxu0 %v1191_v30 }
  0x4a   :  { %321 = vmatmul.mubr.bf16.gmra.mxu0 %v1193_v31 }
  0xe2   :  { %v1060_v34 = vpop.f32.mrf.mxu0  ;;  %v1363_v45 = vpop.f32.mrf.mxu1 }
  0xe4   :  { %v1061_v35 = vpop.f32.mrf.mxu0  ;;  %v1371_v51 = vpop.f32.mrf.mxu1 }
  0xe5   :  { %v1367_v47 = vadd.f32 %v1061_v35, %v1060_v34 }
  0xe6   :  { %v1063_v36 = vpop.f32.mrf.mxu0  ;;  %v1387_v61 = vpop.f32.mrf.mxu1 }
  0xe7   :  { %v385_v54 = vmul.f32 %v1367_v47, %v1367_v47  ;;  %v346_v59 = vsel %vm345_vm0, %v1367_v47, 0.0 }
  0xe8   :  { %v1064_v37 = vpop.f32.mrf.mxu0  ;;  %v1100_v12 = vpop.f32.mrf.mxu1 }
  0xe9   :  { %v1365_v46 = vadd.f32 %v1064_v37, %v1063_v36  ;;  %v401_v2 = vsel %vm345_vm0, %v385_v54, 0.0 }
  0xea   :  { %v1066_v38 = vpop.f32.mrf.mxu0  ;;  %v1102_v27 = vpop.f32.mrf.mxu1 }
  0xeb   :  { %v386_v52 = vmul.f32 %v1365_v46, %v1365_v46  ;;  %v347_v56 = vsel %vm345_vm0, %v1365_v46, 0.0 }
  0xec   :  { %v1067_v39 = vpop.f32.mrf.mxu0  ;;  %v348_v3 = vadd.f32 %v347_v56, %v346_v59 }
  0xed   :  { %v1369_v49 = vadd.f32 %v1067_v39, %v1066_v38  ;;  %v402_v62 = vsel %vm345_vm0, %v386_v52, 0.0 }
  0xee   :  { %v1069_v40 = vpop.f32.mrf.mxu0  ;;  %v403_v9 = vadd.f32 %v402_v62, %v401_v2 }
  0xef   :  { %v387_v57 = vmul.f32 %v1369_v49, %v1369_v49  ;;  %v349_v63 = vsel %vm345_vm0, %v1369_v49, 0.0 }
  0xf0   :  { %v1070_v41 = vpop.f32.mrf.mxu0  ;;  %v350_v10 = vadd.f32 %v349_v63, %v348_v3  ;;  %v1442_v63 = vadd.f32 %v1371_v51, %v1363_v45 }
  0xf1   :  { %v1375_v53 = vadd.f32 %v1070_v41, %v1069_v40  ;;  %v404_v5 = vsel %vm345_vm0, %v387_v57, 0.0  ;;  %v1103_v41 = vpop.f32.mrf.mxu1 }
  0xf2   :  { %v1072_v42 = vpop.f32.mrf.mxu0  ;;  %v405_v17 = vadd.f32 %v404_v5, %v403_v9 }
  0xf3   :  { %v388_v0 = vmul.f32 %v1375_v53, %v1375_v53  ;;  %v351_v6 = vsel %vm345_vm0, %v1375_v53, 0.0  ;;  %v1105_v62 = vpop.f32.mrf.mxu1 }
  0xf4   :  { %v1073_v43 = vpop.f32.mrf.mxu0  ;;  %v352_v18 = vadd.f32 %v351_v6, %v350_v10 }
  0xf5   :  { %v1383_v58 = vadd.f32 %v1073_v43, %v1072_v42  ;;  %v406_v13 = vsel %vm345_vm0, %v388_v0, 0.0 }
  0xf6   :  { %v1075_v44 = vpop.f32.mrf.mxu0  ;;  %v407_v24 = vadd.f32 %v406_v13, %v405_v17  ;;  %v397_v13 = vmul.f32 %v1442_v63, %v1442_v63 }
  0xf7   :  { %v389_v7 = vmul.f32 %v1383_v58, %v1383_v58  ;;  %v353_v14 = vsel %vm345_vm0, %v1383_v58, 0.0 }
  0xf8   :  { %v1076_v48 = vpop.f32.mrf.mxu0  ;;  %v354_v25 = vadd.f32 %v353_v14, %v352_v18  ;;  %v1457_v14 = vadd.f32 %v1103_v41, %v1102_v27  ;;  %v369_v18 = vsel %vm345_vm0, %v1442_v63, 0.0 }
  0xf9   :  { %v1394_v1 = vadd.f32 %v1076_v48, %v1075_v44  ;;  %v408_v20 = vsel %vm345_vm0, %v389_v7, 0.0  ;;  %v1450_v7 = vadd.f32 %v1100_v12, %v1387_v61 }
  0xfa   :  { %v1078_v50 = vpop.f32.mrf.mxu0  ;;  %v409_v31 = vadd.f32 %v408_v20, %v407_v24  ;;  %v399_v27 = vmul.f32 %v1457_v14, %v1457_v14 }
  0xfb   :  { %v390_v15 = vmul.f32 %v1394_v1, %v1394_v1  ;;  %v355_v21 = vsel %vm345_vm0, %v1394_v1, 0.0 }
  0xfc   :  { %v1079_v55 = vpop.f32.mrf.mxu0  ;;  %v356_v32 = vadd.f32 %v355_v21, %v354_v25  ;;  %v424_v25 = vsel %vm345_vm0, %v397_v13, 0.0 }
  0xfd   :  { %v1402_v8 = vadd.f32 %v1079_v55, %v1078_v50  ;;  %v410_v28 = vsel %vm345_vm0, %v390_v15, 0.0 }
  0xfe   :  { %v1081_v60 = vpop.f32.mrf.mxu0  ;;  %v411_v38 = vadd.f32 %v410_v28, %v409_v31  ;;  %v373_v31 = vsel %vm345_vm0, %v1457_v14, 0.0 }
  0xff   :  { %v391_v22 = vmul.f32 %v1402_v8, %v1402_v8  ;;  %v357_v29 = vsel %vm345_vm0, %v1402_v8, 0.0 }
 0x100   :  { %v1082_v4 = vpop.f32.mrf.mxu0  ;;  %v358_v39 = vadd.f32 %v357_v29, %v356_v32 }
 0x101   :  { %v1409_v16 = vadd.f32 %v1082_v4, %v1081_v60  ;;  %v412_v34 = vsel %vm345_vm0, %v391_v22, 0.0 }
 0x102   :  { %v1084_v11 = vpop.f32.mrf.mxu0  ;;  %v413_v48 = vadd.f32 %v412_v34, %v411_v38 }
 0x103   :  { %v392_v30 = vmul.f32 %v1409_v16, %v1409_v16  ;;  %v359_v35 = vsel %vm345_vm0, %v1409_v16, 0.0 }
 0x104   :  { %v1085_v19 = vpop.f32.mrf.mxu0  ;;  %v360_v50 = vadd.f32 %v359_v35, %v358_v39  ;;  %v428_v35 = vsel %vm345_vm0, %v399_v27, 0.0 }
 0x105   :  { %v1416_v23 = vadd.f32 %v1085_v19, %v1084_v11  ;;  %v414_v42 = vsel %vm345_vm0, %v392_v30, 0.0  ;;  %v1106_v11 = vpop.f32.mrf.mxu1  ;;  %v398_v19 = vmul.f32 %v1450_v7, %v1450_v7 }
 0x106   :  { %v1087_v26 = vpop.f32.mrf.mxu0  ;;  %v415_v57 = vadd.f32 %v414_v42, %v413_v48  ;;  %v1107_v21 = vadd.f32 %v1106_v11, %v1105_v62 }
 0x107   :  { %v393_v36 = vmul.f32 %v1416_v23, %v1416_v23  ;;  %v361_v43 = vsel %vm345_vm0, %v1416_v23, 0.0  ;;  %v426_v30 = vsel %vm345_vm0, %v398_v19, 0.0 }
 0x108   :  { %v1088_v33 = vpop.f32.mrf.mxu0  ;;  %v362_v59 = vadd.f32 %v361_v43, %v360_v50  ;;  %v400_v32 = vmul.f32 %v1107_v21, %v1107_v21 }
 0x109   :  { %v1428_v37 = vadd.f32 %v1088_v33, %v1087_v26  ;;  %v416_v54 = vsel %vm345_vm0, %v393_v36, 0.0  ;;  %v371_v26 = vsel %vm345_vm0, %v1450_v7, 0.0  ;;  %v375_v36 = vsel %vm345_vm0, %v1107_v21, 0.0 }
 0x10a   :  { %v1090_v40 = vpop.f32.mrf.mxu0  ;;  %v417_v4 = vadd.f32 %v416_v54, %v415_v57 }
 0x10b   :  { %v394_v44 = vmul.f32 %v1428_v37, %v1428_v37  ;;  %v363_v55 = vsel %vm345_vm0, %v1428_v37, 0.0 }
 0x10c   :  { %v1091_v52 = vpop.f32.mrf.mxu0  ;;  %v364_v5 = vadd.f32 %v363_v55, %v362_v59 }
 0x10d   :  { %v1438_v56 = vadd.f32 %v1091_v52, %v1090_v40  ;;  %v418_v0 = vsel %vm345_vm0, %v394_v44, 0.0  ;;  %v430_v40 = vsel %vm345_vm0, %v400_v32, 0.0 }
 0x10e   :  { %v1093_v60 = vpop.f32.mrf.mxu0  ;;  %v419_v45 = vadd.f32 %v418_v0, %v417_v4 }
 0x10f   :  { %v365_v2 = vsel %vm345_vm0, %v1438_v56, 0.0  ;;  %v395_v3 = vmul.f32 %v1438_v56, %v1438_v56 }
 0x110   :  { %v1094_v6 = vpop.f32.mrf.mxu0  ;;  %v366_v51 = vadd.f32 %v365_v2, %v364_v5 }
 0x111   :  { %v420_v9 = vsel %vm345_vm0, %v395_v3, 0.0  ;;  %v1453_v10 = vadd.f32 %v1094_v6, %v1093_v60 }
 0x112   :  { %v421_v61 = vadd.f32 %v420_v9, %v419_v45 }
 0x113   :  { %v367_v15 = vsel %vm345_vm0, %v1453_v10, 0.0  ;;  %v396_v17 = vmul.f32 %v1453_v10, %v1453_v10 }
 0x114   :  { %v368_v12 = vadd.f32 %v367_v15, %v366_v51 }
 0x115   :  { %v422_v20 = vsel %vm345_vm0, %v396_v17, 0.0 }
 0x116   :  { %v370_v22 = vadd.f32 %v369_v18, %v368_v12  ;;  %v423_v24 = vadd.f32 %v422_v20, %v421_v61 }
 0x118   :  { %v425_v28 = vadd.f32 %v424_v25, %v423_v24  ;;  %v372_v29 = vadd.f32 %v371_v26, %v370_v22  ;;  %v1526_v22 = vld [vmem:[%s1694_s3] ss:$0 sm:$0xff] }
 0x11a   :  { %v374_v33 = vadd.f32 %v373_v31, %v372_v29  ;;  %v427_v34 = vadd.f32 %v426_v30, %v425_v28 }
 0x11c   :  { %v376_v38 = vadd.f32 %v375_v36, %v374_v33  ;;  %v429_v39 = vadd.f32 %v428_v35, %v427_v34 }
 0x11e   :  { %v377_v41 = vrot.slane %v376_v38, 4  ;;  %v431_v42 = vadd.f32 %v430_v40, %v429_v39 }
 0x120   :  { %v378_v43 = vadd.f32 %v377_v41, %v376_v38  ;;  %v432_v44 = vrot.slane %v431_v42, 4 }
 0x122   :  { %v379_v48 = vrot.slane %v378_v43, 2  ;;  %v433_v50 = vadd.f32 %v432_v44, %v431_v42 }
 0x124   :  { %v380_v52 = vadd.f32 %v379_v48, %v378_v43  ;;  %v434_v54 = vrot.slane %v433_v50, 2 }
 0x126   :  { %v381_v55 = vrot.slane %v380_v52, 1  ;;  %v435_v57 = vadd.f32 %v434_v54, %v433_v50 }
 0x128   :  { %v382_v59 = vadd.f32 %v381_v55, %v380_v52  ;;  %v436_v60 = vrot.slane %v435_v57, 1 }
 0x12a   :  { %v1479_v62 = vmul.f32 0.0078125, %v382_v59  ;;  %v437_v0 = vadd.f32 %v436_v60, %v435_v57 }
 0x12c   :  { %v438_v2 = vmul.f32 0.0078125, %v437_v0  ;;  %v439_v3 = vmul.f32 %v1479_v62, %v1479_v62  ;;  %v457_v9 = vsub.f32 %v1107_v21, %v1479_v62  ;;  %v442_v45 = vsub.f32 %v1367_v47, %v1479_v62 }
 0x12d   :  { %v443_v51 = vsub.f32 %v1365_v46, %v1479_v62  ;;  %v444_v11 = vsub.f32 %v1369_v49, %v1479_v62  ;;  %v445_v13 = vsub.f32 %v1375_v53, %v1479_v62  ;;  %v446_v15 = vsub.f32 %v1383_v58, %v1479_v62  ;;  %v1509_v53 = vld [vmem:[%s1693_s2] ss:$0 sm:$0xff] }
 0x12e   :  { %v440_v4 = vsub.f32 %v438_v2, %v439_v3  ;;  %v447_v17 = vsub.f32 %v1394_v1, %v1479_v62  ;;  %v448_v61 = vsub.f32 %v1402_v8, %v1479_v62  ;;  %v449_v47 = vsub.f32 %v1409_v16, %v1479_v62 }
 0x12f   :  { %v450_v46 = vsub.f32 %v1416_v23, %v1479_v62  ;;  %v451_v49 = vsub.f32 %v1428_v37, %v1479_v62  ;;  %v452_v58 = vsub.f32 %v1438_v56, %v1479_v62  ;;  %v453_v1 = vsub.f32 %v1453_v10, %v1479_v62 }
 0x130   :  { %v441_v5 = vmax.f32 %v440_v4, 0.0  ;;  %v454_v8 = vsub.f32 %v1442_v63, %v1479_v62  ;;  %v455_v16 = vsub.f32 %v1450_v7, %v1479_v62  ;;  %v456_v31 = vsub.f32 %v1457_v14, %v1479_v62 }
 0x132   :  { %v458_v6 = vadd.f32 1e-05, %v441_v5 }
 0x134   :  { %1199 = vrsqrt.f32 %v458_v6 }
 0x141   :  { %v1504_v12 = vpop.eup %1199 }
 0x142   :  { %v475_v18 = vmul.f32 %v1504_v12, %v457_v9  ;;  %v460_v19 = vmul.f32 %v1504_v12, %v442_v45  ;;  %v461_v20 = vmul.f32 %v1504_v12, %v443_v51  ;;  %v462_v21 = vmul.f32 %v1504_v12, %v444_v11 }
 0x143   :  { %v463_v24 = vmul.f32 %v1504_v12, %v445_v13  ;;  %v464_v25 = vmul.f32 %v1504_v12, %v446_v15  ;;  %v465_v26 = vmul.f32 %v1504_v12, %v447_v17  ;;  %v466_v27 = vmul.f32 %v1504_v12, %v448_v61 }
 0x144   :  { %v483_v28 = vmul.f32 %v1509_v53, %v460_v19  ;;  %v484_v29 = vmul.f32 %v1509_v53, %v461_v20  ;;  %v485_v30 = vmul.f32 %v1509_v53, %v462_v21  ;;  %v1538_v32 = vmul.f32 %v1509_v53, %v475_v18 }
 0x145   :  { %v486_v33 = vmul.f32 %v1509_v53, %v463_v24  ;;  %v487_v34 = vmul.f32 %v1509_v53, %v464_v25  ;;  %v488_v35 = vmul.f32 %v1509_v53, %v465_v26  ;;  %v467_v40 = vmul.f32 %v1504_v12, %v449_v47 }
 0x146   :  { %v506_v36 = vadd.f32 %v1526_v22, %v483_v28  ;;  %v507_v38 = vadd.f32 %v1526_v22, %v484_v29  ;;  %v508_v39 = vadd.f32 %v1526_v22, %v485_v30  ;;  %v489_v44 = vmul.f32 %v1509_v53, %v466_v27 }
 0x147   :  { %v509_v41 = vadd.f32 %v1526_v22, %v486_v33  ;;  %v510_v42 = vadd.f32 %v1526_v22, %v487_v34  ;;  %v511_v43 = vadd.f32 %v1526_v22, %v488_v35  ;;  %v490_v51 = vmul.f32 %v1509_v53, %v467_v40 }
 0x148   :  { %vm522_vm2 = vcmp.gt.f32.partialorder %v506_v36, 0.0  ;;  %vm523_vm3 = vcmp.gt.f32.partialorder %v507_v38, 0.0  ;;  %v538_v48 = vmul.f32 0.2, %v506_v36  ;;  %v539_v50 = vmul.f32 0.2, %v507_v38 }
 0x149   :  { %vm524_vm4 = vcmp.gt.f32.partialorder %v508_v39, 0.0  ;;  %vm525_vm5 = vcmp.gt.f32.partialorder %v509_v41, 0.0  ;;  %v540_v52 = vmul.f32 0.2, %v508_v39  ;;  %v541_v54 = vmul.f32 0.2, %v509_v41 }
 0x14a   :  { %v554_v55 = vsel %vm522_vm2, %v506_v36, %v538_v48  ;;  %v555_v57 = vsel %vm523_vm3, %v507_v38, %v539_v50  ;;  %vm526_vm6 = vcmp.gt.f32.partialorder %v510_v42, 0.0  ;;  %vm527_vm7 = vcmp.gt.f32.partialorder %v511_v43, 0.0 }
 0x14b   :  { %v570_v59 = vpack.c.bf16 %v555_v57, %v554_v55  ;;  %v1012_v60 = vpack.c.bf16 %v554_v55, %v554_v55  ;;  %v1013_v0 = vpack.c.bf16 %v555_v57, %v555_v57  ;;  %v556_v2 = vsel %vm524_vm4, %v508_v39, %v540_v52 }
 0x14c   :  { %v557_v3 = vsel %vm525_vm5, %v509_v41, %v541_v54  ;;  %v1014_v4 = vpack.c.bf16 %v556_v2, %v556_v2  ;;  %v542_v5 = vmul.f32 0.2, %v510_v42  ;;  %v543_v6 = vmul.f32 0.2, %v511_v43 }
 0x14d   :  { %635 = vst.msk [vmem:[%s1696_s5] sm:$0xf] %vm634_vm1, %v1012_v60  ;;  %636 = vst.msk [vmem:[%s1696_s5 + $0x4] sm:$0xf] %vm634_vm1, %v1013_v0  ;;  %1122 = vmatprep.mubr.msk.bf16.mxu1 %vm345_vm0, %v570_v59  ;;  %v571_v9 = vpack.c.bf16 %v557_v3, %v556_v2  ;;  %v1015_v45 = vpack.c.bf16 %v557_v3, %v557_v3  ;;  %v512_v11 = vadd.f32 %v1526_v22, %v489_v44 }
 0x14e   :  { %637 = vst.msk [vmem:[%s1696_s5 + $0x8] sm:$0xf] %vm634_vm1, %v1014_v4  ;;  %v558_v13 = vsel %vm526_vm6, %v510_v42, %v542_v5  ;;  %v559_v15 = vsel %vm527_vm7, %v511_v43, %v543_v6  ;;  %v468_v17 = vmul.f32 %v1504_v12, %v450_v46  ;;  %v469_v61 = vmul.f32 %v1504_v12, %v451_v49 }
 0x14f   :  { %638 = vst.msk [vmem:[%s1696_s5 + $0xc] sm:$0xf] %vm634_vm1, %v1015_v45  ;;  %1123 = vmatmul.mubr.msk.bf16.vlgmr.msra.gmra.mxu1 %vm345_vm0, %v571_v9  ;;  %v572_v47 = vpack.c.bf16 %v559_v15, %v558_v13  ;;  %v1016_v18 = vpack.c.bf16 %v558_v13, %v558_v13  ;;  %v1017_v19 = vpack.c.bf16 %v559_v15, %v559_v15  ;;  %vm528_vm8 = vcmp.gt.f32.partialorder %v512_v11, 0.0 }
 0x150   :  { %v513_v20 = vadd.f32 %v1526_v22, %v490_v51  ;;  %v544_v23 = vmul.f32 0.2, %v512_v11  ;;  %v491_v46 = vmul.f32 %v1509_v53, %v468_v17  ;;  %v492_v37 = vmul.f32 %v1509_v53, %v469_v61 }
 0x151   :  { %639 = vst.msk [vmem:[%s1696_s5 + $0x10] sm:$0xf] %vm634_vm1, %v1016_v18  ;;  %640 = vst.msk [vmem:[%s1696_s5 + $0x14] sm:$0xf] %vm634_vm1, %v1017_v19  ;;  %1126 = vmatprep.mubr.msk.bf16.mxu1 %vm345_vm0, %v572_v47  ;;  %v470_v21 = vmul.f32 %v1504_v12, %v452_v58  ;;  %v471_v24 = vmul.f32 %v1504_v12, %v453_v1  ;;  %v472_v28 = vmul.f32 %v1504_v12, %v454_v8 }
 0x152   :  { %vm529_vm9 = vcmp.gt.f32.partialorder %v513_v20, 0.0  ;;  %v545_v49 = vmul.f32 0.2, %v513_v20  ;;  %v560_v25 = vsel %vm528_vm8, %v512_v11, %v544_v23  ;;  %v514_v26 = vadd.f32 %v1526_v22, %v491_v46 }
 0x153   :  { %v515_v27 = vadd.f32 %v1526_v22, %v492_v37  ;;  %v1018_v30 = vpack.c.bf16 %v560_v25, %v560_v25  ;;  %v493_v56 = vmul.f32 %v1509_v53, %v470_v21  ;;  %v494_v58 = vmul.f32 %v1509_v53, %v471_v24 }
 0x154   :  { %v561_v29 = vsel %vm529_vm9, %v513_v20, %v545_v49  ;;  %vm530_vm10 = vcmp.gt.f32.partialorder %v514_v26, 0.0  ;;  %v546_v1 = vmul.f32 0.2, %v514_v26  ;;  %v521_v35 = vadd.f32 %v1526_v22, %v1538_v32 }
 0x155   :  { %v573_v33 = vpack.c.bf16 %v561_v29, %v560_v25  ;;  %v1019_v10 = vpack.c.bf16 %v561_v29, %v561_v29  ;;  %vm531_vm11 = vcmp.gt.f32.partialorder %v515_v27, 0.0  ;;  %641 = vst.msk [vmem:[%s1696_s5 + $0x18] sm:$0xf] %vm634_vm1, %v1018_v30  ;;  %v547_v34 = vmul.f32 0.2, %v515_v27 }
 0x156   :  { %v516_v63 = vadd.f32 %v1526_v22, %v493_v56  ;;  %v517_v8 = vadd.f32 %v1526_v22, %v494_v58  ;;  %v473_v36 = vmul.f32 %v1504_v12, %v455_v16  ;;  %v495_v38 = vmul.f32 %v1509_v53, %v472_v28 }
 0x157   :  { %642 = vst.msk [vmem:[%s1696_s5 + $0x1c] sm:$0xf] %vm634_vm1, %v1019_v10  ;;  %v474_v39 = vmul.f32 %v1504_v12, %v456_v31  ;;  %1127 = vmatmul.mubr.msk.bf16.gmra.mxu1 %vm345_vm0, %v573_v33  ;;  %v562_v32 = vsel %vm530_vm10, %v514_v26, %v546_v1  ;;  %v563_v40 = vsel %vm531_vm11, %v515_v27, %v547_v34  ;;  %vm537_vm14 = vcmp.gt.f32.partialorder %v521_v35, 0.0 }
 0x158   :  { %vm532_vm12 = vcmp.gt.f32.partialorder %v516_v63, 0.0  ;;  %vm533_vm13 = vcmp.gt.f32.partialorder %v517_v8, 0.0  ;;  %v574_v41 = vpack.c.bf16 %v563_v40, %v562_v32  ;;  %v1020_v42 = vpack.c.bf16 %v562_v32, %v562_v32 }
 0x159   :  { %v1021_v43 = vpack.c.bf16 %v563_v40, %v563_v40  ;;  %v548_v44 = vmul.f32 0.2, %v516_v63  ;;  %v549_v7 = vmul.f32 0.2, %v517_v8  ;;  %v496_v16 = vmul.f32 %v1509_v53, %v473_v36 }
 0x15a   :  { %v518_v48 = vadd.f32 %v1526_v22, %v495_v38  ;;  %v497_v50 = vmul.f32 %v1509_v53, %v474_v39  ;;  %643 = vst.msk [vmem:[%s1696_s5 + $0x20] sm:$0xf] %vm634_vm1, %v1020_v42  ;;  %1130 = vmatprep.mubr.msk.bf16.mxu1 %vm345_vm0, %v574_v41  ;;  %v553_v62 = vmul.f32 0.2, %v521_v35 }
 0x15b   :  { %644 = vst.msk [vmem:[%s1696_s5 + $0x24] sm:$0xf] %vm634_vm1, %v1021_v43  ;;  %v564_v14 = vsel %vm532_vm12, %v516_v63, %v548_v44  ;;  %v565_v12 = vsel %vm533_vm13, %v517_v8, %v549_v7  ;;  %v519_v52 = vadd.f32 %v1526_v22, %v496_v16 }
 0x15c   :  { %v1022_v31 = vpack.c.bf16 %v564_v14, %v564_v14  ;;  %vm534_vm15 = vcmp.gt.f32.partialorder %v518_v48, 0.0  ;;  %v1023_v53 = vpack.c.bf16 %v565_v12, %v565_v12  ;;  %v550_v54 = vmul.f32 0.2, %v518_v48 }
 0x15d   :  { %v520_v55 = vadd.f32 %v1526_v22, %v497_v50  ;;  %v575_v57 = vpack.c.bf16 %v565_v12, %v564_v14  ;;  %vm535_vm2 = vcmp.gt.f32.partialorder %v519_v52, 0.0  ;;  %v551_v59 = vmul.f32 0.2, %v519_v52 }
 0x15e   :  { %645 = vst.msk [vmem:[%s1696_s5 + $0x28] sm:$0xf] %vm634_vm1, %v1022_v31  ;;  %v569_v60 = vsel %vm537_vm14, %v521_v35, %v553_v62  ;;  %646 = vst.msk [vmem:[%s1696_s5 + $0x2c] sm:$0xf] %vm634_vm1, %v1023_v53  ;;  %v566_v0 = vsel %vm534_vm15, %v518_v48, %v550_v54 }
 0x15f   :  { %vm536_vm3 = vcmp.gt.f32.partialorder %v520_v55, 0.0  ;;  %v552_v2 = vmul.f32 0.2, %v520_v55  ;;  %v1027_v3 = vpack.c.bf16 %v569_v60, %v569_v60  ;;  %1131 = vmatmul.mubr.msk.bf16.gmra.mxu1 %vm345_vm0, %v575_v57  ;;  %v567_v22 = vsel %vm535_vm2, %v519_v52, %v551_v59 }
 0x160   :  { %v1024_v4 = vpack.c.bf16 %v566_v0, %v566_v0  ;;  %v576_v5 = vpack.c.bf16 %v567_v22, %v566_v0  ;;  %v1025_v6 = vpack.c.bf16 %v567_v22, %v567_v22 }
 0x161   :  { %v568_v9 = vsel %vm536_vm3, %v520_v55, %v552_v2  ;;  %650 = vst.msk [vmem:[%s1696_s5 + $0x3c] sm:$0xf] %vm634_vm1, %v1027_v3 }
 0x162   :  { %647 = vst.msk [vmem:[%s1696_s5 + $0x30] sm:$0xf] %vm634_vm1, %v1024_v4  ;;  %v1026_v45 = vpack.c.bf16 %v568_v9, %v568_v9  ;;  %648 = vst.msk [vmem:[%s1696_s5 + $0x34] sm:$0xf] %vm634_vm1, %v1025_v6  ;;  %1134 = vmatprep.mubr.msk.bf16.mxu1 %vm345_vm0, %v576_v5  ;;  %v577_v51 = vpack.c.bf16 %v569_v60, %v568_v9 }
 0x164   :  { %649 = vst.msk [vmem:[%s1696_s5 + $0x38] sm:$0xf] %vm634_vm1, %v1026_v45  ;;  %s1223_s5 = smov [#allocation2]  }
 0x165   :  { %s923_s18 = sshll.u32 %s1223_s5, 4  ;;  %s924_s18 = int_to_ptr.vmem [resolvable:$true] %s923_s18 }
 0x166   :  { %s1201_s19 = scalar_lea.vmem %s924_s18, 1024  ;;  %p1206_p1 = scmp.lt.s32.totalorder %s924_s18, %s924_s18 }
 0x167   :  { %1135 = vmatmul.mubr.msk.bf16.gmra.mxu1 %vm345_vm0, %v577_v51  ;;  %p1202_p0 = scmp.ne.s32.totalorder %s924_s18, %s1201_s19  ;;  %p1207_p2 = scmp.lt.s32.totalorder %s1201_s19, %s1201_s19 }
 0x169   :  { %p1208_p3 = por %p1207_p2, %p1206_p1 }
 0x16b   :  { %p1209_p4 = pnand %p1208_p3, %p1202_p0 }
 0x20f   :  { %v1124_v11 = vpop.f32.mrf.mxu1 }
 0x210   :  { %vm790_vm4 = vcmp.gt.f32.partialorder %v1124_v11, 0.0  ;;  %v806_v13 = vmul.f32 0.2, %v1124_v11 }
 0x211   :  { %v725_v15 = vpop.f32.mrf.mxu1 }
 0x212   :  { %v822_v17 = vsel %vm790_vm4, %v1124_v11, %v806_v13  ;;  %vm788_vm5 = vcmp.gt.f32.partialorder %v725_v15, 0.0  ;;  %v804_v61 = vmul.f32 0.2, %v725_v15 }
 0x213   :  { %v1030_v47 = vpack.c.bf16 %v822_v17, %v822_v17  ;;  %v1125_v18 = vpop.f32.mrf.mxu1 }
 0x214   :  { %v820_v19 = vsel %vm788_vm5, %v725_v15, %v804_v61  ;;  %vm791_vm6 = vcmp.gt.f32.partialorder %v1125_v18, 0.0  ;;  %v807_v20 = vmul.f32 0.2, %v1125_v18 }
 0x215   :  { %902 = vst.msk [vmem:[#allocation2 + $0x8] sm:$0xf] %vm634_vm1, %v1030_v47  ;;  %v1028_v23 = vpack.c.bf16 %v820_v19, %v820_v19  ;;  %v728_v46 = vpop.f32.mrf.mxu1 }
 0x216   :  { %v823_v37 = vsel %vm791_vm6, %v1125_v18, %v807_v20  ;;  %vm789_vm7 = vcmp.gt.f32.partialorder %v728_v46, 0.0  ;;  %v805_v49 = vmul.f32 0.2, %v728_v46 }
 0x217   :  { %900 = vst.msk [vmem:[#allocation2] sm:$0xf] %vm634_vm1, %v1028_v23  ;;  %v1031_v21 = vpack.c.bf16 %v823_v37, %v823_v37  ;;  %v1128_v24 = vpop.f32.mrf.mxu1 }
 0x218   :  { %v821_v25 = vsel %vm789_vm7, %v728_v46, %v805_v49  ;;  %vm794_vm0 = vcmp.gt.f32.partialorder %v1128_v24, 0.0  ;;  %v810_v26 = vmul.f32 0.2, %v1128_v24 }
 0x219   :  { %903 = vst.msk [vmem:[#allocation2 + $0xc] sm:$0xf] %vm634_vm1, %v1031_v21  ;;  %v1029_v27 = vpack.c.bf16 %v821_v25, %v821_v25  ;;  %v741_v28 = vpop.f32.mrf.mxu1 }
 0x21a   :  { %v826_v29 = vsel %vm794_vm0, %v1128_v24, %v810_v26  ;;  %vm792_vm8 = vcmp.gt.f32.partialorder %v741_v28, 0.0  ;;  %v808_v30 = vmul.f32 0.2, %v741_v28 }
 0x21b   :  { %901 = vst.msk [vmem:[#allocation2 + $0x4] sm:$0xf] %vm634_vm1, %v1029_v27  ;;  %v1034_v56 = vpack.c.bf16 %v826_v29, %v826_v29  ;;  %v1129_v58 = vpop.f32.mrf.mxu1 }
 0x21c   :  { %v824_v33 = vsel %vm792_vm8, %v741_v28, %v808_v30  ;;  %vm795_vm9 = vcmp.gt.f32.partialorder %v1129_v58, 0.0  ;;  %v811_v10 = vmul.f32 0.2, %v1129_v58 }
 0x21d   :  { %906 = vst.msk [vmem:[#allocation2 + $0x18] sm:$0xf] %vm634_vm1, %v1034_v56  ;;  %v1032_v1 = vpack.c.bf16 %v824_v33, %v824_v33  ;;  %v744_v34 = vpop.f32.mrf.mxu1 }
 0x21e   :  { %v827_v63 = vsel %vm795_vm9, %v1129_v58, %v811_v10  ;;  %vm793_vm10 = vcmp.gt.f32.partialorder %v744_v34, 0.0  ;;  %v809_v8 = vmul.f32 0.2, %v744_v34 }
 0x21f   :  { %904 = vst.msk [vmem:[#allocation2 + $0x10] sm:$0xf] %vm634_vm1, %v1032_v1  ;;  %v1035_v35 = vpack.c.bf16 %v827_v63, %v827_v63  ;;  %v1132_v36 = vpop.f32.mrf.mxu1 }
 0x220   :  { %v825_v38 = vsel %vm793_vm10, %v744_v34, %v809_v8  ;;  %vm798_vm11 = vcmp.gt.f32.partialorder %v1132_v36, 0.0  ;;  %v814_v39 = vmul.f32 0.2, %v1132_v36 }
 0x221   :  { %907 = vst.msk [vmem:[#allocation2 + $0x1c] sm:$0xf] %vm634_vm1, %v1035_v35  ;;  %v1033_v32 = vpack.c.bf16 %v825_v38, %v825_v38  ;;  %v757_v40 = vpop.f32.mrf.mxu1 }
 0x222   :  { %v830_v41 = vsel %vm798_vm11, %v1132_v36, %v814_v39  ;;  %vm796_vm12 = vcmp.gt.f32.partialorder %v757_v40, 0.0  ;;  %v812_v42 = vmul.f32 0.2, %v757_v40 }
 0x223   :  { %905 = vst.msk [vmem:[#allocation2 + $0x14] sm:$0xf] %vm634_vm1, %v1033_v32  ;;  %v1038_v43 = vpack.c.bf16 %v830_v41, %v830_v41  ;;  %v1133_v44 = vpop.f32.mrf.mxu1 }
 0x224   :  { %v828_v7 = vsel %vm796_vm12, %v757_v40, %v812_v42  ;;  %vm799_vm13 = vcmp.gt.f32.partialorder %v1133_v44, 0.0  ;;  %v815_v16 = vmul.f32 0.2, %v1133_v44 }
 0x225   :  { %910 = vst.msk [vmem:[#allocation2 + $0x28] sm:$0xf] %vm634_vm1, %v1038_v43  ;;  %v1036_v48 = vpack.c.bf16 %v828_v7, %v828_v7  ;;  %v760_v50 = vpop.f32.mrf.mxu1 }
 0x226   :  { %v831_v14 = vsel %vm799_vm13, %v1133_v44, %v815_v16  ;;  %vm797_vm14 = vcmp.gt.f32.partialorder %v760_v50, 0.0  ;;  %v813_v62 = vmul.f32 0.2, %v760_v50 }
 0x227   :  { %908 = vst.msk [vmem:[#allocation2 + $0x20] sm:$0xf] %vm634_vm1, %v1036_v48  ;;  %v1039_v12 = vpack.c.bf16 %v831_v14, %v831_v14  ;;  %v1136_v31 = vpop.f32.mrf.mxu1 }
 0x228   :  { %v829_v52 = vsel %vm797_vm14, %v760_v50, %v813_v62  ;;  %vm802_vm15 = vcmp.gt.f32.partialorder %v1136_v31, 0.0  ;;  %v818_v53 = vmul.f32 0.2, %v1136_v31 }
 0x229   :  { %911 = vst.msk [vmem:[#allocation2 + $0x2c] sm:$0xf] %vm634_vm1, %v1039_v12  ;;  %v1037_v54 = vpack.c.bf16 %v829_v52, %v829_v52  ;;  %v773_v55 = vpop.f32.mrf.mxu1 }
 0x22a   :  { %v834_v57 = vsel %vm802_vm15, %v1136_v31, %v818_v53  ;;  %vm800_vm2 = vcmp.gt.f32.partialorder %v773_v55, 0.0  ;;  %v816_v59 = vmul.f32 0.2, %v773_v55 }
 0x22b   :  { %909 = vst.msk [vmem:[#allocation2 + $0x24] sm:$0xf] %vm634_vm1, %v1037_v54  ;;  %v1042_v60 = vpack.c.bf16 %v834_v57, %v834_v57  ;;  %v1137_v0 = vpop.f32.mrf.mxu1 }
 0x22c   :  { %v832_v2 = vsel %vm800_vm2, %v773_v55, %v816_v59  ;;  %vm803_vm3 = vcmp.gt.f32.partialorder %v1137_v0, 0.0  ;;  %v819_v3 = vmul.f32 0.2, %v1137_v0 }
 0x22d   :  { %914 = vst.msk [vmem:[#allocation2 + $0x38] sm:$0xf] %vm634_vm1, %v1042_v60  ;;  %v1040_v22 = vpack.c.bf16 %v832_v2, %v832_v2  ;;  %v776_v4 = vpop.f32.mrf.mxu1 }
 0x22e   :  { %v835_v5 = vsel %vm803_vm3, %v1137_v0, %v819_v3  ;;  %vm801_vm4 = vcmp.gt.f32.partialorder %v776_v4, 0.0  ;;  %v817_v6 = vmul.f32 0.2, %v776_v4 }
 0x22f   :  { %912 = vst.msk [vmem:[#allocation2 + $0x30] sm:$0xf] %vm634_vm1, %v1040_v22  ;;  %v1043_v9 = vpack.c.bf16 %v835_v5, %v835_v5 }
 0x230   :  { %v833_v45 = vsel %vm801_vm4, %v776_v4, %v817_v6 }
 0x231   :  { %915 = vst.msk [vmem:[#allocation2 + $0x3c] sm:$0xf] %vm634_vm1, %v1043_v9  ;;  %v1041_v51 = vpack.c.bf16 %v833_v45, %v833_v45 }
 0x233   :  { %913 = vst.msk [vmem:[#allocation2 + $0x34] sm:$0xf] %vm634_vm1, %v1041_v51 }
 0x234   :  { %1212 = shalt.err (!%p1209_p4)
}
 0x235   :  { %s1224_s20 = smov 64   ;;  %s1225_s21 = smov 4  }
 0x236   :  { %929 = dma.vmem_to_hbm [thread:$0]  %s924_s18, 1024, %s1697_s6, [#allocation3], %s1224_s20, %s1224_s20, %s1225_s21  }
 0x237   :  { %1221 = dma.done.wait [#allocation3], 1024  }
 0x238   :  { %1222 = vsyncadd [#allocation3], 4294966272 }
 0x239   :  { %935 = vsyncpa [#allocation3], 1 }

// kernel: discriminator_forward.8
= control target key start
LH: loop header
LB: loop body
LE: loop exit
PB: predicated region body
PF: predicated region fallthrough
CT: control target
= control target key end

     0   :  { %s1089_s0 = inlined_call_operand.vmem [shape: bf16[32,512], index: 0, kind: input, shape index: {}]   ;;  %s1090_s1 = inlined_call_operand.vmem [shape: bf16[512,64], index: 1, kind: input, shape index: {}]   ;;  %s1091_s2 = inlined_call_operand.vmem [shape: f32[1,64], index: 2, kind: input, shape index: {}]   ;;  %s1092_s3 = inlined_call_operand.vmem [shape: f32[1,64], index: 3, kind: input, shape index: {}]   ;;  %s1093_s4 = inlined_call_operand.vmem [shape: bf16[64,64], index: 4, kind: input, shape index: {}]   ;;  %s1094_s5 = inlined_call_operand.vmem [shape: bf16[32,64], index: 5, kind: output, shape index: {0}]   ;;  %s1095_s6 = inlined_call_operand.hbm [shape: bf16[32,64], index: 6, kind: output, shape index: {1}]  }
   0x1   :  { %v808_v0 = vld [vmem:[%s1090_s1 + $0x78] sm:$0xff]   ;;  %v812_v4 = vld [vmem:[%s1090_s1 + $0x70] sm:$0xff]   ;;  %v816_v8 = vld [vmem:[%s1090_s1 + $0x68] sm:$0xff]  }
   0x2   :  { %v809_v1 = vld [vmem:[%s1090_s1 + $0xf8] sm:$0xff]   ;;  %731 = vmatprep.subr.bf16.mxu0 %v808_v0  ;;  %v813_v5 = vld [vmem:[%s1090_s1 + $0xf0] sm:$0xff]   ;;  %v817_v9 = vld [vmem:[%s1090_s1 + $0xe8] sm:$0xff]  }
   0x3   :  { %v810_v2 = vld [vmem:[%s1090_s1 + $0x38] sm:$0xff]   ;;  %759 = vmatprep.subr.bf16.mxu1 %v809_v1  ;;  %v814_v6 = vld [vmem:[%s1090_s1 + $0x30] sm:$0xff]   ;;  %v818_v10 = vld [vmem:[%s1090_s1 + $0x28] sm:$0xff]  }
   0x4   :  { %v811_v3 = vld [vmem:[%s1090_s1 + $0xb8] sm:$0xff]   ;;  %732 = vmatpush3.bf16.msra.mxu0 %v810_v2  ;;  %v815_v7 = vld [vmem:[%s1090_s1 + $0xb0] sm:$0xff]   ;;  %v819_v11 = vld [vmem:[%s1090_s1 + $0xa8] sm:$0xff]  }
   0x5   :  { %760 = vmatpush3.bf16.msra.mxu1 %v811_v3  ;;  %733 = vmatprep.subr.bf16.mxu0 %v812_v4  ;;  %v820_v12 = vld [vmem:[%s1090_s1 + $0x60] sm:$0xff]   ;;  %v824_v16 = vld [vmem:[%s1090_s1 + $0x58] sm:$0xff]   ;;  %v828_v20 = vld [vmem:[%s1090_s1 + $0x50] sm:$0xff]  }
   0x6   :  { %761 = vmatprep.subr.bf16.mxu1 %v813_v5  ;;  %v821_v13 = vld [vmem:[%s1090_s1 + $0xe0] sm:$0xff]   ;;  %v825_v17 = vld [vmem:[%s1090_s1 + $0xd8] sm:$0xff]   ;;  %v829_v21 = vld [vmem:[%s1090_s1 + $0xd0] sm:$0xff]  }
   0x7   :  { %v822_v14 = vld [vmem:[%s1090_s1 + $0x20] sm:$0xff]   ;;  %v826_v18 = vld [vmem:[%s1090_s1 + $0x18] sm:$0xff]   ;;  %v830_v22 = vld [vmem:[%s1090_s1 + $0x10] sm:$0xff]  }
   0x8   :  { %734 = vmatpush3.bf16.msra.mxu0 %v814_v6  ;;  %v823_v15 = vld [vmem:[%s1090_s1 + $0xa0] sm:$0xff]   ;;  %v827_v19 = vld [vmem:[%s1090_s1 + $0x98] sm:$0xff]   ;;  %v831_v23 = vld [vmem:[%s1090_s1 + $0x90] sm:$0xff]  }
   0x9   :  { %762 = vmatpush3.bf16.msra.mxu1 %v815_v7  ;;  %735 = vmatprep.subr.bf16.mxu0 %v816_v8  ;;  %v832_v24 = vld [vmem:[%s1090_s1 + $0x48] sm:$0xff]   ;;  %v836_v28 = vld [vmem:[%s1090_s1 + $0x40] sm:$0xff]  }
   0xa   :  { %763 = vmatprep.subr.bf16.mxu1 %v817_v9  ;;  %v833_v25 = vld [vmem:[%s1090_s1 + $0xc8] sm:$0xff]   ;;  %v837_v29 = vld [vmem:[%s1090_s1 + $0xc0] sm:$0xff]  }
   0xb   :  { %v834_v26 = vld [vmem:[%s1090_s1 + $0x8] sm:$0xff]   ;;  %v838_v30 = vld [vmem:[%s1090_s1] sm:$0xff]  }
   0xc   :  { %736 = vmatpush3.bf16.msra.mxu0 %v818_v10  ;;  %v835_v27 = vld [vmem:[%s1090_s1 + $0x88] sm:$0xff]   ;;  %v839_v31 = vld [vmem:[%s1090_s1 + $0x80] sm:$0xff]  }
   0xd   :  { %764 = vmatpush3.bf16.msra.mxu1 %v819_v11  ;;  %737 = vmatprep.subr.bf16.mxu0 %v820_v12  ;;  %v840_v32 = vld [vmem:[%s1089_s0] ss:$16 sps:$4 sm:$0xff]   ;;  %v842_v33 = vld [vmem:[%s1089_s0 + $0x4] ss:$16 sps:$4 sm:$0xff]   ;;  %v843_v34 = vld [vmem:[%s1089_s0 + $0x8] ss:$16 sps:$4 sm:$0xff]  }
   0xe   :  { %765 = vmatprep.subr.bf16.mxu1 %v821_v13  ;;  %v845_v35 = vld [vmem:[%s1089_s0 + $0xc] ss:$16 sps:$4 sm:$0xff]   ;;  %360 = vmatprep.mubr.bf16.mxu0 %v842_v33  ;;  %v846_v36 = vld [vmem:[%s1089_s0 + $0x24] ss:$16 sps:$4 sm:$0xff]   ;;  %v850_v38 = vld [vmem:[%s1089_s0 + $0x20] ss:$16 sps:$4 sm:$0xff]  }
   0xf   :  { %409 = vmatprep.mubr.bf16.mxu1 %v845_v35  ;;  %v848_v37 = vld [vmem:[%s1089_s0 + $0x2c] ss:$16 sps:$4 sm:$0xff]  }
  0x10   :  { %738 = vmatpush3.bf16.msra.mxu0 %v822_v14 }
  0x11   :  { %766 = vmatpush3.bf16.msra.mxu1 %v823_v15  ;;  %739 = vmatprep.subr.bf16.mxu0 %v824_v16 }
  0x12   :  { %767 = vmatprep.subr.bf16.mxu1 %v825_v17 }
  0x14   :  { %740 = vmatpush3.bf16.msra.mxu0 %v826_v18 }
  0x15   :  { %768 = vmatpush3.bf16.msra.mxu1 %v827_v19  ;;  %741 = vmatprep.subr.bf16.mxu0 %v828_v20 }
  0x16   :  { %769 = vmatprep.subr.bf16.mxu1 %v829_v21 }
  0x18   :  { %742 = vmatpush3.bf16.msra.mxu0 %v830_v22 }
  0x19   :  { %770 = vmatpush3.bf16.msra.mxu1 %v831_v23  ;;  %743 = vmatprep.subr.bf16.mxu0 %v832_v24 }
  0x1a   :  { %771 = vmatprep.subr.bf16.mxu1 %v833_v25 }
  0x1c   :  { %744 = vmatpush3.bf16.msra.mxu0 %v834_v26 }
  0x1d   :  { %772 = vmatpush3.bf16.msra.mxu1 %v835_v27  ;;  %745 = vmatprep.subr.bf16.mxu0 %v836_v28 }
  0x1e   :  { %773 = vmatprep.subr.bf16.mxu1 %v837_v29 }
  0x20   :  { %746 = vmatpush3.bf16.msra.mxu0 %v838_v30 }
  0x21   :  { %774 = vmatpush3.bf16.msra.mxu1 %v839_v31 }
  0x23   :  { %361 = vmatmul.mubr.bf16.vlgmr.msra.gmra.mxu0 %v840_v32 }
  0x24   :  { %410 = vmatmul.mubr.bf16.vlgmr.msra.gmra.mxu1 %v843_v34  ;;  %368 = vmatprep.mubr.bf16.mxu0 %v846_v36 }
  0x25   :  { %417 = vmatprep.mubr.bf16.mxu1 %v848_v37 }
  0x26   :  { %12 = vsyncpa [#allocation3], 0  ;;  %v851_v39 = vld [vmem:[%s1089_s0 + $0x28] ss:$16 sps:$4 sm:$0xff]   ;;  %v853_v41 = vld [vmem:[%s1093_s4 + $0x10] sm:$0xff]   ;;  %vm426_vm0 = vcmask 523264  }
  0x27   :  { %v852_v40 = vld [vmem:[%s1093_s4 + $0x18] sm:$0xff]   ;;  %v854_v42 = vld [vmem:[%s1093_s4 + $0x8] sm:$0xff]   ;;  %v855_v43 = vld [vmem:[%s1093_s4] sm:$0xff]   ;;  %vm523_vm5 = vcmask 519168  }
  0x28   :  { %793 = vmatprep.subr.bf16.mxu0 %v852_v40 }
  0x29   :  { %794 = vmatpush3.bf16.msra.mxu0 %v852_v40 }
  0x2a   :  { %795 = vmatprep.subr.bf16.mxu0 %v853_v41 }
  0x2b   :  { %369 = vmatmul.mubr.bf16.gmra.mxu0 %v850_v38 }
  0x2c   :  { %418 = vmatmul.mubr.bf16.gmra.mxu1 %v851_v39 }
  0x2d   :  { %796 = vmatpush3.bf16.msra.mxu0 %v853_v41 }
  0x2e   :  { %797 = vmatprep.subr.bf16.mxu0 %v854_v42 }
  0x31   :  { %798 = vmatpush3.bf16.msra.mxu0 %v854_v42 }
  0x32   :  { %799 = vmatprep.subr.bf16.mxu0 %v855_v43 }
  0x35   :  { %800 = vmatpush3.bf16.msra.mxu0 %v855_v43 }
  0xe3   :  { %v747_v44 = vpop.f32.mrf.mxu0 }
  0xe4   :  { %v775_v45 = vpop.f32.mrf.mxu1 }
  0xe5   :  { %v748_v46 = vpop.f32.mrf.mxu0 }
  0xe6   :  { %v776_v47 = vpop.f32.mrf.mxu1  ;;  %v749_v50 = vadd.f32 %v748_v46, %v747_v44 }
  0xe7   :  { %v750_v48 = vpop.f32.mrf.mxu0  ;;  %v777_v51 = vadd.f32 %v776_v47, %v775_v45 }
  0xe8   :  { %v778_v49 = vpop.f32.mrf.mxu1 }
  0xe9   :  { %v751_v52 = vpop.f32.mrf.mxu0  ;;  %v412_v58 = vadd.f32 %v777_v51, %v749_v50 }
  0xea   :  { %v752_v53 = vadd.f32 %v751_v52, %v750_v48  ;;  %v779_v54 = vpop.f32.mrf.mxu1 }
  0xeb   :  { %v780_v55 = vadd.f32 %v779_v54, %v778_v49  ;;  %v753_v56 = vpop.f32.mrf.mxu0  ;;  %v442_v3 = vmul.f32 %v412_v58, %v412_v58  ;;  %v427_v7 = vsel %vm426_vm0, %v412_v58, 0.0  ;;  %v707_v49 = vld [vmem:[%s1091_s2] ss:$0 sm:$0xff] }
  0xec   :  { %v781_v57 = vpop.f32.mrf.mxu1  ;;  %v708_v54 = vld [vmem:[%s1092_s3] ss:$0 sm:$0xff] }
  0xed   :  { %v415_v59 = vadd.f32 %v780_v55, %v752_v53  ;;  %v754_v60 = vpop.f32.mrf.mxu0  ;;  %v446_v15 = vsel %vm426_vm0, %v442_v3, 0.0 }
  0xee   :  { %v755_v61 = vadd.f32 %v754_v60, %v753_v56  ;;  %v782_v62 = vpop.f32.mrf.mxu1 }
  0xef   :  { %v443_v63 = vmul.f32 %v415_v59, %v415_v59  ;;  %v783_v0 = vadd.f32 %v782_v62, %v781_v57  ;;  %v756_v1 = vpop.f32.mrf.mxu0  ;;  %v428_v4 = vsel %vm426_vm0, %v415_v59, 0.0 }
  0xf0   :  { %v784_v2 = vpop.f32.mrf.mxu1  ;;  %v429_v14 = vadd.f32 %v428_v4, %v427_v7 }
  0xf1   :  { %v420_v5 = vadd.f32 %v783_v0, %v755_v61  ;;  %v757_v6 = vpop.f32.mrf.mxu0  ;;  %v447_v10 = vsel %vm426_vm0, %v443_v63, 0.0 }
  0xf2   :  { %v758_v8 = vadd.f32 %v757_v6, %v756_v1  ;;  %v785_v9 = vpop.f32.mrf.mxu1  ;;  %v448_v18 = vadd.f32 %v447_v10, %v446_v15 }
  0xf3   :  { %v430_v11 = vsel %vm426_vm0, %v420_v5, 0.0  ;;  %v444_v12 = vmul.f32 %v420_v5, %v420_v5  ;;  %v786_v13 = vadd.f32 %v785_v9, %v784_v2 }
  0xf4   :  { %v431_v19 = vadd.f32 %v430_v11, %v429_v14 }
  0xf5   :  { %v449_v16 = vsel %vm426_vm0, %v444_v12, 0.0  ;;  %v423_v17 = vadd.f32 %v786_v13, %v758_v8 }
  0xf6   :  { %v450_v22 = vadd.f32 %v449_v16, %v448_v18 }
  0xf7   :  { %v432_v20 = vsel %vm426_vm0, %v423_v17, 0.0  ;;  %v445_v21 = vmul.f32 %v423_v17, %v423_v17 }
  0xf8   :  { %v433_v23 = vadd.f32 %v432_v20, %v431_v19 }
  0xf9   :  { %v451_v24 = vsel %vm426_vm0, %v445_v21, 0.0 }
  0xfa   :  { %v434_v25 = vrot.slane %v433_v23, 4  ;;  %v452_v26 = vadd.f32 %v451_v24, %v450_v22 }
  0xfc   :  { %v435_v27 = vadd.f32 %v434_v25, %v433_v23  ;;  %v453_v28 = vrot.slane %v452_v26, 4 }
  0xfe   :  { %v436_v29 = vrot.slane %v435_v27, 2  ;;  %v454_v30 = vadd.f32 %v453_v28, %v452_v26 }
 0x100   :  { %v437_v31 = vadd.f32 %v436_v29, %v435_v27  ;;  %v455_v32 = vrot.slane %v454_v30, 2 }
 0x102   :  { %v438_v33 = vrot.slane %v437_v31, 1  ;;  %v456_v34 = vadd.f32 %v455_v32, %v454_v30 }
 0x104   :  { %v439_v35 = vadd.f32 %v438_v33, %v437_v31  ;;  %v457_v36 = vrot.slane %v456_v34, 1 }
 0x106   :  { %v441_v37 = vmul.f32 0.03125, %v439_v35  ;;  %v458_v38 = vadd.f32 %v457_v36, %v456_v34 }
 0x108   :  { %v459_v39 = vmul.f32 0.03125, %v458_v38  ;;  %v460_v40 = vmul.f32 %v441_v37, %v441_v37  ;;  %v465_v44 = vsub.f32 %v420_v5, %v441_v37  ;;  %v466_v45 = vsub.f32 %v423_v17, %v441_v37 }
 0x109   :  { %v463_v46 = vsub.f32 %v412_v58, %v441_v37  ;;  %v464_v47 = vsub.f32 %v415_v59, %v441_v37 }
 0x10a   :  { %v461_v41 = vsub.f32 %v459_v39, %v460_v40 }
 0x10c   :  { %v462_v42 = vmax.f32 %v461_v41, 0.0 }
 0x10e   :  { %v467_v43 = vadd.f32 1e-05, %v462_v42 }
 0x110   :  { %856 = vrsqrt.f32 %v467_v43 }
 0x11d   :  { %v857_v48 = vpop.eup %856 }
 0x11e   :  { %v471_v50 = vmul.f32 %v857_v48, %v465_v44  ;;  %v472_v51 = vmul.f32 %v857_v48, %v466_v45  ;;  %v469_v52 = vmul.f32 %v857_v48, %v463_v46  ;;  %v470_v53 = vmul.f32 %v857_v48, %v464_v47 }
 0x120   :  { %v482_v55 = vmul.f32 %v707_v49, %v471_v50  ;;  %v483_v56 = vmul.f32 %v707_v49, %v472_v51  ;;  %v480_v57 = vmul.f32 %v707_v49, %v469_v52  ;;  %v481_v60 = vmul.f32 %v707_v49, %v470_v53 }
 0x122   :  { %v493_v61 = vadd.f32 %v708_v54, %v482_v55  ;;  %v494_v58 = vadd.f32 %v708_v54, %v483_v56  ;;  %v491_v59 = vadd.f32 %v708_v54, %v480_v57  ;;  %v492_v62 = vadd.f32 %v708_v54, %v481_v60 }
 0x124   :  { %vm498_vm1 = vcmp.gt.f32.partialorder %v494_v58, 0.0  ;;  %v502_v63 = vmul.f32 0.2, %v494_v58  ;;  %vm495_vm2 = vcmp.gt.f32.partialorder %v491_v59, 0.0  ;;  %vm496_vm3 = vcmp.gt.f32.partialorder %v492_v62, 0.0 }
 0x125   :  { %v499_v0 = vmul.f32 0.2, %v491_v59  ;;  %v500_v1 = vmul.f32 0.2, %v492_v62  ;;  %vm497_vm4 = vcmp.gt.f32.partialorder %v493_v61, 0.0 }
 0x126   :  { %v506_v2 = vsel %vm498_vm1, %v494_v58, %v502_v63  ;;  %v501_v3 = vmul.f32 0.2, %v493_v61 }
 0x127   :  { %v726_v4 = vpack.c.bf16 %v506_v2, %v506_v2  ;;  %v503_v5 = vsel %vm495_vm2, %v491_v59, %v499_v0  ;;  %v504_v6 = vsel %vm496_vm3, %v492_v62, %v500_v1 }
 0x128   :  { %v507_v7 = vpack.c.bf16 %v504_v6, %v503_v5  ;;  %v723_v8 = vpack.c.bf16 %v503_v5, %v503_v5  ;;  %v724_v9 = vpack.c.bf16 %v504_v6, %v504_v6  ;;  %v505_v10 = vsel %vm497_vm4, %v493_v61, %v501_v3 }
 0x129   :  { %527 = vst.msk [vmem:[%s1094_s5 + $0xc] sm:$0xf] %vm523_vm5, %v726_v4  ;;  %v508_v11 = vpack.c.bf16 %v506_v2, %v505_v10  ;;  %v725_v12 = vpack.c.bf16 %v505_v10, %v505_v10 }
 0x12a   :  { %524 = vst.msk [vmem:[%s1094_s5] sm:$0xf] %vm523_vm5, %v723_v8  ;;  %525 = vst.msk [vmem:[%s1094_s5 + $0x4] sm:$0xf] %vm523_vm5, %v724_v9  ;;  %801 = vmatprep.mubr.msk.bf16.mxu0 %vm426_vm0, %v507_v7 }
 0x12b   :  { %526 = vst.msk [vmem:[%s1094_s5 + $0x8] sm:$0xf] %vm523_vm5, %v725_v12  ;;  %802 = vmatmul.mubr.msk.bf16.vlgmr.msra.gmra.mxu0 %vm426_vm0, %v508_v11  ;;  %s880_s5 = smov [#allocation2]  }
 0x12c   :  { %s654_s20 = sshll.u32 %s880_s5, 4  ;;  %s655_s20 = int_to_ptr.vmem [resolvable:$true] %s654_s20 }
 0x12d   :  { %s858_s1 = scalar_lea.vmem %s655_s20, 256  ;;  %p863_p1 = scmp.lt.s32.totalorder %s655_s20, %s655_s20 }
 0x12e   :  { %p859_p0 = scmp.ne.s32.totalorder %s655_s20, %s858_s1  ;;  %p864_p2 = scmp.lt.s32.totalorder %s858_s1, %s858_s1 }
 0x130   :  { %p865_p3 = por %p864_p2, %p863_p1 }
 0x132   :  { %p866_p4 = pnand %p865_p3, %p859_p0 }
 0x1eb   :  { %v803_v13 = vpop.f32.mrf.mxu0 }
 0x1ec   :  { %vm617_vm6 = vcmp.gt.f32.partialorder %v803_v13, 0.0  ;;  %v621_v14 = vmul.f32 0.2, %v803_v13 }
 0x1ed   :  { %v600_v15 = vpop.f32.mrf.mxu0 }
 0x1ee   :  { %v625_v16 = vsel %vm617_vm6, %v803_v13, %v621_v14  ;;  %vm615_vm7 = vcmp.gt.f32.partialorder %v600_v15, 0.0  ;;  %v619_v17 = vmul.f32 0.2, %v600_v15 }
 0x1ef   :  { %v729_v18 = vpack.c.bf16 %v625_v16, %v625_v16  ;;  %v804_v19 = vpop.f32.mrf.mxu0 }
 0x1f0   :  { %v623_v20 = vsel %vm615_vm7, %v600_v15, %v619_v17  ;;  %vm618_vm8 = vcmp.gt.f32.partialorder %v804_v19, 0.0  ;;  %v622_v21 = vmul.f32 0.2, %v804_v19 }
 0x1f1   :  { %645 = vst.msk [vmem:[#allocation2 + $0x8] sm:$0xf] %vm523_vm5, %v729_v18  ;;  %v727_v22 = vpack.c.bf16 %v623_v20, %v623_v20  ;;  %v603_v23 = vpop.f32.mrf.mxu0 }
 0x1f2   :  { %v626_v24 = vsel %vm618_vm8, %v804_v19, %v622_v21  ;;  %vm616_vm9 = vcmp.gt.f32.partialorder %v603_v23, 0.0  ;;  %v620_v25 = vmul.f32 0.2, %v603_v23 }
 0x1f3   :  { %643 = vst.msk [vmem:[#allocation2] sm:$0xf] %vm523_vm5, %v727_v22  ;;  %v730_v26 = vpack.c.bf16 %v626_v24, %v626_v24 }
 0x1f4   :  { %v624_v27 = vsel %vm616_vm9, %v603_v23, %v620_v25 }
 0x1f5   :  { %646 = vst.msk [vmem:[#allocation2 + $0xc] sm:$0xf] %vm523_vm5, %v730_v26  ;;  %v728_v28 = vpack.c.bf16 %v624_v27, %v624_v27 }
 0x1f7   :  { %644 = vst.msk [vmem:[#allocation2 + $0x4] sm:$0xf] %vm523_vm5, %v728_v28 }
 0x1f8   :  { %869 = shalt.err (!%p866_p4)
}
 0x1f9   :  { %s881_s21 = smov 64   ;;  %s882_s22 = smov 4  }
 0x1fa   :  { %660 = dma.vmem_to_hbm [thread:$0]  %s655_s20, 256, %s1095_s6, [#allocation3], %s881_s21, %s881_s21, %s882_s22  }
 0x1fb   :  { %878 = dma.done.wait [#allocation3], 256  }
 0x1fc   :  { %879 = vsyncadd [#allocation3], 4294967040 }
 0x1fd   :  { %666 = vsyncpa [#allocation3], 1 }

// kernel: discriminator_forward.9
= control target key start
LH: loop header
LB: loop body
LE: loop exit
PB: predicated region body
PF: predicated region fallthrough
CT: control target
= control target key end

     0   :  { %s1483_s0 = inlined_call_operand.vmem [shape: bf16[8,1024], index: 0, kind: input, shape index: {}]   ;;  %s1484_s1 = inlined_call_operand.vmem [shape: bf16[1024,128], index: 1, kind: input, shape index: {}]   ;;  %s1485_s2 = inlined_call_operand.vmem [shape: f32[1,128], index: 2, kind: input, shape index: {}]   ;;  %s1486_s3 = inlined_call_operand.vmem [shape: f32[1,128], index: 3, kind: input, shape index: {}]   ;;  %s1487_s4 = inlined_call_operand.vmem [shape: bf16[128,128], index: 4, kind: input, shape index: {}]   ;;  %s1488_s5 = inlined_call_operand.vmem [shape: bf16[8,128], index: 5, kind: output, shape index: {0}]   ;;  %s1489_s6 = inlined_call_operand.hbm [shape: bf16[8,128], index: 6, kind: output, shape index: {1}]  }
   0x1   :  { %v1101_v0 = vld [vmem:[%s1484_s1 + $0x78] sm:$0xff]   ;;  %v1105_v4 = vld [vmem:[%s1484_s1 + $0x70] sm:$0xff]   ;;  %v1109_v8 = vld [vmem:[%s1484_s1 + $0x68] sm:$0xff]  }
   0x2   :  { %v1102_v1 = vld [vmem:[%s1484_s1 + $0xf8] sm:$0xff]   ;;  %981 = vmatprep.subr.bf16.mxu0 %v1101_v0  ;;  %v1106_v5 = vld [vmem:[%s1484_s1 + $0xf0] sm:$0xff]   ;;  %v1110_v9 = vld [vmem:[%s1484_s1 + $0xe8] sm:$0xff]  }
   0x3   :  { %v1103_v2 = vld [vmem:[%s1484_s1 + $0x38] sm:$0xff]   ;;  %1003 = vmatprep.subr.bf16.mxu1 %v1102_v1  ;;  %v1107_v6 = vld [vmem:[%s1484_s1 + $0x30] sm:$0xff]   ;;  %v1111_v10 = vld [vmem:[%s1484_s1 + $0x28] sm:$0xff]  }
   0x4   :  { %v1104_v3 = vld [vmem:[%s1484_s1 + $0xb8] sm:$0xff]   ;;  %982 = vmatpush3.bf16.msra.mxu0 %v1103_v2  ;;  %v1108_v7 = vld [vmem:[%s1484_s1 + $0xb0] sm:$0xff]   ;;  %v1112_v11 = vld [vmem:[%s1484_s1 + $0xa8] sm:$0xff]  }
   0x5   :  { %1004 = vmatpush3.bf16.msra.mxu1 %v1104_v3  ;;  %983 = vmatprep.subr.bf16.mxu0 %v1105_v4  ;;  %v1113_v12 = vld [vmem:[%s1484_s1 + $0x60] sm:$0xff]   ;;  %v1117_v16 = vld [vmem:[%s1484_s1 + $0x58] sm:$0xff]   ;;  %v1121_v20 = vld [vmem:[%s1484_s1 + $0x50] sm:$0xff]  }
   0x6   :  { %1005 = vmatprep.subr.bf16.mxu1 %v1106_v5  ;;  %v1114_v13 = vld [vmem:[%s1484_s1 + $0xe0] sm:$0xff]   ;;  %v1118_v17 = vld [vmem:[%s1484_s1 + $0xd8] sm:$0xff]   ;;  %v1122_v21 = vld [vmem:[%s1484_s1 + $0xd0] sm:$0xff]  }
   0x7   :  { %v1115_v14 = vld [vmem:[%s1484_s1 + $0x20] sm:$0xff]   ;;  %v1119_v18 = vld [vmem:[%s1484_s1 + $0x18] sm:$0xff]   ;;  %v1123_v22 = vld [vmem:[%s1484_s1 + $0x10] sm:$0xff]  }
   0x8   :  { %984 = vmatpush3.bf16.msra.mxu0 %v1107_v6  ;;  %v1116_v15 = vld [vmem:[%s1484_s1 + $0xa0] sm:$0xff]   ;;  %v1120_v19 = vld [vmem:[%s1484_s1 + $0x98] sm:$0xff]   ;;  %v1124_v23 = vld [vmem:[%s1484_s1 + $0x90] sm:$0xff]  }
   0x9   :  { %1006 = vmatpush3.bf16.msra.mxu1 %v1108_v7  ;;  %985 = vmatprep.subr.bf16.mxu0 %v1109_v8  ;;  %v1125_v24 = vld [vmem:[%s1484_s1 + $0x48] sm:$0xff]   ;;  %v1129_v28 = vld [vmem:[%s1484_s1 + $0x40] sm:$0xff]   ;;  %v1137_v38 = vld [vmem:[%s1484_s1 + $0x178] sm:$0xff]  }
   0xa   :  { %1007 = vmatprep.subr.bf16.mxu1 %v1110_v9  ;;  %v1126_v25 = vld [vmem:[%s1484_s1 + $0xc8] sm:$0xff]   ;;  %v1130_v29 = vld [vmem:[%s1484_s1 + $0xc0] sm:$0xff]   ;;  %v1138_v39 = vld [vmem:[%s1484_s1 + $0x1f8] sm:$0xff]  }
   0xb   :  { %v1127_v26 = vld [vmem:[%s1484_s1 + $0x8] sm:$0xff]   ;;  %v1131_v30 = vld [vmem:[%s1484_s1] sm:$0xff]   ;;  %v1139_v40 = vld [vmem:[%s1484_s1 + $0x138] sm:$0xff]  }
   0xc   :  { %986 = vmatpush3.bf16.msra.mxu0 %v1111_v10  ;;  %v1128_v27 = vld [vmem:[%s1484_s1 + $0x88] sm:$0xff]   ;;  %v1132_v31 = vld [vmem:[%s1484_s1 + $0x80] sm:$0xff]   ;;  %v1140_v41 = vld [vmem:[%s1484_s1 + $0x1b8] sm:$0xff]  }
   0xd   :  { %1008 = vmatpush3.bf16.msra.mxu1 %v1112_v11  ;;  %987 = vmatprep.subr.bf16.mxu0 %v1113_v12  ;;  %v24_v32 = vld [vmem:[%s1483_s0] sm:$0xff]  ;;  %v25_v33 = vld [vmem:[%s1483_s0 + $0x8] sm:$0xff]  ;;  %v1141_v42 = vld [vmem:[%s1484_s1 + $0x170] sm:$0xff]  }
   0xe   :  { %1009 = vmatprep.subr.bf16.mxu1 %v1114_v13  ;;  %v899_v34 = vcombine.low %v24_v32, %v24_v32  ;;  %v900_v35 = vcombine.high %v24_v32, %v24_v32  ;;  %v901_v36 = vcombine.low %v25_v33, %v25_v33  ;;  %v902_v37 = vcombine.high %v25_v33, %v25_v33  ;;  %v1142_v43 = vld [vmem:[%s1484_s1 + $0x1f0] sm:$0xff]   ;;  %v1145_v46 = vld [vmem:[%s1484_s1 + $0x168] sm:$0xff]   ;;  %v1149_v50 = vld [vmem:[%s1484_s1 + $0x160] sm:$0xff]  }
   0xf   :  { %v1143_v44 = vld [vmem:[%s1484_s1 + $0x130] sm:$0xff]   ;;  %v1146_v47 = vld [vmem:[%s1484_s1 + $0x1e8] sm:$0xff]   ;;  %v1150_v51 = vld [vmem:[%s1484_s1 + $0x1e0] sm:$0xff]  }
  0x10   :  { %988 = vmatpush3.bf16.msra.mxu0 %v1115_v14  ;;  %600 = vmatprep.mubr.bf16.mxu0 %v900_v35  ;;  %v1144_v45 = vld [vmem:[%s1484_s1 + $0x1b0] sm:$0xff]   ;;  %v1147_v48 = vld [vmem:[%s1484_s1 + $0x128] sm:$0xff]   ;;  %v1151_v52 = vld [vmem:[%s1484_s1 + $0x120] sm:$0xff]  }
  0x11   :  { %1010 = vmatpush3.bf16.msra.mxu1 %v1116_v15  ;;  %989 = vmatprep.subr.bf16.mxu0 %v1117_v16  ;;  %v1148_v49 = vld [vmem:[%s1484_s1 + $0x1a8] sm:$0xff]   ;;  %v1152_v53 = vld [vmem:[%s1484_s1 + $0x1a0] sm:$0xff]   ;;  %v1153_v54 = vld [vmem:[%s1484_s1 + $0x158] sm:$0xff]  }
  0x12   :  { %1011 = vmatprep.subr.bf16.mxu1 %v1118_v17  ;;  %640 = vmatprep.mubr.bf16.mxu1 %v902_v37  ;;  %v1154_v55 = vld [vmem:[%s1484_s1 + $0x1d8] sm:$0xff]   ;;  %v1157_v58 = vld [vmem:[%s1484_s1 + $0x150] sm:$0xff]   ;;  %v1161_v62 = vld [vmem:[%s1484_s1 + $0x148] sm:$0xff]  }
  0x13   :  { %v1155_v56 = vld [vmem:[%s1484_s1 + $0x118] sm:$0xff]   ;;  %v1158_v59 = vld [vmem:[%s1484_s1 + $0x1d0] sm:$0xff]   ;;  %v1162_v63 = vld [vmem:[%s1484_s1 + $0x1c8] sm:$0xff]  }
  0x14   :  { %990 = vmatpush3.bf16.msra.mxu0 %v1119_v18  ;;  %v1156_v57 = vld [vmem:[%s1484_s1 + $0x198] sm:$0xff]   ;;  %v1159_v60 = vld [vmem:[%s1484_s1 + $0x110] sm:$0xff]   ;;  %v1163_v0 = vld [vmem:[%s1484_s1 + $0x108] sm:$0xff]  }
  0x15   :  { %1012 = vmatpush3.bf16.msra.mxu1 %v1120_v19  ;;  %991 = vmatprep.subr.bf16.mxu0 %v1121_v20  ;;  %v1160_v61 = vld [vmem:[%s1484_s1 + $0x190] sm:$0xff]   ;;  %v1164_v1 = vld [vmem:[%s1484_s1 + $0x188] sm:$0xff]   ;;  %v1165_v2 = vld [vmem:[%s1484_s1 + $0x140] sm:$0xff]  }
  0x16   :  { %1013 = vmatprep.subr.bf16.mxu1 %v1122_v21  ;;  %v1166_v3 = vld [vmem:[%s1484_s1 + $0x1c0] sm:$0xff]   ;;  %v26_v6 = vld [vmem:[%s1483_s0 + $0x10] sm:$0xff]  ;;  %v27_v9 = vld [vmem:[%s1483_s0 + $0x18] sm:$0xff] }
  0x17   :  { %v1167_v4 = vld [vmem:[%s1484_s1 + $0x100] sm:$0xff]   ;;  %v903_v7 = vcombine.low %v26_v6, %v26_v6  ;;  %v904_v8 = vcombine.high %v26_v6, %v26_v6  ;;  %v905_v10 = vcombine.low %v27_v9, %v27_v9  ;;  %v906_v11 = vcombine.high %v27_v9, %v27_v9 }
  0x18   :  { %992 = vmatpush3.bf16.msra.mxu0 %v1123_v22  ;;  %v1168_v5 = vld [vmem:[%s1484_s1 + $0x180] sm:$0xff]  }
  0x19   :  { %1014 = vmatpush3.bf16.msra.mxu1 %v1124_v23  ;;  %993 = vmatprep.subr.bf16.mxu0 %v1125_v24 }
  0x1a   :  { %1015 = vmatprep.subr.bf16.mxu1 %v1126_v25 }
  0x1c   :  { %994 = vmatpush3.bf16.msra.mxu0 %v1127_v26 }
  0x1d   :  { %1016 = vmatpush3.bf16.msra.mxu1 %v1128_v27  ;;  %995 = vmatprep.subr.bf16.mxu0 %v1129_v28 }
  0x1e   :  { %1017 = vmatprep.subr.bf16.mxu1 %v1130_v29 }
  0x20   :  { %996 = vmatpush3.bf16.msra.mxu0 %v1131_v30 }
  0x21   :  { %1018 = vmatpush3.bf16.msra.mxu1 %v1132_v31  ;;  %1025 = vmatprep.subr.bf16.mxu0 %v1137_v38 }
  0x22   :  { %1047 = vmatprep.subr.bf16.mxu1 %v1138_v39 }
  0x23   :  { %601 = vmatmul.mubr.bf16.vlgmr.msra.gmra.mxu0 %v899_v34 }
  0x24   :  { %641 = vmatmul.mubr.bf16.vlgmr.msra.gmra.mxu1 %v901_v36  ;;  %1026 = vmatpush3.bf16.msra.mxu0 %v1139_v40 }
  0x25   :  { %1048 = vmatpush3.bf16.msra.mxu1 %v1140_v41  ;;  %1027 = vmatprep.subr.bf16.mxu0 %v1141_v42 }
  0x26   :  { %1049 = vmatprep.subr.bf16.mxu1 %v1142_v43  ;;  %680 = vmatprep.mubr.bf16.mxu0 %v904_v8 }
  0x27   :  { %720 = vmatprep.mubr.bf16.mxu1 %v906_v11 }
  0x28   :  { %1028 = vmatpush3.bf16.msra.mxu0 %v1143_v44 }
  0x29   :  { %1050 = vmatpush3.bf16.msra.mxu1 %v1144_v45  ;;  %1029 = vmatprep.subr.bf16.mxu0 %v1145_v46 }
  0x2a   :  { %1051 = vmatprep.subr.bf16.mxu1 %v1146_v47 }
  0x2c   :  { %1030 = vmatpush3.bf16.msra.mxu0 %v1147_v48 }
  0x2d   :  { %1052 = vmatpush3.bf16.msra.mxu1 %v1148_v49  ;;  %1031 = vmatprep.subr.bf16.mxu0 %v1149_v50 }
  0x2e   :  { %1053 = vmatprep.subr.bf16.mxu1 %v1150_v51 }
  0x30   :  { %1032 = vmatpush3.bf16.msra.mxu0 %v1151_v52 }
  0x31   :  { %1054 = vmatpush3.bf16.msra.mxu1 %v1152_v53  ;;  %1033 = vmatprep.subr.bf16.mxu0 %v1153_v54 }
  0x32   :  { %1055 = vmatprep.subr.bf16.mxu1 %v1154_v55 }
  0x34   :  { %1034 = vmatpush3.bf16.msra.mxu0 %v1155_v56 }
  0x35   :  { %1056 = vmatpush3.bf16.msra.mxu1 %v1156_v57  ;;  %1035 = vmatprep.subr.bf16.mxu0 %v1157_v58 }
  0x36   :  { %1057 = vmatprep.subr.bf16.mxu1 %v1158_v59 }
  0x38   :  { %1036 = vmatpush3.bf16.msra.mxu0 %v1159_v60 }
  0x39   :  { %1058 = vmatpush3.bf16.msra.mxu1 %v1160_v61  ;;  %1037 = vmatprep.subr.bf16.mxu0 %v1161_v62 }
  0x3a   :  { %1059 = vmatprep.subr.bf16.mxu1 %v1162_v63 }
  0x3c   :  { %1038 = vmatpush3.bf16.msra.mxu0 %v1163_v0 }
  0x3d   :  { %1060 = vmatpush3.bf16.msra.mxu1 %v1164_v1  ;;  %1039 = vmatprep.subr.bf16.mxu0 %v1165_v2 }
  0x3e   :  { %1061 = vmatprep.subr.bf16.mxu1 %v1166_v3 }
  0x40   :  { %1040 = vmatpush3.bf16.msra.mxu0 %v1167_v4 }
  0x41   :  { %1062 = vmatpush3.bf16.msra.mxu1 %v1168_v5 }
  0x43   :  { %681 = vmatmul.mubr.bf16.vlgmr.msra.gmra.mxu0 %v903_v7 }
  0x44   :  { %721 = vmatmul.mubr.bf16.vlgmr.msra.gmra.mxu1 %v905_v10 }
  0x45   :  { %12 = vsyncpa [#allocation3], 0  ;;  %v1173_v12 = vld [vmem:[%s1487_s4 + $0x38] sm:$0xff]   ;;  %v1205_v13 = vmov 0.0   ;;  %v1174_v14 = vld [vmem:[%s1487_s4 + $0x30] sm:$0xff]   ;;  %vm1206_vm0 = vmmov 0  }
  0x46   :  { %1078 = vmatprep.subr.bf16.mxu0 %v1205_v13  ;;  %v1175_v15 = vld [vmem:[%s1487_s4 + $0x28] sm:$0xff]   ;;  %v1176_v16 = vld [vmem:[%s1487_s4 + $0x20] sm:$0xff]   ;;  %v1177_v17 = vld [vmem:[%s1487_s4 + $0x18] sm:$0xff]   ;;  %1094 = vmatprep.mubr.msk.bf16.mxu0 %vm1206_vm0, %v1205_v13 }
  0x47   :  { %1079 = vmatpush3.bf16.msra.mxu0 %v1173_v12  ;;  %v1178_v18 = vld [vmem:[%s1487_s4 + $0x10] sm:$0xff]   ;;  %v1179_v19 = vld [vmem:[%s1487_s4 + $0x8] sm:$0xff]   ;;  %v1180_v20 = vld [vmem:[%s1487_s4] sm:$0xff]  }
  0x48   :  { %1080 = vmatprep.subr.bf16.mxu0 %v1205_v13  ;;  %v971_v1 = vld [vmem:[%s1485_s2] ss:$0 sm:$0xff]  ;;  %s1207_s2 = smov [#allocation2]  }
  0x49   :  { %v972_v3 = vld [vmem:[%s1486_s3] ss:$0 sm:$0xff]  ;;  %s889_s8 = sshll.u32 %s1207_s2, 4  ;;  %s890_s8 = int_to_ptr.vmem [resolvable:$true] %s889_s8 }
  0x4a   :  { %s1183_s3 = scalar_lea.vmem %s890_s8, 64  ;;  %p1188_p1 = scmp.lt.s32.totalorder %s890_s8, %s890_s8 }
  0x4b   :  { %1081 = vmatpush3.bf16.msra.mxu0 %v1174_v14  ;;  %p1184_p0 = scmp.ne.s32.totalorder %s890_s8, %s1183_s3  ;;  %p1189_p2 = scmp.lt.s32.totalorder %s1183_s3, %s1183_s3 }
  0x4c   :  { %1082 = vmatprep.subr.bf16.mxu0 %v1205_v13 }
  0x4d   :  { %p1190_p3 = por %p1189_p2, %p1188_p1 }
  0x4f   :  { %1083 = vmatpush3.bf16.msra.mxu0 %v1175_v15  ;;  %p1191_p4 = pnand %p1190_p3, %p1184_p0 }
  0x50   :  { %1084 = vmatprep.subr.bf16.mxu0 %v1205_v13 }
  0x53   :  { %1085 = vmatpush3.bf16.msra.mxu0 %v1176_v16 }
  0x54   :  { %1086 = vmatprep.subr.bf16.mxu0 %v1205_v13 }
  0x57   :  { %1087 = vmatpush3.bf16.msra.mxu0 %v1177_v17 }
  0x58   :  { %1088 = vmatprep.subr.bf16.mxu0 %v1205_v13 }
  0x5b   :  { %1089 = vmatpush3.bf16.msra.mxu0 %v1178_v18 }
  0x5c   :  { %1090 = vmatprep.subr.bf16.mxu0 %v1205_v13 }
  0x5f   :  { %1091 = vmatpush3.bf16.msra.mxu0 %v1179_v19 }
  0x60   :  { %1092 = vmatprep.subr.bf16.mxu0 %v1205_v13 }
  0x63   :  { %1093 = vmatpush3.bf16.msra.mxu0 %v1180_v20 }
  0xe3   :  { %v997_v21 = vpop.f32.mrf.mxu0 }
  0xe4   :  { %v1019_v22 = vpop.f32.mrf.mxu1 }
  0xe5   :  { %v998_v23 = vpop.f32.mrf.mxu0 }
  0xe6   :  { %v1020_v24 = vpop.f32.mrf.mxu1  ;;  %v999_v29 = vadd.f32 %v998_v23, %v997_v21 }
  0xe7   :  { %v1000_v25 = vpop.f32.mrf.mxu0  ;;  %v1021_v30 = vadd.f32 %v1020_v24, %v1019_v22 }
  0xe8   :  { %v1022_v26 = vpop.f32.mrf.mxu1 }
  0xe9   :  { %v1001_v27 = vpop.f32.mrf.mxu0  ;;  %v643_v35 = vadd.f32 %v1021_v30, %v999_v29 }
  0xea   :  { %v1023_v28 = vpop.f32.mrf.mxu1 }
 0x103   :  { %v1041_v31 = vpop.f32.mrf.mxu0 }
 0x104   :  { %v1063_v32 = vpop.f32.mrf.mxu1 }
 0x105   :  { %v1042_v33 = vpop.f32.mrf.mxu0 }
 0x106   :  { %v1064_v34 = vpop.f32.mrf.mxu1  ;;  %v1043_v36 = vadd.f32 %v1042_v33, %v1041_v31 }
 0x107   :  { %v1044_v37 = vpop.f32.mrf.mxu0  ;;  %v1065_v40 = vadd.f32 %v1064_v34, %v1063_v32 }
 0x108   :  { %v1066_v38 = vpop.f32.mrf.mxu1  ;;  %v683_v39 = vadd.f32 %v1043_v36, %v643_v35 }
 0x109   :  { %v1045_v41 = vpop.f32.mrf.mxu0 }
 0x10a   :  { %v1067_v42 = vpop.f32.mrf.mxu1  ;;  %v723_v43 = vadd.f32 %v1065_v40, %v683_v39 }
 0x10c   :  { %v728_v44 = vrot.slane %v723_v43, 4  ;;  %v736_v45 = vmul.f32 %v723_v43, %v723_v43 }
 0x10e   :  { %v729_v46 = vadd.f32 %v728_v44, %v723_v43  ;;  %v737_v47 = vrot.slane %v736_v45, 4 }
 0x110   :  { %v730_v48 = vrot.slane %v729_v46, 2  ;;  %v738_v49 = vadd.f32 %v737_v47, %v736_v45 }
 0x112   :  { %v731_v50 = vadd.f32 %v730_v48, %v729_v46  ;;  %v739_v51 = vrot.slane %v738_v49, 2 }
 0x114   :  { %v732_v52 = vrot.slane %v731_v50, 1  ;;  %v740_v53 = vadd.f32 %v739_v51, %v738_v49 }
 0x116   :  { %v733_v54 = vadd.f32 %v732_v52, %v731_v50  ;;  %v741_v55 = vrot.slane %v740_v53, 1 }
 0x118   :  { %v735_v56 = vmul.f32 0.125, %v733_v54  ;;  %v742_v57 = vadd.f32 %v741_v55, %v740_v53 }
 0x11a   :  { %v743_v58 = vmul.f32 0.125, %v742_v57  ;;  %v744_v59 = vmul.f32 %v735_v56, %v735_v56  ;;  %v747_v63 = vsub.f32 %v723_v43, %v735_v56 }
 0x11c   :  { %v745_v60 = vsub.f32 %v743_v58, %v744_v59 }
 0x11e   :  { %v746_v61 = vmax.f32 %v745_v60, 0.0 }
 0x120   :  { %v748_v62 = vadd.f32 1e-05, %v746_v61 }
 0x122   :  { %1181 = vrsqrt.f32 %v748_v62 }
 0x12f   :  { %v1182_v0 = vpop.eup %1181 }
 0x130   :  { %v750_v2 = vmul.f32 %v1182_v0, %v747_v63 }
 0x132   :  { %v758_v4 = vmul.f32 %v971_v1, %v750_v2 }
 0x134   :  { %v766_v5 = vadd.f32 %v972_v3, %v758_v4 }
 0x136   :  { %vm767_vm1 = vcmp.gt.f32.partialorder %v766_v5, 0.0  ;;  %v768_v6 = vmul.f32 0.2, %v766_v5 }
 0x138   :  { %v769_v7 = vsel %vm767_vm1, %v766_v5, %v768_v6 }
 0x139   :  { %v770_v8 = vpack.c.bf16 %v769_v7, %v769_v7 }
 0x13b   :  { %771 = vst [vmem:[%s1488_s5] sm:$0xf] %v770_v8  ;;  %1095 = vmatmul.mubr.bf16.vlgmr.msra.gmra.mxu0 %v770_v8 }
 0x1fb   :  { %v870_v9 = vpop.f32.mrf.mxu0 }
 0x1fc   :  { %vm876_vm2 = vcmp.gt.f32.partialorder %v870_v9, 0.0  ;;  %v877_v10 = vmul.f32 0.2, %v870_v9 }
 0x1fd   :  { %v1096_v11 = vpop.f32.mrf.mxu0 }
 0x1fe   :  { %v878_v12 = vsel %vm876_vm2, %v870_v9, %v877_v10 }
 0x1ff   :  { %v873_v13 = vpop.f32.mrf.mxu0  ;;  %v879_v14 = vpack.c.bf16 %v878_v12, %v878_v12 }
 0x201   :  { %v1097_v15 = vpop.f32.mrf.mxu0  ;;  %880 = vst [vmem:[#allocation2] sm:$0xf] %v879_v14 }
 0x202   :  { %1194 = shalt.err (!%p1191_p4)
}
 0x203   :  { %892 = dma.vmem_to_hbm [thread:$0]  %s890_s8, 64, %s1489_s6, [#allocation3]  }
 0x204   :  { %1203 = dma.done.wait [#allocation3], 64  }
 0x205   :  { %1204 = vsyncadd [#allocation3], 4294967232 }
 0x206   :  { %898 = vsyncpa [#allocation3], 1 }

</bundles_post_ra>
